<compile_context>
chip_gen: v5e
topology: v5e:2x2
jax: 0.10.0
libtpu: 0.0.40
codegen_flags: <defaults>
</compile_context>

<pallas_src>
import functools
import math

import jax
import jax.numpy as jnp
from jax.experimental import pallas as pl
from jax.experimental.pallas import tpu as pltpu


def _gelu_tanh(x):
    # tanh-approximate GELU (nn.GELU(approximate='tanh')); used consistently in
    # kernel and reference.
    # TODO(synk): exact erf-GELU if hidden_act is the erf variant (erf has no
    # guaranteed Mosaic lowering; tanh approximation differs at ~1e-3 level).
    c = math.sqrt(2.0 / math.pi)
    return 0.5 * x * (1.0 + jnp.tanh(c * (x + 0.044715 * x * x * x)))


def _layernorm(x, w, b, eps):
    mu = jnp.mean(x, axis=-1, keepdims=True)
    var = jnp.mean((x - mu) ** 2, axis=-1, keepdims=True)
    return (x - mu) * jax.lax.rsqrt(var + eps) * w + b


def vit_layer_kernel(
    x_ref,                      # (1, S, H)   f32
    ln1w_ref, ln1b_ref,         # (1, H)      f32
    wqkv_ref, bqkv_ref,         # (H, 3H) bf16, (1, 3H) f32   fused q|k|v
    wo_ref, bo_ref,             # (H, H)  bf16, (1, H)  f32   attention output dense
    ln2w_ref, ln2b_ref,         # (1, H)      f32
    wi_ref, bi_ref,             # (H, I)  bf16, (1, I)  f32   intermediate dense
    w2_ref, b2_ref,             # (I, H)  bf16, (1, H)  f32   output dense
    out_ref,                    # (1, TQ, H)
    q_cache, k_cache, v_cache,  # VMEM scratch (nh, S, dh) bf16, persist over q-tiles
    *, num_heads, eps, q_tile,
):
    S = x_ref.shape[1]
    H = x_ref.shape[2]
    nh = num_heads
    dh = H // nh
    TQ = q_tile
    scale = 1.0 / math.sqrt(dh)
    qi = pl.program_id(1)

    # ---- once per batch element (query-tile 0): LN + fused QKV for all S ----
    @pl.when(qi == 0)
    def _project_qkv():
        x_full = x_ref[0].astype(jnp.float32)                       # (S, H)
        xn = _layernorm(x_full, ln1w_ref[0].astype(jnp.float32),
                        ln1b_ref[0].astype(jnp.float32), eps)
        qkv = jnp.dot(xn.astype(jnp.bfloat16), wqkv_ref[...],
                      preferred_element_type=jnp.float32)
        qkv = qkv + bqkv_ref[0]                                      # (S, 3H) f32
        # Split into head-major bf16 caches (static lane slices, no reshape).
        for h in range(nh):
            q_cache[h] = qkv[:, h * dh:(h + 1) * dh].astype(jnp.bfloat16)
            k_cache[h] = qkv[:, H + h * dh:H + (h + 1) * dh].astype(jnp.bfloat16)
            v_cache[h] = qkv[:, 2 * H + h * dh:2 * H + (h + 1) * dh].astype(jnp.bfloat16)

    # ---- per query tile ----
    q_start = pl.multiple_of(qi * TQ, TQ)
    x_tile = x_ref[0, pl.ds(q_start, TQ), :].astype(jnp.float32)     # (TQ, H)

    qh = q_cache[:, pl.ds(q_start, TQ), :]                           # (nh, TQ, dh) bf16
    kh = k_cache[...]                                                # (nh, S, dh)  bf16
    vh = v_cache[...]                                                # (nh, S, dh)  bf16

    # scores / softmax (f32), heads batched — no K transpose needed.
    scores = jnp.einsum('hqd,hkd->hqk', qh, kh,
                        preferred_element_type=jnp.float32) * scale  # (nh, TQ, S)
    m = jnp.max(scores, axis=-1, keepdims=True)
    p = jnp.exp(scores - m)
    denom = jnp.sum(p, axis=-1, keepdims=True)
    probs = p * pl.reciprocal(denom, approx=True)

    ctx = jnp.einsum('hqk,hkd->hqd', probs.astype(jnp.bfloat16), vh,
                     preferred_element_type=jnp.float32)             # (nh, TQ, dh)

    # attention output dense: accumulate per-head partial matmuls (no concat).
    acc = jnp.zeros((TQ, H), jnp.float32)
    for h in range(nh):
        acc = acc + jnp.dot(ctx[h].astype(jnp.bfloat16),
                            wo_ref[h * dh:(h + 1) * dh, :],
                            preferred_element_type=jnp.float32)
    attn_out = acc + bo_ref[0]
    hidden = attn_out + x_tile                                       # residual 1

    # ---- layernorm_after + MLP (per tile) ----
    hn = _layernorm(hidden, ln2w_ref[0].astype(jnp.float32),
                    ln2b_ref[0].astype(jnp.float32), eps)
    inter = jnp.dot(hn.astype(jnp.bfloat16), wi_ref[...],
                    preferred_element_type=jnp.float32) + bi_ref[0]
    inter = _gelu_tanh(inter)
    mlp = jnp.dot(inter.astype(jnp.bfloat16), w2_ref[...],
                  preferred_element_type=jnp.float32) + b2_ref[0]
    out_ref[0] = (mlp + hidden).astype(out_ref.dtype)                # residual 2


def vit_layer_pallas(x, params, *, num_heads, eps, q_tile=128):
    B, S, H = x.shape
    I = params["wi"].shape[1]
    assert H % num_heads == 0
    dh = H // num_heads
    TQ = min(q_tile, S)
    assert S % TQ == 0
    n_q = S // TQ

    wdt = jnp.bfloat16
    # Fuse Q|K|V weights/biases; weights -> bf16, biases/LN stay f32.
    wqkv = jnp.concatenate(
        [params["wq"], params["wk"], params["wv"]], axis=1).astype(wdt)
    bqkv = jnp.concatenate(
        [params["bq"], params["bk"], params["bv"]], axis=1).astype(jnp.float32)

    packed = [
        params["ln1w"].astype(jnp.float32), params["ln1b"].astype(jnp.float32),
        wqkv, bqkv,
        params["wo"].astype(wdt), params["bo"].astype(jnp.float32),
        params["ln2w"].astype(jnp.float32), params["ln2b"].astype(jnp.float32),
        params["wi"].astype(wdt), params["bi"].astype(jnp.float32),
        params["w2"].astype(wdt), params["b2"].astype(jnp.float32),
    ]

    def full_spec(shape):
        rank = len(shape)
        return pl.BlockSpec(shape, lambda b, qi, _r=rank: (0,) * _r)

    in_specs = [pl.BlockSpec((1, S, H), lambda b, qi: (b, 0, 0))]
    in_specs += [full_spec(p.shape) for p in packed]

    kernel = functools.partial(vit_layer_kernel, num_heads=num_heads,
                               eps=eps, q_tile=TQ)

    return pl.pallas_call(
        kernel,
        out_shape=jax.ShapeDtypeStruct((B, S, H), x.dtype),
        grid_spec=pltpu.PrefetchScalarGridSpec(
            num_scalar_prefetch=0,
            grid=(B, n_q),
            in_specs=in_specs,
            out_specs=pl.BlockSpec((1, TQ, H), lambda b, qi: (b, qi, 0)),
            scratch_shapes=[
                pltpu.VMEM((num_heads, S, dh), jnp.bfloat16),   # Q cache
                pltpu.VMEM((num_heads, S, dh), jnp.bfloat16),   # K cache
                pltpu.VMEM((num_heads, S, dh), jnp.bfloat16),   # V cache
            ],
        ),
        compiler_params=pltpu.CompilerParams(
            dimension_semantics=("parallel", "arbitrary"),
            vmem_limit_bytes=48 * 1024 * 1024,
        ),
    )(x, *packed)


def vit_layer_reference(x, params, *, num_heads, eps):
    """Pure-JAX f32 reference matching the PyTorch ViTLayer forward (eval)."""
    B, S, H = x.shape
    dh = H // num_heads

    def ln(t, w, b):
        mu = jnp.mean(t, axis=-1, keepdims=True)
        var = jnp.mean((t - mu) ** 2, axis=-1, keepdims=True)
        return (t - mu) / jnp.sqrt(var + eps) * w + b

    xn = ln(x, params["ln1w"][0], params["ln1b"][0])
    q = xn @ params["wq"] + params["bq"][0]
    k = xn @ params["wk"] + params["bk"][0]
    v = xn @ params["wv"] + params["bv"][0]

    def split(t):  # (B, S, H) -> (B, nh, S, dh)
        return t.reshape(B, S, num_heads, dh).transpose(0, 2, 1, 3)

    qh, kh, vh = split(q), split(k), split(v)
    scores = jnp.einsum("bhqd,bhkd->bhqk", qh, kh) / math.sqrt(dh)
    probs = jax.nn.softmax(scores, axis=-1)
    ctx = jnp.einsum("bhqk,bhkd->bhqd", probs, vh)
    ctx = ctx.transpose(0, 2, 1, 3).reshape(B, S, H)

    attn_out = ctx @ params["wo"] + params["bo"][0]
    hidden = attn_out + x
    hn = ln(hidden, params["ln2w"][0], params["ln2b"][0])
    inter = _gelu_tanh(hn @ params["wi"] + params["bi"][0])
    out = inter @ params["w2"] + params["b2"][0] + hidden
    return out


if __name__ == "__main__":
    # Small, lane/sublane-aligned config (H, S multiples of 128).
    B, S, H = 2, 256, 128
    num_heads = 4
    intermediate = 512
    eps = 1e-12

    key = jax.random.PRNGKey(0)
    keys = jax.random.split(key, 16)

    def w(k, shape, scale=0.05):
        return jax.random.normal(k, shape, dtype=jnp.float32) * scale

    params = {
        "ln1w": jnp.ones((1, H), jnp.float32),
        "ln1b": jnp.zeros((1, H), jnp.float32),
        "wq": w(keys[0], (H, H)), "bq": w(keys[1], (1, H)),
        "wk": w(keys[2], (H, H)), "bk": w(keys[3], (1, H)),
        "wv": w(keys[4], (H, H)), "bv": w(keys[5], (1, H)),
        "wo": w(keys[6], (H, H)), "bo": w(keys[7], (1, H)),
        "ln2w": jnp.ones((1, H), jnp.float32),
        "ln2b": jnp.zeros((1, H), jnp.float32),
        "wi": w(keys[8], (H, intermediate)), "bi": w(keys[9], (1, intermediate)),
        "w2": w(keys[10], (intermediate, H)), "b2": w(keys[11], (1, H)),
    }

    x = jax.random.normal(keys[12], (B, S, H), dtype=jnp.float32)

    out = vit_layer_pallas(x, params, num_heads=num_heads, eps=eps, q_tile=128)
    out = jax.block_until_ready(out)

    ref = vit_layer_reference(x, params, num_heads=num_heads, eps=eps)
    assert out.shape == (B, S, H)
    # Kernel uses bf16 MXU operands (f32 accumulation) -> compare against the
    # f32 reference with a bf16-appropriate tolerance.
    assert jnp.allclose(out, ref, atol=5e-2, rtol=5e-2), "mismatch vs reference"

    # TODO(synk): dropout layers are identity here (inference-mode forward).
    print("KERNEL_OK")
</pallas_src>

<mosaic_0001>
module attributes {stable_mosaic.version = 11 : i64} {
  func.func @vit_layer_kernel(%arg0: i32, %arg1: i32, %arg2: memref<1x256x128xf32, #tpu.memory_space<vmem>>, %arg3: memref<1x128xf32, #tpu.memory_space<vmem>>, %arg4: memref<1x128xf32, #tpu.memory_space<vmem>>, %arg5: memref<128x384xbf16, #tpu.memory_space<vmem>>, %arg6: memref<1x384xf32, #tpu.memory_space<vmem>>, %arg7: memref<128x128xbf16, #tpu.memory_space<vmem>>, %arg8: memref<1x128xf32, #tpu.memory_space<vmem>>, %arg9: memref<1x128xf32, #tpu.memory_space<vmem>>, %arg10: memref<1x128xf32, #tpu.memory_space<vmem>>, %arg11: memref<128x512xbf16, #tpu.memory_space<vmem>>, %arg12: memref<1x512xf32, #tpu.memory_space<vmem>>, %arg13: memref<512x128xbf16, #tpu.memory_space<vmem>>, %arg14: memref<1x128xf32, #tpu.memory_space<vmem>>, %arg15: memref<1x128x128xf32, #tpu.memory_space<vmem>>, %arg16: memref<4x256x32xbf16, #tpu.memory_space<vmem>>, %arg17: memref<4x256x32xbf16, #tpu.memory_space<vmem>>, %arg18: memref<4x256x32xbf16, #tpu.memory_space<vmem>>) attributes {dimension_semantics = [#tpu.dimension_semantics<parallel>, #tpu.dimension_semantics<arbitrary>], iteration_bounds = array<i64: 2, 2>, scalar_prefetch = 0 : i64, scratch_operands = 3 : i64, tpu.core_type = #tpu.core_type<tc>, window_params = [{transform_indices = @transform_0, window_bounds = array<i64: 1, 256, 128>}, {pipeline_mode = #tpu.pipeline_mode<synchronous>, transform_indices = @transform_1, window_bounds = array<i64: 1, 128>}, {pipeline_mode = #tpu.pipeline_mode<synchronous>, transform_indices = @transform_2, window_bounds = array<i64: 1, 128>}, {pipeline_mode = #tpu.pipeline_mode<synchronous>, transform_indices = @transform_3, window_bounds = array<i64: 128, 384>}, {pipeline_mode = #tpu.pipeline_mode<synchronous>, transform_indices = @transform_4, window_bounds = array<i64: 1, 384>}, {pipeline_mode = #tpu.pipeline_mode<synchronous>, transform_indices = @transform_5, window_bounds = array<i64: 128, 128>}, {pipeline_mode = #tpu.pipeline_mode<synchronous>, transform_indices = @transform_6, window_bounds = array<i64: 1, 128>}, {pipeline_mode = #tpu.pipeline_mode<synchronous>, transform_indices = @transform_7, window_bounds = array<i64: 1, 128>}, {pipeline_mode = #tpu.pipeline_mode<synchronous>, transform_indices = @transform_8, window_bounds = array<i64: 1, 128>}, {pipeline_mode = #tpu.pipeline_mode<synchronous>, transform_indices = @transform_9, window_bounds = array<i64: 128, 512>}, {pipeline_mode = #tpu.pipeline_mode<synchronous>, transform_indices = @transform_10, window_bounds = array<i64: 1, 512>}, {pipeline_mode = #tpu.pipeline_mode<synchronous>, transform_indices = @transform_11, window_bounds = array<i64: 512, 128>}, {pipeline_mode = #tpu.pipeline_mode<synchronous>, transform_indices = @transform_12, window_bounds = array<i64: 1, 128>}, {transform_indices = @transform_13, window_bounds = array<i64: 1, 128, 128>}]} {
    %c0_i32 = arith.constant 0 : i32
    %0 = arith.cmpi eq, %arg1, %c0_i32 : i32
    %1 = arith.extui %0 : i1 to i32
    %c0_i32_0 = arith.constant 0 : i32
    %2 = arith.cmpi ne, %1, %c0_i32_0 : i32
    scf.if %2 {
      %c0_52 = arith.constant 0 : index
      %c0_53 = arith.constant 0 : index
      %c0_54 = arith.constant 0 : index
      %119 = vector.load %arg2[%c0_52, %c0_53, %c0_54] : memref<1x256x128xf32, #tpu.memory_space<vmem>>, vector<1x256x128xf32>
      %120 = vector.shape_cast %119 : vector<1x256x128xf32> to vector<256x128xf32>
      %c0_55 = arith.constant 0 : index
      %c0_56 = arith.constant 0 : index
      %121 = vector.load %arg3[%c0_55, %c0_56] : memref<1x128xf32, #tpu.memory_space<vmem>>, vector<1x128xf32>
      %122 = vector.shape_cast %121 : vector<1x128xf32> to vector<128xf32>
      %c0_57 = arith.constant 0 : index
      %c0_58 = arith.constant 0 : index
      %123 = vector.load %arg4[%c0_57, %c0_58] : memref<1x128xf32, #tpu.memory_space<vmem>>, vector<1x128xf32>
      %124 = vector.shape_cast %123 : vector<1x128xf32> to vector<128xf32>
      %cst_59 = arith.constant dense<0.000000e+00> : vector<256xf32>
      %125 = vector.multi_reduction <add>, %120, %cst_59 [1] : vector<256x128xf32> to vector<256xf32>
      %126 = vector.shape_cast %125 : vector<256xf32> to vector<256x1xf32>
      %cst_60 = arith.constant 1.280000e+02 : f32
      %127 = vector.broadcast %cst_60 : f32 to vector<256x1xf32>
      %128 = arith.divf %126, %127 : vector<256x1xf32>
      %129 = vector.broadcast %128 : vector<256x1xf32> to vector<256x128xf32>
      %130 = arith.subf %120, %129 : vector<256x128xf32>
      %131 = arith.mulf %130, %130 : vector<256x128xf32>
      %cst_61 = arith.constant dense<0.000000e+00> : vector<256xf32>
      %132 = vector.multi_reduction <add>, %131, %cst_61 [1] : vector<256x128xf32> to vector<256xf32>
      %133 = vector.shape_cast %132 : vector<256xf32> to vector<256x1xf32>
      %cst_62 = arith.constant 1.280000e+02 : f32
      %134 = vector.broadcast %cst_62 : f32 to vector<256x1xf32>
      %135 = arith.divf %133, %134 : vector<256x1xf32>
      %136 = vector.broadcast %128 : vector<256x1xf32> to vector<256x128xf32>
      %137 = arith.subf %120, %136 : vector<256x128xf32>
      %cst_63 = arith.constant 9.99999996E-13 : f32
      %138 = vector.broadcast %cst_63 : f32 to vector<256x1xf32>
      %139 = arith.addf %135, %138 : vector<256x1xf32>
      %140 = math.rsqrt %139 : vector<256x1xf32>
      %141 = vector.broadcast %140 : vector<256x1xf32> to vector<256x128xf32>
      %142 = arith.mulf %137, %141 : vector<256x128xf32>
      %143 = vector.shape_cast %122 : vector<128xf32> to vector<1x128xf32>
      %144 = vector.broadcast %143 : vector<1x128xf32> to vector<256x128xf32>
      %145 = arith.mulf %142, %144 : vector<256x128xf32>
      %146 = vector.shape_cast %124 : vector<128xf32> to vector<1x128xf32>
      %147 = vector.broadcast %146 : vector<1x128xf32> to vector<256x128xf32>
      %148 = arith.addf %145, %147 : vector<256x128xf32>
      %149 = arith.truncf %148 : vector<256x128xf32> to vector<256x128xbf16>
      %c0_64 = arith.constant 0 : index
      %c0_65 = arith.constant 0 : index
      %150 = vector.load %arg5[%c0_64, %c0_65] : memref<128x384xbf16, #tpu.memory_space<vmem>>, vector<128x384xbf16>
      %cst_66 = arith.constant dense<0.000000e+00> : vector<256x384xf32>
      %151 = tpu.matmul %149, %150, %cst_66 {dimension_numbers = #tpu.dot_dimension_numbers<[1], [0], [0], [1], [0, 0, 1, 1], [], []>} : vector<256x128xbf16>, vector<128x384xbf16>, vector<256x384xf32> -> vector<256x384xf32>
      %c0_67 = arith.constant 0 : index
      %c0_68 = arith.constant 0 : index
      %152 = vector.load %arg6[%c0_67, %c0_68] : memref<1x384xf32, #tpu.memory_space<vmem>>, vector<1x384xf32>
      %153 = vector.shape_cast %152 : vector<1x384xf32> to vector<384xf32>
      %154 = vector.shape_cast %153 : vector<384xf32> to vector<1x384xf32>
      %155 = vector.broadcast %154 : vector<1x384xf32> to vector<256x384xf32>
      %156 = arith.addf %151, %155 : vector<256x384xf32>
      %157 = vector.extract_strided_slice %156 {offsets = [0, 0], sizes = [256, 32], strides = [1, 1]} : vector<256x384xf32> to vector<256x32xf32>
      %158 = arith.truncf %157 : vector<256x32xf32> to vector<256x32xbf16>
      %c0_69 = arith.constant 0 : index
      %c0_70 = arith.constant 0 : index
      %c0_71 = arith.constant 0 : index
      %159 = vector.load %arg16[%c0_69, %c0_70, %c0_71] : memref<4x256x32xbf16, #tpu.memory_space<vmem>>, vector<1x256x32xbf16>
      %160 = vector.shape_cast %159 : vector<1x256x32xbf16> to vector<256x32xbf16>
      %161 = vector.shape_cast %158 : vector<256x32xbf16> to vector<1x256x32xbf16>
      tpu.vector_store %arg16[%c0_69, %c0_70, %c0_71], %161 {strides = array<i32>} : memref<4x256x32xbf16, #tpu.memory_space<vmem>>, vector<1x256x32xbf16>,
      %162 = vector.extract_strided_slice %156 {offsets = [0, 128], sizes = [256, 32], strides = [1, 1]} : vector<256x384xf32> to vector<256x32xf32>
      %163 = arith.truncf %162 : vector<256x32xf32> to vector<256x32xbf16>
      %c0_72 = arith.constant 0 : index
      %c0_73 = arith.constant 0 : index
      %c0_74 = arith.constant 0 : index
      %164 = vector.load %arg17[%c0_72, %c0_73, %c0_74] : memref<4x256x32xbf16, #tpu.memory_space<vmem>>, vector<1x256x32xbf16>
      %165 = vector.shape_cast %164 : vector<1x256x32xbf16> to vector<256x32xbf16>
      %166 = vector.shape_cast %163 : vector<256x32xbf16> to vector<1x256x32xbf16>
      tpu.vector_store %arg17[%c0_72, %c0_73, %c0_74], %166 {strides = array<i32>} : memref<4x256x32xbf16, #tpu.memory_space<vmem>>, vector<1x256x32xbf16>,
      %167 = vector.extract_strided_slice %156 {offsets = [0, 256], sizes = [256, 32], strides = [1, 1]} : vector<256x384xf32> to vector<256x32xf32>
      %168 = arith.truncf %167 : vector<256x32xf32> to vector<256x32xbf16>
      %c0_75 = arith.constant 0 : index
      %c0_76 = arith.constant 0 : index
      %c0_77 = arith.constant 0 : index
      %169 = vector.load %arg18[%c0_75, %c0_76, %c0_77] : memref<4x256x32xbf16, #tpu.memory_space<vmem>>, vector<1x256x32xbf16>
      %170 = vector.shape_cast %169 : vector<1x256x32xbf16> to vector<256x32xbf16>
      %171 = vector.shape_cast %168 : vector<256x32xbf16> to vector<1x256x32xbf16>
      tpu.vector_store %arg18[%c0_75, %c0_76, %c0_77], %171 {strides = array<i32>} : memref<4x256x32xbf16, #tpu.memory_space<vmem>>, vector<1x256x32xbf16>,
      %172 = vector.extract_strided_slice %156 {offsets = [0, 32], sizes = [256, 32], strides = [1, 1]} : vector<256x384xf32> to vector<256x32xf32>
      %173 = arith.truncf %172 : vector<256x32xf32> to vector<256x32xbf16>
      %c1 = arith.constant 1 : index
      %c0_78 = arith.constant 0 : index
      %c0_79 = arith.constant 0 : index
      %174 = vector.load %arg16[%c1, %c0_78, %c0_79] : memref<4x256x32xbf16, #tpu.memory_space<vmem>>, vector<1x256x32xbf16>
      %175 = vector.shape_cast %174 : vector<1x256x32xbf16> to vector<256x32xbf16>
      %176 = vector.shape_cast %173 : vector<256x32xbf16> to vector<1x256x32xbf16>
      tpu.vector_store %arg16[%c1, %c0_78, %c0_79], %176 {strides = array<i32>} : memref<4x256x32xbf16, #tpu.memory_space<vmem>>, vector<1x256x32xbf16>,
      %177 = vector.extract_strided_slice %156 {offsets = [0, 160], sizes = [256, 32], strides = [1, 1]} : vector<256x384xf32> to vector<256x32xf32>
      %178 = arith.truncf %177 : vector<256x32xf32> to vector<256x32xbf16>
      %c1_80 = arith.constant 1 : index
      %c0_81 = arith.constant 0 : index
      %c0_82 = arith.constant 0 : index
      %179 = vector.load %arg17[%c1_80, %c0_81, %c0_82] : memref<4x256x32xbf16, #tpu.memory_space<vmem>>, vector<1x256x32xbf16>
      %180 = vector.shape_cast %179 : vector<1x256x32xbf16> to vector<256x32xbf16>
      %181 = vector.shape_cast %178 : vector<256x32xbf16> to vector<1x256x32xbf16>
      tpu.vector_store %arg17[%c1_80, %c0_81, %c0_82], %181 {strides = array<i32>} : memref<4x256x32xbf16, #tpu.memory_space<vmem>>, vector<1x256x32xbf16>,
      %182 = vector.extract_strided_slice %156 {offsets = [0, 288], sizes = [256, 32], strides = [1, 1]} : vector<256x384xf32> to vector<256x32xf32>
      %183 = arith.truncf %182 : vector<256x32xf32> to vector<256x32xbf16>
      %c1_83 = arith.constant 1 : index
      %c0_84 = arith.constant 0 : index
      %c0_85 = arith.constant 0 : index
      %184 = vector.load %arg18[%c1_83, %c0_84, %c0_85] : memref<4x256x32xbf16, #tpu.memory_space<vmem>>, vector<1x256x32xbf16>
      %185 = vector.shape_cast %184 : vector<1x256x32xbf16> to vector<256x32xbf16>
      %186 = vector.shape_cast %183 : vector<256x32xbf16> to vector<1x256x32xbf16>
      tpu.vector_store %arg18[%c1_83, %c0_84, %c0_85], %186 {strides = array<i32>} : memref<4x256x32xbf16, #tpu.memory_space<vmem>>, vector<1x256x32xbf16>,
      %187 = vector.extract_strided_slice %156 {offsets = [0, 64], sizes = [256, 32], strides = [1, 1]} : vector<256x384xf32> to vector<256x32xf32>
      %188 = arith.truncf %187 : vector<256x32xf32> to vector<256x32xbf16>
      %c2 = arith.constant 2 : index
      %c0_86 = arith.constant 0 : index
      %c0_87 = arith.constant 0 : index
      %189 = vector.load %arg16[%c2, %c0_86, %c0_87] : memref<4x256x32xbf16, #tpu.memory_space<vmem>>, vector<1x256x32xbf16>
      %190 = vector.shape_cast %189 : vector<1x256x32xbf16> to vector<256x32xbf16>
      %191 = vector.shape_cast %188 : vector<256x32xbf16> to vector<1x256x32xbf16>
      tpu.vector_store %arg16[%c2, %c0_86, %c0_87], %191 {strides = array<i32>} : memref<4x256x32xbf16, #tpu.memory_space<vmem>>, vector<1x256x32xbf16>,
      %192 = vector.extract_strided_slice %156 {offsets = [0, 192], sizes = [256, 32], strides = [1, 1]} : vector<256x384xf32> to vector<256x32xf32>
      %193 = arith.truncf %192 : vector<256x32xf32> to vector<256x32xbf16>
      %c2_88 = arith.constant 2 : index
      %c0_89 = arith.constant 0 : index
      %c0_90 = arith.constant 0 : index
      %194 = vector.load %arg17[%c2_88, %c0_89, %c0_90] : memref<4x256x32xbf16, #tpu.memory_space<vmem>>, vector<1x256x32xbf16>
      %195 = vector.shape_cast %194 : vector<1x256x32xbf16> to vector<256x32xbf16>
      %196 = vector.shape_cast %193 : vector<256x32xbf16> to vector<1x256x32xbf16>
      tpu.vector_store %arg17[%c2_88, %c0_89, %c0_90], %196 {strides = array<i32>} : memref<4x256x32xbf16, #tpu.memory_space<vmem>>, vector<1x256x32xbf16>,
      %197 = vector.extract_strided_slice %156 {offsets = [0, 320], sizes = [256, 32], strides = [1, 1]} : vector<256x384xf32> to vector<256x32xf32>
      %198 = arith.truncf %197 : vector<256x32xf32> to vector<256x32xbf16>
      %c2_91 = arith.constant 2 : index
      %c0_92 = arith.constant 0 : index
      %c0_93 = arith.constant 0 : index
      %199 = vector.load %arg18[%c2_91, %c0_92, %c0_93] : memref<4x256x32xbf16, #tpu.memory_space<vmem>>, vector<1x256x32xbf16>
      %200 = vector.shape_cast %199 : vector<1x256x32xbf16> to vector<256x32xbf16>
      %201 = vector.shape_cast %198 : vector<256x32xbf16> to vector<1x256x32xbf16>
      tpu.vector_store %arg18[%c2_91, %c0_92, %c0_93], %201 {strides = array<i32>} : memref<4x256x32xbf16, #tpu.memory_space<vmem>>, vector<1x256x32xbf16>,
      %202 = vector.extract_strided_slice %156 {offsets = [0, 96], sizes = [256, 32], strides = [1, 1]} : vector<256x384xf32> to vector<256x32xf32>
      %203 = arith.truncf %202 : vector<256x32xf32> to vector<256x32xbf16>
      %c3 = arith.constant 3 : index
      %c0_94 = arith.constant 0 : index
      %c0_95 = arith.constant 0 : index
      %204 = vector.load %arg16[%c3, %c0_94, %c0_95] : memref<4x256x32xbf16, #tpu.memory_space<vmem>>, vector<1x256x32xbf16>
      %205 = vector.shape_cast %204 : vector<1x256x32xbf16> to vector<256x32xbf16>
      %206 = vector.shape_cast %203 : vector<256x32xbf16> to vector<1x256x32xbf16>
      tpu.vector_store %arg16[%c3, %c0_94, %c0_95], %206 {strides = array<i32>} : memref<4x256x32xbf16, #tpu.memory_space<vmem>>, vector<1x256x32xbf16>,
      %207 = vector.extract_strided_slice %156 {offsets = [0, 224], sizes = [256, 32], strides = [1, 1]} : vector<256x384xf32> to vector<256x32xf32>
      %208 = arith.truncf %207 : vector<256x32xf32> to vector<256x32xbf16>
      %c3_96 = arith.constant 3 : index
      %c0_97 = arith.constant 0 : index
      %c0_98 = arith.constant 0 : index
      %209 = vector.load %arg17[%c3_96, %c0_97, %c0_98] : memref<4x256x32xbf16, #tpu.memory_space<vmem>>, vector<1x256x32xbf16>
      %210 = vector.shape_cast %209 : vector<1x256x32xbf16> to vector<256x32xbf16>
      %211 = vector.shape_cast %208 : vector<256x32xbf16> to vector<1x256x32xbf16>
      tpu.vector_store %arg17[%c3_96, %c0_97, %c0_98], %211 {strides = array<i32>} : memref<4x256x32xbf16, #tpu.memory_space<vmem>>, vector<1x256x32xbf16>,
      %212 = vector.extract_strided_slice %156 {offsets = [0, 352], sizes = [256, 32], strides = [1, 1]} : vector<256x384xf32> to vector<256x32xf32>
      %213 = arith.truncf %212 : vector<256x32xf32> to vector<256x32xbf16>
      %c3_99 = arith.constant 3 : index
      %c0_100 = arith.constant 0 : index
      %c0_101 = arith.constant 0 : index
      %214 = vector.load %arg18[%c3_99, %c0_100, %c0_101] : memref<4x256x32xbf16, #tpu.memory_space<vmem>>, vector<1x256x32xbf16>
      %215 = vector.shape_cast %214 : vector<1x256x32xbf16> to vector<256x32xbf16>
      %216 = vector.shape_cast %213 : vector<256x32xbf16> to vector<1x256x32xbf16>
      tpu.vector_store %arg18[%c3_99, %c0_100, %c0_101], %216 {strides = array<i32>} : memref<4x256x32xbf16, #tpu.memory_space<vmem>>, vector<1x256x32xbf16>,
    } else {
    }
    %c128_i32 = arith.constant 128 : i32
    %3 = arith.muli %arg1, %c128_i32 : i32
    %4 = tpu.assume_multiple %3, 128 : i32
    %c0 = arith.constant 0 : index
    %5 = arith.index_cast %4 : i32 to index
    %c0_1 = arith.constant 0 : index
    %6 = vector.load %arg2[%c0, %5, %c0_1] : memref<1x256x128xf32, #tpu.memory_space<vmem>>, vector<1x128x128xf32>
    %7 = vector.shape_cast %6 : vector<1x128x128xf32> to vector<128x128xf32>
    %c0_2 = arith.constant 0 : index
    %8 = arith.index_cast %4 : i32 to index
    %c0_3 = arith.constant 0 : index
    %9 = vector.load %arg16[%c0_2, %8, %c0_3] : memref<4x256x32xbf16, #tpu.memory_space<vmem>>, vector<4x128x32xbf16>
    %c0_4 = arith.constant 0 : index
    %c0_5 = arith.constant 0 : index
    %c0_6 = arith.constant 0 : index
    %10 = vector.load %arg17[%c0_4, %c0_5, %c0_6] : memref<4x256x32xbf16, #tpu.memory_space<vmem>>, vector<4x256x32xbf16>
    %c0_7 = arith.constant 0 : index
    %c0_8 = arith.constant 0 : index
    %c0_9 = arith.constant 0 : index
    %11 = vector.load %arg18[%c0_7, %c0_8, %c0_9] : memref<4x256x32xbf16, #tpu.memory_space<vmem>>, vector<4x256x32xbf16>
    "tpu.trace_start"() <{level = 10 : i32, message = "hqd,hkd->hqk"}> : () -> ()
    %cst = arith.constant dense<0.000000e+00> : vector<4x128x256xf32>
    %12 = tpu.matmul %9, %10, %cst {dimension_numbers = #tpu.dot_dimension_numbers<[2], [2], [1], [1], [0, 0, 0, 1, 1, 1], [0], [0]>} : vector<4x128x32xbf16>, vector<4x256x32xbf16>, vector<4x128x256xf32> -> vector<4x128x256xf32>
    "tpu.trace_stop"() : () -> ()
    %cst_10 = arith.constant 0.176776692 : f32
    %13 = vector.broadcast %cst_10 : f32 to vector<4x128x256xf32>
    %14 = arith.mulf %12, %13 : vector<4x128x256xf32>
    %cst_11 = arith.constant dense<0xFF800000> : vector<4x128xf32>
    %15 = vector.multi_reduction <maximumf>, %14, %cst_11 [2] : vector<4x128x256xf32> to vector<4x128xf32>
    %16 = vector.shape_cast %15 : vector<4x128xf32> to vector<4x128x1xf32>
    %17 = vector.broadcast %16 : vector<4x128x1xf32> to vector<4x128x256xf32>
    %18 = arith.subf %14, %17 : vector<4x128x256xf32>
    %19 = math.exp %18 : vector<4x128x256xf32>
    %cst_12 = arith.constant dense<0.000000e+00> : vector<4x128xf32>
    %20 = vector.multi_reduction <add>, %19, %cst_12 [2] : vector<4x128x256xf32> to vector<4x128xf32>
    %21 = vector.shape_cast %20 : vector<4x128xf32> to vector<4x128x1xf32>
    %22 = tpu.reciprocal %21 {approx = true} : vector<4x128x1xf32> -> vector<4x128x1xf32>
    %23 = vector.broadcast %22 : vector<4x128x1xf32> to vector<4x128x256xf32>
    %24 = arith.mulf %19, %23 : vector<4x128x256xf32>
    %25 = arith.truncf %24 : vector<4x128x256xf32> to vector<4x128x256xbf16>
    "tpu.trace_start"() <{level = 10 : i32, message = "hqk,hkd->hqd"}> : () -> ()
    %cst_13 = arith.constant dense<0.000000e+00> : vector<4x128x32xf32>
    %26 = tpu.matmul %25, %11, %cst_13 {dimension_numbers = #tpu.dot_dimension_numbers<[2], [1], [1], [2], [0, 0, 0, 1, 1, 2], [0], [0]>} : vector<4x128x256xbf16>, vector<4x256x32xbf16>, vector<4x128x32xf32> -> vector<4x128x32xf32>
    %cst_14 = arith.constant 0.000000e+00 : f32
    "tpu.trace_stop"() : () -> ()
    %27 = vector.broadcast %cst_14 : f32 to vector<128x128xf32>
    %28 = vector.extract_strided_slice %26 {offsets = [0, 0, 0], sizes = [1, 128, 32], strides = [1, 1, 1]} : vector<4x128x32xf32> to vector<1x128x32xf32>
    %29 = vector.shape_cast %28 : vector<1x128x32xf32> to vector<128x32xf32>
    %30 = arith.truncf %29 : vector<128x32xf32> to vector<128x32xbf16>
    %c0_15 = arith.constant 0 : index
    %c0_16 = arith.constant 0 : index
    %31 = vector.load %arg7[%c0_15, %c0_16] : memref<128x128xbf16, #tpu.memory_space<vmem>>, vector<32x128xbf16>
    %cst_17 = arith.constant dense<0.000000e+00> : vector<128x128xf32>
    %32 = tpu.matmul %30, %31, %cst_17 {dimension_numbers = #tpu.dot_dimension_numbers<[1], [0], [0], [1], [0, 0, 1, 1], [], []>} : vector<128x32xbf16>, vector<32x128xbf16>, vector<128x128xf32> -> vector<128x128xf32>
    %33 = arith.addf %27, %32 : vector<128x128xf32>
    %34 = vector.extract_strided_slice %26 {offsets = [1, 0, 0], sizes = [1, 128, 32], strides = [1, 1, 1]} : vector<4x128x32xf32> to vector<1x128x32xf32>
    %35 = vector.shape_cast %34 : vector<1x128x32xf32> to vector<128x32xf32>
    %36 = arith.truncf %35 : vector<128x32xf32> to vector<128x32xbf16>
    %c32 = arith.constant 32 : index
    %c0_18 = arith.constant 0 : index
    %37 = vector.load %arg7[%c32, %c0_18] : memref<128x128xbf16, #tpu.memory_space<vmem>>, vector<32x128xbf16>
    %cst_19 = arith.constant dense<0.000000e+00> : vector<128x128xf32>
    %38 = tpu.matmul %36, %37, %cst_19 {dimension_numbers = #tpu.dot_dimension_numbers<[1], [0], [0], [1], [0, 0, 1, 1], [], []>} : vector<128x32xbf16>, vector<32x128xbf16>, vector<128x128xf32> -> vector<128x128xf32>
    %39 = arith.addf %33, %38 : vector<128x128xf32>
    %40 = vector.extract_strided_slice %26 {offsets = [2, 0, 0], sizes = [1, 128, 32], strides = [1, 1, 1]} : vector<4x128x32xf32> to vector<1x128x32xf32>
    %41 = vector.shape_cast %40 : vector<1x128x32xf32> to vector<128x32xf32>
    %42 = arith.truncf %41 : vector<128x32xf32> to vector<128x32xbf16>
    %c64 = arith.constant 64 : index
    %c0_20 = arith.constant 0 : index
    %43 = vector.load %arg7[%c64, %c0_20] : memref<128x128xbf16, #tpu.memory_space<vmem>>, vector<32x128xbf16>
    %cst_21 = arith.constant dense<0.000000e+00> : vector<128x128xf32>
    %44 = tpu.matmul %42, %43, %cst_21 {dimension_numbers = #tpu.dot_dimension_numbers<[1], [0], [0], [1], [0, 0, 1, 1], [], []>} : vector<128x32xbf16>, vector<32x128xbf16>, vector<128x128xf32> -> vector<128x128xf32>
    %45 = arith.addf %39, %44 : vector<128x128xf32>
    %46 = vector.extract_strided_slice %26 {offsets = [3, 0, 0], sizes = [1, 128, 32], strides = [1, 1, 1]} : vector<4x128x32xf32> to vector<1x128x32xf32>
    %47 = vector.shape_cast %46 : vector<1x128x32xf32> to vector<128x32xf32>
    %48 = arith.truncf %47 : vector<128x32xf32> to vector<128x32xbf16>
    %c96 = arith.constant 96 : index
    %c0_22 = arith.constant 0 : index
    %49 = vector.load %arg7[%c96, %c0_22] : memref<128x128xbf16, #tpu.memory_space<vmem>>, vector<32x128xbf16>
    %cst_23 = arith.constant dense<0.000000e+00> : vector<128x128xf32>
    %50 = tpu.matmul %48, %49, %cst_23 {dimension_numbers = #tpu.dot_dimension_numbers<[1], [0], [0], [1], [0, 0, 1, 1], [], []>} : vector<128x32xbf16>, vector<32x128xbf16>, vector<128x128xf32> -> vector<128x128xf32>
    %51 = arith.addf %45, %50 : vector<128x128xf32>
    %c0_24 = arith.constant 0 : index
    %c0_25 = arith.constant 0 : index
    %52 = vector.load %arg8[%c0_24, %c0_25] : memref<1x128xf32, #tpu.memory_space<vmem>>, vector<1x128xf32>
    %53 = vector.shape_cast %52 : vector<1x128xf32> to vector<128xf32>
    %54 = vector.shape_cast %53 : vector<128xf32> to vector<1x128xf32>
    %55 = vector.broadcast %54 : vector<1x128xf32> to vector<128x128xf32>
    %56 = arith.addf %51, %55 : vector<128x128xf32>
    %57 = arith.addf %56, %7 : vector<128x128xf32>
    %c0_26 = arith.constant 0 : index
    %c0_27 = arith.constant 0 : index
    %58 = vector.load %arg9[%c0_26, %c0_27] : memref<1x128xf32, #tpu.memory_space<vmem>>, vector<1x128xf32>
    %59 = vector.shape_cast %58 : vector<1x128xf32> to vector<128xf32>
    %c0_28 = arith.constant 0 : index
    %c0_29 = arith.constant 0 : index
    %60 = vector.load %arg10[%c0_28, %c0_29] : memref<1x128xf32, #tpu.memory_space<vmem>>, vector<1x128xf32>
    %61 = vector.shape_cast %60 : vector<1x128xf32> to vector<128xf32>
    %cst_30 = arith.constant dense<0.000000e+00> : vector<128xf32>
    %62 = vector.multi_reduction <add>, %57, %cst_30 [1] : vector<128x128xf32> to vector<128xf32>
    %63 = vector.shape_cast %62 : vector<128xf32> to vector<128x1xf32>
    %cst_31 = arith.constant 1.280000e+02 : f32
    %64 = vector.broadcast %cst_31 : f32 to vector<128x1xf32>
    %65 = arith.divf %63, %64 : vector<128x1xf32>
    %66 = vector.broadcast %65 : vector<128x1xf32> to vector<128x128xf32>
    %67 = arith.subf %57, %66 : vector<128x128xf32>
    %68 = arith.mulf %67, %67 : vector<128x128xf32>
    %cst_32 = arith.constant dense<0.000000e+00> : vector<128xf32>
    %69 = vector.multi_reduction <add>, %68, %cst_32 [1] : vector<128x128xf32> to vector<128xf32>
    %70 = vector.shape_cast %69 : vector<128xf32> to vector<128x1xf32>
    %cst_33 = arith.constant 1.280000e+02 : f32
    %71 = vector.broadcast %cst_33 : f32 to vector<128x1xf32>
    %72 = arith.divf %70, %71 : vector<128x1xf32>
    %73 = vector.broadcast %65 : vector<128x1xf32> to vector<128x128xf32>
    %74 = arith.subf %57, %73 : vector<128x128xf32>
    %cst_34 = arith.constant 9.99999996E-13 : f32
    %75 = vector.broadcast %cst_34 : f32 to vector<128x1xf32>
    %76 = arith.addf %72, %75 : vector<128x1xf32>
    %77 = math.rsqrt %76 : vector<128x1xf32>
    %78 = vector.broadcast %77 : vector<128x1xf32> to vector<128x128xf32>
    %79 = arith.mulf %74, %78 : vector<128x128xf32>
    %80 = vector.shape_cast %59 : vector<128xf32> to vector<1x128xf32>
    %81 = vector.broadcast %80 : vector<1x128xf32> to vector<128x128xf32>
    %82 = arith.mulf %79, %81 : vector<128x128xf32>
    %83 = vector.shape_cast %61 : vector<128xf32> to vector<1x128xf32>
    %84 = vector.broadcast %83 : vector<1x128xf32> to vector<128x128xf32>
    %85 = arith.addf %82, %84 : vector<128x128xf32>
    %86 = arith.truncf %85 : vector<128x128xf32> to vector<128x128xbf16>
    %c0_35 = arith.constant 0 : index
    %c0_36 = arith.constant 0 : index
    %87 = vector.load %arg11[%c0_35, %c0_36] : memref<128x512xbf16, #tpu.memory_space<vmem>>, vector<128x512xbf16>
    %cst_37 = arith.constant dense<0.000000e+00> : vector<128x512xf32>
    %88 = tpu.matmul %86, %87, %cst_37 {dimension_numbers = #tpu.dot_dimension_numbers<[1], [0], [0], [1], [0, 0, 1, 1], [], []>} : vector<128x128xbf16>, vector<128x512xbf16>, vector<128x512xf32> -> vector<128x512xf32>
    %c0_38 = arith.constant 0 : index
    %c0_39 = arith.constant 0 : index
    %89 = vector.load %arg12[%c0_38, %c0_39] : memref<1x512xf32, #tpu.memory_space<vmem>>, vector<1x512xf32>
    %90 = vector.shape_cast %89 : vector<1x512xf32> to vector<512xf32>
    %91 = vector.shape_cast %90 : vector<512xf32> to vector<1x512xf32>
    %92 = vector.broadcast %91 : vector<1x512xf32> to vector<128x512xf32>
    %93 = arith.addf %88, %92 : vector<128x512xf32>
    %cst_40 = arith.constant 5.000000e-01 : f32
    %94 = vector.broadcast %cst_40 : f32 to vector<128x512xf32>
    %95 = arith.mulf %94, %93 : vector<128x512xf32>
    %cst_41 = arith.constant 4.471500e-02 : f32
    %96 = vector.broadcast %cst_41 : f32 to vector<128x512xf32>
    %97 = arith.mulf %96, %93 : vector<128x512xf32>
    %98 = arith.mulf %97, %93 : vector<128x512xf32>
    %99 = arith.mulf %98, %93 : vector<128x512xf32>
    %100 = arith.addf %93, %99 : vector<128x512xf32>
    %cst_42 = arith.constant 0.797884583 : f32
    %101 = vector.broadcast %cst_42 : f32 to vector<128x512xf32>
    %102 = arith.mulf %101, %100 : vector<128x512xf32>
    %103 = math.tanh %102 : vector<128x512xf32>
    %cst_43 = arith.constant 1.000000e+00 : f32
    %104 = vector.broadcast %cst_43 : f32 to vector<128x512xf32>
    %105 = arith.addf %104, %103 : vector<128x512xf32>
    %106 = arith.mulf %95, %105 : vector<128x512xf32>
    %107 = arith.truncf %106 : vector<128x512xf32> to vector<128x512xbf16>
    %c0_44 = arith.constant 0 : index
    %c0_45 = arith.constant 0 : index
    %108 = vector.load %arg13[%c0_44, %c0_45] : memref<512x128xbf16, #tpu.memory_space<vmem>>, vector<512x128xbf16>
    %cst_46 = arith.constant dense<0.000000e+00> : vector<128x128xf32>
    %109 = tpu.matmul %107, %108, %cst_46 {dimension_numbers = #tpu.dot_dimension_numbers<[1], [0], [0], [1], [0, 0, 1, 1], [], []>} : vector<128x512xbf16>, vector<512x128xbf16>, vector<128x128xf32> -> vector<128x128xf32>
    %c0_47 = arith.constant 0 : index
    %c0_48 = arith.constant 0 : index
    %110 = vector.load %arg14[%c0_47, %c0_48] : memref<1x128xf32, #tpu.memory_space<vmem>>, vector<1x128xf32>
    %111 = vector.shape_cast %110 : vector<1x128xf32> to vector<128xf32>
    %112 = vector.shape_cast %111 : vector<128xf32> to vector<1x128xf32>
    %113 = vector.broadcast %112 : vector<1x128xf32> to vector<128x128xf32>
    %114 = arith.addf %109, %113 : vector<128x128xf32>
    %115 = arith.addf %114, %57 : vector<128x128xf32>
    %c0_49 = arith.constant 0 : index
    %c0_50 = arith.constant 0 : index
    %c0_51 = arith.constant 0 : index
    %116 = vector.load %arg15[%c0_49, %c0_50, %c0_51] : memref<1x128x128xf32, #tpu.memory_space<vmem>>, vector<1x128x128xf32>
    %117 = vector.shape_cast %116 : vector<1x128x128xf32> to vector<128x128xf32>
    %118 = vector.shape_cast %115 : vector<128x128xf32> to vector<1x128x128xf32>
    tpu.vector_store %arg15[%c0_49, %c0_50, %c0_51], %118 {strides = array<i32>} : memref<1x128x128xf32, #tpu.memory_space<vmem>>, vector<1x128x128xf32>,
    return
  }
  func.func @transform_0(%arg0: i32, %arg1: i32) -> (i32, i32, i32) {
    %c0_i32 = arith.constant 0 : i32
    %c0_i32_0 = arith.constant 0 : i32
    %c0_i32_1 = arith.constant 0 : i32
    return %arg0, %c0_i32, %c0_i32_0 : i32, i32, i32
  }
  func.func @transform_1(%arg0: i32, %arg1: i32) -> (i32, i32) {
    %c0_i32 = arith.constant 0 : i32
    %c0_i32_0 = arith.constant 0 : i32
    %c0_i32_1 = arith.constant 0 : i32
    return %c0_i32, %c0_i32_0 : i32, i32
  }
  func.func @transform_2(%arg0: i32, %arg1: i32) -> (i32, i32) {
    %c0_i32 = arith.constant 0 : i32
    %c0_i32_0 = arith.constant 0 : i32
    %c0_i32_1 = arith.constant 0 : i32
    return %c0_i32, %c0_i32_0 : i32, i32
  }
  func.func @transform_3(%arg0: i32, %arg1: i32) -> (i32, i32) {
    %c0_i32 = arith.constant 0 : i32
    %c0_i32_0 = arith.constant 0 : i32
    %c0_i32_1 = arith.constant 0 : i32
    return %c0_i32, %c0_i32_0 : i32, i32
  }
  func.func @transform_4(%arg0: i32, %arg1: i32) -> (i32, i32) {
    %c0_i32 = arith.constant 0 : i32
    %c0_i32_0 = arith.constant 0 : i32
    %c0_i32_1 = arith.constant 0 : i32
    return %c0_i32, %c0_i32_0 : i32, i32
  }
  func.func @transform_5(%arg0: i32, %arg1: i32) -> (i32, i32) {
    %c0_i32 = arith.constant 0 : i32
    %c0_i32_0 = arith.constant 0 : i32
    %c0_i32_1 = arith.constant 0 : i32
    return %c0_i32, %c0_i32_0 : i32, i32
  }
  func.func @transform_6(%arg0: i32, %arg1: i32) -> (i32, i32) {
    %c0_i32 = arith.constant 0 : i32
    %c0_i32_0 = arith.constant 0 : i32
    %c0_i32_1 = arith.constant 0 : i32
    return %c0_i32, %c0_i32_0 : i32, i32
  }
  func.func @transform_7(%arg0: i32, %arg1: i32) -> (i32, i32) {
    %c0_i32 = arith.constant 0 : i32
    %c0_i32_0 = arith.constant 0 : i32
    %c0_i32_1 = arith.constant 0 : i32
    return %c0_i32, %c0_i32_0 : i32, i32
  }
  func.func @transform_8(%arg0: i32, %arg1: i32) -> (i32, i32) {
    %c0_i32 = arith.constant 0 : i32
    %c0_i32_0 = arith.constant 0 : i32
    %c0_i32_1 = arith.constant 0 : i32
    return %c0_i32, %c0_i32_0 : i32, i32
  }
  func.func @transform_9(%arg0: i32, %arg1: i32) -> (i32, i32) {
    %c0_i32 = arith.constant 0 : i32
    %c0_i32_0 = arith.constant 0 : i32
    %c0_i32_1 = arith.constant 0 : i32
    return %c0_i32, %c0_i32_0 : i32, i32
  }
  func.func @transform_10(%arg0: i32, %arg1: i32) -> (i32, i32) {
    %c0_i32 = arith.constant 0 : i32
    %c0_i32_0 = arith.constant 0 : i32
    %c0_i32_1 = arith.constant 0 : i32
    return %c0_i32, %c0_i32_0 : i32, i32
  }
  func.func @transform_11(%arg0: i32, %arg1: i32) -> (i32, i32) {
    %c0_i32 = arith.constant 0 : i32
    %c0_i32_0 = arith.constant 0 : i32
    %c0_i32_1 = arith.constant 0 : i32
    return %c0_i32, %c0_i32_0 : i32, i32
  }
  func.func @transform_12(%arg0: i32, %arg1: i32) -> (i32, i32) {
    %c0_i32 = arith.constant 0 : i32
    %c0_i32_0 = arith.constant 0 : i32
    %c0_i32_1 = arith.constant 0 : i32
    return %c0_i32, %c0_i32_0 : i32, i32
  }
  func.func @transform_13(%arg0: i32, %arg1: i32) -> (i32, i32, i32) {
    %c0_i32 = arith.constant 0 : i32
    %c0_i32_0 = arith.constant 0 : i32
    return %arg0, %arg1, %c0_i32 : i32, i32, i32
  }
}

</mosaic_0001>

<bundles_post_ra>
// kernel: tpu_custom_call.1
= control target key start
LH: loop header
LB: loop body
LE: loop exit
PB: predicated region body
PF: predicated region fallthrough
CT: control target
= control target key end

     0   :  { %s17726_s0 = inlined_call_operand.hbm [shape: f32[2,256,128], index: 0, kind: input, shape index: {}]   ;;  %s17727_s1 = inlined_call_operand.hbm [shape: f32[1,128], index: 1, kind: input, shape index: {}]   ;;  %s17728_s2 = inlined_call_operand.hbm [shape: f32[1,128], index: 2, kind: input, shape index: {}]   ;;  %s17729_s3 = inlined_call_operand.hbm [shape: bf16[128,384], index: 3, kind: input, shape index: {}]   ;;  %s17730_s4 = inlined_call_operand.vmem [shape: f32[1,384], index: 4, kind: input, shape index: {}]   ;;  %s17731_s5 = inlined_call_operand.hbm [shape: bf16[128,128], index: 5, kind: input, shape index: {}]   ;;  %s17732_s6 = inlined_call_operand.hbm [shape: f32[1,128], index: 6, kind: input, shape index: {}]   ;;  %s17733_s7 = inlined_call_operand.hbm [shape: f32[1,128], index: 7, kind: input, shape index: {}]   ;;  %s17734_s8 = inlined_call_operand.hbm [shape: f32[1,128], index: 8, kind: input, shape index: {}]   ;;  %s17735_s9 = inlined_call_operand.hbm [shape: bf16[128,512], index: 9, kind: input, shape index: {}]   ;;  %s17736_s10 = inlined_call_operand.vmem [shape: f32[1,512], index: 10, kind: input, shape index: {}]   ;;  %s17737_s11 = inlined_call_operand.hbm [shape: bf16[512,128], index: 11, kind: input, shape index: {}]   ;;  %s17738_s12 = inlined_call_operand.vmem [shape: f32[1,128], index: 12, kind: input, shape index: {}]   ;;  %s17739_s13 = inlined_call_operand.hbm [shape: f32[2,256,128], index: 13, kind: output, shape index: {}]  }
   0x1   :  { %17948 = sst [smem:[#allocation153_spill]] %s17726_s0 }
   0x2   :  { %17949 = sst [smem:[#allocation154_spill]] %s17727_s1 }
   0x3   :  { %17950 = sst [smem:[#allocation155_spill]] %s17728_s2 }
   0x4   :  { %17951 = sst [smem:[#allocation156_spill]] %s17729_s3 }
   0x5   :  { %17952 = sst [smem:[#allocation157_spill]] %s17730_s4 }
   0x6   :  { %17953 = sst [smem:[#allocation158_spill]] %s17731_s5 }
   0x7   :  { %17954 = sst [smem:[#allocation159_spill]] %s17732_s6 }
   0x8   :  { %17955 = sst [smem:[#allocation160_spill]] %s17733_s7 }
   0x9   :  { %17956 = sst [smem:[#allocation161_spill]] %s17734_s8 }
   0xa   :  { %17957 = sst [smem:[#allocation162_spill]] %s17735_s9 }
   0xb   :  { %17958 = sst [smem:[#allocation163_spill]] %s17736_s10 }
   0xc   :  { %17959 = sst [smem:[#allocation164_spill]] %s17737_s11 }
   0xd   :  { %17960 = sst [smem:[#allocation165_spill]] %s17738_s12 }
   0xe   :  { %17961 = sst [smem:[#allocation166_spill]] %s17739_s13 }
   0xf   :  { %18 = vsyncpa [#allocation6], 0 }
  0x10   :  { %20 = vsyncpa [#allocation6 + $0x1], 0 }
  0x11   :  { %21 = vsyncpa [#allocation9], 0 }
  0x12   :  { %22 = vsyncpa [#allocation12], 0 }
  0x13   :  { %23 = vsyncpa [#allocation15], 0 }
  0x14   :  { %24 = vsyncpa [#allocation18], 0 }
  0x15   :  { %25 = vsyncpa [#allocation21], 0 }
  0x16   :  { %26 = vsyncpa [#allocation7], 0 }
  0x17   :  { %28 = vsyncpa [#allocation7 + $0x1], 0  ;;  %s12349_s25 = smov 0   ;;  %s12351_s26 = smov 0  }
  0x18   :  { %s12353_s27 = smov 0   ;;  %s12355_s28 = smov 0  }
  0x19   :  { %s12357_s29 = smov 0   ;;  %s12359_s30 = smov 0  }
  0x1a   :  { %s12361_s14 = smov 0   ;;  %s12363_s15 = smov 0  }
  0x1b   :  { %s12365_s16 = smov 0   ;;  %s12367_s17 = smov 0  }
  0x1c   :  { %s12369_s18 = smov 0  }
  0x1d LB: > { %17962 = sst [smem:[#allocation30_spill]] %s12213_s25  ;;  %s17741_s19 = sadd.s32 4294967295, %s12253_s18   ;;  %s12253_s18 = sphi %s12369_s18, %s34_s18   ;;  %s12249_s17 = sphi %s12367_s17, %s18502_s17   ;;  %s12245_s16 = sphi %s12365_s16, %s18501_s16   ;;  %s12241_s15 = sphi %s12363_s15, %s18500_s15   ;;  %s12237_s14 = sphi %s12361_s14, %s18499_s14   ;;  %s12233_s30 = sphi %s12359_s30, %s18498_s30   ;;  %s12229_s29 = sphi %s12357_s29, %s18497_s29   ;;  %s12225_s28 = sphi %s12355_s28, %s18496_s28   ;;  %s12221_s27 = sphi %s12353_s27, %s18495_s27   ;;  %s12217_s26 = sphi %s12351_s26, %s18494_s26   ;;  %s12213_s25 = sphi %s12349_s25, %s18493_s25  }
  0x1e   : > { %17963 = sst [smem:[#allocation31_spill]] %s12217_s26  ;;  %p9545_p0 = scmp.ge.s32.totalorder %s12253_s18, 1 }
  0x1f   : > { %17964 = sst [smem:[#allocation32_spill]] %s12237_s14  ;;  %p12408_p1 = scmp.eq.s32.totalorder %s17741_s19, 0 }
  0x20   : > { %17965 = sst [smem:[#allocation33_spill]] %s12241_s15  ;;  %p357_p2 = scmp.lt.s32.totalorder %s12253_s18, 5 }
  0x21   : > { %s17967_s1 = sld [smem:[#allocation154_spill]]  ;;  %s12255_s13 = smov [#allocation8]  }
  0x22   : > { %p12416_p3 = pnand %p9545_p0, %p357_p2  ;;  %s371_s15 = sshll.u32 %s12255_s13, 4  ;;  %s372_s15 = int_to_ptr.vmem [resolvable:$true] %s371_s15 }
  0x23   : > { %s17970_s3 = sld [smem:[#allocation156_spill]]  ;;  %s12256_s21 = smov [#allocation11]  }
  0x24   : > { %s17968_s24 = scalar_select %p12416_p3, 1, 0 }
  0x25   : > { %p11021_p4 = pneg %p12416_p3  ;;  %s394_s22 = sshll.u32 %s12256_s21, 4  ;;  %s395_s22 = int_to_ptr.vmem [resolvable:$true] %s394_s22 }
  0x26   : > { %17969 = sst [smem:[#allocation34_spill]] %s17968_s24  ;;  %s12257_s13 = smov 192  }
  0x27   : > { %s369_s23 = sshll.u32 %s17967_s1, 4  ;;  %p12427_p5 = pnand %p11021_p4, %p12408_p1  ;;  %s370_s23 = int_to_ptr.hbm [resolvable:$true] %s369_s23 }
  0x28   : > { %s12258_s1 = smov 12   ;;  %s17972_s6 = sld [smem:[#allocation159_spill]] }
  0x29   : > { %s392_s10 = sshll.u32 %s17970_s3, 4  ;;  %s12259_s14 = smov [#allocation14]   ;;  %s393_s10 = int_to_ptr.hbm [resolvable:$true] %s392_s10 }
  0x2a   : > { %11024 = dma.hbm_to_vmem [thread:$0]  (!%p12427_p5), %s370_s23, 16, %s372_s15, [#allocation9]  }
  0x2b   : > { %11030 = dma.hbm_to_vmem [thread:$0]  (!%p12427_p5), %s393_s10, 3072, %s395_s22, [#allocation12], %s12257_s13, %s12257_s13, %s12258_s1  }
  0x2c   : > { %s426_s24 = sshll.u32 %s12259_s14, 4  ;;  %s17973_s8 = sld [smem:[#allocation161_spill]]  ;;  %s427_s24 = int_to_ptr.vmem [resolvable:$true] %s426_s24 }
  0x2d   : > { %s12260_s15 = smov [#allocation17]   ;;  %s17974_s2 = sld [smem:[#allocation155_spill]] }
  0x2e   : > { %s424_s3 = sshll.u32 %s17972_s6, 4  ;;  %s450_s23 = sshll.u32 %s12260_s15, 4  ;;  %s425_s3 = int_to_ptr.hbm [resolvable:$true] %s424_s3  ;;  %s451_s23 = int_to_ptr.vmem [resolvable:$true] %s450_s23 }
  0x2f   : > { %11036 = dma.hbm_to_vmem [thread:$0]  (!%p12427_p5), %s425_s3, 16, %s427_s24, [#allocation15]  }
  0x30   : > { %s17975_s5 = sld [smem:[#allocation158_spill]]  ;;  %s12261_s0 = smov [#allocation10]  }
  0x31   : > { %s383_s25 = sshll.u32 %s12261_s0, 4  ;;  %s12262_s3 = smov [#allocation13]   ;;  %s384_s25 = int_to_ptr.vmem [resolvable:$true] %s383_s25 }
  0x32   : > { %s448_s21 = sshll.u32 %s17973_s8, 4  ;;  %s411_s24 = sshll.u32 %s12262_s3, 4  ;;  %s449_s21 = int_to_ptr.hbm [resolvable:$true] %s448_s21  ;;  %s412_s24 = int_to_ptr.vmem [resolvable:$true] %s411_s24 }
  0x33   : > { %s381_s10 = sshll.u32 %s17974_s2, 4  ;;  %s12263_s26 = smov 64   ;;  %s382_s10 = int_to_ptr.hbm [resolvable:$true] %s381_s10 }
  0x34   : > { %11042 = dma.hbm_to_vmem [thread:$0]  (!%p12427_p5), %s449_s21, 16, %s451_s23, [#allocation18]  }
  0x35   : > { %11027 = dma.hbm_to_vmem [thread:$0]  (!%p12427_p5), %s382_s10, 16, %s384_s25, [#allocation9]  }
  0x36   : > { %s409_s13 = sshll.u32 %s17975_s5, 4  ;;  %s12264_s12 = smov 4   ;;  %s410_s13 = int_to_ptr.hbm [resolvable:$true] %s409_s13 }
  0x37   : > { %11033 = dma.hbm_to_vmem [thread:$0]  (!%p12427_p5), %s410_s13, 1024, %s412_s24, [#allocation12], %s12263_s26, %s12263_s26, %s12264_s12  }
  0x38   : > { %s17976_s7 = sld [smem:[#allocation160_spill]]  ;;  %s12265_s23 = smov [#allocation16]  }
  0x39   : > { %s438_s1 = sshll.u32 %s12265_s23, 4  ;;  %s17977_s9 = sld [smem:[#allocation162_spill]]  ;;  %s439_s1 = int_to_ptr.vmem [resolvable:$true] %s438_s1 }
  0x3a   : > { %s12266_s13 = smov [#allocation19]   ;;  %s12267_s25 = smov 256  }
  0x3b   : > { %s461_s0 = sshll.u32 %s12266_s13, 4  ;;  %s12268_s3 = smov 16   ;;  %s462_s0 = int_to_ptr.vmem [resolvable:$true] %s461_s0 }
  0x3c   : > { %s17978_s11 = sld [smem:[#allocation164_spill]]  ;;  %s43_s22 = sadd.s32 1, %s12245_s16 }
  0x3d   : > { %s17979_s14 = sld [smem:[#allocation31_spill]]  ;;  %p44_p6 = scmp.ge.s32.totalorder %s43_s22, 2 }
  0x3e   : > { %s436_s15 = sshll.u32 %s17976_s7, 4  ;;  %s17980_s13 = sld [smem:[#allocation30_spill]]  ;;  %s437_s15 = int_to_ptr.hbm [resolvable:$true] %s436_s15 }
  0x3f   : > { %s459_s10 = sshll.u32 %s17977_s9, 4  ;;  %p60_p7 = scmp.ne.s32.totalorder %s12233_s30, %s12229_s29  ;;  %s460_s10 = int_to_ptr.hbm [resolvable:$true] %s459_s10 }
  0x40   : > { %11039 = dma.hbm_to_vmem [thread:$0]  (!%p12427_p5), %s437_s15, 16, %s439_s1, [#allocation15]  }
  0x41   : > { %11045 = dma.hbm_to_vmem [thread:$0]  (!%p12427_p5), %s460_s10, 4096, %s462_s0, [#allocation18], %s12267_s25, %s12267_s25, %s12268_s3  }
  0x42   : > { %s476_s21 = sshll.u32 %s17978_s11, 4  ;;  %s12269_s15 = smov [#allocation20]   ;;  %s477_s21 = int_to_ptr.hbm [resolvable:$true] %s476_s21 }
  0x43   : > { %s478_s23 = sshll.u32 %s12269_s15, 4  ;;  %s9544_s1 = sadd.s32 4294967294, %s12253_s18   ;;  %s479_s23 = int_to_ptr.vmem [resolvable:$true] %s478_s23 }
  0x44   : > { %11048 = dma.hbm_to_vmem [thread:$0]  (!%p12427_p5), %s477_s21, 4096, %s479_s23, [#allocation21], %s12263_s26, %s12263_s26, %s12264_s12  }
  0x45   : > { %s46_s10 = sadd.s32 1, %s12249_s17  ;;  %s53_s0 = sadd.s32 1, %s12233_s30 }
  0x46   : > { %p61_p8 = scmp.eq.s32.totalorder %s12253_s18, 0  ;;  %s18504_s22 = smov (%p44_p6, %s43_s22), 0 }
  0x47   : > { %s18506_s10 = smov (!%p44_p6, %s46_s10), %s12249_s17  ;;  %p66_p10 = scmp.ne.s32.totalorder %s12229_s29, %s12225_s28 }
  0x48   : > { %p12480_p9 = por %p61_p8, %p60_p7  ;;  %p48_p11 = scmp.ge.s32.totalorder %s18506_s10, 2 }
  0x49   : > { %s329_s26 = ssub.s32 %s12245_s16, %s18504_s22  ;;  %p12490_p12 = por %p12408_p1, %p66_p10 }
  0x4a   : > { %s333_s25 = sadd.s32 1, %s12221_s27  ;;  %s18508_s10 = smov (%p48_p11, %s18506_s10), 0 }
  0x4b   : > { %p343_p13 = scmp.ne.s32.totalorder %s12221_s27, %s17979_s14  ;;  %s17983_s3 = sadd.s32 4294967295, %s12253_s18  }
  0x4c   : > { %p344_p0 = scmp.eq.s32.totalorder %s17983_s3, 3  ;;  %s50_s24 = ssub.s32 %s12249_s17, %s18508_s10 }
  0x4d   : > { %p349_p2 = scmp.ne.s32.totalorder %s17979_s14, %s17980_s13  ;;  %p51_p4 = scmp.eq.s32.totalorder %s50_s24, 0 }
  0x4e   : > { %s330_s28 = sor.u32 %s329_s26, %s50_s24  ;;  %p12505_p6 = por %p344_p0, %p343_p13 }
  0x4f   : > { %p331_p5 = scmp.eq.s32.totalorder %s330_s28, 0  ;;  %p350_p7 = scmp.eq.s32.totalorder %s9544_s1, 3 }
  0x50   : > { %s12510_s21 = scalar_select %p51_p4, %s12233_s30, %s53_s0  }
  0x51   : > { %s12513_s15 = scalar_select %p331_p5, %s12221_s27, %s333_s25  }
  0x52   : > { %p11066_p8 = scmp.lt.s32.totalorder %s12253_s18, 4  ;;  %s495_s23 = sand.u32 1, %s12233_s30  }
  0x53   : > { %s10700_s2 = sshll.u32 %s12249_s17, 8  ;;  %p12518_p10 = por %p350_p7, %p349_p2 }
  0x54   : > { %s9556_s14 = sshll.u32 %s495_s23, 8  ;;  %s17986_s24 = sld [smem:[#allocation153_spill]] }
  0x55   : > { %s499_s6 = scalar_lea.vmem [#allocation5], %s9556_s14  ;;  %p11050_p11 = pnand %p11066_p8, %p12480_p9 }
  0x56   : > { %s507_s0 = sshll.u32 %s499_s6, 4  ;;  %s496_s1 = scalar_lea.sflag [#allocation6], %s495_s23  ;;  %s508_s0 = int_to_ptr.vmem [resolvable:$true] %s507_s0 }
  0x57   : > { %s12270_s25 = smov 128   ;;  %s12271_s7 = smov 8  }
  0x58   : > { %519 = sbr.rel (%p12416_p3) target bundleno = 3294 (0xcde), region = 72 }
  0x5a   : > { %s504_s28 = scalar_lea.hbm %s17986_s24, %s10700_s2 }
  0x5b   : > { %s505_s5 = sshll.u32 %s504_s28, 4  ;;  %s506_s5 = int_to_ptr.hbm [resolvable:$true] %s505_s5 }
  0x5c   : > { %11052 = dma.hbm_to_vmem [thread:$0]  (!%p11050_p11), %s506_s5, 4096, %s508_s0, %s496_s1, %s12270_s25, %s12270_s25, %s12271_s7  }
  0x5d   : > { %s521_s9 = sand.u32 1, %s12229_s29  }
  0x5e   : > { %s9560_s11 = sshll.u32 %s521_s9, 8  ;;  %s522_s13 = scalar_lea.sflag [#allocation6], %s521_s9 }
  0x5f   : > { %s12530_s2 = scalar_lea.vmem [#allocation5], %s9560_s11 }
  0x60   : > { %12184 = dma.done.wait (%p12490_p12), %s522_s13, 4096  }
  0x61   : > { %12186 = vsyncadd (%p12490_p12), %s522_s13, 4294963200 }
  0x62   : > { %12188 = dma.done.wait (%p12408_p1), [#allocation9], 32  }
  0x63   : > { %12190 = vsyncadd (%p12408_p1), [#allocation9], 4294967264 }
  0x64   : > { %12192 = dma.done.wait (%p12408_p1), [#allocation12], 4096  }
  0x65   : > { %12194 = vsyncadd (%p12408_p1), [#allocation12], 4294963200 }
  0x66   : > { %12196 = dma.done.wait (%p12408_p1), [#allocation15], 32  }
  0x67   : > { %12198 = vsyncadd (%p12408_p1), [#allocation15], 4294967264 }
  0x68   : > { %12200 = dma.done.wait (%p12408_p1), [#allocation18], 4112  }
  0x69   : > { %12202 = vsyncadd (%p12408_p1), [#allocation18], 4294963184 }
  0x6a   : > { %12204 = dma.done.wait (%p12408_p1), [#allocation21], 4096  }
  0x6b   : > { %12206 = vsyncadd (%p12408_p1), [#allocation21], 4294963200  ;;  %s17988_s5 = sld [smem:[#allocation31_spill]] }
  0x6c   : > { %s17989_s9 = sld [smem:[#allocation32_spill]] }
  0x71   : > { %s611_s6 = sand.u32 1, %s17988_s5  }
  0x72   : > { %s9570_s7 = sshll.u32 %s611_s6, 7  ;;  %p9571_p3 = scmp.ne.s32.totalorder %s17989_s9, 0 }
  0x73   : > { %s12559_s8 = scalar_lea.vmem [#allocation22], %s9570_s7 }
  0x74   : > { %619 = sbr.rel (%p9571_p3) target bundleno = 1462 (0x5b6), region = 116 }
  0x79   : > { %v12563_v0 = vld [vmem:[%s12530_s2 + $0x20] sm:$0xff]  ;;  %v12566_v1 = vld [vmem:[%s12530_s2 + $0x10] sm:$0xff]  ;;  %v12575_v3 = vld [vmem:[%s12530_s2 + $0x28] sm:$0xff]  ;;  %v12272_v32 = vmov 128.0   ;;  %s18054_s4 = sld [smem:[#allocation157_spill]]  ;;  %s12273_s12 = smov 96  }
  0x7a   : > { %v12569_v2 = vld [vmem:[%s12530_s2] sm:$0xff]  ;;  %662 = vadd.xlane.f32.xlu2 %v12563_v0  ;;  %658 = vadd.xlane.f32.xlu1 %v12566_v1  ;;  %v12578_v4 = vld [vmem:[%s12530_s2 + $0x18] sm:$0xff]  ;;  %v12581_v5 = vld [vmem:[%s12530_s2 + $0x8] sm:$0xff]  ;;  %11191 = vrcp.f32 %v12272_v32  ;;  %s12274_s23 = smov 64   ;;  %s12275_s14 = smov 32  }
  0x7b   : > { %654 = vadd.xlane.f32.xlu0 %v12569_v2  ;;  %v12587_v6 = vld [vmem:[%s12530_s2 + $0x40] sm:$0xff]  ;;  %v12590_v7 = vld [vmem:[%s12530_s2 + $0x38] sm:$0xff]  ;;  %v12593_v8 = vld [vmem:[%s12530_s2 + $0x30] sm:$0xff] }
  0x7c   : > { %v12599_v9 = vld [vmem:[%s12530_s2 + $0x58] sm:$0xff]  ;;  %v12602_v10 = vld [vmem:[%s12530_s2 + $0x50] sm:$0xff]  ;;  %v12605_v11 = vld [vmem:[%s12530_s2 + $0x48] sm:$0xff] }
  0x7d   : > { %v12611_v12 = vld [vmem:[%s12530_s2 + $0x70] sm:$0xff]  ;;  %v12614_v13 = vld [vmem:[%s12530_s2 + $0x68] sm:$0xff]  ;;  %v12617_v14 = vld [vmem:[%s12530_s2 + $0x60] sm:$0xff] }
  0x7e   : > { %v12623_v15 = vld [vmem:[%s12530_s2 + $0x88] sm:$0xff]  ;;  %v12626_v16 = vld [vmem:[%s12530_s2 + $0x80] sm:$0xff]  ;;  %v12629_v17 = vld [vmem:[%s12530_s2 + $0x78] sm:$0xff] }
  0x7f   : > { %v12635_v18 = vld [vmem:[%s12530_s2 + $0xa0] sm:$0xff]  ;;  %v12638_v19 = vld [vmem:[%s12530_s2 + $0x98] sm:$0xff]  ;;  %v12641_v20 = vld [vmem:[%s12530_s2 + $0x90] sm:$0xff] }
  0x80   : > { %v12647_v21 = vld [vmem:[%s12530_s2 + $0xb8] sm:$0xff]  ;;  %v12650_v22 = vld [vmem:[%s12530_s2 + $0xb0] sm:$0xff]  ;;  %v12653_v23 = vld [vmem:[%s12530_s2 + $0xa8] sm:$0xff]  ;;  %v11192_v33 = vpop.eup %11191 }
  0x81   : > { %v12659_v24 = vld [vmem:[%s12530_s2 + $0xd0] sm:$0xff]  ;;  %v12662_v25 = vld [vmem:[%s12530_s2 + $0xc8] sm:$0xff]  ;;  %v12665_v26 = vld [vmem:[%s12530_s2 + $0xc0] sm:$0xff]  ;;  %v719_v34 = vmul.f32 128.0, %v11192_v33  ;;  %vm723_vm0 = vweird.f32 %v11192_v33 }
  0x82   : > { %664 = vadd.xlane.f32.xlu2 %v12575_v3  ;;  %660 = vadd.xlane.f32.xlu1 %v12578_v4  ;;  %v12671_v27 = vld [vmem:[%s12530_s2 + $0xe8] sm:$0xff]  ;;  %v12674_v28 = vld [vmem:[%s12530_s2 + $0xe0] sm:$0xff]  ;;  %v12677_v29 = vld [vmem:[%s12530_s2 + $0xd8] sm:$0xff] }
  0x83   : > { %656 = vadd.xlane.f32.xlu0 %v12581_v5  ;;  %v12683_v30 = vld [vmem:[%s12530_s2 + $0xf8] sm:$0xff]  ;;  %v12686_v31 = vld [vmem:[%s12530_s2 + $0xf0] sm:$0xff]  ;;  %v720_v35 = vsub.f32 1.0, %v719_v34 }
  0x85   : > { %v721_v36 = vmul.f32 %v11192_v33, %v720_v35 }
  0x87   : > { %v722_v37 = vadd.f32 %v11192_v33, %v721_v36 }
  0x89   : > { %v12690_v38 = vsel %vm723_vm0, %v11192_v33, %v722_v37 }
  0x8a   : > { %670 = vadd.xlane.f32.xlu2 %v12587_v6  ;;  %668 = vadd.xlane.f32.xlu1 %v12590_v7 }
  0x8b   : > { %666 = vadd.xlane.f32.xlu0 %v12593_v8 }
  0x92   : > { %676 = vadd.xlane.f32.xlu2 %v12599_v9  ;;  %674 = vadd.xlane.f32.xlu1 %v12602_v10 }
  0x93   : > { %672 = vadd.xlane.f32.xlu0 %v12605_v11 }
  0x9a   : > { %682 = vadd.xlane.f32.xlu2 %v12611_v12  ;;  %680 = vadd.xlane.f32.xlu1 %v12614_v13 }
  0x9b   : > { %678 = vadd.xlane.f32.xlu0 %v12617_v14 }
  0xa2   : > { %688 = vadd.xlane.f32.xlu2 %v12623_v15  ;;  %686 = vadd.xlane.f32.xlu1 %v12626_v16 }
  0xa3   : > { %684 = vadd.xlane.f32.xlu0 %v12629_v17 }
  0xaa   : > { %694 = vadd.xlane.f32.xlu2 %v12635_v18  ;;  %692 = vadd.xlane.f32.xlu1 %v12638_v19 }
  0xab   : > { %690 = vadd.xlane.f32.xlu0 %v12641_v20 }
  0xb2   : > { %700 = vadd.xlane.f32.xlu2 %v12647_v21  ;;  %698 = vadd.xlane.f32.xlu1 %v12650_v22 }
  0xb3   : > { %696 = vadd.xlane.f32.xlu0 %v12653_v23 }
  0xba   : > { %706 = vadd.xlane.f32.xlu2 %v12659_v24  ;;  %704 = vadd.xlane.f32.xlu1 %v12662_v25 }
  0xbb   : > { %702 = vadd.xlane.f32.xlu0 %v12665_v26 }
  0xc2   : > { %712 = vadd.xlane.f32.xlu2 %v12671_v27  ;;  %710 = vadd.xlane.f32.xlu1 %v12674_v28 }
  0xc3   : > { %708 = vadd.xlane.f32.xlu0 %v12677_v29 }
  0xca   : > { %716 = vadd.xlane.f32.xlu1 %v12683_v30 }
  0xcb   : > { %714 = vadd.xlane.f32.xlu0 %v12686_v31 }
  0xed   : > { %v663_v39 = vpop.xlane.xlu2 %662  ;;  %v659_v40 = vpop.xlane.xlu1 %658 }
  0xee   : > { %v727_v41 = vmul.f32 %v12690_v38, %v659_v40  ;;  %v655_v42 = vpop.xlane.xlu0 %654  ;;  %v729_v56 = vmul.f32 %v12690_v38, %v663_v39 }
  0xef   : > { %v725_v43 = vmul.f32 %v12690_v38, %v655_v42 }
  0xf0   : > { %v12695_v44 = vsub.f32 %v12566_v1, %v727_v41  ;;  %v12724_v62 = vsub.f32 %v12563_v0, %v729_v56 }
  0xf1   : > { %v12698_v45 = vsub.f32 %v12569_v2, %v725_v43 }
  0xf2   : > { %v791_v46 = vmul.f32 %v12695_v44, %v12695_v44 }
  0xf3   : > { %v789_v47 = vmul.f32 %v12698_v45, %v12698_v45 }
  0xf4   : > { %825 = vadd.xlane.f32.xlu1 %v791_v46 }
  0xf5   : > { %821 = vadd.xlane.f32.xlu2 %v789_v47  ;;  %v665_v48 = vpop.xlane.xlu2 %664  ;;  %v661_v49 = vpop.xlane.xlu1 %660 }
  0xf6   : > { %v730_v50 = vmul.f32 %v12690_v38, %v665_v48  ;;  %v728_v51 = vmul.f32 %v12690_v38, %v661_v49  ;;  %v657_v52 = vpop.xlane.xlu0 %656 }
  0xf7   : > { %v726_v53 = vmul.f32 %v12690_v38, %v657_v52 }
  0xf8   : > { %v12708_v54 = vsub.f32 %v12575_v3, %v730_v50  ;;  %v12711_v55 = vsub.f32 %v12578_v4, %v728_v51 }
  0xf9   : > { %v12715_v57 = vsub.f32 %v12581_v5, %v726_v53  ;;  %v793_v5 = vmul.f32 %v12724_v62, %v12724_v62 }
  0xfa   : > { %v794_v58 = vmul.f32 %v12708_v54, %v12708_v54  ;;  %v792_v59 = vmul.f32 %v12711_v55, %v12711_v55 }
  0xfb   : > { %v790_v60 = vmul.f32 %v12715_v57, %v12715_v57 }
  0xfc   : > { %831 = vadd.xlane.f32.xlu1 %v794_v58 }
  0xfd   : > { %827 = vadd.xlane.f32.xlu2 %v792_v59  ;;  %823 = vadd.xlane.f32.xlu0 %v790_v60  ;;  %v671_v61 = vpop.xlane.xlu2 %670  ;;  %v669_v63 = vpop.xlane.xlu1 %668 }
  0xfe   : > { %v733_v1 = vmul.f32 %v12690_v38, %v671_v61  ;;  %v667_v2 = vpop.xlane.xlu0 %666  ;;  %v732_v33 = vmul.f32 %v12690_v38, %v669_v63 }
  0xff   : > { %v731_v3 = vmul.f32 %v12690_v38, %v667_v2 }
 0x100   : > { %v12729_v4 = vsub.f32 %v12587_v6, %v733_v1  ;;  %v12742_v6 = vsub.f32 %v12590_v7, %v732_v33 }
 0x101   : > { %v12734_v32 = vsub.f32 %v12593_v8, %v731_v3 }
 0x102   : > { %v797_v0 = vmul.f32 %v12729_v4, %v12729_v4  ;;  %v796_v41 = vmul.f32 %v12742_v6, %v12742_v6 }
 0x103   : > { %v795_v34 = vmul.f32 %v12734_v32, %v12734_v32 }
 0x104   : > { %837 = vadd.xlane.f32.xlu1 %v797_v0 }
 0x105   : > { %829 = vadd.xlane.f32.xlu0 %v793_v5  ;;  %833 = vadd.xlane.f32.xlu2 %v795_v34  ;;  %v677_v35 = vpop.xlane.xlu2 %676  ;;  %v675_v36 = vpop.xlane.xlu1 %674 }
 0x106   : > { %v736_v37 = vmul.f32 %v12690_v38, %v677_v35  ;;  %v673_v8 = vpop.xlane.xlu0 %672  ;;  %v735_v43 = vmul.f32 %v12690_v38, %v675_v36 }
 0x107   : > { %v734_v39 = vmul.f32 %v12690_v38, %v673_v8 }
 0x108   : > { %v12747_v40 = vsub.f32 %v12599_v9, %v736_v37  ;;  %v12760_v9 = vsub.f32 %v12602_v10, %v735_v43 }
 0x109   : > { %v12752_v42 = vsub.f32 %v12605_v11, %v734_v39 }
 0x10a   : > { %v800_v7 = vmul.f32 %v12747_v40, %v12747_v40  ;;  %v799_v52 = vmul.f32 %v12760_v9, %v12760_v9 }
 0x10b   : > { %v798_v46 = vmul.f32 %v12752_v42, %v12752_v42 }
 0x10c   : > { %843 = vadd.xlane.f32.xlu1 %v800_v7 }
 0x10d   : > { %835 = vadd.xlane.f32.xlu0 %v796_v41  ;;  %839 = vadd.xlane.f32.xlu2 %v798_v46  ;;  %v683_v47 = vpop.xlane.xlu2 %682  ;;  %v681_v48 = vpop.xlane.xlu1 %680 }
 0x10e   : > { %v739_v49 = vmul.f32 %v12690_v38, %v683_v47  ;;  %v679_v11 = vpop.xlane.xlu0 %678  ;;  %v738_v56 = vmul.f32 %v12690_v38, %v681_v48 }
 0x10f   : > { %v737_v50 = vmul.f32 %v12690_v38, %v679_v11 }
 0x110   : > { %v12765_v51 = vsub.f32 %v12611_v12, %v739_v49  ;;  %v12778_v12 = vsub.f32 %v12614_v13, %v738_v56 }
 0x111   : > { %v12770_v53 = vsub.f32 %v12617_v14, %v737_v50 }
 0x112   : > { %17990 = vst [vmem:[#allocation35_spill] sm:$0xff] %v12765_v51  ;;  %v803_v10 = vmul.f32 %v12765_v51, %v12765_v51  ;;  %v802_v2 = vmul.f32 %v12778_v12, %v12778_v12 }
 0x113   : > { %v801_v58 = vmul.f32 %v12770_v53, %v12770_v53 }
 0x114   : > { %849 = vadd.xlane.f32.xlu1 %v803_v10 }
 0x115   : > { %841 = vadd.xlane.f32.xlu0 %v799_v52  ;;  %845 = vadd.xlane.f32.xlu2 %v801_v58  ;;  %v689_v59 = vpop.xlane.xlu2 %688  ;;  %v687_v60 = vpop.xlane.xlu1 %686 }
 0x116   : > { %v742_v61 = vmul.f32 %v12690_v38, %v689_v59  ;;  %v685_v14 = vpop.xlane.xlu0 %684  ;;  %v741_v5 = vmul.f32 %v12690_v38, %v687_v60 }
 0x117   : > { %v740_v63 = vmul.f32 %v12690_v38, %v685_v14 }
 0x118   : > { %v12783_v1 = vsub.f32 %v12623_v15, %v742_v61  ;;  %v12796_v15 = vsub.f32 %v12626_v16, %v741_v5 }
 0x119   : > { %v12788_v3 = vsub.f32 %v12629_v17, %v740_v63 }
 0x11a   : > { %17991 = vst [vmem:[#allocation36_spill] sm:$0xff] %v12783_v1  ;;  %v806_v13 = vmul.f32 %v12783_v1, %v12783_v1  ;;  %v805_v8 = vmul.f32 %v12796_v15, %v12796_v15 }
 0x11b   : > { %17992 = vst [vmem:[#allocation37_spill] sm:$0xff] %v12788_v3  ;;  %v804_v33 = vmul.f32 %v12788_v3, %v12788_v3 }
 0x11c   : > { %855 = vadd.xlane.f32.xlu1 %v806_v13  ;;  %17993 = vst [vmem:[#allocation38_spill] sm:$0xff] %v12796_v15  ;;  %v12987_v15 = vld [vmem:[#allocation8] ss:$0 sm:$0xff] }
 0x11d   : > { %847 = vadd.xlane.f32.xlu0 %v802_v2  ;;  %851 = vadd.xlane.f32.xlu2 %v804_v33  ;;  %v695_v0 = vpop.xlane.xlu2 %694  ;;  %v693_v34 = vpop.xlane.xlu1 %692 }
 0x11e   : > { %v745_v35 = vmul.f32 %v12690_v38, %v695_v0  ;;  %v691_v17 = vpop.xlane.xlu0 %690  ;;  %v744_v41 = vmul.f32 %v12690_v38, %v693_v34 }
 0x11f   : > { %v743_v36 = vmul.f32 %v12690_v38, %v691_v17 }
 0x120   : > { %v12801_v37 = vsub.f32 %v12635_v18, %v745_v35  ;;  %v12814_v18 = vsub.f32 %v12638_v19, %v744_v41 }
 0x121   : > { %v12806_v39 = vsub.f32 %v12641_v20, %v743_v36 }
 0x122   : > { %17994 = vst [vmem:[#allocation39_spill] sm:$0xff] %v12801_v37  ;;  %v809_v16 = vmul.f32 %v12801_v37, %v12801_v37  ;;  %v808_v11 = vmul.f32 %v12814_v18, %v12814_v18 }
 0x123   : > { %17995 = vst [vmem:[#allocation40_spill] sm:$0xff] %v12806_v39  ;;  %v807_v43 = vmul.f32 %v12806_v39, %v12806_v39 }
 0x124   : > { %861 = vadd.xlane.f32.xlu1 %v809_v16  ;;  %17996 = vst [vmem:[#allocation41_spill] sm:$0xff] %v12814_v18 }
 0x125   : > { %853 = vadd.xlane.f32.xlu0 %v805_v8  ;;  %857 = vadd.xlane.f32.xlu2 %v807_v43  ;;  %v701_v7 = vpop.xlane.xlu2 %700  ;;  %v699_v46 = vpop.xlane.xlu1 %698 }
 0x126   : > { %v748_v47 = vmul.f32 %v12690_v38, %v701_v7  ;;  %v697_v20 = vpop.xlane.xlu0 %696  ;;  %v747_v52 = vmul.f32 %v12690_v38, %v699_v46 }
 0x127   : > { %v746_v48 = vmul.f32 %v12690_v38, %v697_v20 }
 0x128   : > { %v12819_v49 = vsub.f32 %v12647_v21, %v748_v47  ;;  %v12832_v21 = vsub.f32 %v12650_v22, %v747_v52  ;;  %v10723_v52 = vld [vmem:[#allocation11 + $0xb0] sm:$0xf0] }
 0x129   : > { %v12824_v50 = vsub.f32 %v12653_v23, %v746_v48 }
 0x12a   : > { %17997 = vst [vmem:[#allocation42_spill] sm:$0xff] %v12819_v49  ;;  %v812_v19 = vmul.f32 %v12819_v49, %v12819_v49  ;;  %v811_v14 = vmul.f32 %v12832_v21, %v12832_v21 }
 0x12b   : > { %17998 = vst [vmem:[#allocation43_spill] sm:$0xff] %v12824_v50  ;;  %v810_v56 = vmul.f32 %v12824_v50, %v12824_v50 }
 0x12c   : > { %867 = vadd.xlane.f32.xlu1 %v812_v19  ;;  %17999 = vst [vmem:[#allocation44_spill] sm:$0xff] %v12832_v21  ;;  %v10722_v19 = vld [vmem:[#allocation11 + $0xac] sm:$0xf] }
 0x12d   : > { %859 = vadd.xlane.f32.xlu0 %v808_v11  ;;  %863 = vadd.xlane.f32.xlu2 %v810_v56  ;;  %v707_v10 = vpop.xlane.xlu2 %706  ;;  %v705_v58 = vpop.xlane.xlu1 %704  ;;  %v9658_v11 = vld [vmem:[#allocation11 + $0xa8] sm:$0xf] }
 0x12e   : > { %v751_v59 = vmul.f32 %v12690_v38, %v707_v10  ;;  %v703_v23 = vpop.xlane.xlu0 %702  ;;  %v750_v2 = vmul.f32 %v12690_v38, %v705_v58  ;;  %v9659_v56 = vor.u32 %v10723_v52, %v9658_v11  ;;  %v9666_v10 = vld [vmem:[#allocation11 + $0xb0] sm:$0xf]  ;;  %v10724_v58 = vld [vmem:[#allocation11 + $0xb8] sm:$0xf0]  ;;  %v9630_v52 = vld [vmem:[#allocation11 + $0x68] sm:$0xf] }
 0x12f   : > { %v749_v60 = vmul.f32 %v12690_v38, %v703_v23  ;;  %v12886_v23 = vor.u32 %v10724_v58, %v9666_v10  ;;  %v9624_v11 = vld [vmem:[#allocation11 + $0x6c] sm:$0xf0]  ;;  %v9610_v10 = vld [vmem:[#allocation11 + $0x48] sm:$0xf]  ;;  %v10711_v58 = vld [vmem:[#allocation11 + $0x50] sm:$0xf0] }
 0x130   : > { %v12837_v61 = vsub.f32 %v12659_v24, %v751_v59  ;;  %v12850_v24 = vsub.f32 %v12662_v25, %v750_v2  ;;  %1555 = vmatpush.bf16.msra.mxu0 %v9659_v56  ;;  %10957 = vmatpush.bf16.msra.mxu3 %v9659_v56 }
 0x131   : > { %v12842_v63 = vsub.f32 %v12665_v26, %v749_v60  ;;  %1733 = vmatpush.bf16.msra.mxu2 %v12886_v23  ;;  %v10720_v60 = vld [vmem:[#allocation11 + $0x98] sm:$0xf0] }
 0x132   : > { %v815_v22 = vmul.f32 %v12837_v61, %v12837_v61  ;;  %v814_v17 = vmul.f32 %v12850_v24, %v12850_v24 }
 0x133   : > { %v813_v5 = vmul.f32 %v12842_v63, %v12842_v63 }
 0x134   : > { %873 = vadd.xlane.f32.xlu1 %v815_v22  ;;  %v9648_v22 = vld [vmem:[#allocation11 + $0x9c] sm:$0xf0] }
 0x135   : > { %865 = vadd.xlane.f32.xlu0 %v811_v14  ;;  %869 = vadd.xlane.f32.xlu2 %v813_v5  ;;  %v713_v13 = vpop.xlane.xlu2 %712  ;;  %v711_v33 = vpop.xlane.xlu1 %710  ;;  %v10719_v14 = vld [vmem:[#allocation11 + $0x94] sm:$0xf]  ;;  %v9654_v5 = vld [vmem:[#allocation11 + $0x98] sm:$0xf] }
 0x136   : > { %v754_v0 = vmul.f32 %v12690_v38, %v713_v13  ;;  %v709_v26 = vpop.xlane.xlu0 %708  ;;  %v753_v8 = vmul.f32 %v12690_v38, %v711_v33  ;;  %v10721_v13 = vld [vmem:[#allocation11 + $0xa0] sm:$0xf0]  ;;  %v12890_v33 = vor.u32 %v10719_v14, %v9648_v22  ;;  %v9612_v14 = vld [vmem:[#allocation11 + $0x54] sm:$0xf0]  ;;  %v10712_v22 = vld [vmem:[#allocation11 + $0x58] sm:$0xf0] }
 0x137   : > { %v752_v34 = vmul.f32 %v12690_v38, %v709_v26  ;;  %v9634_v26 = vld [vmem:[#allocation11 + $0x78] sm:$0xf] }
 0x138   : > { %v12855_v35 = vsub.f32 %v12671_v27, %v754_v0  ;;  %v12868_v27 = vsub.f32 %v12674_v28, %v753_v8  ;;  %v12892_v0 = vor.u32 %v10721_v13, %v9654_v5 }
 0x139   : > { %v12860_v36 = vsub.f32 %v12677_v29, %v752_v34  ;;  %v10717_v34 = vld [vmem:[#allocation11 + $0x80] sm:$0xf0] }
 0x13a   : > { %v818_v25 = vmul.f32 %v12855_v35, %v12855_v35  ;;  %v817_v29 = vmul.f32 %v12868_v27, %v12868_v27  ;;  %1734 = vmatpush.bf16.msra.mxu2 %v12892_v0  ;;  %v9635_v8 = vor.u32 %v10717_v34, %v9634_v26  ;;  %v9598_v26 = vld [vmem:[#allocation11 + $0x30] sm:$0xf]  ;;  %v10708_v34 = vld [vmem:[#allocation11 + $0x38] sm:$0xf0] }
 0x13b   : > { %v816_v41 = vmul.f32 %v12860_v36, %v12860_v36 }
 0x13c   : > { %879 = vadd.xlane.f32.xlu1 %v818_v25  ;;  %v9636_v25 = vld [vmem:[#allocation11 + $0x84] sm:$0xf0] }
 0x13d   : > { %871 = vadd.xlane.f32.xlu0 %v814_v17  ;;  %875 = vadd.xlane.f32.xlu2 %v816_v41  ;;  %v717_v43 = vpop.xlane.xlu1 %716  ;;  %v10716_v17 = vld [vmem:[#allocation11 + $0x7c] sm:$0xf]  ;;  %v9642_v41 = vld [vmem:[#allocation11 + $0x80] sm:$0xf] }
 0x13e   : > { %v715_v16 = vpop.xlane.xlu0 %714  ;;  %v756_v47 = vmul.f32 %v12690_v38, %v717_v43  ;;  %v12896_v43 = vor.u32 %v10716_v17, %v9636_v25  ;;  %v10707_v17 = vld [vmem:[#allocation11 + $0x34] sm:$0xf]  ;;  %v9600_v25 = vld [vmem:[#allocation11 + $0x3c] sm:$0xf0] }
 0x13f   : > { %v755_v7 = vmul.f32 %v12690_v38, %v715_v16  ;;  %v10718_v16 = vld [vmem:[#allocation11 + $0x88] sm:$0xf0] }
 0x140   : > { %v12880_v28 = vsub.f32 %v12683_v30, %v756_v47  ;;  %v9646_v30 = vld [vmem:[#allocation11 + $0x90] sm:$0xf]  ;;  %v10714_v47 = vld [vmem:[#allocation11 + $0x68] sm:$0xf0] }
 0x141   : > { %v12874_v46 = vsub.f32 %v12686_v31, %v755_v7  ;;  %v9660_v31 = vld [vmem:[#allocation11 + $0xb4] sm:$0xf0]  ;;  %v9647_v2 = vor.u32 %v10720_v60, %v9646_v30  ;;  %v12898_v7 = vor.u32 %v10718_v16, %v9642_v41  ;;  %v10710_v30 = vld [vmem:[#allocation11 + $0x4c] sm:$0xf]  ;;  %v9611_v60 = vor.u32 %v10711_v58, %v9610_v10  ;;  %v10709_v16 = vld [vmem:[#allocation11 + $0x40] sm:$0xf0] }
 0x142   : > { %18001 = vst [vmem:[#allocation46_spill] sm:$0xff] %v12880_v28  ;;  %v820_v48 = vmul.f32 %v12880_v28, %v12880_v28  ;;  %v12884_v59 = vor.u32 %v10722_v19, %v9660_v31  ;;  %v10715_v19 = vld [vmem:[#allocation11 + $0x70] sm:$0xf0]  ;;  %v12908_v5 = vor.u32 %v10710_v30, %v9612_v14  ;;  %v9606_v41 = vld [vmem:[#allocation11 + $0x38] sm:$0xf] }
 0x143   : > { %18000 = vst [vmem:[#allocation45_spill] sm:$0xff] %v12874_v46  ;;  %v819_v20 = vmul.f32 %v12874_v46, %v12874_v46  ;;  %1556 = vmatpush.bf16.msra.mxu0 %v9647_v2  ;;  %10958 = vmatpush.bf16.msra.mxu3 %v9647_v2  ;;  %v12904_v31 = vor.u32 %v10715_v19, %v9630_v52  ;;  %v9618_v2 = vld [vmem:[#allocation11 + $0x50] sm:$0xf]  ;;  %v9586_v52 = vld [vmem:[#allocation11 + $0x18] sm:$0xf] }
 0x144   : > { %1644 = vmatpush.bf16.msra.mxu1 %v12884_v59  ;;  %1735 = vmatpush.bf16.msra.mxu2 %v12898_v7  ;;  %v12910_v13 = vor.u32 %v10712_v22, %v9618_v2  ;;  %v10705_v19 = vld [vmem:[#allocation11 + $0x20] sm:$0xf0]  ;;  %v10704_v10 = vld [vmem:[#allocation11 + $0x1c] sm:$0xf]  ;;  %v9588_v30 = vld [vmem:[#allocation11 + $0x24] sm:$0xf0] }
 0x145   : > { %877 = vadd.xlane.f32.xlu0 %v817_v29  ;;  %881 = vadd.xlane.f32.xlu2 %v819_v20  ;;  %v9622_v29 = vld [vmem:[#allocation11 + $0x60] sm:$0xf]  ;;  %v10713_v20 = vld [vmem:[#allocation11 + $0x64] sm:$0xf]  ;;  %v9587_v58 = vor.u32 %v10705_v19, %v9586_v52  ;;  %v12923_v2 = vor.u32 %v10704_v10, %v9588_v30  ;;  %v10706_v22 = vld [vmem:[#allocation11 + $0x28] sm:$0xf0] }
 0x146   : > { %v12902_v56 = vor.u32 %v10713_v20, %v9624_v11  ;;  %v12916_v20 = vor.u32 %v10709_v16, %v9606_v41  ;;  %v9576_v41 = vld [vmem:[#allocation11 + $0xc] sm:$0xf0]  ;;  %v9582_v16 = vld [vmem:[#allocation11 + $0x8] sm:$0xf] }
 0x147   : > { %1557 = vmatpush.bf16.msra.mxu0 %v9635_v8  ;;  %10959 = vmatpush.bf16.msra.mxu3 %v9635_v8  ;;  %v9599_v8 = vor.u32 %v10708_v34, %v9598_v26  ;;  %v9574_v34 = vld [vmem:[#allocation11] sm:$0xf] }
 0x148   : > { %1645 = vmatpush.bf16.msra.mxu1 %v12890_v33  ;;  %1736 = vmatpush.bf16.msra.mxu2 %v12904_v31 }
 0x14c   : > { %1646 = vmatpush.bf16.msra.mxu1 %v12896_v43  ;;  %1737 = vmatpush.bf16.msra.mxu2 %v12910_v13 }
 0x14d   : > { %883 = vadd.xlane.f32.xlu0 %v820_v48  ;;  %v9623_v48 = vor.u32 %v10714_v47, %v9622_v29  ;;  %v12914_v47 = vor.u32 %v10707_v17, %v9600_v25  ;;  %v10702_v17 = vld [vmem:[#allocation11 + $0x8] sm:$0xf0] }
 0x14e   : > { %v9575_v25 = vor.u32 %v10702_v17, %v9574_v34 }
 0x14f   : > { %1558 = vmatpush.bf16.msra.mxu0 %v9623_v48  ;;  %10960 = vmatpush.bf16.msra.mxu3 %v9623_v48 }
 0x150   : > { %1647 = vmatpush.bf16.msra.mxu1 %v12902_v56  ;;  %1738 = vmatpush.bf16.msra.mxu2 %v12916_v20 }
 0x153   : > { %1559 = vmatpush.bf16.msra.mxu0 %v9611_v60  ;;  %10961 = vmatpush.bf16.msra.mxu3 %v9611_v60  ;;  %v9594_v60 = vld [vmem:[#allocation11 + $0x20] sm:$0xf] }
 0x154   : > { %1648 = vmatpush.bf16.msra.mxu1 %v12908_v5  ;;  %v12925_v26 = vor.u32 %v10706_v22, %v9594_v60 }
 0x156   : > { %1739 = vmatpush.bf16.msra.mxu2 %v12925_v26 }
 0x157   : > { %1560 = vmatpush.bf16.msra.mxu0 %v9599_v8  ;;  %10962 = vmatpush.bf16.msra.mxu3 %v9599_v8  ;;  %v10701_v8 = vld [vmem:[#allocation11 + $0x4] sm:$0xf] }
 0x158   : > { %1649 = vmatpush.bf16.msra.mxu1 %v12914_v47  ;;  %v12930_v52 = vor.u32 %v10701_v8, %v9576_v41 }
 0x15b   : > { %1561 = vmatpush.bf16.msra.mxu0 %v9587_v58  ;;  %10963 = vmatpush.bf16.msra.mxu3 %v9587_v58 }
 0x15c   : > { %1650 = vmatpush.bf16.msra.mxu1 %v12923_v2 }
 0x15f   : > { %1562 = vmatpush.bf16.msra.mxu0 %v9575_v25  ;;  %10964 = vmatpush.bf16.msra.mxu3 %v9575_v25 }
 0x160   : > { %1651 = vmatpush.bf16.msra.mxu1 %v12930_v52 }
 0x163   : > { %10965 = vmatpush.bf16.msrb.mxu3 %v12884_v59 }
 0x167   : > { %v826_v29 = vpop.xlane.xlu1 %825  ;;  %10966 = vmatpush.bf16.msrb.mxu3 %v12890_v33 }
 0x168   : > { %v822_v48 = vpop.xlane.xlu2 %821  ;;  %v887_v17 = vmul.f32 %v826_v29, %v12690_v38 }
 0x169   : > { %v885_v11 = vmul.f32 %v822_v48, %v12690_v38  ;;  %v10703_v48 = vld [vmem:[#allocation11 + $0x10] sm:$0xf0] }
 0x16a   : > { %v12932_v19 = vor.u32 %v10703_v48, %v9582_v16  ;;  %v12947_v59 = vadd.f32 1e-12, %v887_v17 }
 0x16b   : > { %v12921_v14 = vadd.f32 1e-12, %v885_v11  ;;  %10967 = vmatpush.bf16.msrb.mxu3 %v12896_v43 }
 0x16c   : > { %18002 = vst [vmem:[#allocation47_spill] sm:$0xff] %v12932_v19  ;;  %1740 = vmatpush.bf16.msra.mxu2 %v12932_v19  ;;  %vm975_vm7 = vweird.f32 %v12947_v59 }
 0x16d   : > { %11193 = vrsqrt.f32 %v12921_v14  ;;  %vm955_vm2 = vweird.f32 %v12921_v14 }
 0x16f   : > { %v832_v11 = vpop.xlane.xlu1 %831  ;;  %10968 = vmatpush.bf16.msrb.mxu3 %v12902_v56 }
 0x170   : > { %v828_v10 = vpop.xlane.xlu2 %827  ;;  %v824_v58 = vpop.xlane.xlu0 %823 }
 0x171   : > { %v886_v30 = vmul.f32 %v824_v58, %v12690_v38  ;;  %v888_v8 = vmul.f32 %v828_v10, %v12690_v38 }
 0x173   : > { %v11194_v60 = vpop.eup %11193  ;;  %v918_v22 = vadd.f32 1e-12, %v886_v30  ;;  %v12949_v58 = vadd.f32 1e-12, %v888_v8  ;;  %10969 = vmatpush.bf16.msrb.mxu3 %v12908_v5 }
 0x174   : > { %v950_v34 = vmul.f32 %v11194_v60, %v12921_v14  ;;  %vm956_vm1 = vweird.f32 %v11194_v60 }
 0x175   : > { %11195 = vrsqrt.f32 %v918_v22  ;;  %vm957_vm4 = vmor %vm955_vm2, %vm956_vm1  ;;  %vm965_vm5 = vweird.f32 %v918_v22  ;;  %vm985_vm9 = vweird.f32 %v12949_v58 }
 0x176   : > { %v951_v48 = vmul.f32 %v11194_v60, %v950_v34  ;;  %11197 = vrsqrt.f32 %v12947_v59 }
 0x177   : > { %v12942_v25 = vpop.xlane.xlu1 %837  ;;  %11199 = vrsqrt.f32 %v12949_v58  ;;  %10970 = vmatpush.bf16.msrb.mxu3 %v12914_v47 }
 0x178   : > { %v12944_v41 = vpop.xlane.xlu2 %833  ;;  %v830_v16 = vpop.xlane.xlu0 %829  ;;  %v952_v49 = vmul.f32 0.5, %v951_v48 }
 0x17a   : > { %v953_v34 = vsub.f32 1.5, %v952_v49  ;;  %v890_v49 = vmul.f32 %v832_v11, %v12690_v38 }
 0x17b   : > { %v11196_v30 = vpop.eup %11195  ;;  %10971 = vmatpush.bf16.msrb.mxu3 %v12923_v2 }
 0x17c   : > { %v960_v33 = vmul.f32 %v11196_v30, %v918_v22  ;;  %v12961_v48 = vpop.eup %11197  ;;  %v954_v56 = vmul.f32 %v11194_v60, %v953_v34  ;;  %vm966_vm3 = vweird.f32 %v11196_v30  ;;  %v12979_v11 = vadd.f32 1e-12, %v890_v49 }
 0x17d   : > { %v12963_v37 = vpop.eup %11199  ;;  %vm967_vm6 = vmor %vm965_vm5, %vm966_vm3  ;;  %vm976_vm8 = vweird.f32 %v12961_v48 }
 0x17e   : > { %v961_v29 = vmul.f32 %v11196_v30, %v960_v33  ;;  %v970_v33 = vmul.f32 %v12961_v48, %v12947_v59  ;;  %v980_v5 = vmul.f32 %v12963_v37, %v12949_v58  ;;  %v958_v47 = vsel %vm957_vm4, %v11194_v60, %v954_v56  ;;  %v12994_v56 = vld [vmem:[#allocation10] ss:$0 sm:$0xff]  ;;  %vm977_vm11 = vmor %vm975_vm7, %vm976_vm8 }
 0x17f   : > { %v12959_v17 = vpop.xlane.xlu1 %843  ;;  %10972 = vmatpush.bf16.msrb.mxu3 %v12930_v52  ;;  %11201 = vrsqrt.f32 %v12979_v11  ;;  %vm986_vm10 = vweird.f32 %v12963_v37  ;;  %vm1005_vm13 = vweird.f32 %v12979_v11 }
 0x180   : > { %v12954_v10 = vpop.xlane.xlu2 %839  ;;  %v12956_v21 = vpop.xlane.xlu0 %835  ;;  %v962_v43 = vmul.f32 0.5, %v961_v29  ;;  %v971_v14 = vmul.f32 %v12961_v48, %v970_v33  ;;  %v981_v39 = vmul.f32 %v12963_v37, %v980_v5  ;;  %vm987_vm12 = vmor %vm985_vm9, %vm986_vm10 }
 0x182   : > { %v963_v8 = vsub.f32 1.5, %v962_v43  ;;  %v889_v43 = vmul.f32 %v830_v16, %v12690_v38  ;;  %v1269_v16 = vmul.f32 %v958_v47, %v12698_v45  ;;  %v972_v60 = vmul.f32 0.5, %v971_v14 }
 0x183   : > { %v982_v22 = vmul.f32 0.5, %v981_v39 }
 0x184   : > { %v964_v29 = vmul.f32 %v11196_v30, %v963_v8  ;;  %v12982_v18 = vadd.f32 1e-12, %v889_v43 }
 0x185   : > { %v983_v52 = vsub.f32 1.5, %v982_v22  ;;  %v13003_v43 = vpop.eup %11201 }
 0x186   : > { %v968_v8 = vsel %vm967_vm6, %v11196_v30, %v964_v29  ;;  %11203 = vrsqrt.f32 %v12982_v18  ;;  %v1304_v30 = vmul.f32 %v12987_v15, %v1269_v16  ;;  %v973_v29 = vsub.f32 1.5, %v972_v60 }
 0x187   : > { %v12984_v1 = vpop.xlane.xlu1 %849  ;;  %v1270_v2 = vmul.f32 %v968_v8, %v12715_v57  ;;  %v1000_v16 = vmul.f32 %v13003_v43, %v12979_v11  ;;  %vm1006_vm14 = vweird.f32 %v13003_v43  ;;  %vm995_vm1 = vweird.f32 %v12982_v18 }
 0x188   : > { %v12973_v50 = vpop.xlane.xlu2 %845  ;;  %v12975_v34 = vpop.xlane.xlu0 %841  ;;  %v1339_v57 = vadd.f32 %v12994_v56, %v1304_v30  ;;  %v974_v8 = vmul.f32 %v12961_v48, %v973_v29  ;;  %vm13064_vm0 = vmor %vm1005_vm13, %vm1006_vm14 }
 0x189   : > { %v1305_v45 = vmul.f32 %v12987_v15, %v1270_v2  ;;  %v984_v2 = vmul.f32 %v12963_v37, %v983_v52  ;;  %v1001_v58 = vmul.f32 %v13003_v43, %v1000_v16 }
 0x18a   : > { %v978_v30 = vsel %vm977_vm11, %v12961_v48, %v974_v8 }
 0x18b   : > { %v1340_v5 = vadd.f32 %v12994_v56, %v1305_v45  ;;  %v891_v45 = vmul.f32 %v12944_v41, %v12690_v38  ;;  %v988_v29 = vsel %vm987_vm12, %v12963_v37, %v984_v2  ;;  %v1002_v48 = vmul.f32 0.5, %v1001_v58 }
 0x18c   : > { %v13005_v39 = vpop.eup %11203  ;;  %v1272_v51 = vmul.f32 %v988_v29, %v12711_v55  ;;  %v893_v2 = vmul.f32 %v12942_v25, %v12690_v38  ;;  %v894_v55 = vmul.f32 %v12954_v10, %v12690_v38 }
 0x18d   : > { %v1371_v47 = vpack.c.bf16 %v1340_v5, %v1339_v57  ;;  %v990_v22 = vmul.f32 %v13005_v39, %v12982_v18  ;;  %v892_v57 = vmul.f32 %v12956_v21, %v12690_v38  ;;  %v1271_v5 = vmul.f32 %v978_v30, %v12695_v44 }
 0x18e   : > { %v1307_v44 = vmul.f32 %v12987_v15, %v1272_v51  ;;  %v1003_v21 = vsub.f32 1.5, %v1002_v48  ;;  %v13055_v25 = vadd.f32 1e-12, %v893_v2  ;;  %vm996_vm15 = vweird.f32 %v13005_v39 }
 0x18f   : > { %v13007_v14 = vpop.xlane.xlu1 %855  ;;  %1563 = vmatmul.bf16.vlgmr.msra.gmra.mxu0 %v1371_v47  ;;  %1652 = vmatmul.bf16.vlgmr.msra.gmra.mxu1 %v1371_v47  ;;  %v991_v52 = vmul.f32 %v13005_v39, %v990_v22  ;;  %v13039_v16 = vadd.f32 1e-12, %v892_v57  ;;  %v1306_v37 = vmul.f32 %v12987_v15, %v1271_v5  ;;  %v13062_v57 = vadd.f32 1e-12, %v894_v55  ;;  %vm997_vm2 = vmor %vm995_vm1, %vm996_vm15 }
 0x190   : > { %v12996_v33 = vpop.xlane.xlu2 %851  ;;  %v12998_v49 = vpop.xlane.xlu0 %847  ;;  %1741 = vmatmul.bf16.vlgmr.msra.gmra.mxu2 %v1371_v47  ;;  %v13032_v47 = vadd.f32 1e-12, %v891_v45  ;;  %v1342_v58 = vadd.f32 %v12994_v56, %v1307_v44  ;;  %v1004_v10 = vmul.f32 %v13003_v43, %v1003_v21  ;;  %vm1035_vm9 = vweird.f32 %v13055_v25 }
 0x191   : > { %v992_v41 = vmul.f32 0.5, %v991_v52  ;;  %v1341_v45 = vadd.f32 %v12994_v56, %v1306_v37  ;;  %vm1025_vm7 = vweird.f32 %v13039_v16  ;;  %vm1045_vm11 = vweird.f32 %v13062_v57 }
 0x192   : > { %11205 = vrsqrt.f32 %v13032_v47  ;;  %v1008_v2 = vsel %vm13064_vm0, %v13003_v43, %v1004_v10  ;;  %vm1015_vm3 = vweird.f32 %v13032_v47 }
 0x193   : > { %v993_v30 = vsub.f32 1.5, %v992_v41  ;;  %11207 = vrsqrt.f32 %v13039_v16  ;;  %v1372_v51 = vpack.c.bf16 %v1342_v58, %v1341_v45 }
 0x194   : > { %11209 = vrsqrt.f32 %v13055_v25 }
 0x195   : > { %v994_v52 = vmul.f32 %v13005_v39, %v993_v30  ;;  %11211 = vrsqrt.f32 %v13062_v57 }
 0x197   : > { %v13035_v8 = vpop.xlane.xlu1 %861  ;;  %v998_v44 = vsel %vm997_vm2, %v13005_v39, %v994_v52  ;;  %v896_v52 = vmul.f32 %v12959_v17, %v12690_v38 }
 0x198   : > { %v13017_v60 = vpop.xlane.xlu2 %857  ;;  %v13021_v59 = vpop.xlane.xlu0 %853  ;;  %18004 = vst [vmem:[#allocation49_spill] sm:$0xff] %v13035_v8  ;;  %v1273_v58 = vmul.f32 %v998_v44, %v12724_v62 }
 0x199   : > { %18003 = vst [vmem:[#allocation48_spill] sm:$0xff] %v13017_v60  ;;  %v13057_v29 = vpop.eup %11205 }
 0x19a   : > { %v13070_v41 = vpop.eup %11207  ;;  %v1010_v37 = vmul.f32 %v13057_v29, %v13032_v47  ;;  %v1308_v62 = vmul.f32 %v12987_v15, %v1273_v58  ;;  %vm1016_vm4 = vweird.f32 %v13057_v29  ;;  %v897_v47 = vmul.f32 %v12973_v50, %v12690_v38 }
 0x19b   : > { %v1020_v55 = vmul.f32 %v13070_v41, %v13039_v16  ;;  %v13091_v43 = vpop.eup %11209  ;;  %vm1026_vm5 = vweird.f32 %v13070_v41  ;;  %vm13141_vm6 = vmor %vm1015_vm3, %vm1016_vm4 }
 0x19c   : > { %v1011_v45 = vmul.f32 %v13057_v29, %v1010_v37  ;;  %v13094_v10 = vpop.eup %11211  ;;  %v1030_v5 = vmul.f32 %v13091_v43, %v13055_v25  ;;  %v1343_v17 = vadd.f32 %v12994_v56, %v1308_v62  ;;  %vm13152_vm8 = vmor %vm1025_vm7, %vm1026_vm5  ;;  %vm1036_vm10 = vweird.f32 %v13091_v43 }
 0x19d   : > { %v1021_v39 = vmul.f32 %v13070_v41, %v1020_v55  ;;  %v1040_v44 = vmul.f32 %v13094_v10, %v13062_v57  ;;  %v895_v55 = vmul.f32 %v12975_v34, %v12690_v38  ;;  %vm1046_vm12 = vweird.f32 %v13094_v10  ;;  %vm13202_vm15 = vmor %vm1035_vm9, %vm1036_vm10 }
 0x19e   : > { %v1031_v58 = vmul.f32 %v13091_v43, %v1030_v5  ;;  %vm13215_vm0 = vmor %vm1045_vm11, %vm1046_vm12 }
 0x19f   : > { %1568 = vmatmul.bf16.gmra.mxu0 %v1372_v51  ;;  %1657 = vmatmul.bf16.gmra.mxu1 %v1372_v51  ;;  %v13068_v11 = vpop.xlane.xlu1 %867  ;;  %v1041_v34 = vmul.f32 %v13094_v10, %v1040_v44 }
 0x1a0   : > { %v13037_v46 = vpop.xlane.xlu2 %863  ;;  %v13048_v22 = vpop.xlane.xlu0 %859  ;;  %1746 = vmatmul.bf16.gmra.mxu2 %v1372_v51  ;;  %18009 = vst [vmem:[#allocation52_spill] sm:$0xff] %v13068_v11  ;;  %v1274_v51 = vmul.f32 %v1008_v2, %v12708_v54  ;;  %v13108_v11 = vadd.f32 1e-12, %v896_v52  ;;  %v13118_v52 = vadd.f32 1e-12, %v895_v55 }
 0x1a1   : > { %18005 = vst [vmem:[#allocation50_spill] sm:$0xff] %v13037_v46  ;;  %v1042_v55 = vmul.f32 0.5, %v1041_v34 }
 0x1a2   : > { %18006 = vst [vmem:[#allocation51_spill] sm:$0xff] %v13048_v22  ;;  %v1309_v54 = vmul.f32 %v12987_v15, %v1274_v51  ;;  %vm1065_vm4 = vweird.f32 %v13108_v11  ;;  %vm1055_vm7 = vweird.f32 %v13118_v52 }
 0x1a3   : > { %v1043_v34 = vsub.f32 1.5, %v1042_v55  ;;  %v13178_v55 = vadd.f32 1e-12, %v897_v47 }
 0x1a7   : > { %v874_v37 = vpop.xlane.xlu1 %873 }
 0x1a8   : > { %v870_v48 = vpop.xlane.xlu2 %869  ;;  %v13084_v30 = vpop.xlane.xlu0 %865 }
 0x1a9   : > { %v909_v21 = vmul.f32 %v870_v48, %v12690_v38  ;;  %18010 = vst [vmem:[#allocation53_spill] sm:$0xff] %v13084_v30  ;;  %v1012_v48 = vmul.f32 0.5, %v1011_v45  ;;  %v911_v30 = vmul.f32 %v874_v37, %v12690_v38  ;;  %v1344_v45 = vadd.f32 %v12994_v56, %v1309_v54 }
 0x1aa   : > { %v1032_v54 = vmul.f32 0.5, %v1031_v58 }
 0x1ab   : > { %v13086_v18 = vadd.f32 1e-12, %v909_v21  ;;  %v1022_v21 = vmul.f32 0.5, %v1021_v39  ;;  %v1013_v8 = vsub.f32 1.5, %v1012_v48  ;;  %v1373_v39 = vpack.c.bf16 %v1344_v45, %v1343_v17 }
 0x1ac   : > { %v13124_v5 = vadd.f32 1e-12, %v911_v30 }
 0x1ad   : > { %11213 = vrsqrt.f32 %v13086_v18  ;;  %v1023_v62 = vsub.f32 1.5, %v1022_v21  ;;  %vm1195_vm13 = vweird.f32 %v13086_v18 }
 0x1ae   : > { %11215 = vrsqrt.f32 %v13108_v11  ;;  %vm1215_vm11 = vweird.f32 %v13124_v5 }
 0x1af   : > { %1573 = vmatmul.bf16.gmra.mxu0 %v1373_v39  ;;  %1662 = vmatmul.bf16.gmra.mxu1 %v1373_v39  ;;  %v1024_v30 = vmul.f32 %v13070_v41, %v1023_v62 }
 0x1b0   : > { %v876_v2 = vpop.xlane.xlu2 %875  ;;  %v872_v46 = vpop.xlane.xlu0 %871  ;;  %1751 = vmatmul.bf16.gmra.mxu2 %v1373_v39 }
 0x1b1   : > { %v912_v51 = vmul.f32 %v876_v2, %v12690_v38  ;;  %v1014_v2 = vmul.f32 %v13057_v29, %v1013_v8  ;;  %v910_v21 = vmul.f32 %v872_v46, %v12690_v38  ;;  %v1033_v46 = vsub.f32 1.5, %v1032_v54 }
 0x1b2   : > { %v1028_v62 = vsel %vm13152_vm8, %v13070_v41, %v1024_v30  ;;  %v1044_v8 = vmul.f32 %v13094_v10, %v1043_v34 }
 0x1b3   : > { %v13114_v3 = vpop.eup %11213  ;;  %v13126_v48 = vadd.f32 1e-12, %v912_v51  ;;  %v13135_v17 = vadd.f32 1e-12, %v910_v21  ;;  %v1018_v45 = vsel %vm13141_vm6, %v13057_v29, %v1014_v2  ;;  %v13170_v50 = vmul.f32 %v13091_v43, %v1033_v46 }
 0x1b4   : > { %v1190_v37 = vmul.f32 %v13114_v3, %v13086_v18  ;;  %v13150_v51 = vpop.eup %11215  ;;  %v1275_v16 = vmul.f32 %v1018_v45, %v12734_v32  ;;  %v1276_v30 = vmul.f32 %v1028_v62, %v12742_v6  ;;  %v898_v46 = vmul.f32 %v12998_v49, %v12690_v38 }
 0x1b5   : > { %11217 = vrsqrt.f32 %v13126_v48  ;;  %v1060_v2 = vmul.f32 %v13150_v51, %v13108_v11  ;;  %vm1196_vm14 = vweird.f32 %v13114_v3  ;;  %v1038_v18 = vsel %vm13202_vm15, %v13091_v43, %v13170_v50 }
 0x1b6   : > { %v1191_v44 = vmul.f32 %v13114_v3, %v1190_v37  ;;  %11219 = vrsqrt.f32 %v13118_v52  ;;  %v1311_v6 = vmul.f32 %v12987_v15, %v1276_v30  ;;  %v13219_v25 = vadd.f32 1e-12, %v898_v46  ;;  %vm13228_vm1 = vmor %vm1195_vm13, %vm1196_vm14 }
 0x1b7   : > { %11221 = vrsqrt.f32 %v13124_v5  ;;  %vm1205_vm3 = vweird.f32 %v13135_v17  ;;  %vm1066_vm5 = vweird.f32 %v13150_v51  ;;  %vm1225_vm8 = vweird.f32 %v13126_v48 }
 0x1b8   : > { %v1192_v58 = vmul.f32 0.5, %v1191_v44  ;;  %11223 = vrsqrt.f32 %v13135_v17  ;;  %v878_v29 = vpop.xlane.xlu0 %877  ;;  %v880_v44 = vpop.xlane.xlu1 %879  ;;  %vm13314_vm15 = vmor %vm1065_vm4, %vm1066_vm5 }
 0x1b9   : > { %v913_v32 = vmul.f32 %v878_v29, %v12690_v38  ;;  %v914_v47 = vmul.f32 %v880_v44, %v12690_v38  ;;  %11225 = vrsqrt.f32 %v13178_v55 }
 0x1ba   : > { %v1193_v41 = vsub.f32 1.5, %v1192_v58  ;;  %v1310_v58 = vmul.f32 %v12987_v15, %v1275_v16  ;;  %v1061_v16 = vmul.f32 %v13150_v51, %v1060_v2  ;;  %v1048_v2 = vsel %vm13215_vm0, %v13094_v10, %v1044_v8 }
 0x1bb   : > { %v13162_v37 = vpop.eup %11217  ;;  %v13207_v44 = vadd.f32 1e-12, %v913_v32  ;;  %v13232_v57 = vadd.f32 1e-12, %v914_v47  ;;  %v899_v47 = vmul.f32 %v12984_v1, %v12690_v38 }
 0x1bc   : > { %v13167_v54 = vpop.eup %11219  ;;  %v1220_v45 = vmul.f32 %v13162_v37, %v13126_v48  ;;  %v1194_v49 = vmul.f32 %v13114_v3, %v1193_v41  ;;  %v1345_v30 = vadd.f32 %v12994_v56, %v1310_v58  ;;  %v1346_v41 = vadd.f32 %v12994_v56, %v1311_v6 }
 0x1bd   : > { %v13175_v21 = vpop.eup %11221  ;;  %v1050_v28 = vmul.f32 %v13167_v54, %v13118_v52  ;;  %v13243_v8 = vmul.f32 0.5, %v1061_v16  ;;  %11227 = vrsqrt.f32 %v13207_v44  ;;  %vm1226_vm9 = vweird.f32 %v13162_v37 }
 0x1be   : > { %v11224_v39 = vpop.eup %11223  ;;  %v1210_v34 = vmul.f32 %v13175_v21, %v13124_v5  ;;  %v1221_v19 = vmul.f32 %v13162_v37, %v1220_v45  ;;  %v1374_v58 = vpack.c.bf16 %v1346_v41, %v1345_v30  ;;  %v1198_v60 = vsel %vm13228_vm1, %v13114_v3, %v1194_v49  ;;  %vm13284_vm13 = vmor %vm1225_vm8, %vm1226_vm9 }
 0x1bf   : > { %v1200_v62 = vmul.f32 %v11224_v39, %v13135_v17  ;;  %v1051_v46 = vmul.f32 %v13167_v54, %v1050_v28  ;;  %11229 = vrsqrt.f32 %v13219_v25  ;;  %vm1206_vm2 = vweird.f32 %v11224_v39  ;;  %v13253_v1 = vpop.eup %11225 }
 0x1c0   : > { %v1211_v45 = vmul.f32 %v13175_v21, %v1210_v34  ;;  %1578 = vmatmul.bf16.gmra.mxu0 %v1374_v58  ;;  %1667 = vmatmul.bf16.gmra.mxu1 %v1374_v58  ;;  %v1222_v28 = vmul.f32 0.5, %v1221_v19  ;;  %11231 = vrsqrt.f32 %v13232_v57  ;;  %v1278_v3 = vmul.f32 %v1048_v2, %v12752_v42  ;;  %vm1207_vm6 = vmor %vm1205_vm3, %vm1206_vm2  ;;  %v884_v29 = vpop.xlane.xlu0 %883 }
 0x1c1   : > { %v1201_v22 = vmul.f32 %v11224_v39, %v1200_v62  ;;  %1756 = vmatmul.bf16.gmra.mxu2 %v1374_v58  ;;  %v1052_v43 = vmul.f32 0.5, %v1051_v46  ;;  %v13257_v19 = vadd.f32 1e-12, %v899_v47  ;;  %v1277_v49 = vmul.f32 %v1038_v18, %v12729_v4 }
 0x1c2   : > { %v1212_v50 = vmul.f32 0.5, %v1211_v45  ;;  %v1063_v42 = vsub.f32 1.5, %v13243_v8  ;;  %v900_v17 = vmul.f32 %v12996_v33, %v12690_v38  ;;  %v1313_v30 = vmul.f32 %v12987_v15, %v1278_v3 }
 0x1c3   : > { %v1202_v10 = vmul.f32 0.5, %v1201_v22  ;;  %v1293_v22 = vmul.f32 %v1198_v60, %v12842_v63  ;;  %v1223_v63 = vsub.f32 1.5, %v1222_v28  ;;  %v13262_v16 = vpop.eup %11227  ;;  %v1053_v4 = vsub.f32 1.5, %v1052_v43 }
 0x1c4   : > { %v1213_v58 = vsub.f32 1.5, %v1212_v50  ;;  %vm1056_vm10 = vweird.f32 %v13167_v54  ;;  %v916_v33 = vmul.f32 %v884_v29, %v12690_v38  ;;  %v1312_v45 = vmul.f32 %v12987_v15, %v1277_v49 }
 0x1c5   : > { %v1203_v6 = vsub.f32 1.5, %v1202_v10  ;;  %v1328_v2 = vmul.f32 %v12987_v15, %v1293_v22  ;;  %v13269_v32 = vpop.eup %11229  ;;  %vm1216_vm12 = vweird.f32 %v13175_v21  ;;  %v1224_v60 = vmul.f32 %v13162_v37, %v1223_v63  ;;  %vm13329_vm0 = vmor %vm1055_vm7, %vm1056_vm10 }
 0x1c6   : > { %v13273_v46 = vpop.eup %11231  ;;  %v1230_v48 = vmul.f32 %v13262_v16, %v13207_v44  ;;  %v1348_v8 = vadd.f32 %v12994_v56, %v1313_v30  ;;  %v1054_v5 = vmul.f32 %v13167_v54, %v1053_v4  ;;  %v1214_v3 = vmul.f32 %v13175_v21, %v1213_v58  ;;  %vm13300_vm14 = vmor %vm1215_vm11, %vm1216_vm12 }
 0x1c7   : > { %v1204_v34 = vmul.f32 %v11224_v39, %v1203_v6  ;;  %v1363_v47 = vadd.f32 %v12994_v56, %v1328_v2  ;;  %v1080_v6 = vmul.f32 %v13269_v32, %v13219_v25  ;;  %v1240_v22 = vmul.f32 %v13273_v46, %v13232_v57 }
 0x1c8   : > { %v1070_v43 = vmul.f32 %v13253_v1, %v13178_v55  ;;  %v1347_v49 = vadd.f32 %v12994_v56, %v1312_v45  ;;  %v13318_v30 = vadd.f32 1e-12, %v900_v17  ;;  %v1231_v2 = vmul.f32 %v13262_v16, %v1230_v48 }
 0x1c9   : > { %v1208_v62 = vsel %vm1207_vm6, %v11224_v39, %v1204_v34  ;;  %v882_v39 = vpop.xlane.xlu2 %881  ;;  %v13304_v34 = vadd.f32 1e-12, %v916_v33  ;;  %11233 = vrsqrt.f32 %v13257_v19  ;;  %v1081_v4 = vmul.f32 %v13269_v32, %v1080_v6 }
 0x1ca   : > { %v1294_v41 = vmul.f32 %v1208_v62, %v12850_v24  ;;  %v915_v18 = vmul.f32 %v882_v39, %v12690_v38  ;;  %v1064_v62 = vmul.f32 %v13150_v51, %v1063_v42  ;;  %v1375_v17 = vpack.c.bf16 %v1348_v8, %v1347_v49  ;;  %v18040_v49 = vld [vmem:[#allocation47_spill] sm:$0xff] }
 0x1cb   : > { %v1218_v58 = vsel %vm13300_vm14, %v13175_v21, %v1214_v3  ;;  %v1241_v52 = vmul.f32 %v13273_v46, %v1240_v22  ;;  %v1071_v39 = vmul.f32 %v13253_v1, %v1070_v43  ;;  %11235 = vrsqrt.f32 %v13304_v34 }
 0x1cc   : > { %v1329_v24 = vmul.f32 %v12987_v15, %v1294_v41  ;;  %v1228_v41 = vsel %vm13284_vm13, %v13162_v37, %v1224_v60  ;;  %v13333_v42 = vadd.f32 1e-12, %v915_v18  ;;  %v1058_v37 = vsel %vm13329_vm0, %v13167_v54, %v1054_v5 }
 0x1cd   : > { %v1296_v33 = vmul.f32 %v1228_v41, %v12860_v36  ;;  %v1068_v54 = vsel %vm13314_vm15, %v13150_v51, %v1064_v62  ;;  %11237 = vrsqrt.f32 %v13318_v30  ;;  %v1232_v45 = vmul.f32 0.5, %v1231_v2 }
 0x1ce   : > { %v1364_v28 = vadd.f32 %v12994_v56, %v1329_v24  ;;  %11239 = vrsqrt.f32 %v13333_v42  ;;  %v1295_v21 = vmul.f32 %v1218_v58, %v12837_v61  ;;  %v1082_v24 = vmul.f32 0.5, %v1081_v4 }
 0x1cf   : > { %v1242_v60 = vmul.f32 0.5, %v1241_v52  ;;  %v13356_v48 = vpop.eup %11233  ;;  %v1072_v36 = vmul.f32 0.5, %v1071_v39  ;;  %v1280_v10 = vmul.f32 %v1068_v54, %v12747_v40  ;;  %v1331_v51 = vmul.f32 %v12987_v15, %v1296_v33 }
 0x1d0   : > { %v13307_v63 = vpack.c.bf16 %v1364_v28, %v1363_v47  ;;  %1583 = vmatmul.bf16.gmra.mxu0 %v1375_v17  ;;  %1672 = vmatmul.bf16.gmra.mxu1 %v1375_v17  ;;  %v1233_v18 = vsub.f32 1.5, %v1232_v45  ;;  %vm1075_vm1 = vweird.f32 %v13178_v55  ;;  %v1330_v61 = vmul.f32 %v12987_v15, %v1295_v21  ;;  %v18049_v45 = vld [vmem:[#allocation35_spill] sm:$0xff] }
 0x1d1   : > { %1761 = vmatmul.bf16.gmra.mxu2 %v1375_v17  ;;  %v13360_v8 = vpop.eup %11235  ;;  %v1083_v28 = vsub.f32 1.5, %v1082_v24  ;;  %vm1235_vm2 = vweird.f32 %v13207_v44  ;;  %vm1236_vm3 = vweird.f32 %v13262_v16  ;;  %v1090_v5 = vmul.f32 %v13356_v48, %v13257_v19 }
 0x1d2   : > { %1623 = vmatmul.bf16.vlgmr.msra.gmra.mxu3 %v13307_v63  ;;  %v1073_v6 = vsub.f32 1.5, %v1072_v36  ;;  %v1315_v3 = vmul.f32 %v12987_v15, %v1280_v10  ;;  %v1366_v22 = vadd.f32 %v12994_v56, %v1331_v51  ;;  %vm1245_vm4 = vweird.f32 %v13232_v57  ;;  %vm13385_vm6 = vmor %vm1235_vm2, %vm1236_vm3 }
 0x1d3   : > { %10973 = vmatpush.bf16.msra.mxu3 %v12886_v23  ;;  %v1279_v23 = vmul.f32 %v1058_v37, %v12760_v9  ;;  %v13365_v47 = vpop.eup %11237  ;;  %vm1246_vm5 = vweird.f32 %v13273_v46  ;;  %v1234_v44 = vmul.f32 %v13262_v16, %v1233_v18  ;;  %v1260_v43 = vmul.f32 %v13360_v8, %v13304_v34 }
 0x1d4   : > { %v13370_v40 = vpop.eup %11239  ;;  %v901_v50 = vmul.f32 %v13021_v59, %v12690_v38  ;;  %v1365_v29 = vadd.f32 %v12994_v56, %v1330_v61  ;;  %v1084_v41 = vmul.f32 %v13269_v32, %v1083_v28  ;;  %vm1086_vm7 = vweird.f32 %v13269_v32  ;;  %vm13404_vm9 = vmor %vm1245_vm4, %vm1246_vm5 }
 0x1d5   : > { %v1314_v9 = vmul.f32 %v12987_v15, %v1279_v23  ;;  %v1250_v11 = vmul.f32 %v13370_v40, %v13333_v42  ;;  %vm1076_vm8 = vweird.f32 %v13253_v1  ;;  %v902_v59 = vmul.f32 %v13007_v14, %v12690_v38 }
 0x1d6   : > { %v1350_v37 = vadd.f32 %v12994_v56, %v1315_v3  ;;  %v13409_v4 = vpack.c.bf16 %v1366_v22, %v1365_v29  ;;  %v1074_v58 = vmul.f32 %v13253_v1, %v1073_v6  ;;  %vm1085_vm10 = vweird.f32 %v13219_v25  ;;  %vm13437_vm12 = vmor %vm1075_vm1, %vm1076_vm8  ;;  %v18056_v29 = vld [vmem:[#allocation36_spill] sm:$0xff] }
 0x1d7   : > { %10974 = vmatpush.bf16.msra.mxu3 %v12892_v0  ;;  %v1243_v0 = vsub.f32 1.5, %v1242_v60  ;;  %v1349_v62 = vadd.f32 %v12994_v56, %v1314_v9  ;;  %v1261_v14 = vmul.f32 %v13360_v8, %v1260_v43  ;;  %vm13417_vm11 = vmor %vm1085_vm10, %vm1086_vm7  ;;  %v13421_v52 = vadd.f32 1e-12, %v901_v50 }
 0x1d8   : > { %v1088_v25 = vsel %vm13417_vm11, %v13269_v32, %v1084_v41  ;;  %v1251_v54 = vmul.f32 %v13370_v40, %v1250_v11  ;;  %v13441_v23 = vadd.f32 1e-12, %v902_v59  ;;  %vm1265_vm13 = vweird.f32 %v13304_v34  ;;  %v18041_v34 = vld [vmem:[#allocation48_spill] sm:$0xff] }
 0x1d9   : > { %v1244_v2 = vmul.f32 %v13273_v46, %v1243_v0  ;;  %v1376_v39 = vpack.c.bf16 %v1350_v37, %v1349_v62  ;;  %v1262_v21 = vmul.f32 0.5, %v1261_v14  ;;  %11241 = vrsqrt.f32 %v13421_v52 }
 0x1da   : > { %v1282_v55 = vmul.f32 %v1088_v25, %v12778_v12  ;;  %v1252_v36 = vmul.f32 0.5, %v1251_v54  ;;  %11243 = vrsqrt.f32 %v13441_v23  ;;  %vm1266_vm14 = vweird.f32 %v13360_v8 }
 0x1db   : > { %10975 = vmatpush.bf16.msra.mxu3 %v12898_v7  ;;  %v1100_v7 = vmul.f32 %v13365_v47, %v13318_v30  ;;  %vm1095_vm15 = vweird.f32 %v13257_v19  ;;  %vm1096_vm0 = vweird.f32 %v13356_v48  ;;  %vm1255_vm1 = vweird.f32 %v13333_v42  ;;  %vm13476_vm4 = vmor %vm1265_vm13, %vm1266_vm14 }
 0x1dc   : > { %v1317_v18 = vmul.f32 %v12987_v15, %v1282_v55  ;;  %v1253_v12 = vsub.f32 1.5, %v1252_v36  ;;  %vm1256_vm2 = vweird.f32 %v13370_v40  ;;  %vm1105_vm3 = vweird.f32 %v13318_v30  ;;  %vm13504_vm7 = vmor %vm1095_vm15, %vm1096_vm0 }
 0x1dd   : > { %v1101_v33 = vmul.f32 %v13365_v47, %v1100_v7  ;;  %vm1106_vm5 = vweird.f32 %v13365_v47  ;;  %v903_v62 = vmul.f32 %v18041_v34, %v12690_v38  ;;  %vm1115_vm13 = vweird.f32 %v13421_v52 }
 0x1de   : > { %v1352_v22 = vadd.f32 %v12994_v56, %v1317_v18  ;;  %v1254_v50 = vmul.f32 %v13370_v40, %v1253_v12  ;;  %vm1107_vm8 = vmor %vm1105_vm3, %vm1106_vm5  ;;  %vm1854_vm15 = vcmask 257024  }
 0x1df   : > { %10976 = vmatpush.bf16.msra.mxu3 %v12904_v31  ;;  %v1238_v31 = vsel %vm13385_vm6, %v13262_v16, %v1234_v44  ;;  %v1248_v16 = vsel %vm13404_vm9, %v13273_v46, %v1244_v2  ;;  %v1091_v46 = vmul.f32 %v13356_v48, %v1090_v5  ;;  %v1102_v60 = vmul.f32 0.5, %v1101_v33  ;;  %vm13492_vm6 = vmor %vm1255_vm1, %vm1256_vm2 }
 0x1e0   : > { %1588 = vmatmul.bf16.gmra.mxu0 %v1376_v39  ;;  %1677 = vmatmul.bf16.gmra.mxu1 %v1376_v39  ;;  %v1297_v32 = vmul.f32 %v1238_v31, %v12868_v27  ;;  %v1298_v24 = vmul.f32 %v1248_v16, %v12855_v35  ;;  %v13460_v35 = vpop.eup %11241  ;;  %v1258_v14 = vsel %vm13492_vm6, %v13370_v40, %v1254_v50  ;;  %v13523_v57 = vadd.f32 1e-12, %v903_v62  ;;  %v18048_v16 = vld [vmem:[#allocation45_spill] sm:$0xff] }
 0x1e1   : > { %1766 = vmatmul.bf16.gmra.mxu2 %v1376_v39  ;;  %v1092_v51 = vmul.f32 0.5, %v1091_v46  ;;  %v1103_v61 = vsub.f32 1.5, %v1102_v60  ;;  %v13469_v5 = vpop.eup %11243  ;;  %v1110_v7 = vmul.f32 %v13460_v35, %v13421_v52  ;;  %v1299_v54 = vmul.f32 %v1258_v14, %v18048_v16 }
 0x1e2   : > { %1628 = vmatmul.bf16.gmra.mxu3 %v13409_v4  ;;  %v1332_v10 = vmul.f32 %v12987_v15, %v1297_v32  ;;  %v1333_v9 = vmul.f32 %v12987_v15, %v1298_v24  ;;  %v1120_v42 = vmul.f32 %v13469_v5, %v13441_v23  ;;  %vm1125_vm9 = vweird.f32 %v13441_v23 }
 0x1e3   : > { %10977 = vmatpush.bf16.msra.mxu3 %v12910_v13  ;;  %v1078_v13 = vsel %vm13437_vm12, %v13253_v1, %v1074_v58  ;;  %v1263_v1 = vsub.f32 1.5, %v1262_v21  ;;  %v1093_v28 = vsub.f32 1.5, %v1092_v51  ;;  %v1104_v43 = vmul.f32 %v13365_v47, %v1103_v61 }
 0x1e4   : > { %v1281_v27 = vmul.f32 %v1078_v13, %v12770_v53  ;;  %v1368_v44 = vadd.f32 %v12994_v56, %v1333_v9  ;;  %v1111_v31 = vmul.f32 %v13460_v35, %v1110_v7  ;;  %v1121_v33 = vmul.f32 %v13469_v5, %v1120_v42 }
 0x1e5   : > { %v1264_v0 = vmul.f32 %v13360_v8, %v1263_v1  ;;  %v1094_v11 = vmul.f32 %v13356_v48, %v1093_v28  ;;  %v1108_v19 = vsel %vm1107_vm8, %v13365_v47, %v1104_v43  ;;  %v18047_v47 = vld [vmem:[#allocation37_spill] sm:$0xff]  ;;  %vm1126_vm10 = vweird.f32 %v13469_v5 }
 0x1e6   : > { %v1316_v53 = vmul.f32 %v12987_v15, %v1281_v27  ;;  %v1284_v25 = vmul.f32 %v1108_v19, %v18047_v47  ;;  %v1112_v40 = vmul.f32 0.5, %v1111_v31  ;;  %v1122_v13 = vmul.f32 0.5, %v1121_v33  ;;  %vm13560_vm12 = vmor %vm1125_vm9, %vm1126_vm10 }
 0x1e7   : > { %10978 = vmatpush.bf16.msra.mxu3 %v12916_v20  ;;  %v1367_v20 = vadd.f32 %v12994_v56, %v1332_v10  ;;  %v1268_v17 = vsel %vm13476_vm4, %v13360_v8, %v1264_v0  ;;  %v18046_v8 = vld [vmem:[#allocation46_spill] sm:$0xff]  ;;  %v1098_v39 = vsel %vm13504_vm7, %v13356_v48, %v1094_v11  ;;  %v1334_v48 = vmul.f32 %v12987_v15, %v1299_v54 }
 0x1e8   : > { %v1351_v41 = vadd.f32 %v12994_v56, %v1316_v53  ;;  %v1300_v30 = vmul.f32 %v1268_v17, %v18046_v8  ;;  %v1283_v32 = vmul.f32 %v1098_v39, %v18049_v45  ;;  %v1319_v21 = vmul.f32 %v12987_v15, %v1284_v25  ;;  %v18050_v10 = vld [vmem:[#allocation50_spill] sm:$0xff]  ;;  %v18051_v53 = vld [vmem:[#allocation49_spill] sm:$0xff] }
 0x1e9   : > { %v13497_v2 = vpack.c.bf16 %v1368_v44, %v1367_v20  ;;  %v1113_v55 = vsub.f32 1.5, %v1112_v40  ;;  %v1123_v27 = vsub.f32 1.5, %v1122_v13  ;;  %v906_v51 = vmul.f32 %v18050_v10, %v12690_v38  ;;  %v18057_v25 = vld [vmem:[#allocation53_spill] sm:$0xff] }
 0x1ea   : > { %v1377_v58 = vpack.c.bf16 %v1352_v22, %v1351_v41  ;;  %v1335_v46 = vmul.f32 %v12987_v15, %v1300_v30  ;;  %v1318_v60 = vmul.f32 %v12987_v15, %v1283_v32  ;;  %v1354_v18 = vadd.f32 %v12994_v56, %v1319_v21  ;;  %v18060_v32 = vld [vmem:[#allocation52_spill] sm:$0xff] }
 0x1eb   : > { %10979 = vmatpush.bf16.msra.mxu3 %v12925_v26  ;;  %v18037_v26 = vld [vmem:[#allocation51_spill] sm:$0xff]  ;;  %v1369_v9 = vadd.f32 %v12994_v56, %v1334_v48  ;;  %v1114_v61 = vmul.f32 %v13460_v35, %v1113_v55  ;;  %vm1116_vm11 = vweird.f32 %v13460_v35  ;;  %v905_v20 = vmul.f32 %v18051_v53, %v12690_v38 }
 0x1ec   : > { %v904_v6 = vmul.f32 %v18037_v26, %v12690_v38  ;;  %v1370_v36 = vadd.f32 %v12994_v56, %v1335_v46  ;;  %v1353_v28 = vadd.f32 %v12994_v56, %v1318_v60  ;;  %v1124_v23 = vmul.f32 %v13469_v5, %v1123_v27  ;;  %vm1117_vm14 = vmor %vm1115_vm13, %vm1116_vm11 }
 0x1ed   : > { %v13567_v3 = vadd.f32 1e-12, %v906_v51  ;;  %v1118_v44 = vsel %vm1117_vm14, %v13460_v35, %v1114_v61  ;;  %v13572_v7 = vadd.f32 1e-12, %v905_v20  ;;  %v18055_v35 = vld [vmem:[#allocation38_spill] sm:$0xff]  ;;  %v907_v16 = vmul.f32 %v18057_v25, %v12690_v38 }
 0x1ee   : > { %v13515_v37 = vadd.f32 1e-12, %v904_v6  ;;  %v13557_v0 = vpack.c.bf16 %v1370_v36, %v1369_v9  ;;  %v1378_v22 = vpack.c.bf16 %v1354_v18, %v1353_v28  ;;  %v1128_v50 = vsel %vm13560_vm12, %v13469_v5, %v1124_v23  ;;  %v18066_v28 = vld [vmem:[#allocation41_spill] sm:$0xff] }
 0x1ef   : > { %10980 = vmatpush.bf16.msra.mxu3 %v18040_v49  ;;  %v1419_v49 = vld [vmem:[%s18054_s4] sm:$0x7]  ;;  %v1285_v34 = vmul.f32 %v1118_v44, %v18055_v35  ;;  %v1286_v41 = vmul.f32 %v1128_v50, %v18056_v29  ;;  %vm1135_vm1 = vweird.f32 %v13523_v57  ;;  %v908_v46 = vmul.f32 %v18060_v32, %v12690_v38 }
 0x1f0   : > { %1593 = vmatmul.bf16.gmra.mxu0 %v1377_v58  ;;  %1682 = vmatmul.bf16.gmra.mxu1 %v1377_v58  ;;  %11245 = vrsqrt.f32 %v13515_v37  ;;  %v13585_v59 = vperm.slane %v1419_v49, 0  ;;  %v13587_v5 = vperm.slane %v1419_v49, 1  ;;  %v13612_v21 = vperm.slane %v1419_v49, 2  ;;  %v13679_v50 = vld [vmem:[#allocation8] ss:$0 sm:$0xff] }
 0x1f1   : > { %1771 = vmatmul.bf16.gmra.mxu2 %v1377_v58  ;;  %11247 = vrsqrt.f32 %v13523_v57  ;;  %v1320_v42 = vmul.f32 %v12987_v15, %v1285_v34  ;;  %v1321_v14 = vmul.f32 %v12987_v15, %v1286_v41  ;;  %vm1145_vm3 = vweird.f32 %v13515_v37 }
 0x1f2   : > { %1633 = vmatmul.bf16.gmra.mxu3 %v13497_v2  ;;  %11249 = vrsqrt.f32 %v13567_v3  ;;  %v13650_v51 = vadd.f32 1e-12, %v908_v46  ;;  %vm1155_vm6 = vweird.f32 %v13572_v7  ;;  %vm1165_vm8 = vweird.f32 %v13567_v3 }
 0x1f3   : > { %11251 = vrsqrt.f32 %v13572_v7  ;;  %v1355_v54 = vadd.f32 %v12994_v56, %v1320_v42  ;;  %v1356_v13 = vadd.f32 %v12994_v56, %v1321_v14  ;;  %v13631_v56 = vadd.f32 1e-12, %v907_v16 }
 0x1f4   : > { %vm1185_vm12 = vweird.f32 %v13650_v51 }
 0x1f5   : > { %11253 = vrsqrt.f32 %v13631_v56 }
 0x1f6   : > { %v13538_v24 = vpop.eup %11245  ;;  %11255 = vrsqrt.f32 %v13650_v51 }
 0x1f7   : > { %v13544_v1 = vpop.eup %11247  ;;  %v1140_v12 = vmul.f32 %v13538_v24, %v13515_v37  ;;  %vm1146_vm0 = vweird.f32 %v13538_v24  ;;  %v1379_v37 = vpack.c.bf16 %v1356_v13, %v1355_v54 }
 0x1f8   : > { %v1130_v6 = vmul.f32 %v13544_v1, %v13523_v57  ;;  %v13590_v17 = vpop.eup %11249  ;;  %vm1136_vm2 = vweird.f32 %v13544_v1  ;;  %vm13627_vm4 = vmor %vm1145_vm3, %vm1146_vm0 }
 0x1f9   : > { %v1141_v43 = vmul.f32 %v13538_v24, %v1140_v12  ;;  %v13595_v33 = vpop.eup %11251  ;;  %v1160_v47 = vmul.f32 %v13590_v17, %v13567_v3  ;;  %vm13646_vm5 = vmor %vm1135_vm1, %vm1136_vm2  ;;  %vm1166_vm9 = vweird.f32 %v13590_v17  ;;  %vm1175_vm1 = vweird.f32 %v13631_v56  ;;  %v18087_v3 = vld [vmem:[#allocation44_spill] sm:$0xff] }
 0x1fa   : > { %v1131_v52 = vmul.f32 %v13544_v1, %v1130_v6  ;;  %v1150_v48 = vmul.f32 %v13595_v33, %v13572_v7  ;;  %vm1156_vm7 = vweird.f32 %v13595_v33  ;;  %vm13722_vm11 = vmor %vm1165_vm8, %vm1166_vm9 }
 0x1fb   : > { %v1142_v62 = vmul.f32 0.5, %v1141_v43  ;;  %v1161_v60 = vmul.f32 %v13590_v17, %v1160_v47  ;;  %v13682_v34 = vpop.eup %11253  ;;  %vm13714_vm10 = vmor %vm1155_vm6, %vm1156_vm7 }
 0x1fc   : > { %v1132_v11 = vmul.f32 0.5, %v1131_v52  ;;  %v1151_v12 = vmul.f32 %v13595_v33, %v1150_v48  ;;  %v1170_v47 = vmul.f32 %v13682_v34, %v13631_v56  ;;  %vm1176_vm14 = vweird.f32 %v13682_v34 }
 0x1fd   : > { %v1143_v58 = vsub.f32 1.5, %v1142_v62  ;;  %v1162_v26 = vmul.f32 0.5, %v1161_v60  ;;  %vm1177_vm2 = vmor %vm1175_vm1, %vm1176_vm14 }
 0x1fe   : > { %v1133_v8 = vsub.f32 1.5, %v1132_v11  ;;  %v1152_v43 = vmul.f32 0.5, %v1151_v12  ;;  %v1171_v48 = vmul.f32 %v13682_v34, %v1170_v47 }
 0x1ff   : > { %v1144_v40 = vmul.f32 %v13538_v24, %v1143_v58  ;;  %v1163_v49 = vsub.f32 1.5, %v1162_v26  ;;  %v13688_v58 = vpop.eup %11255 }
 0x200   : > { %1598 = vmatmul.bf16.gmra.mxu0 %v1378_v22  ;;  %1687 = vmatmul.bf16.gmra.mxu1 %v1378_v22  ;;  %v1134_v55 = vmul.f32 %v13544_v1, %v1133_v8  ;;  %v1153_v41 = vsub.f32 1.5, %v1152_v43  ;;  %v13694_v8 = vld [vmem:[#allocation10] ss:$0 sm:$0xff]  ;;  %v1180_v32 = vmul.f32 %v13688_v58, %v13650_v51  ;;  %vm1186_vm13 = vweird.f32 %v13688_v58 }
 0x201   : > { %1776 = vmatmul.bf16.gmra.mxu2 %v1378_v22  ;;  %v1148_v36 = vsel %vm13627_vm4, %v13538_v24, %v1144_v40  ;;  %vm13774_vm0 = vmor %vm1185_vm12, %vm1186_vm13 }
 0x202   : > { %1638 = vmatmul.bf16.gmra.mxu3 %v13557_v0  ;;  %v1138_v24 = vsel %vm13646_vm5, %v13544_v1, %v1134_v55  ;;  %v1288_v23 = vmul.f32 %v1148_v36, %v18066_v28  ;;  %v18069_v1 = vld [vmem:[#allocation40_spill] sm:$0xff]  ;;  %v1154_v40 = vmul.f32 %v13595_v33, %v1153_v41 }
 0x203   : > { %v1287_v44 = vmul.f32 %v1138_v24, %v18069_v1 }
 0x204   : > { %v1323_v52 = vmul.f32 %v13679_v50, %v1288_v23  ;;  %v1158_v38 = vsel %vm13714_vm10, %v13595_v33, %v1154_v40  ;;  %v18081_v33 = vld [vmem:[#allocation39_spill] sm:$0xff] }
 0x205   : > { %v1322_v29 = vmul.f32 %v13679_v50, %v1287_v44 }
 0x207   : > { %v1357_v54 = vadd.f32 %v13694_v8, %v1322_v29 }
 0x20c   : > { %v1564_v19 = vpop.f32.mrf.mxu0  ;;  %v1653_v31 = vpop.f32.mrf.mxu1 }
 0x20d   : > { %v1565_v30 = vadd.f32 %v1564_v19, %v13585_v59  ;;  %v1654_v39 = vadd.f32 %v1653_v31, %v13587_v5 }
 0x20f   : > { %v13604_v15 = vpack.c.bf16 %v1565_v30, %v1565_v30  ;;  %v13606_v45 = vpack.c.bf16 %v1654_v39, %v1654_v39  ;;  %v1358_v30 = vadd.f32 %v13694_v8, %v1323_v52  ;;  %v1164_v39 = vmul.f32 %v13590_v17, %v1163_v49 }
 0x210   : > { %1603 = vmatmul.bf16.gmra.mxu0 %v1379_v37  ;;  %1692 = vmatmul.bf16.gmra.mxu1 %v1379_v37 }
 0x211   : > { %18058 = vst [vmem:[#allocation51_spill] sm:$0xff] %v13604_v15  ;;  %2208 = vrot.lane.b32.xlu0 %v13606_v45, %s12273_s12  ;;  %2498 = vrot.lane.b32.xlu2 %v13604_v15, %s12274_s23  ;;  %v1380_v13 = vpack.c.bf16 %v1358_v30, %v1357_v54  ;;  %v1168_v7 = vsel %vm13722_vm11, %v13590_v17, %v1164_v39 }
 0x212   : > { %18059 = vst [vmem:[#allocation47_spill] sm:$0xff] %v13606_v45  ;;  %1712 = vmatmul.bf16.vlgmr.msrb.gmra.mxu3 %v13307_v63  ;;  %2047 = vrot.lane.b32.xlu1 %v13604_v15, %s12273_s12 }
 0x213   : > { %1855 = vst.msk [vmem:[#allocation2] sm:$0xf] %vm1854_vm15, %v13604_v15  ;;  %v1742_v27 = vpop.f32.mrf.mxu2  ;;  %1781 = vmatmul.bf16.gmra.mxu2 %v1379_v37  ;;  %v1181_v37 = vmul.f32 %v13688_v58, %v1180_v32 }
 0x214   : > { %1919 = vst.msk [vmem:[#allocation3] sm:$0xf] %vm1854_vm15, %v13606_v45  ;;  %v1743_v18 = vadd.f32 %v1742_v27, %v13612_v21  ;;  %v1566_v9 = vpop.f32.mrf.mxu0  ;;  %v1655_v61 = vpop.f32.mrf.mxu1 }
 0x215   : > { %v1567_v57 = vadd.f32 %v1566_v9, %v13585_v59  ;;  %v1656_v53 = vadd.f32 %v1655_v61, %v13587_v5  ;;  %v1172_v61 = vmul.f32 0.5, %v1171_v48  ;;  %v1182_v28 = vmul.f32 0.5, %v1181_v37 }
 0x216   : > { %v13660_v20 = vpack.c.bf16 %v1743_v18, %v1743_v18  ;;  %v18077_v18 = vld [vmem:[#allocation43_spill] sm:$0xff] }
 0x217   : > { %v13663_v6 = vpack.c.bf16 %v1567_v57, %v1567_v57  ;;  %v13665_v22 = vpack.c.bf16 %v1656_v53, %v1656_v53  ;;  %v1290_v9 = vmul.f32 %v1168_v7, %v18077_v18  ;;  %v1289_v53 = vmul.f32 %v1158_v38, %v18081_v33 }
 0x218   : > { %18065 = vst [vmem:[#allocation48_spill] sm:$0xff] %v13660_v20  ;;  %v1173_v26 = vsub.f32 1.5, %v1172_v61  ;;  %v1183_v43 = vsub.f32 1.5, %v1182_v28 }
 0x219   : > { %18067 = vst [vmem:[#allocation46_spill] sm:$0xff] %v13663_v6  ;;  %2627 = vrot.lane.b32.xlu0 %v13606_v45, %s12274_s23  ;;  %v1325_v23 = vmul.f32 %v13679_v50, %v1290_v9  ;;  %v1324_v44 = vmul.f32 %v13679_v50, %v1289_v53 }
 0x21a   : > { %18068 = vst [vmem:[#allocation37_spill] sm:$0xff] %v13665_v22  ;;  %2369 = vrot.lane.b32.xlu1 %v13660_v20, %s12273_s12  ;;  %v1184_v51 = vmul.f32 %v13688_v58, %v1183_v43 }
 0x21b   : > { %1983 = vst.msk [vmem:[#allocation4] sm:$0xf] %vm1854_vm15, %v13660_v20  ;;  %v1744_v35 = vpop.f32.mrf.mxu2  ;;  %v1360_v49 = vadd.f32 %v13694_v8, %v1325_v23 }
 0x21c   : > { %1856 = vst.msk [vmem:[#allocation2 + $0x4] sm:$0xf] %vm1854_vm15, %v13663_v6  ;;  %v1745_v62 = vadd.f32 %v1744_v35, %v13612_v21  ;;  %v1569_v11 = vpop.f32.mrf.mxu0  ;;  %v1658_v42 = vpop.f32.mrf.mxu1  ;;  %v1174_v35 = vmul.f32 %v13682_v34, %v1173_v26  ;;  %v1188_v56 = vsel %vm13774_vm0, %v13688_v58, %v1184_v51 }
 0x21d   : > { %1920 = vst.msk [vmem:[#allocation3 + $0x4] sm:$0xf] %vm1854_vm15, %v13665_v22  ;;  %v1570_v31 = vadd.f32 %v1569_v11, %v13585_v59  ;;  %v1659_v14 = vadd.f32 %v1658_v42, %v13587_v5 }
 0x21e   : > { %v13690_v19 = vpack.c.bf16 %v1745_v62, %v1745_v62  ;;  %v1178_v54 = vsel %vm1177_vm2, %v13682_v34, %v1174_v35 }
 0x21f   : > { %v13704_v25 = vpack.c.bf16 %v1570_v31, %v1570_v31  ;;  %v13706_v16 = vpack.c.bf16 %v1659_v14, %v1659_v14  ;;  %v1359_v31 = vadd.f32 %v13694_v8, %v1324_v44  ;;  %v1291_v32 = vmul.f32 %v1178_v54, %v18087_v3 }
 0x220   : > { %18070 = vst [vmem:[#allocation45_spill] sm:$0xff] %v13690_v19  ;;  %1608 = vmatmul.bf16.gmra.mxu0 %v1380_v13  ;;  %1697 = vmatmul.bf16.gmra.mxu1 %v1380_v13 }
 0x221   : > { %1984 = vst.msk [vmem:[#allocation4 + $0x4] sm:$0xf] %vm1854_vm15, %v13690_v19  ;;  %2371 = vrot.lane.b32.xlu0 %v13690_v19, %s12273_s12  ;;  %v1381_v47 = vpack.c.bf16 %v1360_v49, %v1359_v31 }
 0x222   : > { %18071 = vst [vmem:[#allocation35_spill] sm:$0xff] %v13704_v25  ;;  %1717 = vmatmul.bf16.gmra.mxu3 %v13409_v4  ;;  %2500 = vrot.lane.b32.xlu1 %v13663_v6, %s12274_s23 }
 0x223   : > { %18072 = vst [vmem:[#allocation50_spill] sm:$0xff] %v13706_v16  ;;  %v1747_v55 = vpop.f32.mrf.mxu2  ;;  %1786 = vmatmul.bf16.gmra.mxu2 %v1380_v13 }
 0x224   : > { %1857 = vst.msk [vmem:[#allocation2 + $0x8] sm:$0xf] %vm1854_vm15, %v13704_v25  ;;  %v1748_v60 = vadd.f32 %v1747_v55, %v13612_v21  ;;  %v1571_v36 = vpop.f32.mrf.mxu0  ;;  %v1660_v27 = vpop.f32.mrf.mxu1  ;;  %v18088_v55 = vld [vmem:[#allocation42_spill] sm:$0xff] }
 0x225   : > { %1921 = vst.msk [vmem:[#allocation3 + $0x8] sm:$0xf] %vm1854_vm15, %v13706_v16  ;;  %v1572_v17 = vadd.f32 %v1571_v36, %v13585_v59  ;;  %v1661_v10 = vadd.f32 %v1660_v27, %v13587_v5  ;;  %v1292_v38 = vmul.f32 %v1188_v56, %v18088_v55  ;;  %v1326_v36 = vmul.f32 %v13679_v50, %v1291_v32 }
 0x226   : > { %v13745_v12 = vpack.c.bf16 %v1748_v60, %v1748_v60 }
 0x227   : > { %v13747_v24 = vpack.c.bf16 %v1572_v17, %v1572_v17  ;;  %v13749_v57 = vpack.c.bf16 %v1661_v10, %v1661_v10  ;;  %v1327_v27 = vmul.f32 %v13679_v50, %v1292_v38  ;;  %v1361_v10 = vadd.f32 %v13694_v8, %v1326_v36 }
 0x228   : > { %18078 = vst [vmem:[#allocation49_spill] sm:$0xff] %v13745_v12 }
 0x229   : > { %18079 = vst [vmem:[#allocation38_spill] sm:$0xff] %v13747_v24  ;;  %2051 = vrot.lane.b32.xlu0 %v13704_v25, %s12273_s12  ;;  %v1362_v9 = vadd.f32 %v13694_v8, %v1327_v27 }
 0x22a   : > { %18080 = vst [vmem:[#allocation36_spill] sm:$0xff] %v13749_v57 }
 0x22b   : > { %1985 = vst.msk [vmem:[#allocation4 + $0x8] sm:$0xf] %vm1854_vm15, %v13745_v12  ;;  %v1749_v1 = vpop.f32.mrf.mxu2  ;;  %v1382_v26 = vpack.c.bf16 %v1362_v9, %v1361_v10 }
 0x22c   : > { %1858 = vst.msk [vmem:[#allocation2 + $0xc] sm:$0xf] %vm1854_vm15, %v13747_v24  ;;  %v1750_v52 = vadd.f32 %v1749_v1, %v13612_v21  ;;  %v1574_v29 = vpop.f32.mrf.mxu0  ;;  %v1663_v41 = vpop.f32.mrf.mxu1 }
 0x22d   : > { %1922 = vst.msk [vmem:[#allocation3 + $0xc] sm:$0xf] %vm1854_vm15, %v13749_v57  ;;  %v1575_v11 = vadd.f32 %v1574_v29, %v13585_v59  ;;  %v1664_v42 = vadd.f32 %v1663_v41, %v13587_v5 }
 0x22e   : > { %v13768_v62 = vpack.c.bf16 %v1750_v52, %v1750_v52 }
 0x22f   : > { %v13783_v30 = vpack.c.bf16 %v1575_v11, %v1575_v11  ;;  %v13785_v39 = vpack.c.bf16 %v1664_v42, %v1664_v42 }
 0x230   : > { %18082 = vst [vmem:[#allocation53_spill] sm:$0xff] %v13768_v62  ;;  %1613 = vmatmul.bf16.gmra.mxu0 %v1381_v47  ;;  %1702 = vmatmul.bf16.gmra.mxu1 %v1381_v47 }
 0x231   : > { %1986 = vst.msk [vmem:[#allocation4 + $0xc] sm:$0xf] %vm1854_vm15, %v13768_v62  ;;  %2502 = vrot.lane.b32.xlu0 %v13704_v25, %s12274_s23 }
 0x232   : > { %18085 = vst [vmem:[#allocation52_spill] sm:$0xff] %v13783_v30  ;;  %1722 = vmatmul.bf16.gmra.mxu3 %v13497_v2 }
 0x233   : > { %18086 = vst [vmem:[#allocation41_spill] sm:$0xff] %v13785_v39  ;;  %1791 = vmatmul.bf16.gmra.mxu2 %v1381_v47  ;;  %v1752_v40 = vpop.f32.mrf.mxu2 }
 0x234   : > { %1859 = vst.msk [vmem:[#allocation2 + $0x10] sm:$0xf] %vm1854_vm15, %v13783_v30  ;;  %v1753_v46 = vadd.f32 %v1752_v40, %v13612_v21  ;;  %v1576_v13 = vpop.f32.mrf.mxu0  ;;  %v1665_v34 = vpop.f32.mrf.mxu1 }
 0x235   : > { %1923 = vst.msk [vmem:[#allocation3 + $0x10] sm:$0xf] %vm1854_vm15, %v13785_v39  ;;  %v1577_v7 = vadd.f32 %v1576_v13, %v13585_v59  ;;  %v1666_v48 = vadd.f32 %v1665_v34, %v13587_v5 }
 0x236   : > { %v13801_v37 = vpack.c.bf16 %v1753_v46, %v1753_v46 }
 0x237   : > { %v13803_v58 = vpack.c.bf16 %v1577_v7, %v1577_v7  ;;  %v13805_v60 = vpack.c.bf16 %v1666_v48, %v1666_v48 }
 0x238   : > { %18089 = vst [vmem:[#allocation40_spill] sm:$0xff] %v13801_v37 }
 0x239   : > { %18090 = vst [vmem:[#allocation43_spill] sm:$0xff] %v13803_v58 }
 0x23a   : > { %18091 = vst [vmem:[#allocation39_spill] sm:$0xff] %v13805_v60 }
 0x23b   : > { %1987 = vst.msk [vmem:[#allocation4 + $0x10] sm:$0xf] %vm1854_vm15, %v13801_v37  ;;  %v1754_v17 = vpop.f32.mrf.mxu2 }
 0x23c   : > { %1860 = vst.msk [vmem:[#allocation2 + $0x14] sm:$0xf] %vm1854_vm15, %v13803_v58  ;;  %v1755_v18 = vadd.f32 %v1754_v17, %v13612_v21 }
 0x23d   : > { %1924 = vst.msk [vmem:[#allocation3 + $0x14] sm:$0xf] %vm1854_vm15, %v13805_v60  ;;  %v1579_v33 = vpop.f32.mrf.mxu0  ;;  %v1668_v53 = vpop.f32.mrf.mxu1 }
 0x23e   : > { %v13818_v61 = vpack.c.bf16 %v1755_v18, %v1755_v18  ;;  %v1580_v28 = vadd.f32 %v1579_v33, %v13585_v59  ;;  %v1669_v23 = vadd.f32 %v1668_v53, %v13587_v5 }
 0x240   : > { %18092 = vst [vmem:[#allocation44_spill] sm:$0xff] %v13818_v61  ;;  %v13825_v50 = vpack.c.bf16 %v1580_v28, %v1580_v28  ;;  %v13827_v1 = vpack.c.bf16 %v1669_v23, %v1669_v23  ;;  %1618 = vmatmul.bf16.gmra.mxu0 %v1382_v26  ;;  %1707 = vmatmul.bf16.gmra.mxu1 %v1382_v26 }
 0x241   : > { %1988 = vst.msk [vmem:[#allocation4 + $0x14] sm:$0xf] %vm1854_vm15, %v13818_v61 }
 0x242   : > { %1727 = vmatmul.bf16.gmra.mxu3 %v13557_v0  ;;  %18093 = vst [vmem:[#allocation42_spill] sm:$0xff] %v13825_v50 }
 0x243   : > { %18094 = vst [vmem:[#allocation54_spill] sm:$0xff] %v13827_v1  ;;  %1796 = vmatmul.bf16.gmra.mxu2 %v1382_v26 }
 0x244   : > { %1861 = vst.msk [vmem:[#allocation2 + $0x18] sm:$0xf] %vm1854_vm15, %v13825_v50  ;;  %v1757_v8 = vpop.f32.mrf.mxu2 }
 0x245   : > { %1925 = vst.msk [vmem:[#allocation3 + $0x18] sm:$0xf] %vm1854_vm15, %v13827_v1  ;;  %v1758_v44 = vadd.f32 %v1757_v8, %v13612_v21  ;;  %v1581_v43 = vpop.f32.mrf.mxu0  ;;  %v1670_v52 = vpop.f32.mrf.mxu1 }
 0x246   : > { %v1582_v49 = vadd.f32 %v1581_v43, %v13585_v59  ;;  %v1671_v35 = vadd.f32 %v1670_v52, %v13587_v5 }
 0x247   : > { %v13836_v29 = vpack.c.bf16 %v1758_v44, %v1758_v44 }
 0x248   : > { %v13838_v41 = vpack.c.bf16 %v1582_v49, %v1582_v49  ;;  %v13840_v11 = vpack.c.bf16 %v1671_v35, %v1671_v35 }
 0x249   : > { %18095 = vst [vmem:[#allocation55_spill] sm:$0xff] %v13836_v29 }
 0x24a   : > { %18096 = vst [vmem:[#allocation56_spill] sm:$0xff] %v13840_v11 }
 0x24b   : > { %1989 = vst.msk [vmem:[#allocation4 + $0x18] sm:$0xf] %vm1854_vm15, %v13836_v29 }
 0x24c   : > { %1862 = vst.msk [vmem:[#allocation2 + $0x1c] sm:$0xf] %vm1854_vm15, %v13838_v41  ;;  %v1759_v42 = vpop.f32.mrf.mxu2 }
 0x24d   : > { %1926 = vst.msk [vmem:[#allocation3 + $0x1c] sm:$0xf] %vm1854_vm15, %v13840_v11  ;;  %v1760_v31 = vadd.f32 %v1759_v42, %v13612_v21  ;;  %v1584_v51 = vpop.f32.mrf.mxu0  ;;  %v1673_v14 = vpop.f32.mrf.mxu1 }
 0x24e   : > { %v1585_v47 = vadd.f32 %v1584_v51, %v13585_v59  ;;  %v1674_v54 = vadd.f32 %v1673_v14, %v13587_v5 }
 0x24f   : > { %v13852_v56 = vpack.c.bf16 %v1760_v31, %v1760_v31 }
 0x250   : > { %v13854_v40 = vpack.c.bf16 %v1585_v47, %v1585_v47  ;;  %v13856_v3 = vpack.c.bf16 %v1674_v54, %v1674_v54 }
 0x251   : > { %18097 = vst [vmem:[#allocation57_spill] sm:$0xff] %v13852_v56 }
 0x252   : > { %1801 = vmatmul.bf16.vlgmr.msra.gmra.mxu3 %v13307_v63  ;;  %18098 = vst [vmem:[#allocation58_spill] sm:$0xff] %v13856_v3 }
 0x253   : > { %1990 = vst.msk [vmem:[#allocation4 + $0x1c] sm:$0xf] %vm1854_vm15, %v13852_v56 }
 0x254   : > { %1863 = vst.msk [vmem:[#allocation2 + $0x20] sm:$0xf] %vm1854_vm15, %v13854_v40  ;;  %v1762_v63 = vpop.f32.mrf.mxu2 }
 0x255   : > { %v1624_v32 = vpop.f32.mrf.mxu3  ;;  %1927 = vst.msk [vmem:[#allocation3 + $0x20] sm:$0xf] %vm1854_vm15, %v13856_v3  ;;  %v1763_v34 = vadd.f32 %v1762_v63, %v13612_v21  ;;  %v1586_v7 = vpop.f32.mrf.mxu0 }
 0x256   : > { %v1625_v46 = vadd.f32 %v1624_v32, %v13585_v59  ;;  %v1675_v48 = vpop.f32.mrf.mxu1  ;;  %v1587_v55 = vadd.f32 %v1586_v7, %v13585_v59 }
 0x257   : > { %v1676_v38 = vadd.f32 %v1675_v48, %v13587_v5  ;;  %v13874_v36 = vpack.c.bf16 %v1763_v34, %v1763_v34 }
 0x258   : > { %v13865_v13 = vpack.c.bf16 %v1625_v46, %v1625_v46  ;;  %v13876_v27 = vpack.c.bf16 %v1587_v55, %v1587_v55 }
 0x259   : > { %v13878_v17 = vpack.c.bf16 %v1676_v38, %v1676_v38  ;;  %1991 = vst.msk [vmem:[#allocation4 + $0x20] sm:$0xf] %vm1854_vm15, %v13874_v36 }
 0x25a   : > { %18099 = vst [vmem:[#allocation59_spill] sm:$0xff] %v13865_v13  ;;  %2095 = vrot.lane.b32.xlu2 %v13865_v13, %s12273_s12 }
 0x25b   : > { %1879 = vst.msk [vmem:[#allocation2 + $0x60] sm:$0xf] %vm1854_vm15, %v13865_v13 }
 0x25c   : > { %18100 = vst [vmem:[#allocation60_spill] sm:$0xff] %v13876_v27  ;;  %v1764_v33 = vpop.f32.mrf.mxu2 }
 0x25d   : > { %18101 = vst [vmem:[#allocation61_spill] sm:$0xff] %v13878_v17  ;;  %v1626_v10 = vpop.f32.mrf.mxu3  ;;  %v1765_v53 = vadd.f32 %v1764_v33, %v13612_v21  ;;  %v1589_v28 = vpop.f32.mrf.mxu0 }
 0x25e   : > { %1864 = vst.msk [vmem:[#allocation2 + $0x24] sm:$0xf] %vm1854_vm15, %v13876_v27  ;;  %v1627_v18 = vadd.f32 %v1626_v10, %v13585_v59  ;;  %v1678_v23 = vpop.f32.mrf.mxu1  ;;  %v1590_v26 = vadd.f32 %v1589_v28, %v13585_v59 }
 0x25f   : > { %1928 = vst.msk [vmem:[#allocation3 + $0x24] sm:$0xf] %vm1854_vm15, %v13878_v17  ;;  %v1679_v8 = vadd.f32 %v1678_v23, %v13587_v5  ;;  %v13898_v44 = vpack.c.bf16 %v1765_v53, %v1765_v53 }
 0x260   : > { %v13887_v9 = vpack.c.bf16 %v1627_v18, %v1627_v18  ;;  %v13901_v43 = vpack.c.bf16 %v1590_v26, %v1590_v26 }
 0x261   : > { %v13903_v52 = vpack.c.bf16 %v1679_v8, %v1679_v8  ;;  %1992 = vst.msk [vmem:[#allocation4 + $0x24] sm:$0xf] %vm1854_vm15, %v13898_v44 }
 0x262   : > { %18102 = vst [vmem:[#allocation62_spill] sm:$0xff] %v13887_v9  ;;  %2097 = vrot.lane.b32.xlu1 %v13887_v9, %s12273_s12  ;;  %2546 = vrot.lane.b32.xlu2 %v13865_v13, %s12274_s23 }
 0x263   : > { %1880 = vst.msk [vmem:[#allocation2 + $0x64] sm:$0xf] %vm1854_vm15, %v13887_v9  ;;  %1806 = vmatmul.bf16.gmra.mxu3 %v13409_v4 }
 0x264   : > { %18103 = vst [vmem:[#allocation63_spill] sm:$0xff] %v13901_v43  ;;  %v1767_v31 = vpop.f32.mrf.mxu2 }
 0x265   : > { %v1629_v49 = vpop.f32.mrf.mxu3  ;;  %1865 = vst.msk [vmem:[#allocation2 + $0x28] sm:$0xf] %vm1854_vm15, %v13901_v43  ;;  %v1768_v4 = vadd.f32 %v1767_v31, %v13612_v21  ;;  %v1591_v51 = vpop.f32.mrf.mxu0 }
 0x266   : > { %v1630_v35 = vadd.f32 %v1629_v49, %v13585_v59  ;;  %1929 = vst.msk [vmem:[#allocation3 + $0x28] sm:$0xf] %vm1854_vm15, %v13903_v52  ;;  %v1680_v14 = vpop.f32.mrf.mxu1  ;;  %v1592_v47 = vadd.f32 %v1591_v51, %v13585_v59 }
 0x267   : > { %v1681_v54 = vadd.f32 %v1680_v14, %v13587_v5  ;;  %v13923_v32 = vpack.c.bf16 %v1768_v4, %v1768_v4 }
 0x268   : > { %v13912_v42 = vpack.c.bf16 %v1630_v35, %v1630_v35  ;;  %v13927_v63 = vpack.c.bf16 %v1592_v47, %v1592_v47 }
 0x269   : > { %v13929_v34 = vpack.c.bf16 %v1681_v54, %v1681_v54  ;;  %1993 = vst.msk [vmem:[#allocation4 + $0x28] sm:$0xf] %vm1854_vm15, %v13923_v32 }
 0x26a   : > { %18104 = vst [vmem:[#allocation64_spill] sm:$0xff] %v13912_v42  ;;  %2099 = vrot.lane.b32.xlu0 %v13912_v42, %s12273_s12  ;;  %2548 = vrot.lane.b32.xlu1 %v13887_v9, %s12274_s23 }
 0x26b   : > { %1881 = vst.msk [vmem:[#allocation2 + $0x68] sm:$0xf] %vm1854_vm15, %v13912_v42  ;;  %2049 = vrot.lane.b32.xlu2 %v13663_v6, %s12273_s12  ;;  %v2499_v46 = vpop.permute.xlu2 %2498 }
 0x26c   : > { %2595 = vst.msk [vmem:[#allocation2 + $0x100] sm:$0xf] %vm1854_vm15, %v2499_v46  ;;  %v1769_v38 = vpop.f32.mrf.mxu2 }
 0x26d   : > { %v1631_v7 = vpop.f32.mrf.mxu3  ;;  %1866 = vst.msk [vmem:[#allocation2 + $0x2c] sm:$0xf] %vm1854_vm15, %v13927_v63  ;;  %v1770_v10 = vadd.f32 %v1769_v38, %v13612_v21  ;;  %v1594_v18 = vpop.f32.mrf.mxu0 }
 0x26e   : > { %v1632_v48 = vadd.f32 %v1631_v7, %v13585_v59  ;;  %1930 = vst.msk [vmem:[#allocation3 + $0x2c] sm:$0xf] %vm1854_vm15, %v13929_v34  ;;  %v1683_v33 = vpop.f32.mrf.mxu1  ;;  %v1595_v53 = vadd.f32 %v1594_v18, %v13585_v59 }
 0x26f   : > { %v1684_v28 = vadd.f32 %v1683_v33, %v13587_v5  ;;  %v13950_v23 = vpack.c.bf16 %v1770_v10, %v1770_v10 }
 0x270   : > { %v13939_v55 = vpack.c.bf16 %v1632_v48, %v1632_v48  ;;  %v13955_v26 = vpack.c.bf16 %v1595_v53, %v1595_v53 }
 0x271   : > { %v13957_v8 = vpack.c.bf16 %v1684_v28, %v1684_v28  ;;  %1994 = vst.msk [vmem:[#allocation4 + $0x2c] sm:$0xf] %vm1854_vm15, %v13950_v23 }
 0x272   : > { %18105 = vst [vmem:[#allocation65_spill] sm:$0xff] %v13939_v55  ;;  %2550 = vrot.lane.b32.xlu0 %v13912_v42, %s12274_s23  ;;  %2212 = vrot.lane.b32.xlu1 %v13706_v16, %s12273_s12 }
 0x273   : > { %1882 = vst.msk [vmem:[#allocation2 + $0x6c] sm:$0xf] %vm1854_vm15, %v13939_v55  ;;  %2210 = vrot.lane.b32.xlu2 %v13665_v22, %s12273_s12  ;;  %1811 = vmatmul.bf16.gmra.mxu3 %v13497_v2 }
 0x274   : > { %1867 = vst.msk [vmem:[#allocation2 + $0x30] sm:$0xf] %vm1854_vm15, %v13955_v26  ;;  %v1772_v4 = vpop.f32.mrf.mxu2 }
 0x275   : > { %v1634_v49 = vpop.f32.mrf.mxu3  ;;  %1931 = vst.msk [vmem:[#allocation3 + $0x30] sm:$0xf] %vm1854_vm15, %v13957_v8  ;;  %v1773_v2 = vadd.f32 %v1772_v4, %v13612_v21  ;;  %v1596_v51 = vpop.f32.mrf.mxu0 }
 0x276   : > { %v1635_v35 = vadd.f32 %v1634_v49, %v13585_v59  ;;  %v1685_v14 = vpop.f32.mrf.mxu1  ;;  %v1597_v47 = vadd.f32 %v1596_v51, %v13585_v59 }
 0x277   : > { %v1686_v54 = vadd.f32 %v1685_v14, %v13587_v5  ;;  %v13977_v46 = vpack.c.bf16 %v1773_v2, %v1773_v2 }
 0x278   : > { %v13966_v31 = vpack.c.bf16 %v1635_v35, %v1635_v35  ;;  %v13981_v7 = vpack.c.bf16 %v1597_v47, %v1597_v47 }
 0x279   : > { %v13983_v48 = vpack.c.bf16 %v1686_v54, %v1686_v54  ;;  %1995 = vst.msk [vmem:[#allocation4 + $0x30] sm:$0xf] %vm1854_vm15, %v13977_v46 }
 0x27a   : > { %18106 = vst [vmem:[#allocation66_spill] sm:$0xff] %v13966_v31  ;;  %2214 = vrot.lane.b32.xlu0 %v13749_v57, %s12273_s12  ;;  %2631 = vrot.lane.b32.xlu1 %v13706_v16, %s12274_s23 }
 0x27b   : > { %1883 = vst.msk [vmem:[#allocation2 + $0x70] sm:$0xf] %vm1854_vm15, %v13966_v31  ;;  %2629 = vrot.lane.b32.xlu2 %v13665_v22, %s12274_s23 }
 0x27c   : > { %1868 = vst.msk [vmem:[#allocation2 + $0x34] sm:$0xf] %vm1854_vm15, %v13981_v7  ;;  %v1774_v33 = vpop.f32.mrf.mxu2 }
 0x27d   : > { %v1636_v38 = vpop.f32.mrf.mxu3  ;;  %1932 = vst.msk [vmem:[#allocation3 + $0x34] sm:$0xf] %vm1854_vm15, %v13983_v48  ;;  %v1775_v53 = vadd.f32 %v1774_v33, %v13612_v21  ;;  %v1599_v28 = vpop.f32.mrf.mxu0 }
 0x27e   : > { %v1637_v10 = vadd.f32 %v1636_v38, %v13585_v59  ;;  %v1688_v49 = vpop.f32.mrf.mxu1  ;;  %v1600_v35 = vadd.f32 %v1599_v28, %v13585_v59 }
 0x27f   : > { %v1689_v4 = vadd.f32 %v1688_v49, %v13587_v5  ;;  %v14003_v2 = vpack.c.bf16 %v1775_v53, %v1775_v53 }
 0x280   : > { %v13992_v18 = vpack.c.bf16 %v1637_v10, %v1637_v10  ;;  %v14008_v14 = vpack.c.bf16 %v1600_v35, %v1600_v35 }
 0x281   : > { %v14010_v47 = vpack.c.bf16 %v1689_v4, %v1689_v4  ;;  %1996 = vst.msk [vmem:[#allocation4 + $0x34] sm:$0xf] %vm1854_vm15, %v14003_v2 }
 0x282   : > { %18107 = vst [vmem:[#allocation67_spill] sm:$0xff] %v13992_v18  ;;  %2633 = vrot.lane.b32.xlu0 %v13749_v57, %s12274_s23  ;;  %2375 = vrot.lane.b32.xlu1 %v13768_v62, %s12273_s12 }
 0x283   : > { %1884 = vst.msk [vmem:[#allocation2 + $0x74] sm:$0xf] %vm1854_vm15, %v13992_v18  ;;  %2373 = vrot.lane.b32.xlu2 %v13745_v12, %s12273_s12  ;;  %1816 = vmatmul.bf16.gmra.mxu3 %v13557_v0  ;;  %v2209_v51 = vpop.permute.xlu0 %2208 }
 0x284   : > { %v2048_v54 = vpop.permute.xlu1 %2047  ;;  %2305 = vst.msk [vmem:[#allocation3 + $0x80] sm:$0xf] %vm1854_vm15, %v2209_v51  ;;  %v1777_v33 = vpop.f32.mrf.mxu2 }
 0x285   : > { %v1639_v38 = vpop.f32.mrf.mxu3  ;;  %1869 = vst.msk [vmem:[#allocation2 + $0x38] sm:$0xf] %vm1854_vm15, %v14008_v14  ;;  %v1778_v53 = vadd.f32 %v1777_v33, %v13612_v21  ;;  %v1601_v28 = vpop.f32.mrf.mxu0 }
 0x286   : > { %v1640_v10 = vadd.f32 %v1639_v38, %v13585_v59  ;;  %1933 = vst.msk [vmem:[#allocation3 + $0x38] sm:$0xf] %vm1854_vm15, %v14010_v47  ;;  %v1690_v49 = vpop.f32.mrf.mxu1  ;;  %v1602_v35 = vadd.f32 %v1601_v28, %v13585_v59 }
 0x287   : > { %2144 = vst.msk [vmem:[#allocation2 + $0x80] sm:$0xf] %vm1854_vm15, %v2048_v54  ;;  %v1691_v4 = vadd.f32 %v1690_v49, %v13587_v5  ;;  %v14032_v51 = vpack.c.bf16 %v1778_v53, %v1778_v53 }
 0x288   : > { %v14020_v0 = vpack.c.bf16 %v1640_v10, %v1640_v10  ;;  %v14036_v38 = vpack.c.bf16 %v1602_v35, %v1602_v35 }
 0x289   : > { %v14038_v10 = vpack.c.bf16 %v1691_v4, %v1691_v4  ;;  %1997 = vst.msk [vmem:[#allocation4 + $0x38] sm:$0xf] %vm1854_vm15, %v14032_v51 }
 0x28a   : > { %18108 = vst [vmem:[#allocation68_spill] sm:$0xff] %v14020_v0  ;;  %2377 = vrot.lane.b32.xlu0 %v13801_v37, %s12273_s12  ;;  %2055 = vrot.lane.b32.xlu1 %v13783_v30, %s12273_s12 }
 0x28b   : > { %1885 = vst.msk [vmem:[#allocation2 + $0x78] sm:$0xf] %vm1854_vm15, %v14020_v0  ;;  %2053 = vrot.lane.b32.xlu2 %v13747_v24, %s12273_s12  ;;  %v2628_v54 = vpop.permute.xlu0 %2627 }
 0x28c   : > { %v2370_v33 = vpop.permute.xlu1 %2369  ;;  %2724 = vst.msk [vmem:[#allocation3 + $0x100] sm:$0xf] %vm1854_vm15, %v2628_v54  ;;  %v1779_v35 = vpop.f32.mrf.mxu2 }
 0x28d   : > { %v1641_v28 = vpop.f32.mrf.mxu3  ;;  %1870 = vst.msk [vmem:[#allocation2 + $0x3c] sm:$0xf] %vm1854_vm15, %v14036_v38  ;;  %v1780_v4 = vadd.f32 %v1779_v35, %v13612_v21  ;;  %v1604_v54 = vpop.f32.mrf.mxu0 }
 0x28e   : > { %v1642_v53 = vadd.f32 %v1641_v28, %v13585_v59  ;;  %1934 = vst.msk [vmem:[#allocation3 + $0x3c] sm:$0xf] %vm1854_vm15, %v14038_v10  ;;  %v1693_v22 = vpop.f32.mrf.mxu1  ;;  %v1605_v16 = vadd.f32 %v1604_v54, %v13585_v59 }
 0x28f   : > { %2466 = vst.msk [vmem:[#allocation4 + $0x80] sm:$0xf] %vm1854_vm15, %v2370_v33  ;;  %v1694_v57 = vadd.f32 %v1693_v22, %v13587_v5  ;;  %v14060_v28 = vpack.c.bf16 %v1780_v4, %v1780_v4 }
 0x290   : > { %v14048_v49 = vpack.c.bf16 %v1642_v53, %v1642_v53  ;;  %v14064_v53 = vpack.c.bf16 %v1605_v16, %v1605_v16 }
 0x291   : > { %v14066_v35 = vpack.c.bf16 %v1694_v57, %v1694_v57  ;;  %1998 = vst.msk [vmem:[#allocation4 + $0x3c] sm:$0xf] %vm1854_vm15, %v14060_v28 }
 0x292   : > { %18109 = vst [vmem:[#allocation69_spill] sm:$0xff] %v14048_v49  ;;  %2057 = vrot.lane.b32.xlu0 %v13803_v58, %s12273_s12  ;;  %2506 = vrot.lane.b32.xlu1 %v13783_v30, %s12274_s23 }
 0x293   : > { %1886 = vst.msk [vmem:[#allocation2 + $0x7c] sm:$0xf] %vm1854_vm15, %v14048_v49  ;;  %2504 = vrot.lane.b32.xlu2 %v13747_v24, %s12274_s23  ;;  %v2372_v33 = vpop.permute.xlu0 %2371 }
 0x294   : > { %18110 = vst [vmem:[#allocation70_spill] sm:$0xff] %v14066_v35  ;;  %v2501_v54 = vpop.permute.xlu1 %2500 }
 0x295   : > { %2467 = vst.msk [vmem:[#allocation4 + $0x84] sm:$0xf] %vm1854_vm15, %v2372_v33  ;;  %v1713_v22 = vpop.f32.mrf.mxu3  ;;  %v1606_v33 = vpop.f32.mrf.mxu0 }
 0x296   : > { %1871 = vst.msk [vmem:[#allocation2 + $0x40] sm:$0xf] %vm1854_vm15, %v14064_v53  ;;  %v1714_v4 = vadd.f32 %v1713_v22, %v13587_v5  ;;  %v1782_v16 = vpop.f32.mrf.mxu2  ;;  %v1695_v45 = vpop.f32.mrf.mxu1  ;;  %v1607_v9 = vadd.f32 %v1606_v33, %v13585_v59 }
 0x297   : > { %1935 = vst.msk [vmem:[#allocation3 + $0x40] sm:$0xf] %vm1854_vm15, %v14066_v35  ;;  %v1783_v57 = vadd.f32 %v1782_v16, %v13612_v21  ;;  %v1696_v42 = vadd.f32 %v1695_v45, %v13587_v5 }
 0x298   : > { %v14076_v13 = vpack.c.bf16 %v1714_v4, %v1714_v4  ;;  %2596 = vst.msk [vmem:[#allocation2 + $0x104] sm:$0xf] %vm1854_vm15, %v2501_v54  ;;  %v14092_v4 = vpack.c.bf16 %v1607_v9, %v1607_v9 }
 0x299   : > { %v14088_v22 = vpack.c.bf16 %v1783_v57, %v1783_v57  ;;  %v14094_v16 = vpack.c.bf16 %v1696_v42, %v1696_v42 }
 0x29a   : > { %1943 = vst.msk [vmem:[#allocation3 + $0x60] sm:$0xf] %vm1854_vm15, %v14076_v13  ;;  %2508 = vrot.lane.b32.xlu0 %v13803_v58, %s12274_s23  ;;  %2103 = vrot.lane.b32.xlu1 %v13966_v31, %s12273_s12 }
 0x29b   : > { %2101 = vrot.lane.b32.xlu2 %v13939_v55, %s12273_s12  ;;  %v2052_v54 = vpop.permute.xlu0 %2051  ;;  %1999 = vst.msk [vmem:[#allocation4 + $0x40] sm:$0xf] %vm1854_vm15, %v14088_v22 }
 0x29c   : > { %2146 = vst.msk [vmem:[#allocation2 + $0x88] sm:$0xf] %vm1854_vm15, %v2052_v54 }
 0x29d   : > { %v1715_v45 = vpop.f32.mrf.mxu3  ;;  %1872 = vst.msk [vmem:[#allocation2 + $0x44] sm:$0xf] %vm1854_vm15, %v14092_v4  ;;  %v1609_v24 = vpop.f32.mrf.mxu0 }
 0x29e   : > { %v1716_v57 = vadd.f32 %v1715_v45, %v13587_v5  ;;  %1936 = vst.msk [vmem:[#allocation3 + $0x44] sm:$0xf] %vm1854_vm15, %v14094_v16  ;;  %v1784_v9 = vpop.f32.mrf.mxu2  ;;  %v1698_v15 = vpop.f32.mrf.mxu1  ;;  %v1610_v54 = vadd.f32 %v1609_v24, %v13585_v59 }
 0x29f   : > { %v1785_v42 = vadd.f32 %v1784_v9, %v13612_v21  ;;  %v1699_v30 = vadd.f32 %v1698_v15, %v13587_v5 }
 0x2a0   : > { %v14104_v33 = vpack.c.bf16 %v1716_v57, %v1716_v57  ;;  %v14119_v9 = vpack.c.bf16 %v1610_v54, %v1610_v54 }
 0x2a1   : > { %v14115_v45 = vpack.c.bf16 %v1785_v42, %v1785_v42  ;;  %v14121_v58 = vpack.c.bf16 %v1699_v30, %v1699_v30 }
 0x2a2   : > { %18111 = vst [vmem:[#allocation71_spill] sm:$0xff] %v14104_v33  ;;  %2105 = vrot.lane.b32.xlu0 %v13992_v18, %s12273_s12  ;;  %2554 = vrot.lane.b32.xlu1 %v13966_v31, %s12274_s23 }
 0x2a3   : > { %1944 = vst.msk [vmem:[#allocation3 + $0x64] sm:$0xf] %vm1854_vm15, %v14104_v33  ;;  %2552 = vrot.lane.b32.xlu2 %v13939_v55, %s12274_s23  ;;  %v2503_v57 = vpop.permute.xlu0 %2502 }
 0x2a4   : > { %2597 = vst.msk [vmem:[#allocation2 + $0x108] sm:$0xf] %vm1854_vm15, %v2503_v57 }
 0x2a5   : > { %2000 = vst.msk [vmem:[#allocation4 + $0x44] sm:$0xf] %vm1854_vm15, %v14115_v45  ;;  %v1718_v15 = vpop.f32.mrf.mxu3  ;;  %v1611_v55 = vpop.f32.mrf.mxu0 }
 0x2a6   : > { %1873 = vst.msk [vmem:[#allocation2 + $0x48] sm:$0xf] %vm1854_vm15, %v14119_v9  ;;  %v1719_v24 = vadd.f32 %v1718_v15, %v13587_v5  ;;  %v1787_v54 = vpop.f32.mrf.mxu2  ;;  %v1700_v31 = vpop.f32.mrf.mxu1  ;;  %v1612_v57 = vadd.f32 %v1611_v55, %v13585_v59 }
 0x2a7   : > { %1937 = vst.msk [vmem:[#allocation3 + $0x48] sm:$0xf] %vm1854_vm15, %v14121_v58  ;;  %v1788_v30 = vadd.f32 %v1787_v54, %v13612_v21  ;;  %v1701_v6 = vadd.f32 %v1700_v31, %v13587_v5 }
 0x2a8   : > { %v14131_v42 = vpack.c.bf16 %v1719_v24, %v1719_v24  ;;  %v14146_v24 = vpack.c.bf16 %v1612_v57, %v1612_v57 }
 0x2a9   : > { %v14142_v15 = vpack.c.bf16 %v1788_v30, %v1788_v30  ;;  %v14148_v54 = vpack.c.bf16 %v1701_v6, %v1701_v6 }
 0x2aa   : > { %1945 = vst.msk [vmem:[#allocation3 + $0x68] sm:$0xf] %vm1854_vm15, %v14131_v42  ;;  %2556 = vrot.lane.b32.xlu0 %v13992_v18, %s12274_s23  ;;  %2218 = vrot.lane.b32.xlu1 %v13805_v60, %s12273_s12 }
 0x2ab   : > { %2216 = vrot.lane.b32.xlu2 %v13785_v39, %s12273_s12  ;;  %18112 = vst [vmem:[#allocation72_spill] sm:$0xff] %v14148_v54 }
 0x2ac   : > { %2001 = vst.msk [vmem:[#allocation4 + $0x48] sm:$0xf] %vm1854_vm15, %v14142_v15 }
 0x2ad   : > { %v1720_v55 = vpop.f32.mrf.mxu3  ;;  %1874 = vst.msk [vmem:[#allocation2 + $0x4c] sm:$0xf] %vm1854_vm15, %v14146_v24  ;;  %v1614_v25 = vpop.f32.mrf.mxu0 }
 0x2ae   : > { %v1721_v31 = vadd.f32 %v1720_v55, %v13587_v5  ;;  %1938 = vst.msk [vmem:[#allocation3 + $0x4c] sm:$0xf] %vm1854_vm15, %v14148_v54  ;;  %v1789_v18 = vpop.f32.mrf.mxu2  ;;  %v1703_v6 = vpop.f32.mrf.mxu1  ;;  %v1615_v12 = vadd.f32 %v1614_v25, %v13585_v59 }
 0x2af   : > { %v1790_v57 = vadd.f32 %v1789_v18, %v13612_v21  ;;  %v1704_v62 = vadd.f32 %v1703_v6, %v13587_v5 }
 0x2b0   : > { %v14157_v30 = vpack.c.bf16 %v1721_v31, %v1721_v31  ;;  %v14172_v18 = vpack.c.bf16 %v1615_v12, %v1615_v12 }
 0x2b1   : > { %v14168_v55 = vpack.c.bf16 %v1790_v57, %v1790_v57  ;;  %v14174_v31 = vpack.c.bf16 %v1704_v62, %v1704_v62 }
 0x2b2   : > { %1946 = vst.msk [vmem:[#allocation3 + $0x6c] sm:$0xf] %vm1854_vm15, %v14157_v30  ;;  %2220 = vrot.lane.b32.xlu0 %v13827_v1, %s12273_s12  ;;  %2637 = vrot.lane.b32.xlu1 %v13805_v60, %s12274_s23 }
 0x2b3   : > { %2635 = vrot.lane.b32.xlu2 %v13785_v39, %s12274_s23  ;;  %18113 = vst [vmem:[#allocation73_spill] sm:$0xff] %v14174_v31 }
 0x2b4   : > { %v2096_v37 = vpop.permute.xlu2 %2095  ;;  %2002 = vst.msk [vmem:[#allocation4 + $0x4c] sm:$0xf] %vm1854_vm15, %v14168_v55 }
 0x2b5   : > { %v1723_v25 = vpop.f32.mrf.mxu3  ;;  %1875 = vst.msk [vmem:[#allocation2 + $0x50] sm:$0xf] %vm1854_vm15, %v14172_v18  ;;  %v1616_v39 = vpop.f32.mrf.mxu0 }
 0x2b6   : > { %v1724_v6 = vadd.f32 %v1723_v25, %v13587_v5  ;;  %1939 = vst.msk [vmem:[#allocation3 + $0x50] sm:$0xf] %vm1854_vm15, %v14174_v31  ;;  %v1792_v12 = vpop.f32.mrf.mxu2  ;;  %v1705_v60 = vpop.f32.mrf.mxu1  ;;  %v1617_v20 = vadd.f32 %v1616_v39, %v13585_v59 }
 0x2b7   : > { %2168 = vst.msk [vmem:[#allocation2 + $0xe0] sm:$0xf] %vm1854_vm15, %v2096_v37  ;;  %v1793_v62 = vadd.f32 %v1792_v12, %v13612_v21  ;;  %v1706_v19 = vadd.f32 %v1705_v60, %v13587_v5 }
 0x2b8   : > { %v14184_v57 = vpack.c.bf16 %v1724_v6, %v1724_v6  ;;  %v14199_v25 = vpack.c.bf16 %v1617_v20, %v1617_v20 }
 0x2b9   : > { %v14195_v37 = vpack.c.bf16 %v1793_v62, %v1793_v62  ;;  %v14201_v6 = vpack.c.bf16 %v1706_v19, %v1706_v19 }
 0x2ba   : > { %18114 = vst [vmem:[#allocation74_spill] sm:$0xff] %v14184_v57  ;;  %2639 = vrot.lane.b32.xlu0 %v13827_v1, %s12274_s23  ;;  %2381 = vrot.lane.b32.xlu1 %v13836_v29, %s12273_s12 }
 0x2bb   : > { %1947 = vst.msk [vmem:[#allocation3 + $0x70] sm:$0xf] %vm1854_vm15, %v14184_v57  ;;  %2379 = vrot.lane.b32.xlu2 %v13818_v61, %s12273_s12 }
 0x2bc   : > { %18115 = vst [vmem:[#allocation75_spill] sm:$0xff] %v14195_v37  ;;  %v2547_v12 = vpop.permute.xlu2 %2546 }
 0x2bd   : > { %18116 = vst [vmem:[#allocation76_spill] sm:$0xff] %v14199_v25  ;;  %v1725_v39 = vpop.f32.mrf.mxu3  ;;  %v1619_v1 = vpop.f32.mrf.mxu0 }
 0x2be   : > { %2003 = vst.msk [vmem:[#allocation4 + $0x50] sm:$0xf] %vm1854_vm15, %v14195_v37  ;;  %v1726_v60 = vadd.f32 %v1725_v39, %v13587_v5  ;;  %v1794_v20 = vpop.f32.mrf.mxu2  ;;  %v1708_v61 = vpop.f32.mrf.mxu1  ;;  %v1620_v29 = vadd.f32 %v1619_v1, %v13585_v59 }
 0x2bf   : > { %1876 = vst.msk [vmem:[#allocation2 + $0x54] sm:$0xf] %vm1854_vm15, %v14199_v25  ;;  %v1795_v19 = vadd.f32 %v1794_v20, %v13612_v21  ;;  %v1709_v25 = vadd.f32 %v1708_v61, %v13587_v5 }
 0x2c0   : > { %1940 = vst.msk [vmem:[#allocation3 + $0x54] sm:$0xf] %vm1854_vm15, %v14201_v6  ;;  %v14211_v62 = vpack.c.bf16 %v1726_v60, %v1726_v60  ;;  %v14226_v39 = vpack.c.bf16 %v1620_v29, %v1620_v29 }
 0x2c1   : > { %2619 = vst.msk [vmem:[#allocation2 + $0x160] sm:$0xf] %vm1854_vm15, %v2547_v12  ;;  %v14222_v12 = vpack.c.bf16 %v1795_v19, %v1795_v19  ;;  %v14228_v60 = vpack.c.bf16 %v1709_v25, %v1709_v25 }
 0x2c2   : > { %1948 = vst.msk [vmem:[#allocation3 + $0x74] sm:$0xf] %vm1854_vm15, %v14211_v62  ;;  %2383 = vrot.lane.b32.xlu0 %v13852_v56, %s12273_s12  ;;  %2061 = vrot.lane.b32.xlu1 %v13838_v41, %s12273_s12 }
 0x2c3   : > { %18117 = vst [vmem:[#allocation77_spill] sm:$0xff] %v14222_v12  ;;  %2059 = vrot.lane.b32.xlu2 %v13825_v50, %s12273_s12 }
 0x2c4   : > { %18118 = vst [vmem:[#allocation78_spill] sm:$0xff] %v14226_v39 }
 0x2c5   : > { %18119 = vst [vmem:[#allocation79_spill] sm:$0xff] %v14228_v60  ;;  %v2050_v1 = vpop.permute.xlu2 %2049  ;;  %v1728_v61 = vpop.f32.mrf.mxu3 }
 0x2c6   : > { %2004 = vst.msk [vmem:[#allocation4 + $0x54] sm:$0xf] %vm1854_vm15, %v14222_v12  ;;  %v1729_v20 = vadd.f32 %v1728_v61, %v13587_v5  ;;  %v1797_v29 = vpop.f32.mrf.mxu2  ;;  %v1621_v56 = vpop.f32.mrf.mxu0 }
 0x2c7   : > { %1877 = vst.msk [vmem:[#allocation2 + $0x58] sm:$0xf] %vm1854_vm15, %v14226_v39  ;;  %v1798_v25 = vadd.f32 %v1797_v29, %v13612_v21  ;;  %v1710_v37 = vpop.f32.mrf.mxu1  ;;  %v1622_v12 = vadd.f32 %v1621_v56, %v13585_v59 }
 0x2c8   : > { %1941 = vst.msk [vmem:[#allocation3 + $0x58] sm:$0xf] %vm1854_vm15, %v14228_v60  ;;  %v14238_v19 = vpack.c.bf16 %v1729_v20, %v1729_v20  ;;  %v1711_v39 = vadd.f32 %v1710_v37, %v13587_v5 }
 0x2c9   : > { %2145 = vst.msk [vmem:[#allocation2 + $0x84] sm:$0xf] %vm1854_vm15, %v2050_v1  ;;  %v14249_v1 = vpack.c.bf16 %v1798_v25, %v1798_v25  ;;  %v14253_v61 = vpack.c.bf16 %v1622_v12, %v1622_v12 }
 0x2ca   : > { %1949 = vst.msk [vmem:[#allocation3 + $0x78] sm:$0xf] %vm1854_vm15, %v14238_v19  ;;  %2063 = vrot.lane.b32.xlu0 %v13854_v40, %s12273_s12  ;;  %2512 = vrot.lane.b32.xlu1 %v13838_v41, %s12274_s23  ;;  %v14255_v20 = vpack.c.bf16 %v1711_v39, %v1711_v39 }
 0x2cb   : > { %2510 = vrot.lane.b32.xlu2 %v13825_v50, %s12274_s23  ;;  %2005 = vst.msk [vmem:[#allocation4 + $0x58] sm:$0xf] %vm1854_vm15, %v14249_v1 }
 0x2cc   : > { %1878 = vst.msk [vmem:[#allocation2 + $0x5c] sm:$0xf] %vm1854_vm15, %v14253_v61 }
 0x2cd   : > { %v2211_v59 = vpop.permute.xlu2 %2210  ;;  %v1730_v56 = vpop.f32.mrf.mxu3  ;;  %1942 = vst.msk [vmem:[#allocation3 + $0x5c] sm:$0xf] %vm1854_vm15, %v14255_v20 }
 0x2ce   : > { %v1731_v37 = vadd.f32 %v1730_v56, %v13587_v5  ;;  %2306 = vst.msk [vmem:[#allocation3 + $0x84] sm:$0xf] %vm1854_vm15, %v2211_v59  ;;  %v1799_v12 = vpop.f32.mrf.mxu2 }
 0x2cf   : > { %v1800_v39 = vadd.f32 %v1799_v12, %v13612_v21 }
 0x2d0   : > { %v14265_v29 = vpack.c.bf16 %v1731_v37, %v1731_v37 }
 0x2d1   : > { %v14274_v5 = vpack.c.bf16 %v1800_v39, %v1800_v39 }
 0x2d2   : > { %18120 = vst [vmem:[#allocation80_spill] sm:$0xff] %v14265_v29  ;;  %2514 = vrot.lane.b32.xlu0 %v13854_v40, %s12274_s23  ;;  %2109 = vrot.lane.b32.xlu1 %v14048_v49, %s12273_s12 }
 0x2d3   : > { %1950 = vst.msk [vmem:[#allocation3 + $0x7c] sm:$0xf] %vm1854_vm15, %v14265_v29  ;;  %2107 = vrot.lane.b32.xlu2 %v14020_v0, %s12273_s12 }
 0x2d4   : > { %v2098_v25 = vpop.permute.xlu1 %2097  ;;  %2006 = vst.msk [vmem:[#allocation4 + $0x5c] sm:$0xf] %vm1854_vm15, %v14274_v5 }
 0x2d5   : > { %v2630_v59 = vpop.permute.xlu2 %2629  ;;  %v1802_v56 = vpop.f32.mrf.mxu3  ;;  %2169 = vst.msk [vmem:[#allocation2 + $0xe4] sm:$0xf] %vm1854_vm15, %v2098_v25 }
 0x2d6   : > { %v1803_v37 = vadd.f32 %v1802_v56, %v13612_v21  ;;  %2725 = vst.msk [vmem:[#allocation3 + $0x104] sm:$0xf] %vm1854_vm15, %v2630_v59 }
 0x2d8   : > { %v14283_v12 = vpack.c.bf16 %v1803_v37, %v1803_v37 }
 0x2da   : > { %2007 = vst.msk [vmem:[#allocation4 + $0x60] sm:$0xf] %vm1854_vm15, %v14283_v12  ;;  %2256 = vrot.lane.b32.xlu0 %v14076_v13, %s12273_s12  ;;  %2560 = vrot.lane.b32.xlu1 %v14048_v49, %s12274_s23 }
 0x2db   : > { %2558 = vrot.lane.b32.xlu2 %v14020_v0, %s12274_s23 }
 0x2dc   : > { %v2549_v39 = vpop.permute.xlu1 %2548  ;;  %v2100_v25 = vpop.permute.xlu0 %2099 }
 0x2dd   : > { %2620 = vst.msk [vmem:[#allocation2 + $0x164] sm:$0xf] %vm1854_vm15, %v2549_v39  ;;  %v2374_v56 = vpop.permute.xlu2 %2373  ;;  %v1804_v59 = vpop.f32.mrf.mxu3 }
 0x2de   : > { %2468 = vst.msk [vmem:[#allocation4 + $0x88] sm:$0xf] %vm1854_vm15, %v2374_v56  ;;  %v1805_v37 = vadd.f32 %v1804_v59, %v13612_v21 }
 0x2df   : > { %2170 = vst.msk [vmem:[#allocation2 + $0xe8] sm:$0xf] %vm1854_vm15, %v2100_v25 }
 0x2e0   : > { %v14297_v50 = vpack.c.bf16 %v1805_v37, %v1805_v37 }
 0x2e2   : > { %2008 = vst.msk [vmem:[#allocation4 + $0x64] sm:$0xf] %vm1854_vm15, %v14297_v50  ;;  %2226 = vrot.lane.b32.xlu0 %v13878_v17, %s12273_s12  ;;  %2224 = vrot.lane.b32.xlu1 %v13856_v3, %s12273_s12 }
 0x2e3   : > { %2222 = vrot.lane.b32.xlu2 %v13840_v11, %s12273_s12 }
 0x2e4   : > { %v2213_v39 = vpop.permute.xlu1 %2212  ;;  %v2551_v56 = vpop.permute.xlu0 %2550 }
 0x2e5   : > { %2307 = vst.msk [vmem:[#allocation3 + $0x88] sm:$0xf] %vm1854_vm15, %v2213_v39  ;;  %v2054_v59 = vpop.permute.xlu2 %2053 }
 0x2e6   : > { %2147 = vst.msk [vmem:[#allocation2 + $0x8c] sm:$0xf] %vm1854_vm15, %v2054_v59  ;;  %v1807_v25 = vpop.f32.mrf.mxu3 }
 0x2e7   : > { %2621 = vst.msk [vmem:[#allocation2 + $0x168] sm:$0xf] %vm1854_vm15, %v2551_v56  ;;  %v1808_v37 = vadd.f32 %v1807_v25, %v13612_v21 }
 0x2e9   : > { %v14311_v0 = vpack.c.bf16 %v1808_v37, %v1808_v37 }
 0x2ea   : > { %2645 = vrot.lane.b32.xlu0 %v13878_v17, %s12274_s23  ;;  %2643 = vrot.lane.b32.xlu1 %v13856_v3, %s12274_s23 }
 0x2eb   : > { %18121 = vst [vmem:[#allocation81_spill] sm:$0xff] %v14311_v0  ;;  %2641 = vrot.lane.b32.xlu2 %v13840_v11, %s12274_s23 }
 0x2ec   : > { %2009 = vst.msk [vmem:[#allocation4 + $0x68] sm:$0xf] %vm1854_vm15, %v14311_v0  ;;  %v2632_v39 = vpop.permute.xlu1 %2631  ;;  %v2215_v59 = vpop.permute.xlu0 %2214 }
 0x2ed   : > { %2726 = vst.msk [vmem:[#allocation3 + $0x108] sm:$0xf] %vm1854_vm15, %v2632_v39  ;;  %v2505_v56 = vpop.permute.xlu2 %2504 }
 0x2ee   : > { %2598 = vst.msk [vmem:[#allocation2 + $0x10c] sm:$0xf] %vm1854_vm15, %v2505_v56  ;;  %v1809_v25 = vpop.f32.mrf.mxu3 }
 0x2ef   : > { %2308 = vst.msk [vmem:[#allocation3 + $0x8c] sm:$0xf] %vm1854_vm15, %v2215_v59  ;;  %v1810_v37 = vadd.f32 %v1809_v25, %v13612_v21 }
 0x2f1   : > { %v14325_v17 = vpack.c.bf16 %v1810_v37, %v1810_v37 }
 0x2f2   : > { %2389 = vrot.lane.b32.xlu0 %v13923_v32, %s12273_s12  ;;  %2387 = vrot.lane.b32.xlu1 %v13898_v44, %s12273_s12 }
 0x2f3   : > { %2010 = vst.msk [vmem:[#allocation4 + $0x6c] sm:$0xf] %vm1854_vm15, %v14325_v17  ;;  %2385 = vrot.lane.b32.xlu2 %v13874_v36, %s12273_s12 }
 0x2f4   : > { %v2376_v39 = vpop.permute.xlu1 %2375  ;;  %v2634_v56 = vpop.permute.xlu0 %2633 }
 0x2f5   : > { %2469 = vst.msk [vmem:[#allocation4 + $0x8c] sm:$0xf] %vm1854_vm15, %v2376_v39  ;;  %v2102_v59 = vpop.permute.xlu2 %2101 }
 0x2f6   : > { %2171 = vst.msk [vmem:[#allocation2 + $0xec] sm:$0xf] %vm1854_vm15, %v2102_v59  ;;  %v1812_v25 = vpop.f32.mrf.mxu3 }
 0x2f7   : > { %2727 = vst.msk [vmem:[#allocation3 + $0x10c] sm:$0xf] %vm1854_vm15, %v2634_v56  ;;  %v1813_v37 = vadd.f32 %v1812_v25, %v13612_v21 }
 0x2f9   : > { %v14339_v11 = vpack.c.bf16 %v1813_v37, %v1813_v37 }
 0x2fa   : > { %2069 = vrot.lane.b32.xlu0 %v13927_v63, %s12273_s12  ;;  %2067 = vrot.lane.b32.xlu1 %v13901_v43, %s12273_s12 }
 0x2fb   : > { %2011 = vst.msk [vmem:[#allocation4 + $0x70] sm:$0xf] %vm1854_vm15, %v14339_v11  ;;  %2065 = vrot.lane.b32.xlu2 %v13876_v27, %s12273_s12 }
 0x2fc   : > { %v2056_v39 = vpop.permute.xlu1 %2055  ;;  %v2378_v59 = vpop.permute.xlu0 %2377 }
 0x2fd   : > { %2148 = vst.msk [vmem:[#allocation2 + $0x90] sm:$0xf] %vm1854_vm15, %v2056_v39  ;;  %v2553_v56 = vpop.permute.xlu2 %2552 }
 0x2fe   : > { %2622 = vst.msk [vmem:[#allocation2 + $0x16c] sm:$0xf] %vm1854_vm15, %v2553_v56  ;;  %v1814_v25 = vpop.f32.mrf.mxu3 }
 0x2ff   : > { %2470 = vst.msk [vmem:[#allocation4 + $0x90] sm:$0xf] %vm1854_vm15, %v2378_v59  ;;  %v1815_v37 = vadd.f32 %v1814_v25, %v13612_v21 }
 0x301   : > { %v14353_v3 = vpack.c.bf16 %v1815_v37, %v1815_v37 }
 0x302   : > { %2520 = vrot.lane.b32.xlu0 %v13927_v63, %s12274_s23  ;;  %2518 = vrot.lane.b32.xlu1 %v13901_v43, %s12274_s23 }
 0x303   : > { %2012 = vst.msk [vmem:[#allocation4 + $0x74] sm:$0xf] %vm1854_vm15, %v14353_v3  ;;  %2516 = vrot.lane.b32.xlu2 %v13876_v27, %s12274_s23 }
 0x304   : > { %v2507_v39 = vpop.permute.xlu1 %2506  ;;  %v2058_v56 = vpop.permute.xlu0 %2057 }
 0x305   : > { %2599 = vst.msk [vmem:[#allocation2 + $0x110] sm:$0xf] %vm1854_vm15, %v2507_v39  ;;  %v2217_v59 = vpop.permute.xlu2 %2216 }
 0x306   : > { %2309 = vst.msk [vmem:[#allocation3 + $0x90] sm:$0xf] %vm1854_vm15, %v2217_v59  ;;  %v1817_v25 = vpop.f32.mrf.mxu3 }
 0x307   : > { %2149 = vst.msk [vmem:[#allocation2 + $0x94] sm:$0xf] %vm1854_vm15, %v2058_v56  ;;  %v1818_v37 = vadd.f32 %v1817_v25, %v13612_v21 }
 0x309   : > { %v14367_v49 = vpack.c.bf16 %v1818_v37, %v1818_v37 }
 0x30a   : > { %2262 = vrot.lane.b32.xlu0 %v14157_v30, %s12273_s12  ;;  %2260 = vrot.lane.b32.xlu1 %v14131_v42, %s12273_s12 }
 0x30b   : > { %18122 = vst [vmem:[#allocation82_spill] sm:$0xff] %v14367_v49  ;;  %2258 = vrot.lane.b32.xlu2 %v14104_v33, %s12273_s12 }
 0x30c   : > { %2013 = vst.msk [vmem:[#allocation4 + $0x78] sm:$0xf] %vm1854_vm15, %v14367_v49  ;;  %v2104_v39 = vpop.permute.xlu1 %2103  ;;  %v2509_v59 = vpop.permute.xlu0 %2508 }
 0x30d   : > { %v2636_v27 = vpop.permute.xlu2 %2635  ;;  %2172 = vst.msk [vmem:[#allocation2 + $0xf0] sm:$0xf] %vm1854_vm15, %v2104_v39 }
 0x30e   : > { %2728 = vst.msk [vmem:[#allocation3 + $0x110] sm:$0xf] %vm1854_vm15, %v2636_v27  ;;  %v1819_v56 = vpop.f32.mrf.mxu3 }
 0x30f   : > { %2600 = vst.msk [vmem:[#allocation2 + $0x114] sm:$0xf] %vm1854_vm15, %v2509_v59  ;;  %v1820_v25 = vadd.f32 %v1819_v56, %v13612_v21 }
 0x311   : > { %v14381_v37 = vpack.c.bf16 %v1820_v25, %v1820_v25 }
 0x312   : > { %2232 = vrot.lane.b32.xlu0 %v13957_v8, %s12273_s12  ;;  %2230 = vrot.lane.b32.xlu1 %v13929_v34, %s12273_s12 }
 0x313   : > { %2014 = vst.msk [vmem:[#allocation4 + $0x7c] sm:$0xf] %vm1854_vm15, %v14381_v37  ;;  %2228 = vrot.lane.b32.xlu2 %v13903_v52, %s12273_s12 }
 0x314   : > { %v2555_v27 = vpop.permute.xlu1 %2554  ;;  %v2106_v39 = vpop.permute.xlu0 %2105 }
 0x315   : > { %v2380_v43 = vpop.permute.xlu2 %2379  ;;  %2623 = vst.msk [vmem:[#allocation2 + $0x170] sm:$0xf] %vm1854_vm15, %v2555_v27 }
 0x316   : > { %2471 = vst.msk [vmem:[#allocation4 + $0x94] sm:$0xf] %vm1854_vm15, %v2380_v43 }
 0x317   : > { %2173 = vst.msk [vmem:[#allocation2 + $0xf4] sm:$0xf] %vm1854_vm15, %v2106_v39 }
 0x31a   : > { %2651 = vrot.lane.b32.xlu0 %v13957_v8, %s12274_s23  ;;  %2649 = vrot.lane.b32.xlu1 %v13929_v34, %s12274_s23 }
 0x31b   : > { %2647 = vrot.lane.b32.xlu2 %v13903_v52, %s12274_s23 }
 0x31c   : > { %v2219_v21 = vpop.permute.xlu1 %2218  ;;  %v2557_v59 = vpop.permute.xlu0 %2556 }
 0x31d   : > { %v2060_v56 = vpop.permute.xlu2 %2059  ;;  %2310 = vst.msk [vmem:[#allocation3 + $0x94] sm:$0xf] %vm1854_vm15, %v2219_v21 }
 0x31e   : > { %2150 = vst.msk [vmem:[#allocation2 + $0x98] sm:$0xf] %vm1854_vm15, %v2060_v56 }
 0x31f   : > { %2624 = vst.msk [vmem:[#allocation2 + $0x174] sm:$0xf] %vm1854_vm15, %v2557_v59 }
 0x322   : > { %2395 = vrot.lane.b32.xlu0 %v14003_v2, %s12273_s12  ;;  %2393 = vrot.lane.b32.xlu1 %v13977_v46, %s12273_s12 }
 0x323   : > { %2391 = vrot.lane.b32.xlu2 %v13950_v23, %s12273_s12 }
 0x324   : > { %v2638_v43 = vpop.permute.xlu1 %2637  ;;  %v2221_v25 = vpop.permute.xlu0 %2220 }
 0x325   : > { %v2511_v27 = vpop.permute.xlu2 %2510  ;;  %2729 = vst.msk [vmem:[#allocation3 + $0x114] sm:$0xf] %vm1854_vm15, %v2638_v43 }
 0x326   : > { %2601 = vst.msk [vmem:[#allocation2 + $0x118] sm:$0xf] %vm1854_vm15, %v2511_v27 }
 0x327   : > { %2311 = vst.msk [vmem:[#allocation3 + $0x98] sm:$0xf] %vm1854_vm15, %v2221_v25 }
 0x32a   : > { %2075 = vrot.lane.b32.xlu0 %v14008_v14, %s12273_s12  ;;  %2073 = vrot.lane.b32.xlu1 %v13981_v7, %s12273_s12 }
 0x32b   : > { %2071 = vrot.lane.b32.xlu2 %v13955_v26, %s12273_s12 }
 0x32c   : > { %v2382_v39 = vpop.permute.xlu1 %2381  ;;  %v2640_v21 = vpop.permute.xlu0 %2639 }
 0x32d   : > { %2472 = vst.msk [vmem:[#allocation4 + $0x98] sm:$0xf] %vm1854_vm15, %v2382_v39  ;;  %v2108_v59 = vpop.permute.xlu2 %2107 }
 0x32e   : > { %2174 = vst.msk [vmem:[#allocation2 + $0xf8] sm:$0xf] %vm1854_vm15, %v2108_v59 }
 0x32f   : > { %2730 = vst.msk [vmem:[#allocation3 + $0x118] sm:$0xf] %vm1854_vm15, %v2640_v21 }
 0x332   : > { %2526 = vrot.lane.b32.xlu0 %v14008_v14, %s12274_s23  ;;  %2524 = vrot.lane.b32.xlu1 %v13981_v7, %s12274_s23 }
 0x333   : > { %2522 = vrot.lane.b32.xlu2 %v13955_v26, %s12274_s23 }
 0x334   : > { %v2062_v56 = vpop.permute.xlu1 %2061  ;;  %v2384_v43 = vpop.permute.xlu0 %2383 }
 0x335   : > { %2151 = vst.msk [vmem:[#allocation2 + $0x9c] sm:$0xf] %vm1854_vm15, %v2062_v56  ;;  %v2559_v25 = vpop.permute.xlu2 %2558 }
 0x336   : > { %2625 = vst.msk [vmem:[#allocation2 + $0x178] sm:$0xf] %vm1854_vm15, %v2559_v25 }
 0x337   : > { %2473 = vst.msk [vmem:[#allocation4 + $0x9c] sm:$0xf] %vm1854_vm15, %v2384_v43 }
 0x33a   : > { %2268 = vrot.lane.b32.xlu0 %v14238_v19, %s12273_s12  ;;  %2266 = vrot.lane.b32.xlu1 %v14211_v62, %s12273_s12 }
 0x33b   : > { %2264 = vrot.lane.b32.xlu2 %v14184_v57, %s12273_s12 }
 0x33c   : > { %v2513_v27 = vpop.permute.xlu1 %2512  ;;  %v2064_v39 = vpop.permute.xlu0 %2063 }
 0x33d   : > { %2602 = vst.msk [vmem:[#allocation2 + $0x11c] sm:$0xf] %vm1854_vm15, %v2513_v27  ;;  %v2223_v21 = vpop.permute.xlu2 %2222 }
 0x33e   : > { %2312 = vst.msk [vmem:[#allocation3 + $0x9c] sm:$0xf] %vm1854_vm15, %v2223_v21 }
 0x33f   : > { %2152 = vst.msk [vmem:[#allocation2 + $0xa0] sm:$0xf] %vm1854_vm15, %v2064_v39 }
 0x342   : > { %2238 = vrot.lane.b32.xlu0 %v14038_v10, %s12273_s12  ;;  %2236 = vrot.lane.b32.xlu1 %v14010_v47, %s12273_s12 }
 0x343   : > { %2234 = vrot.lane.b32.xlu2 %v13983_v48, %s12273_s12 }
 0x344   : > { %v2110_v59 = vpop.permute.xlu1 %2109  ;;  %v2515_v56 = vpop.permute.xlu0 %2514 }
 0x345   : > { %2175 = vst.msk [vmem:[#allocation2 + $0xfc] sm:$0xf] %vm1854_vm15, %v2110_v59  ;;  %v2642_v43 = vpop.permute.xlu2 %2641 }
 0x346   : > { %2731 = vst.msk [vmem:[#allocation3 + $0x11c] sm:$0xf] %vm1854_vm15, %v2642_v43 }
 0x347   : > { %2603 = vst.msk [vmem:[#allocation2 + $0x120] sm:$0xf] %vm1854_vm15, %v2515_v56 }
 0x34a   : > { %2657 = vrot.lane.b32.xlu0 %v14038_v10, %s12274_s23  ;;  %2655 = vrot.lane.b32.xlu1 %v14010_v47, %s12274_s23 }
 0x34b   : > { %2653 = vrot.lane.b32.xlu2 %v13983_v48, %s12274_s23 }
 0x34c   : > { %v2561_v25 = vpop.permute.xlu1 %2560  ;;  %v2257_v27 = vpop.permute.xlu0 %2256 }
 0x34d   : > { %2626 = vst.msk [vmem:[#allocation2 + $0x17c] sm:$0xf] %vm1854_vm15, %v2561_v25  ;;  %v2386_v39 = vpop.permute.xlu2 %2385 }
 0x34e   : > { %2474 = vst.msk [vmem:[#allocation4 + $0xa0] sm:$0xf] %vm1854_vm15, %v2386_v39 }
 0x34f   : > { %2329 = vst.msk [vmem:[#allocation3 + $0xe0] sm:$0xf] %vm1854_vm15, %v2257_v27 }
 0x352   : > { %2401 = vrot.lane.b32.xlu0 %v14088_v22, %s12273_s12  ;;  %2399 = vrot.lane.b32.xlu1 %v14060_v28, %s12273_s12 }
 0x353   : > { %2397 = vrot.lane.b32.xlu2 %v14032_v51, %s12273_s12 }
 0x354   : > { %v2225_v21 = vpop.permute.xlu1 %2224  ;;  %v2227_v59 = vpop.permute.xlu0 %2226 }
 0x355   : > { %2313 = vst.msk [vmem:[#allocation3 + $0xa0] sm:$0xf] %vm1854_vm15, %v2225_v21  ;;  %v2066_v56 = vpop.permute.xlu2 %2065 }
 0x356   : > { %2153 = vst.msk [vmem:[#allocation2 + $0xa4] sm:$0xf] %vm1854_vm15, %v2066_v56 }
 0x357   : > { %2314 = vst.msk [vmem:[#allocation3 + $0xa4] sm:$0xf] %vm1854_vm15, %v2227_v59 }
 0x35a   : > { %2081 = vrot.lane.b32.xlu0 %v14092_v4, %s12273_s12  ;;  %2079 = vrot.lane.b32.xlu1 %v14064_v53, %s12273_s12 }
 0x35b   : > { %2077 = vrot.lane.b32.xlu2 %v14036_v38, %s12273_s12 }
 0x35c   : > { %v2644_v43 = vpop.permute.xlu1 %2643  ;;  %v2646_v25 = vpop.permute.xlu0 %2645 }
 0x35d   : > { %2732 = vst.msk [vmem:[#allocation3 + $0x120] sm:$0xf] %vm1854_vm15, %v2644_v43  ;;  %v2517_v27 = vpop.permute.xlu2 %2516 }
 0x35e   : > { %2604 = vst.msk [vmem:[#allocation2 + $0x124] sm:$0xf] %vm1854_vm15, %v2517_v27 }
 0x35f   : > { %2733 = vst.msk [vmem:[#allocation3 + $0x124] sm:$0xf] %vm1854_vm15, %v2646_v25 }
 0x362   : > { %2532 = vrot.lane.b32.xlu0 %v14092_v4, %s12274_s23  ;;  %2530 = vrot.lane.b32.xlu1 %v14064_v53, %s12274_s23 }
 0x363   : > { %2528 = vrot.lane.b32.xlu2 %v14036_v38, %s12274_s23 }
 0x364   : > { %v2388_v39 = vpop.permute.xlu1 %2387  ;;  %v2390_v21 = vpop.permute.xlu0 %2389 }
 0x365   : > { %2475 = vst.msk [vmem:[#allocation4 + $0xa4] sm:$0xf] %vm1854_vm15, %v2388_v39  ;;  %v2259_v59 = vpop.permute.xlu2 %2258 }
 0x366   : > { %2330 = vst.msk [vmem:[#allocation3 + $0xe4] sm:$0xf] %vm1854_vm15, %v2259_v59 }
 0x367   : > { %2476 = vst.msk [vmem:[#allocation4 + $0xa8] sm:$0xf] %vm1854_vm15, %v2390_v21 }
 0x36a   : > { %2419 = vrot.lane.b32.xlu0 %v14297_v50, %s12273_s12  ;;  %2417 = vrot.lane.b32.xlu1 %v14283_v12, %s12273_s12 }
 0x36b   : > { %2270 = vrot.lane.b32.xlu2 %v14265_v29, %s12273_s12 }
 0x36c   : > { %v2068_v56 = vpop.permute.xlu1 %2067  ;;  %v2070_v43 = vpop.permute.xlu0 %2069 }
 0x36d   : > { %2154 = vst.msk [vmem:[#allocation2 + $0xa8] sm:$0xf] %vm1854_vm15, %v2068_v56  ;;  %v2229_v25 = vpop.permute.xlu2 %2228 }
 0x36e   : > { %2315 = vst.msk [vmem:[#allocation3 + $0xa8] sm:$0xf] %vm1854_vm15, %v2229_v25 }
 0x36f   : > { %2155 = vst.msk [vmem:[#allocation2 + $0xac] sm:$0xf] %vm1854_vm15, %v2070_v43 }
 0x372   : > { %2244 = vrot.lane.b32.xlu0 %v14121_v58, %s12273_s12  ;;  %2242 = vrot.lane.b32.xlu1 %v14094_v16, %s12273_s12 }
 0x373   : > { %2240 = vrot.lane.b32.xlu2 %v14066_v35, %s12273_s12 }
 0x374   : > { %v2519_v27 = vpop.permute.xlu1 %2518  ;;  %v2521_v39 = vpop.permute.xlu0 %2520 }
 0x375   : > { %2605 = vst.msk [vmem:[#allocation2 + $0x128] sm:$0xf] %vm1854_vm15, %v2519_v27  ;;  %v2648_v21 = vpop.permute.xlu2 %2647 }
 0x376   : > { %2734 = vst.msk [vmem:[#allocation3 + $0x128] sm:$0xf] %vm1854_vm15, %v2648_v21 }
 0x377   : > { %2606 = vst.msk [vmem:[#allocation2 + $0x12c] sm:$0xf] %vm1854_vm15, %v2521_v39 }
 0x37a   : > { %2663 = vrot.lane.b32.xlu0 %v14121_v58, %s12274_s23  ;;  %2661 = vrot.lane.b32.xlu1 %v14094_v16, %s12274_s23 }
 0x37b   : > { %2659 = vrot.lane.b32.xlu2 %v14066_v35, %s12274_s23 }
 0x37c   : > { %v2261_v59 = vpop.permute.xlu1 %2260  ;;  %v2263_v56 = vpop.permute.xlu0 %2262 }
 0x37d   : > { %2331 = vst.msk [vmem:[#allocation3 + $0xe8] sm:$0xf] %vm1854_vm15, %v2261_v59  ;;  %v2392_v43 = vpop.permute.xlu2 %2391 }
 0x37e   : > { %2477 = vst.msk [vmem:[#allocation4 + $0xac] sm:$0xf] %vm1854_vm15, %v2392_v43 }
 0x37f   : > { %2332 = vst.msk [vmem:[#allocation3 + $0xec] sm:$0xf] %vm1854_vm15, %v2263_v56 }
 0x382   : > { %2407 = vrot.lane.b32.xlu0 %v14168_v55, %s12273_s12  ;;  %2405 = vrot.lane.b32.xlu1 %v14142_v15, %s12273_s12 }
 0x383   : > { %2403 = vrot.lane.b32.xlu2 %v14115_v45, %s12273_s12 }
 0x384   : > { %v2231_v25 = vpop.permute.xlu1 %2230  ;;  %v2233_v27 = vpop.permute.xlu0 %2232 }
 0x385   : > { %2316 = vst.msk [vmem:[#allocation3 + $0xac] sm:$0xf] %vm1854_vm15, %v2231_v25  ;;  %v2072_v39 = vpop.permute.xlu2 %2071 }
 0x386   : > { %2156 = vst.msk [vmem:[#allocation2 + $0xb0] sm:$0xf] %vm1854_vm15, %v2072_v39 }
 0x387   : > { %2317 = vst.msk [vmem:[#allocation3 + $0xb0] sm:$0xf] %vm1854_vm15, %v2233_v27 }
 0x38a   : > { %2087 = vrot.lane.b32.xlu0 %v14172_v18, %s12273_s12  ;;  %2085 = vrot.lane.b32.xlu1 %v14146_v24, %s12273_s12 }
 0x38b   : > { %2083 = vrot.lane.b32.xlu2 %v14119_v9, %s12273_s12 }
 0x38c   : > { %v2650_v21 = vpop.permute.xlu1 %2649  ;;  %v2652_v59 = vpop.permute.xlu0 %2651 }
 0x38d   : > { %2735 = vst.msk [vmem:[#allocation3 + $0x12c] sm:$0xf] %vm1854_vm15, %v2650_v21  ;;  %v2523_v56 = vpop.permute.xlu2 %2522 }
 0x38e   : > { %2607 = vst.msk [vmem:[#allocation2 + $0x130] sm:$0xf] %vm1854_vm15, %v2523_v56 }
 0x38f   : > { %2736 = vst.msk [vmem:[#allocation3 + $0x130] sm:$0xf] %vm1854_vm15, %v2652_v59 }
 0x392   : > { %2538 = vrot.lane.b32.xlu0 %v14172_v18, %s12274_s23  ;;  %2536 = vrot.lane.b32.xlu1 %v14146_v24, %s12274_s23 }
 0x393   : > { %2534 = vrot.lane.b32.xlu2 %v14119_v9, %s12274_s23 }
 0x394   : > { %v2394_v43 = vpop.permute.xlu1 %2393  ;;  %v2396_v25 = vpop.permute.xlu0 %2395 }
 0x395   : > { %2478 = vst.msk [vmem:[#allocation4 + $0xb0] sm:$0xf] %vm1854_vm15, %v2394_v43  ;;  %v2265_v27 = vpop.permute.xlu2 %2264 }
 0x396   : > { %2333 = vst.msk [vmem:[#allocation3 + $0xf0] sm:$0xf] %vm1854_vm15, %v2265_v27 }
 0x397   : > { %2479 = vst.msk [vmem:[#allocation4 + $0xb4] sm:$0xf] %vm1854_vm15, %v2396_v25 }
 0x39a   : > { %2425 = vrot.lane.b32.xlu0 %v14339_v11, %s12273_s12  ;;  %2423 = vrot.lane.b32.xlu1 %v14325_v17, %s12273_s12 }
 0x39b   : > { %2421 = vrot.lane.b32.xlu2 %v14311_v0, %s12273_s12 }
 0x39c   : > { %v2074_v39 = vpop.permute.xlu1 %2073  ;;  %v2076_v21 = vpop.permute.xlu0 %2075 }
 0x39d   : > { %2157 = vst.msk [vmem:[#allocation2 + $0xb4] sm:$0xf] %vm1854_vm15, %v2074_v39  ;;  %v2235_v59 = vpop.permute.xlu2 %2234 }
 0x39e   : > { %2318 = vst.msk [vmem:[#allocation3 + $0xb4] sm:$0xf] %vm1854_vm15, %v2235_v59  ;;  %v18123_v59 = vld [vmem:[#allocation77_spill] sm:$0xff] }
 0x39f   : > { %2158 = vst.msk [vmem:[#allocation2 + $0xb8] sm:$0xf] %vm1854_vm15, %v2076_v21 }
 0x3a2   : > { %2250 = vrot.lane.b32.xlu0 %v14201_v6, %s12273_s12  ;;  %2248 = vrot.lane.b32.xlu1 %v14174_v31, %s12273_s12 }
 0x3a3   : > { %2246 = vrot.lane.b32.xlu2 %v14148_v54, %s12273_s12 }
 0x3a4   : > { %v2525_v56 = vpop.permute.xlu1 %2524  ;;  %v2527_v43 = vpop.permute.xlu0 %2526 }
 0x3a5   : > { %2608 = vst.msk [vmem:[#allocation2 + $0x134] sm:$0xf] %vm1854_vm15, %v2525_v56  ;;  %v2654_v25 = vpop.permute.xlu2 %2653  ;;  %v18124_v56 = vld [vmem:[#allocation75_spill] sm:$0xff] }
 0x3a6   : > { %2737 = vst.msk [vmem:[#allocation3 + $0x134] sm:$0xf] %vm1854_vm15, %v2654_v25 }
 0x3a7   : > { %2609 = vst.msk [vmem:[#allocation2 + $0x138] sm:$0xf] %vm1854_vm15, %v2527_v43 }
 0x3aa   : > { %2669 = vrot.lane.b32.xlu0 %v14201_v6, %s12274_s23  ;;  %2667 = vrot.lane.b32.xlu1 %v14174_v31, %s12274_s23 }
 0x3ab   : > { %2665 = vrot.lane.b32.xlu2 %v14148_v54, %s12274_s23 }
 0x3ac   : > { %v2267_v27 = vpop.permute.xlu1 %2266  ;;  %v2269_v39 = vpop.permute.xlu0 %2268 }
 0x3ad   : > { %2334 = vst.msk [vmem:[#allocation3 + $0xf4] sm:$0xf] %vm1854_vm15, %v2267_v27  ;;  %v2398_v21 = vpop.permute.xlu2 %2397  ;;  %v18125_v27 = vld [vmem:[#allocation78_spill] sm:$0xff] }
 0x3ae   : > { %2480 = vst.msk [vmem:[#allocation4 + $0xb8] sm:$0xf] %vm1854_vm15, %v2398_v21 }
 0x3af   : > { %2335 = vst.msk [vmem:[#allocation3 + $0xf8] sm:$0xf] %vm1854_vm15, %v2269_v39  ;;  %v18126_v39 = vld [vmem:[#allocation76_spill] sm:$0xff] }
 0x3b2   : > { %2413 = vrot.lane.b32.xlu0 %v14249_v1, %s12273_s12  ;;  %2411 = vrot.lane.b32.xlu1 %v18123_v59, %s12273_s12 }
 0x3b3   : > { %2409 = vrot.lane.b32.xlu2 %v18124_v56, %s12273_s12 }
 0x3b4   : > { %v2237_v43 = vpop.permute.xlu1 %2236  ;;  %v2239_v25 = vpop.permute.xlu0 %2238 }
 0x3b5   : > { %2319 = vst.msk [vmem:[#allocation3 + $0xb8] sm:$0xf] %vm1854_vm15, %v2237_v43  ;;  %v2078_v54 = vpop.permute.xlu2 %2077 }
 0x3b6   : > { %2159 = vst.msk [vmem:[#allocation2 + $0xbc] sm:$0xf] %vm1854_vm15, %v2078_v54 }
 0x3b7   : > { %2320 = vst.msk [vmem:[#allocation3 + $0xbc] sm:$0xf] %vm1854_vm15, %v2239_v25 }
 0x3ba   : > { %2093 = vrot.lane.b32.xlu0 %v14253_v61, %s12273_s12  ;;  %2091 = vrot.lane.b32.xlu1 %v18125_v27, %s12273_s12 }
 0x3bb   : > { %2089 = vrot.lane.b32.xlu2 %v18126_v39, %s12273_s12 }
 0x3bc   : > { %v2656_v21 = vpop.permute.xlu1 %2655  ;;  %v2658_v35 = vpop.permute.xlu0 %2657 }
 0x3bd   : > { %2738 = vst.msk [vmem:[#allocation3 + $0x138] sm:$0xf] %vm1854_vm15, %v2656_v21  ;;  %v2529_v31 = vpop.permute.xlu2 %2528 }
 0x3be   : > { %2610 = vst.msk [vmem:[#allocation2 + $0x13c] sm:$0xf] %vm1854_vm15, %v2529_v31 }
 0x3bf   : > { %2739 = vst.msk [vmem:[#allocation3 + $0x13c] sm:$0xf] %vm1854_vm15, %v2658_v35 }
 0x3c2   : > { %2544 = vrot.lane.b32.xlu0 %v14253_v61, %s12274_s23  ;;  %2542 = vrot.lane.b32.xlu1 %v18125_v27, %s12274_s23 }
 0x3c3   : > { %2540 = vrot.lane.b32.xlu2 %v18126_v39, %s12274_s23 }
 0x3c4   : > { %v2400_v54 = vpop.permute.xlu1 %2399  ;;  %v2402_v43 = vpop.permute.xlu0 %2401 }
 0x3c5   : > { %2481 = vst.msk [vmem:[#allocation4 + $0xbc] sm:$0xf] %vm1854_vm15, %v2400_v54  ;;  %v2271_v25 = vpop.permute.xlu2 %2270 }
 0x3c6   : > { %2336 = vst.msk [vmem:[#allocation3 + $0xfc] sm:$0xf] %vm1854_vm15, %v2271_v25 }
 0x3c7   : > { %2482 = vst.msk [vmem:[#allocation4 + $0xc0] sm:$0xf] %vm1854_vm15, %v2402_v43 }
 0x3ca   : > { %2429 = vrot.lane.b32.xlu1 %v14367_v49, %s12273_s12  ;;  %2675 = vrot.lane.b32.xlu0 %v14076_v13, %s12274_s23 }
 0x3cb   : > { %2427 = vrot.lane.b32.xlu2 %v14353_v3, %s12273_s12 }
 0x3cc   : > { %v2080_v35 = vpop.permute.xlu1 %2079  ;;  %v2082_v31 = vpop.permute.xlu0 %2081 }
 0x3cd   : > { %2160 = vst.msk [vmem:[#allocation2 + $0xc0] sm:$0xf] %vm1854_vm15, %v2080_v35  ;;  %v2241_v21 = vpop.permute.xlu2 %2240 }
 0x3ce   : > { %2321 = vst.msk [vmem:[#allocation3 + $0xc0] sm:$0xf] %vm1854_vm15, %v2241_v21 }
 0x3cf   : > { %2161 = vst.msk [vmem:[#allocation2 + $0xc4] sm:$0xf] %vm1854_vm15, %v2082_v31 }
 0x3d2   : > { %2254 = vrot.lane.b32.xlu1 %v14255_v20, %s12273_s12  ;;  %2431 = vrot.lane.b32.xlu0 %v14381_v37, %s12273_s12 }
 0x3d3   : > { %2252 = vrot.lane.b32.xlu2 %v14228_v60, %s12273_s12 }
 0x3d4   : > { %v2531_v54 = vpop.permute.xlu1 %2530  ;;  %v2533_v43 = vpop.permute.xlu0 %2532 }
 0x3d5   : > { %2611 = vst.msk [vmem:[#allocation2 + $0x140] sm:$0xf] %vm1854_vm15, %v2531_v54  ;;  %v2660_v25 = vpop.permute.xlu2 %2659 }
 0x3d6   : > { %2740 = vst.msk [vmem:[#allocation3 + $0x140] sm:$0xf] %vm1854_vm15, %v2660_v25 }
 0x3d7   : > { %2612 = vst.msk [vmem:[#allocation2 + $0x144] sm:$0xf] %vm1854_vm15, %v2533_v43 }
 0x3da   : > { %2673 = vrot.lane.b32.xlu1 %v14255_v20, %s12274_s23  ;;  %2681 = vrot.lane.b32.xlu0 %v14157_v30, %s12274_s23 }
 0x3db   : > { %2671 = vrot.lane.b32.xlu2 %v14228_v60, %s12274_s23 }
 0x3dc   : > { %v2418_v35 = vpop.permute.xlu1 %2417  ;;  %v2420_v31 = vpop.permute.xlu0 %2419 }
 0x3dd   : > { %2490 = vst.msk [vmem:[#allocation4 + $0xe0] sm:$0xf] %vm1854_vm15, %v2418_v35  ;;  %v2404_v21 = vpop.permute.xlu2 %2403  ;;  %v18127_v35 = vld [vmem:[#allocation45_spill] sm:$0xff] }
 0x3de   : > { %2483 = vst.msk [vmem:[#allocation4 + $0xc4] sm:$0xf] %vm1854_vm15, %v2404_v21 }
 0x3df   : > { %2491 = vst.msk [vmem:[#allocation4 + $0xe4] sm:$0xf] %vm1854_vm15, %v2420_v31 }
 0x3e2   : > { %2679 = vrot.lane.b32.xlu1 %v14131_v42, %s12274_s23  ;;  %2687 = vrot.lane.b32.xlu0 %v14238_v19, %s12274_s23 }
 0x3e3   : > { %2415 = vrot.lane.b32.xlu2 %v14274_v5, %s12273_s12 }
 0x3e4   : > { %v2243_v54 = vpop.permute.xlu1 %2242  ;;  %v2245_v43 = vpop.permute.xlu0 %2244 }
 0x3e5   : > { %2322 = vst.msk [vmem:[#allocation3 + $0xc4] sm:$0xf] %vm1854_vm15, %v2243_v54  ;;  %v2084_v25 = vpop.permute.xlu2 %2083  ;;  %v18128_v54 = vld [vmem:[#allocation48_spill] sm:$0xff] }
 0x3e6   : > { %2162 = vst.msk [vmem:[#allocation2 + $0xc8] sm:$0xf] %vm1854_vm15, %v2084_v25 }
 0x3e7   : > { %2323 = vst.msk [vmem:[#allocation3 + $0xc8] sm:$0xf] %vm1854_vm15, %v2245_v43  ;;  %v18129_v43 = vld [vmem:[#allocation40_spill] sm:$0xff] }
 0x3ea   : > { %2685 = vrot.lane.b32.xlu1 %v14211_v62, %s12274_s23  ;;  %2758 = vrot.lane.b32.xlu0 %v18127_v35, %s12274_s23 }
 0x3eb   : > { %2677 = vrot.lane.b32.xlu2 %v14104_v33, %s12274_s23 }
 0x3ec   : > { %v2662_v31 = vpop.permute.xlu1 %2661  ;;  %v2664_v21 = vpop.permute.xlu0 %2663 }
 0x3ed   : > { %2741 = vst.msk [vmem:[#allocation3 + $0x144] sm:$0xf] %vm1854_vm15, %v2662_v31  ;;  %v2535_v60 = vpop.permute.xlu2 %2534  ;;  %v18131_v31 = vld [vmem:[#allocation57_spill] sm:$0xff] }
 0x3ee   : > { %2613 = vst.msk [vmem:[#allocation2 + $0x148] sm:$0xf] %vm1854_vm15, %v2535_v60  ;;  %v18130_v60 = vld [vmem:[#allocation53_spill] sm:$0xff] }
 0x3ef   : > { %2742 = vst.msk [vmem:[#allocation3 + $0x148] sm:$0xf] %vm1854_vm15, %v2664_v21 }
 0x3f2   : > { %2756 = vrot.lane.b32.xlu1 %v18128_v54, %s12274_s23  ;;  %2764 = vrot.lane.b32.xlu0 %v18129_v43, %s12274_s23 }
 0x3f3   : > { %2683 = vrot.lane.b32.xlu2 %v14184_v57, %s12274_s23 }
 0x3f4   : > { %v2406_v25 = vpop.permute.xlu1 %2405  ;;  %v2408_v33 = vpop.permute.xlu0 %2407 }
 0x3f5   : > { %2484 = vst.msk [vmem:[#allocation4 + $0xc8] sm:$0xf] %vm1854_vm15, %v2406_v25  ;;  %v2422_v35 = vpop.permute.xlu2 %2421 }
 0x3f6   : > { %2492 = vst.msk [vmem:[#allocation4 + $0xe8] sm:$0xf] %vm1854_vm15, %v2422_v35  ;;  %v18133_v35 = vld [vmem:[#allocation49_spill] sm:$0xff] }
 0x3f7   : > { %2485 = vst.msk [vmem:[#allocation4 + $0xcc] sm:$0xf] %vm1854_vm15, %v2408_v33  ;;  %v18132_v33 = vld [vmem:[#allocation55_spill] sm:$0xff] }
 0x3fa   : > { %2762 = vrot.lane.b32.xlu1 %v18130_v60, %s12274_s23  ;;  %2770 = vrot.lane.b32.xlu0 %v18131_v31, %s12274_s23 }
 0x3fb   : > { %2689 = vrot.lane.b32.xlu2 %v14265_v29, %s12274_s23 }
 0x3fc   : > { %v2086_v21 = vpop.permute.xlu1 %2085  ;;  %v2088_v57 = vpop.permute.xlu0 %2087 }
 0x3fd   : > { %2163 = vst.msk [vmem:[#allocation2 + $0xcc] sm:$0xf] %vm1854_vm15, %v2086_v21  ;;  %v2247_v43 = vpop.permute.xlu2 %2246 }
 0x3fe   : > { %2324 = vst.msk [vmem:[#allocation3 + $0xcc] sm:$0xf] %vm1854_vm15, %v2247_v43 }
 0x3ff   : > { %2164 = vst.msk [vmem:[#allocation2 + $0xd0] sm:$0xf] %vm1854_vm15, %v2088_v57  ;;  %v18134_v57 = vld [vmem:[#allocation44_spill] sm:$0xff] }
 0x402   : > { %2768 = vrot.lane.b32.xlu1 %v18132_v33, %s12274_s23  ;;  %2776 = vrot.lane.b32.xlu0 %v13923_v32, %s12274_s23 }
 0x403   : > { %2760 = vrot.lane.b32.xlu2 %v18133_v35, %s12274_s23 }
 0x404   : > { %v2537_v25 = vpop.permute.xlu1 %2536  ;;  %v2539_v29 = vpop.permute.xlu0 %2538 }
 0x405   : > { %2614 = vst.msk [vmem:[#allocation2 + $0x14c] sm:$0xf] %vm1854_vm15, %v2537_v25  ;;  %v2666_v31 = vpop.permute.xlu2 %2665 }
 0x406   : > { %2743 = vst.msk [vmem:[#allocation3 + $0x14c] sm:$0xf] %vm1854_vm15, %v2666_v31 }
 0x407   : > { %2615 = vst.msk [vmem:[#allocation2 + $0x150] sm:$0xf] %vm1854_vm15, %v2539_v29 }
 0x40a   : > { %2774 = vrot.lane.b32.xlu1 %v13898_v44, %s12274_s23  ;;  %2782 = vrot.lane.b32.xlu0 %v14003_v2, %s12274_s23 }
 0x40b   : > { %2766 = vrot.lane.b32.xlu2 %v18134_v57, %s12274_s23 }
 0x40c   : > { %v2424_v43 = vpop.permute.xlu1 %2423  ;;  %v2426_v21 = vpop.permute.xlu0 %2425 }
 0x40d   : > { %2493 = vst.msk [vmem:[#allocation4 + $0xec] sm:$0xf] %vm1854_vm15, %v2424_v43  ;;  %v2410_v35 = vpop.permute.xlu2 %2409 }
 0x40e   : > { %2486 = vst.msk [vmem:[#allocation4 + $0xd0] sm:$0xf] %vm1854_vm15, %v2410_v35 }
 0x40f   : > { %2494 = vst.msk [vmem:[#allocation4 + $0xf0] sm:$0xf] %vm1854_vm15, %v2426_v21 }
 0x412   : > { %2780 = vrot.lane.b32.xlu1 %v13977_v46, %s12274_s23  ;;  %2788 = vrot.lane.b32.xlu0 %v14088_v22, %s12274_s23 }
 0x413   : > { %2772 = vrot.lane.b32.xlu2 %v13874_v36, %s12274_s23 }
 0x414   : > { %v2249_v29 = vpop.permute.xlu1 %2248  ;;  %v2251_v31 = vpop.permute.xlu0 %2250 }
 0x415   : > { %2325 = vst.msk [vmem:[#allocation3 + $0xd0] sm:$0xf] %vm1854_vm15, %v2249_v29  ;;  %v2090_v25 = vpop.permute.xlu2 %2089 }
 0x416   : > { %2165 = vst.msk [vmem:[#allocation2 + $0xd4] sm:$0xf] %vm1854_vm15, %v2090_v25 }
 0x417   : > { %2326 = vst.msk [vmem:[#allocation3 + $0xd4] sm:$0xf] %vm1854_vm15, %v2251_v31 }
 0x41a   : > { %2786 = vrot.lane.b32.xlu1 %v14060_v28, %s12274_s23  ;;  %2794 = vrot.lane.b32.xlu0 %v14168_v55, %s12274_s23 }
 0x41b   : > { %2778 = vrot.lane.b32.xlu2 %v13950_v23, %s12274_s23 }
 0x41c   : > { %v2668_v35 = vpop.permute.xlu1 %2667  ;;  %v2670_v43 = vpop.permute.xlu0 %2669 }
 0x41d   : > { %2744 = vst.msk [vmem:[#allocation3 + $0x150] sm:$0xf] %vm1854_vm15, %v2668_v35  ;;  %v2541_v21 = vpop.permute.xlu2 %2540 }
 0x41e   : > { %2616 = vst.msk [vmem:[#allocation2 + $0x154] sm:$0xf] %vm1854_vm15, %v2541_v21 }
 0x41f   : > { %2745 = vst.msk [vmem:[#allocation3 + $0x154] sm:$0xf] %vm1854_vm15, %v2670_v43 }
 0x422   : > { %2792 = vrot.lane.b32.xlu1 %v14142_v15, %s12274_s23  ;;  %2800 = vrot.lane.b32.xlu0 %v14249_v1, %s12274_s23 }
 0x423   : > { %2784 = vrot.lane.b32.xlu2 %v14032_v51, %s12274_s23 }
 0x424   : > { %v2412_v29 = vpop.permute.xlu1 %2411  ;;  %v2414_v31 = vpop.permute.xlu0 %2413 }
 0x425   : > { %2487 = vst.msk [vmem:[#allocation4 + $0xd4] sm:$0xf] %vm1854_vm15, %v2412_v29  ;;  %v2428_v25 = vpop.permute.xlu2 %2427 }
 0x426   : > { %2495 = vst.msk [vmem:[#allocation4 + $0xf4] sm:$0xf] %vm1854_vm15, %v2428_v25 }
 0x427   : > { %2488 = vst.msk [vmem:[#allocation4 + $0xd8] sm:$0xf] %vm1854_vm15, %v2414_v31 }
 0x42a   : > { %2798 = vrot.lane.b32.xlu1 %v18123_v59, %s12274_s23  ;;  %2806 = vrot.lane.b32.xlu0 %v14297_v50, %s12274_s23 }
 0x42b   : > { %2790 = vrot.lane.b32.xlu2 %v14115_v45, %s12274_s23 }
 0x42c   : > { %v2092_v35 = vpop.permute.xlu1 %2091  ;;  %v2094_v43 = vpop.permute.xlu0 %2093 }
 0x42d   : > { %2166 = vst.msk [vmem:[#allocation2 + $0xd8] sm:$0xf] %vm1854_vm15, %v2092_v35  ;;  %v2253_v21 = vpop.permute.xlu2 %2252 }
 0x42e   : > { %2327 = vst.msk [vmem:[#allocation3 + $0xd8] sm:$0xf] %vm1854_vm15, %v2253_v21 }
 0x42f   : > { %2167 = vst.msk [vmem:[#allocation2 + $0xdc] sm:$0xf] %vm1854_vm15, %v2094_v43 }
 0x432   : > { %2804 = vrot.lane.b32.xlu1 %v14283_v12, %s12274_s23  ;;  %2812 = vrot.lane.b32.xlu0 %v14339_v11, %s12274_s23 }
 0x433   : > { %2796 = vrot.lane.b32.xlu2 %v18124_v56, %s12274_s23 }
 0x434   : > { %v2543_v29 = vpop.permute.xlu1 %2542  ;;  %v2545_v31 = vpop.permute.xlu0 %2544 }
 0x435   : > { %2617 = vst.msk [vmem:[#allocation2 + $0x158] sm:$0xf] %vm1854_vm15, %v2543_v29  ;;  %v2672_v25 = vpop.permute.xlu2 %2671  ;;  %v18135_v29 = vld [vmem:[#allocation35_spill] sm:$0xff] }
 0x436   : > { %2746 = vst.msk [vmem:[#allocation3 + $0x158] sm:$0xf] %vm1854_vm15, %v2672_v25 }
 0x437   : > { %2618 = vst.msk [vmem:[#allocation2 + $0x15c] sm:$0xf] %vm1854_vm15, %v2545_v31 }
 0x43a   : > { %2810 = vrot.lane.b32.xlu1 %v14325_v17, %s12274_s23  ;;  %2818 = vrot.lane.b32.xlu0 %v14381_v37, %s12274_s23 }
 0x43b   : > { %2802 = vrot.lane.b32.xlu2 %v14274_v5, %s12274_s23 }
 0x43c   : > { %v2430_v35 = vpop.permute.xlu1 %2429  ;;  %v2676_v43 = vpop.permute.xlu0 %2675 }
 0x43d   : > { %2496 = vst.msk [vmem:[#allocation4 + $0xf8] sm:$0xf] %vm1854_vm15, %v2430_v35  ;;  %v2416_v21 = vpop.permute.xlu2 %2415 }
 0x43e   : > { %2489 = vst.msk [vmem:[#allocation4 + $0xdc] sm:$0xf] %vm1854_vm15, %v2416_v21  ;;  %v18137_v21 = vld [vmem:[#allocation43_spill] sm:$0xff] }
 0x43f   : > { %2748 = vst.msk [vmem:[#allocation3 + $0x160] sm:$0xf] %vm1854_vm15, %v2676_v43  ;;  %v18136_v43 = vld [vmem:[#allocation46_spill] sm:$0xff] }
 0x442   : > { %2816 = vrot.lane.b32.xlu1 %v14367_v49, %s12274_s23  ;;  %2889 = vrot.lane.b32.xlu0 %v18135_v29, %s12275_s14 }
 0x443   : > { %2808 = vrot.lane.b32.xlu2 %v14311_v0, %s12274_s23 }
 0x444   : > { %v2255_v31 = vpop.permute.xlu1 %2254  ;;  %v2432_v25 = vpop.permute.xlu0 %2431 }
 0x445   : > { %2328 = vst.msk [vmem:[#allocation3 + $0xdc] sm:$0xf] %vm1854_vm15, %v2255_v31  ;;  %v2678_v35 = vpop.permute.xlu2 %2677  ;;  %v18138_v31 = vld [vmem:[#allocation52_spill] sm:$0xff] }
 0x446   : > { %2749 = vst.msk [vmem:[#allocation3 + $0x164] sm:$0xf] %vm1854_vm15, %v2678_v35 }
 0x447   : > { %2497 = vst.msk [vmem:[#allocation4 + $0xfc] sm:$0xf] %vm1854_vm15, %v2432_v25  ;;  %v18139_v25 = vld [vmem:[#allocation51_spill] sm:$0xff] }
 0x44a   : > { %2887 = vrot.lane.b32.xlu1 %v18136_v43, %s12275_s14  ;;  %2895 = vrot.lane.b32.xlu0 %v18137_v21, %s12275_s14 }
 0x44b   : > { %2814 = vrot.lane.b32.xlu2 %v14353_v3, %s12274_s23 }
 0x44c   : > { %v2674_v29 = vpop.permute.xlu1 %2673  ;;  %v2682_v0 = vpop.permute.xlu0 %2681 }
 0x44d   : > { %2747 = vst.msk [vmem:[#allocation3 + $0x15c] sm:$0xf] %vm1854_vm15, %v2674_v29  ;;  %v2684_v49 = vpop.permute.xlu2 %2683 }
 0x44e   : > { %2752 = vst.msk [vmem:[#allocation3 + $0x170] sm:$0xf] %vm1854_vm15, %v2684_v49 }
 0x44f   : > { %2751 = vst.msk [vmem:[#allocation3 + $0x16c] sm:$0xf] %vm1854_vm15, %v2682_v0 }
 0x452   : > { %2893 = vrot.lane.b32.xlu1 %v18138_v31, %s12275_s14  ;;  %2901 = vrot.lane.b32.xlu0 %v13854_v40, %s12275_s14  ;;  %v18140_v40 = vld [vmem:[#allocation38_spill] sm:$0xff]  ;;  %v18141_v31 = vld [vmem:[#allocation63_spill] sm:$0xff] }
 0x453   : > { %2885 = vrot.lane.b32.xlu2 %v18139_v25, %s12275_s14 }
 0x454   : > { %v2680_v35 = vpop.permute.xlu1 %2679  ;;  %v2688_v43 = vpop.permute.xlu0 %2687 }
 0x455   : > { %2750 = vst.msk [vmem:[#allocation3 + $0x168] sm:$0xf] %vm1854_vm15, %v2680_v35  ;;  %v2690_v21 = vpop.permute.xlu2 %2689 }
 0x456   : > { %2755 = vst.msk [vmem:[#allocation3 + $0x17c] sm:$0xf] %vm1854_vm15, %v2690_v21 }
 0x457   : > { %2754 = vst.msk [vmem:[#allocation3 + $0x178] sm:$0xf] %vm1854_vm15, %v2688_v43 }
 0x45a   : > { %2899 = vrot.lane.b32.xlu1 %v13838_v41, %s12275_s14  ;;  %2907 = vrot.lane.b32.xlu0 %v13927_v63, %s12275_s14  ;;  %v18142_v41 = vld [vmem:[#allocation42_spill] sm:$0xff] }
 0x45b   : > { %2891 = vrot.lane.b32.xlu2 %v18140_v40, %s12275_s14 }
 0x45c   : > { %v2686_v0 = vpop.permute.xlu1 %2685  ;;  %v2759_v49 = vpop.permute.xlu0 %2758 }
 0x45d   : > { %2753 = vst.msk [vmem:[#allocation3 + $0x174] sm:$0xf] %vm1854_vm15, %v2686_v0  ;;  %v2761_v29 = vpop.permute.xlu2 %2760 }
 0x45e   : > { %2855 = vst.msk [vmem:[#allocation4 + $0x108] sm:$0xf] %vm1854_vm15, %v2761_v29  ;;  %v18145_v29 = vld [vmem:[#allocation62_spill] sm:$0xff] }
 0x45f   : > { %2854 = vst.msk [vmem:[#allocation4 + $0x104] sm:$0xf] %vm1854_vm15, %v2759_v49 }
 0x462   : > { %2905 = vrot.lane.b32.xlu1 %v18141_v31, %s12275_s14  ;;  %2913 = vrot.lane.b32.xlu0 %v14008_v14, %s12275_s14  ;;  %v18143_v14 = vld [vmem:[#allocation60_spill] sm:$0xff] }
 0x463   : > { %2897 = vrot.lane.b32.xlu2 %v18142_v41, %s12275_s14 }
 0x464   : > { %v2757_v63 = vpop.permute.xlu1 %2756  ;;  %v2765_v25 = vpop.permute.xlu0 %2764 }
 0x465   : > { %2853 = vst.msk [vmem:[#allocation4 + $0x100] sm:$0xf] %vm1854_vm15, %v2757_v63  ;;  %v2767_v35 = vpop.permute.xlu2 %2766  ;;  %v18147_v63 = vld [vmem:[#allocation66_spill] sm:$0xff] }
 0x466   : > { %2858 = vst.msk [vmem:[#allocation4 + $0x114] sm:$0xf] %vm1854_vm15, %v2767_v35  ;;  %v18149_v35 = vld [vmem:[#allocation59_spill] sm:$0xff] }
 0x467   : > { %2857 = vst.msk [vmem:[#allocation4 + $0x110] sm:$0xf] %vm1854_vm15, %v2765_v25  ;;  %v18148_v25 = vld [vmem:[#allocation47_spill] sm:$0xff] }
 0x46a   : > { %2911 = vrot.lane.b32.xlu1 %v13981_v7, %s12275_s14  ;;  %2919 = vrot.lane.b32.xlu0 %v14092_v4, %s12275_s14 }
 0x46b   : > { %2903 = vrot.lane.b32.xlu2 %v18143_v14, %s12275_s14 }
 0x46c   : > { %v2763_v43 = vpop.permute.xlu1 %2762  ;;  %v2771_v21 = vpop.permute.xlu0 %2770 }
 0x46d   : > { %2856 = vst.msk [vmem:[#allocation4 + $0x10c] sm:$0xf] %vm1854_vm15, %v2763_v43  ;;  %v2773_v40 = vpop.permute.xlu2 %2772 }
 0x46e   : > { %2861 = vst.msk [vmem:[#allocation4 + $0x120] sm:$0xf] %vm1854_vm15, %v2773_v40  ;;  %v18151_v40 = vld [vmem:[#allocation36_spill] sm:$0xff] }
 0x46f   : > { %2860 = vst.msk [vmem:[#allocation4 + $0x11c] sm:$0xf] %vm1854_vm15, %v2771_v21  ;;  %v18150_v21 = vld [vmem:[#allocation69_spill] sm:$0xff] }
 0x472   : > { %2917 = vrot.lane.b32.xlu1 %v14064_v53, %s12275_s14  ;;  %2925 = vrot.lane.b32.xlu0 %v14172_v18, %s12275_s14 }
 0x473   : > { %2909 = vrot.lane.b32.xlu2 %v13955_v26, %s12275_s14 }
 0x474   : > { %v2769_v7 = vpop.permute.xlu1 %2768  ;;  %v2777_v4 = vpop.permute.xlu0 %2776 }
 0x475   : > { %2859 = vst.msk [vmem:[#allocation4 + $0x118] sm:$0xf] %vm1854_vm15, %v2769_v7  ;;  %v2779_v0 = vpop.permute.xlu2 %2778  ;;  %v18152_v7 = vld [vmem:[#allocation65_spill] sm:$0xff] }
 0x476   : > { %2864 = vst.msk [vmem:[#allocation4 + $0x12c] sm:$0xf] %vm1854_vm15, %v2779_v0 }
 0x477   : > { %2863 = vst.msk [vmem:[#allocation4 + $0x128] sm:$0xf] %vm1854_vm15, %v2777_v4 }
 0x47a   : > { %2923 = vrot.lane.b32.xlu1 %v14146_v24, %s12275_s14  ;;  %2931 = vrot.lane.b32.xlu0 %v14253_v61, %s12275_s14  ;;  %v18144_v24 = vld [vmem:[#allocation64_spill] sm:$0xff] }
 0x47b   : > { %2915 = vrot.lane.b32.xlu2 %v14036_v38, %s12275_s14 }
 0x47c   : > { %v2775_v53 = vpop.permute.xlu1 %2774  ;;  %v2783_v26 = vpop.permute.xlu0 %2782 }
 0x47d   : > { %2862 = vst.msk [vmem:[#allocation4 + $0x124] sm:$0xf] %vm1854_vm15, %v2775_v53  ;;  %v2785_v18 = vpop.permute.xlu2 %2784 }
 0x47e   : > { %2867 = vst.msk [vmem:[#allocation4 + $0x138] sm:$0xf] %vm1854_vm15, %v2785_v18  ;;  %v18154_v18 = vld [vmem:[#allocation54_spill] sm:$0xff] }
 0x47f   : > { %2866 = vst.msk [vmem:[#allocation4 + $0x134] sm:$0xf] %vm1854_vm15, %v2783_v26  ;;  %v18153_v26 = vld [vmem:[#allocation50_spill] sm:$0xff] }
 0x482   : > { %2929 = vrot.lane.b32.xlu1 %v18125_v27, %s12275_s14  ;;  %2937 = vrot.lane.b32.xlu0 %v18144_v24, %s12275_s14  ;;  %v18146_v27 = vld [vmem:[#allocation67_spill] sm:$0xff]  ;;  %v18155_v24 = vld [vmem:[#allocation68_spill] sm:$0xff] }
 0x483   : > { %2921 = vrot.lane.b32.xlu2 %v14119_v9, %s12275_s14 }
 0x484   : > { %v2781_v61 = vpop.permute.xlu1 %2780  ;;  %v2789_v38 = vpop.permute.xlu0 %2788 }
 0x485   : > { %2865 = vst.msk [vmem:[#allocation4 + $0x130] sm:$0xf] %vm1854_vm15, %v2781_v61  ;;  %v2791_v49 = vpop.permute.xlu2 %2790 }
 0x486   : > { %2870 = vst.msk [vmem:[#allocation4 + $0x144] sm:$0xf] %vm1854_vm15, %v2791_v49 }
 0x487   : > { %2869 = vst.msk [vmem:[#allocation4 + $0x140] sm:$0xf] %vm1854_vm15, %v2789_v38 }
 0x48a   : > { %2935 = vrot.lane.b32.xlu1 %v18145_v29, %s12275_s14  ;;  %2943 = vrot.lane.b32.xlu0 %v18146_v27, %s12275_s14  ;;  %v18156_v29 = vld [vmem:[#allocation39_spill] sm:$0xff]  ;;  %v18157_v27 = vld [vmem:[#allocation61_spill] sm:$0xff] }
 0x48b   : > { %2927 = vrot.lane.b32.xlu2 %v18126_v39, %s12275_s14 }
 0x48c   : > { %v2787_v31 = vpop.permute.xlu1 %2786  ;;  %v2795_v9 = vpop.permute.xlu0 %2794 }
 0x48d   : > { %2868 = vst.msk [vmem:[#allocation4 + $0x13c] sm:$0xf] %vm1854_vm15, %v2787_v31  ;;  %v2797_v41 = vpop.permute.xlu2 %2796  ;;  %v18158_v31 = vld [vmem:[#allocation37_spill] sm:$0xff] }
 0x48e   : > { %2873 = vst.msk [vmem:[#allocation4 + $0x150] sm:$0xf] %vm1854_vm15, %v2797_v41 }
 0x48f   : > { %2872 = vst.msk [vmem:[#allocation4 + $0x14c] sm:$0xf] %vm1854_vm15, %v2795_v9 }
 0x492   : > { %2941 = vrot.lane.b32.xlu1 %v18147_v63, %s12275_s14  ;;  %3014 = vrot.lane.b32.xlu0 %v18148_v25, %s12275_s14  ;;  %v18159_v25 = vld [vmem:[#allocation58_spill] sm:$0xff] }
 0x493   : > { %2933 = vrot.lane.b32.xlu2 %v18149_v35, %s12275_s14  ;;  %v18160_v35 = vld [vmem:[#allocation41_spill] sm:$0xff] }
 0x494   : > { %v2793_v14 = vpop.permute.xlu1 %2792  ;;  %v2801_v39 = vpop.permute.xlu0 %2800 }
 0x495   : > { %2871 = vst.msk [vmem:[#allocation4 + $0x148] sm:$0xf] %vm1854_vm15, %v2793_v14  ;;  %v2803_v43 = vpop.permute.xlu2 %2802 }
 0x496   : > { %2876 = vst.msk [vmem:[#allocation4 + $0x15c] sm:$0xf] %vm1854_vm15, %v2803_v43 }
 0x497   : > { %2875 = vst.msk [vmem:[#allocation4 + $0x158] sm:$0xf] %vm1854_vm15, %v2801_v39 }
 0x49a   : > { %2947 = vrot.lane.b32.xlu1 %v18150_v21, %s12275_s14  ;;  %3020 = vrot.lane.b32.xlu0 %v18151_v40, %s12275_s14 }
 0x49b   : > { %2939 = vrot.lane.b32.xlu2 %v18152_v7, %s12275_s14 }
 0x49c   : > { %v2799_v4 = vpop.permute.xlu1 %2798  ;;  %v2807_v0 = vpop.permute.xlu0 %2806 }
 0x49d   : > { %2874 = vst.msk [vmem:[#allocation4 + $0x154] sm:$0xf] %vm1854_vm15, %v2799_v4  ;;  %v2809_v53 = vpop.permute.xlu2 %2808 }
 0x49e   : > { %2879 = vst.msk [vmem:[#allocation4 + $0x168] sm:$0xf] %vm1854_vm15, %v2809_v53 }
 0x49f   : > { %2878 = vst.msk [vmem:[#allocation4 + $0x164] sm:$0xf] %vm1854_vm15, %v2807_v0  ;;  %v18162_v0 = vld [vmem:[#allocation73_spill] sm:$0xff] }
 0x4a2   : > { %3018 = vrot.lane.b32.xlu1 %v18153_v26, %s12275_s14  ;;  %3026 = vrot.lane.b32.xlu0 %v18154_v18, %s12275_s14 }
 0x4a3   : > { %2945 = vrot.lane.b32.xlu2 %v18155_v24, %s12275_s14 }
 0x4a4   : > { %v2805_v61 = vpop.permute.xlu1 %2804  ;;  %v2813_v38 = vpop.permute.xlu0 %2812 }
 0x4a5   : > { %2877 = vst.msk [vmem:[#allocation4 + $0x160] sm:$0xf] %vm1854_vm15, %v2805_v61  ;;  %v2815_v49 = vpop.permute.xlu2 %2814 }
 0x4a6   : > { %2882 = vst.msk [vmem:[#allocation4 + $0x174] sm:$0xf] %vm1854_vm15, %v2815_v49 }
 0x4a7   : > { %2881 = vst.msk [vmem:[#allocation4 + $0x170] sm:$0xf] %vm1854_vm15, %v2813_v38 }
 0x4aa   : > { %3024 = vrot.lane.b32.xlu1 %v18156_v29, %s12275_s14  ;;  %3032 = vrot.lane.b32.xlu0 %v18157_v27, %s12275_s14 }
 0x4ab   : > { %3016 = vrot.lane.b32.xlu2 %v18158_v31, %s12275_s14  ;;  %v18169_v31 = vld [vmem:[#allocation74_spill] sm:$0xff] }
 0x4ac   : > { %v2811_v9 = vpop.permute.xlu1 %2810  ;;  %v2819_v41 = vpop.permute.xlu0 %2818 }
 0x4ad   : > { %2880 = vst.msk [vmem:[#allocation4 + $0x16c] sm:$0xf] %vm1854_vm15, %v2811_v9  ;;  %v2886_v63 = vpop.permute.xlu2 %2885 }
 0x4ae   : > { %2982 = vst.msk [vmem:[#allocation2 + $0x180] sm:$0xf] %vm1854_vm15, %v2886_v63 }
 0x4af   : > { %2884 = vst.msk [vmem:[#allocation4 + $0x17c] sm:$0xf] %vm1854_vm15, %v2819_v41 }
 0x4b2   : > { %3030 = vrot.lane.b32.xlu1 %v18159_v25, %s12275_s14  ;;  %3038 = vrot.lane.b32.xlu0 %v13957_v8, %s12275_s14  ;;  %v18161_v8 = vld [vmem:[#allocation56_spill] sm:$0xff] }
 0x4b3   : > { %3022 = vrot.lane.b32.xlu2 %v18160_v35, %s12275_s14  ;;  %v18171_v25 = vld [vmem:[#allocation80_spill] sm:$0xff] }
 0x4b4   : > { %v2817_v14 = vpop.permute.xlu1 %2816  ;;  %v2890_v39 = vpop.permute.xlu0 %2889 }
 0x4b5   : > { %2883 = vst.msk [vmem:[#allocation4 + $0x178] sm:$0xf] %vm1854_vm15, %v2817_v14  ;;  %v2892_v43 = vpop.permute.xlu2 %2891 }
 0x4b6   : > { %2985 = vst.msk [vmem:[#allocation2 + $0x18c] sm:$0xf] %vm1854_vm15, %v2892_v43 }
 0x4b7   : > { %2984 = vst.msk [vmem:[#allocation2 + $0x188] sm:$0xf] %vm1854_vm15, %v2890_v39 }
 0x4ba   : > { %3036 = vrot.lane.b32.xlu1 %v13929_v34, %s12275_s14  ;;  %3044 = vrot.lane.b32.xlu0 %v14038_v10, %s12275_s14 }
 0x4bb   : > { %3028 = vrot.lane.b32.xlu2 %v18161_v8, %s12275_s14 }
 0x4bc   : > { %v2888_v21 = vpop.permute.xlu1 %2887  ;;  %v2896_v40 = vpop.permute.xlu0 %2895 }
 0x4bd   : > { %2983 = vst.msk [vmem:[#allocation2 + $0x184] sm:$0xf] %vm1854_vm15, %v2888_v21  ;;  %v2898_v7 = vpop.permute.xlu2 %2897 }
 0x4be   : > { %2988 = vst.msk [vmem:[#allocation2 + $0x198] sm:$0xf] %vm1854_vm15, %v2898_v7  ;;  %v18173_v7 = vld [vmem:[#allocation82_spill] sm:$0xff] }
 0x4bf   : > { %2987 = vst.msk [vmem:[#allocation2 + $0x194] sm:$0xf] %vm1854_vm15, %v2896_v40 }
 0x4c2   : > { %3042 = vrot.lane.b32.xlu1 %v14010_v47, %s12275_s14  ;;  %3050 = vrot.lane.b32.xlu0 %v14121_v58, %s12275_s14 }
 0x4c3   : > { %3034 = vrot.lane.b32.xlu2 %v13903_v52, %s12275_s14 }
 0x4c4   : > { %v2894_v34 = vpop.permute.xlu1 %2893  ;;  %v2902_v10 = vpop.permute.xlu0 %2901 }
 0x4c5   : > { %2986 = vst.msk [vmem:[#allocation2 + $0x190] sm:$0xf] %vm1854_vm15, %v2894_v34  ;;  %v2904_v4 = vpop.permute.xlu2 %2903 }
 0x4c6   : > { %2991 = vst.msk [vmem:[#allocation2 + $0x1a4] sm:$0xf] %vm1854_vm15, %v2904_v4 }
 0x4c7   : > { %2990 = vst.msk [vmem:[#allocation2 + $0x1a0] sm:$0xf] %vm1854_vm15, %v2902_v10 }
 0x4ca   : > { %3048 = vrot.lane.b32.xlu1 %v14094_v16, %s12275_s14  ;;  %3056 = vrot.lane.b32.xlu0 %v14201_v6, %s12275_s14  ;;  %v18163_v16 = vld [vmem:[#allocation70_spill] sm:$0xff] }
 0x4cb   : > { %3040 = vrot.lane.b32.xlu2 %v13983_v48, %s12275_s14 }
 0x4cc   : > { %v2900_v58 = vpop.permute.xlu1 %2899  ;;  %v2908_v52 = vpop.permute.xlu0 %2907 }
 0x4cd   : > { %2989 = vst.msk [vmem:[#allocation2 + $0x19c] sm:$0xf] %vm1854_vm15, %v2900_v58  ;;  %v2910_v47 = vpop.permute.xlu2 %2909 }
 0x4ce   : > { %2994 = vst.msk [vmem:[#allocation2 + $0x1b0] sm:$0xf] %vm1854_vm15, %v2910_v47 }
 0x4cf   : > { %2993 = vst.msk [vmem:[#allocation2 + $0x1ac] sm:$0xf] %vm1854_vm15, %v2908_v52 }
 0x4d2   : > { %3054 = vrot.lane.b32.xlu1 %v18162_v0, %s12275_s14  ;;  %3062 = vrot.lane.b32.xlu0 %v14076_v13, %s12275_s14  ;;  %v18164_v13 = vld [vmem:[#allocation72_spill] sm:$0xff] }
 0x4d3   : > { %3046 = vrot.lane.b32.xlu2 %v18163_v16, %s12275_s14 }
 0x4d4   : > { %v2906_v6 = vpop.permute.xlu1 %2905  ;;  %v2914_v48 = vpop.permute.xlu0 %2913 }
 0x4d5   : > { %2992 = vst.msk [vmem:[#allocation2 + $0x1a8] sm:$0xf] %vm1854_vm15, %v2906_v6  ;;  %v2916_v53 = vpop.permute.xlu2 %2915 }
 0x4d6   : > { %2997 = vst.msk [vmem:[#allocation2 + $0x1bc] sm:$0xf] %vm1854_vm15, %v2916_v53 }
 0x4d7   : > { %2996 = vst.msk [vmem:[#allocation2 + $0x1b8] sm:$0xf] %vm1854_vm15, %v2914_v48 }
 0x4da   : > { %3060 = vrot.lane.b32.xlu1 %v14255_v20, %s12275_s14  ;;  %3068 = vrot.lane.b32.xlu0 %v14157_v30, %s12275_s14  ;;  %v18165_v30 = vld [vmem:[#allocation79_spill] sm:$0xff] }
 0x4db   : > { %3052 = vrot.lane.b32.xlu2 %v18164_v13, %s12275_s14 }
 0x4dc   : > { %v2912_v26 = vpop.permute.xlu1 %2911  ;;  %v2920_v18 = vpop.permute.xlu0 %2919 }
 0x4dd   : > { %2995 = vst.msk [vmem:[#allocation2 + $0x1b4] sm:$0xf] %vm1854_vm15, %v2912_v26  ;;  %v2922_v24 = vpop.permute.xlu2 %2921 }
 0x4de   : > { %3000 = vst.msk [vmem:[#allocation2 + $0x1c8] sm:$0xf] %vm1854_vm15, %v2922_v24 }
 0x4df   : > { %2999 = vst.msk [vmem:[#allocation2 + $0x1c4] sm:$0xf] %vm1854_vm15, %v2920_v18 }
 0x4e2   : > { %3066 = vrot.lane.b32.xlu1 %v14131_v42, %s12275_s14  ;;  %3074 = vrot.lane.b32.xlu0 %v14238_v19, %s12275_s14  ;;  %v18166_v42 = vld [vmem:[#allocation45_spill] sm:$0xff]  ;;  %v18167_v19 = vld [vmem:[#allocation71_spill] sm:$0xff] }
 0x4e3   : > { %3058 = vrot.lane.b32.xlu2 %v18165_v30, %s12275_s14 }
 0x4e4   : > { %v2918_v20 = vpop.permute.xlu1 %2917  ;;  %v2926_v61 = vpop.permute.xlu0 %2925 }
 0x4e5   : > { %2998 = vst.msk [vmem:[#allocation2 + $0x1c0] sm:$0xf] %vm1854_vm15, %v2918_v20  ;;  %v2928_v38 = vpop.permute.xlu2 %2927 }
 0x4e6   : > { %3003 = vst.msk [vmem:[#allocation2 + $0x1d4] sm:$0xf] %vm1854_vm15, %v2928_v38 }
 0x4e7   : > { %3002 = vst.msk [vmem:[#allocation2 + $0x1d0] sm:$0xf] %vm1854_vm15, %v2926_v61 }
 0x4ea   : > { %3072 = vrot.lane.b32.xlu1 %v14211_v62, %s12275_s14  ;;  %3145 = vrot.lane.b32.xlu0 %v18166_v42, %s12275_s14  ;;  %v18168_v62 = vld [vmem:[#allocation40_spill] sm:$0xff] }
 0x4eb   : > { %3064 = vrot.lane.b32.xlu2 %v18167_v19, %s12275_s14 }
 0x4ec   : > { %v2924_v49 = vpop.permute.xlu1 %2923  ;;  %v2932_v29 = vpop.permute.xlu0 %2931 }
 0x4ed   : > { %3001 = vst.msk [vmem:[#allocation2 + $0x1cc] sm:$0xf] %vm1854_vm15, %v2924_v49  ;;  %v2934_v27 = vpop.permute.xlu2 %2933 }
 0x4ee   : > { %3006 = vst.msk [vmem:[#allocation2 + $0x1e0] sm:$0xf] %vm1854_vm15, %v2934_v27 }
 0x4ef   : > { %3005 = vst.msk [vmem:[#allocation2 + $0x1dc] sm:$0xf] %vm1854_vm15, %v2932_v29 }
 0x4f2   : > { %3143 = vrot.lane.b32.xlu1 %v18128_v54, %s12275_s14  ;;  %3151 = vrot.lane.b32.xlu0 %v18168_v62, %s12275_s14  ;;  %v18170_v54 = vld [vmem:[#allocation57_spill] sm:$0xff] }
 0x4f3   : > { %3070 = vrot.lane.b32.xlu2 %v18169_v31, %s12275_s14 }
 0x4f4   : > { %v2930_v9 = vpop.permute.xlu1 %2929  ;;  %v2938_v41 = vpop.permute.xlu0 %2937 }
 0x4f5   : > { %3004 = vst.msk [vmem:[#allocation2 + $0x1d8] sm:$0xf] %vm1854_vm15, %v2930_v9  ;;  %v2940_v63 = vpop.permute.xlu2 %2939 }
 0x4f6   : > { %3009 = vst.msk [vmem:[#allocation2 + $0x1ec] sm:$0xf] %vm1854_vm15, %v2940_v63 }
 0x4f7   : > { %3008 = vst.msk [vmem:[#allocation2 + $0x1e8] sm:$0xf] %vm1854_vm15, %v2938_v41 }
 0x4fa   : > { %3149 = vrot.lane.b32.xlu1 %v18130_v60, %s12275_s14  ;;  %3157 = vrot.lane.b32.xlu0 %v18170_v54, %s12275_s14  ;;  %v18172_v60 = vld [vmem:[#allocation49_spill] sm:$0xff] }
 0x4fb   : > { %3076 = vrot.lane.b32.xlu2 %v18171_v25, %s12275_s14 }
 0x4fc   : > { %v2936_v35 = vpop.permute.xlu1 %2935  ;;  %v2944_v14 = vpop.permute.xlu0 %2943 }
 0x4fd   : > { %3007 = vst.msk [vmem:[#allocation2 + $0x1e4] sm:$0xf] %vm1854_vm15, %v2936_v35  ;;  %v2946_v39 = vpop.permute.xlu2 %2945 }
 0x4fe   : > { %3012 = vst.msk [vmem:[#allocation2 + $0x1f8] sm:$0xf] %vm1854_vm15, %v2946_v39 }
 0x4ff   : > { %3011 = vst.msk [vmem:[#allocation2 + $0x1f4] sm:$0xf] %vm1854_vm15, %v2944_v14 }
 0x502   : > { %3155 = vrot.lane.b32.xlu1 %v18132_v33, %s12275_s14  ;;  %3163 = vrot.lane.b32.xlu0 %v13923_v32, %s12275_s14 }
 0x503   : > { %3147 = vrot.lane.b32.xlu2 %v18172_v60, %s12275_s14 }
 0x504   : > { %v2942_v43 = vpop.permute.xlu1 %2941  ;;  %v3015_v8 = vpop.permute.xlu0 %3014 }
 0x505   : > { %3010 = vst.msk [vmem:[#allocation2 + $0x1f0] sm:$0xf] %vm1854_vm15, %v2942_v43  ;;  %v3017_v21 = vpop.permute.xlu2 %3016 }
 0x506   : > { %3112 = vst.msk [vmem:[#allocation3 + $0x184] sm:$0xf] %vm1854_vm15, %v3017_v21 }
 0x507   : > { %3111 = vst.msk [vmem:[#allocation3 + $0x180] sm:$0xf] %vm1854_vm15, %v3015_v8 }
 0x50a   : > { %3161 = vrot.lane.b32.xlu1 %v13898_v44, %s12275_s14  ;;  %3169 = vrot.lane.b32.xlu0 %v14003_v2, %s12275_s14 }
 0x50b   : > { %3153 = vrot.lane.b32.xlu2 %v18134_v57, %s12275_s14 }
 0x50c   : > { %v2948_v32 = vpop.permute.xlu1 %2947  ;;  %v3021_v33 = vpop.permute.xlu0 %3020 }
 0x50d   : > { %3013 = vst.msk [vmem:[#allocation2 + $0x1fc] sm:$0xf] %vm1854_vm15, %v2948_v32  ;;  %v3023_v40 = vpop.permute.xlu2 %3022 }
 0x50e   : > { %3115 = vst.msk [vmem:[#allocation3 + $0x190] sm:$0xf] %vm1854_vm15, %v3023_v40 }
 0x50f   : > { %3114 = vst.msk [vmem:[#allocation3 + $0x18c] sm:$0xf] %vm1854_vm15, %v3021_v33 }
 0x512   : > { %3167 = vrot.lane.b32.xlu1 %v13977_v46, %s12275_s14  ;;  %3175 = vrot.lane.b32.xlu0 %v14088_v22, %s12275_s14 }
 0x513   : > { %3159 = vrot.lane.b32.xlu2 %v13874_v36, %s12275_s14 }
 0x514   : > { %v3019_v44 = vpop.permute.xlu1 %3018  ;;  %v3027_v2 = vpop.permute.xlu0 %3026 }
 0x515   : > { %3113 = vst.msk [vmem:[#allocation3 + $0x188] sm:$0xf] %vm1854_vm15, %v3019_v44  ;;  %v3029_v57 = vpop.permute.xlu2 %3028 }
 0x516   : > { %3118 = vst.msk [vmem:[#allocation3 + $0x19c] sm:$0xf] %vm1854_vm15, %v3029_v57 }
 0x517   : > { %3117 = vst.msk [vmem:[#allocation3 + $0x198] sm:$0xf] %vm1854_vm15, %v3027_v2 }
 0x51a   : > { %3173 = vrot.lane.b32.xlu1 %v14060_v28, %s12275_s14  ;;  %3181 = vrot.lane.b32.xlu0 %v14168_v55, %s12275_s14 }
 0x51b   : > { %3165 = vrot.lane.b32.xlu2 %v13950_v23, %s12275_s14 }
 0x51c   : > { %v3025_v46 = vpop.permute.xlu1 %3024  ;;  %v3033_v36 = vpop.permute.xlu0 %3032 }
 0x51d   : > { %3116 = vst.msk [vmem:[#allocation3 + $0x194] sm:$0xf] %vm1854_vm15, %v3025_v46  ;;  %v3035_v22 = vpop.permute.xlu2 %3034 }
 0x51e   : > { %3121 = vst.msk [vmem:[#allocation3 + $0x1a8] sm:$0xf] %vm1854_vm15, %v3035_v22 }
 0x51f   : > { %3120 = vst.msk [vmem:[#allocation3 + $0x1a4] sm:$0xf] %vm1854_vm15, %v3033_v36 }
 0x522   : > { %3179 = vrot.lane.b32.xlu1 %v14142_v15, %s12275_s14  ;;  %3187 = vrot.lane.b32.xlu0 %v14249_v1, %s12275_s14 }
 0x523   : > { %3171 = vrot.lane.b32.xlu2 %v14032_v51, %s12275_s14 }
 0x524   : > { %v3031_v28 = vpop.permute.xlu1 %3030  ;;  %v3039_v23 = vpop.permute.xlu0 %3038 }
 0x525   : > { %3119 = vst.msk [vmem:[#allocation3 + $0x1a0] sm:$0xf] %vm1854_vm15, %v3031_v28  ;;  %v3041_v55 = vpop.permute.xlu2 %3040 }
 0x526   : > { %3124 = vst.msk [vmem:[#allocation3 + $0x1b4] sm:$0xf] %vm1854_vm15, %v3041_v55 }
 0x527   : > { %3123 = vst.msk [vmem:[#allocation3 + $0x1b0] sm:$0xf] %vm1854_vm15, %v3039_v23 }
 0x52a   : > { %3185 = vrot.lane.b32.xlu1 %v18123_v59, %s12275_s14  ;;  %3193 = vrot.lane.b32.xlu0 %v14297_v50, %s12275_s14 }
 0x52b   : > { %3177 = vrot.lane.b32.xlu2 %v14115_v45, %s12275_s14 }
 0x52c   : > { %v3037_v15 = vpop.permute.xlu1 %3036  ;;  %v3045_v51 = vpop.permute.xlu0 %3044 }
 0x52d   : > { %3122 = vst.msk [vmem:[#allocation3 + $0x1ac] sm:$0xf] %vm1854_vm15, %v3037_v15  ;;  %v3047_v1 = vpop.permute.xlu2 %3046 }
 0x52e   : > { %3127 = vst.msk [vmem:[#allocation3 + $0x1c0] sm:$0xf] %vm1854_vm15, %v3047_v1 }
 0x52f   : > { %3126 = vst.msk [vmem:[#allocation3 + $0x1bc] sm:$0xf] %vm1854_vm15, %v3045_v51 }
 0x532   : > { %3191 = vrot.lane.b32.xlu1 %v14283_v12, %s12275_s14  ;;  %3199 = vrot.lane.b32.xlu0 %v14339_v11, %s12275_s14 }
 0x533   : > { %3183 = vrot.lane.b32.xlu2 %v18124_v56, %s12275_s14 }
 0x534   : > { %v3043_v50 = vpop.permute.xlu1 %3042  ;;  %v3051_v45 = vpop.permute.xlu0 %3050 }
 0x535   : > { %3125 = vst.msk [vmem:[#allocation3 + $0x1b8] sm:$0xf] %vm1854_vm15, %v3043_v50  ;;  %v3053_v59 = vpop.permute.xlu2 %3052 }
 0x536   : > { %3130 = vst.msk [vmem:[#allocation3 + $0x1cc] sm:$0xf] %vm1854_vm15, %v3053_v59 }
 0x537   : > { %3129 = vst.msk [vmem:[#allocation3 + $0x1c8] sm:$0xf] %vm1854_vm15, %v3051_v45 }
 0x53a   : > { %3197 = vrot.lane.b32.xlu1 %v14325_v17, %s12275_s14  ;;  %3205 = vrot.lane.b32.xlu0 %v14381_v37, %s12275_s14  ;;  %v18174_v17 = vld [vmem:[#allocation81_spill] sm:$0xff] }
 0x53b   : > { %3189 = vrot.lane.b32.xlu2 %v14274_v5, %s12275_s14 }
 0x53c   : > { %v3049_v11 = vpop.permute.xlu1 %3048  ;;  %v3057_v12 = vpop.permute.xlu0 %3056 }
 0x53d   : > { %3128 = vst.msk [vmem:[#allocation3 + $0x1c4] sm:$0xf] %vm1854_vm15, %v3049_v11  ;;  %v3059_v56 = vpop.permute.xlu2 %3058 }
 0x53e   : > { %3133 = vst.msk [vmem:[#allocation3 + $0x1d8] sm:$0xf] %vm1854_vm15, %v3059_v56 }
 0x53f   : > { %3132 = vst.msk [vmem:[#allocation3 + $0x1d4] sm:$0xf] %vm1854_vm15, %v3057_v12 }
 0x542   : > { %3203 = vrot.lane.b32.xlu1 %v18173_v7, %s12275_s14 }
 0x543   : > { %3195 = vrot.lane.b32.xlu2 %v18174_v17, %s12275_s14 }
 0x544   : > { %v3055_v34 = vpop.permute.xlu1 %3054  ;;  %v3063_v37 = vpop.permute.xlu0 %3062 }
 0x545   : > { %3131 = vst.msk [vmem:[#allocation3 + $0x1d0] sm:$0xf] %vm1854_vm15, %v3055_v34  ;;  %v3065_v5 = vpop.permute.xlu2 %3064 }
 0x546   : > { %3136 = vst.msk [vmem:[#allocation3 + $0x1e4] sm:$0xf] %vm1854_vm15, %v3065_v5 }
 0x547   : > { %3135 = vst.msk [vmem:[#allocation3 + $0x1e0] sm:$0xf] %vm1854_vm15, %v3063_v37 }
 0x54b   : > { %3201 = vrot.lane.b32.xlu2 %v14353_v3, %s12275_s14 }
 0x54c   : > { %v3061_v10 = vpop.permute.xlu1 %3060  ;;  %v3069_v4 = vpop.permute.xlu0 %3068 }
 0x54d   : > { %3134 = vst.msk [vmem:[#allocation3 + $0x1dc] sm:$0xf] %vm1854_vm15, %v3061_v10  ;;  %v3071_v58 = vpop.permute.xlu2 %3070 }
 0x54e   : > { %3139 = vst.msk [vmem:[#allocation3 + $0x1f0] sm:$0xf] %vm1854_vm15, %v3071_v58 }
 0x54f   : > { %3138 = vst.msk [vmem:[#allocation3 + $0x1ec] sm:$0xf] %vm1854_vm15, %v3069_v4 }
 0x554   : > { %v3067_v52 = vpop.permute.xlu1 %3066  ;;  %v3075_v47 = vpop.permute.xlu0 %3074 }
 0x555   : > { %3137 = vst.msk [vmem:[#allocation3 + $0x1e8] sm:$0xf] %vm1854_vm15, %v3067_v52  ;;  %v3077_v0 = vpop.permute.xlu2 %3076 }
 0x556   : > { %3142 = vst.msk [vmem:[#allocation3 + $0x1fc] sm:$0xf] %vm1854_vm15, %v3077_v0 }
 0x557   : > { %3141 = vst.msk [vmem:[#allocation3 + $0x1f8] sm:$0xf] %vm1854_vm15, %v3075_v47 }
 0x55c   : > { %v3073_v16 = vpop.permute.xlu1 %3072  ;;  %v3146_v3 = vpop.permute.xlu0 %3145 }
 0x55d   : > { %3140 = vst.msk [vmem:[#allocation3 + $0x1f4] sm:$0xf] %vm1854_vm15, %v3073_v16  ;;  %v3148_v6 = vpop.permute.xlu2 %3147 }
 0x55e   : > { %3242 = vst.msk [vmem:[#allocation4 + $0x188] sm:$0xf] %vm1854_vm15, %v3148_v6 }
 0x55f   : > { %3241 = vst.msk [vmem:[#allocation4 + $0x184] sm:$0xf] %vm1854_vm15, %v3146_v3 }
 0x564   : > { %v3144_v48 = vpop.permute.xlu1 %3143  ;;  %v3152_v53 = vpop.permute.xlu0 %3151 }
 0x565   : > { %3240 = vst.msk [vmem:[#allocation4 + $0x180] sm:$0xf] %vm1854_vm15, %v3144_v48  ;;  %v3154_v13 = vpop.permute.xlu2 %3153 }
 0x566   : > { %3245 = vst.msk [vmem:[#allocation4 + $0x194] sm:$0xf] %vm1854_vm15, %v3154_v13 }
 0x567   : > { %3244 = vst.msk [vmem:[#allocation4 + $0x190] sm:$0xf] %vm1854_vm15, %v3152_v53 }
 0x56c   : > { %v3150_v26 = vpop.permute.xlu1 %3149  ;;  %v3158_v18 = vpop.permute.xlu0 %3157 }
 0x56d   : > { %3243 = vst.msk [vmem:[#allocation4 + $0x18c] sm:$0xf] %vm1854_vm15, %v3150_v26  ;;  %v3160_v24 = vpop.permute.xlu2 %3159 }
 0x56e   : > { %3248 = vst.msk [vmem:[#allocation4 + $0x1a0] sm:$0xf] %vm1854_vm15, %v3160_v24 }
 0x56f   : > { %3247 = vst.msk [vmem:[#allocation4 + $0x19c] sm:$0xf] %vm1854_vm15, %v3158_v18 }
 0x574   : > { %v3156_v30 = vpop.permute.xlu1 %3155  ;;  %v3164_v20 = vpop.permute.xlu0 %3163 }
 0x575   : > { %3246 = vst.msk [vmem:[#allocation4 + $0x198] sm:$0xf] %vm1854_vm15, %v3156_v30  ;;  %v3166_v61 = vpop.permute.xlu2 %3165 }
 0x576   : > { %3251 = vst.msk [vmem:[#allocation4 + $0x1ac] sm:$0xf] %vm1854_vm15, %v3166_v61 }
 0x577   : > { %3250 = vst.msk [vmem:[#allocation4 + $0x1a8] sm:$0xf] %vm1854_vm15, %v3164_v20 }
 0x57c   : > { %v3162_v38 = vpop.permute.xlu1 %3161  ;;  %v3170_v42 = vpop.permute.xlu0 %3169 }
 0x57d   : > { %3249 = vst.msk [vmem:[#allocation4 + $0x1a4] sm:$0xf] %vm1854_vm15, %v3162_v38  ;;  %v3172_v19 = vpop.permute.xlu2 %3171 }
 0x57e   : > { %3254 = vst.msk [vmem:[#allocation4 + $0x1b8] sm:$0xf] %vm1854_vm15, %v3172_v19 }
 0x57f   : > { %3253 = vst.msk [vmem:[#allocation4 + $0x1b4] sm:$0xf] %vm1854_vm15, %v3170_v42 }
 0x584   : > { %v3168_v49 = vpop.permute.xlu1 %3167  ;;  %v3176_v29 = vpop.permute.xlu0 %3175 }
 0x585   : > { %3252 = vst.msk [vmem:[#allocation4 + $0x1b0] sm:$0xf] %vm1854_vm15, %v3168_v49  ;;  %v3178_v27 = vpop.permute.xlu2 %3177 }
 0x586   : > { %3257 = vst.msk [vmem:[#allocation4 + $0x1c4] sm:$0xf] %vm1854_vm15, %v3178_v27 }
 0x587   : > { %3256 = vst.msk [vmem:[#allocation4 + $0x1c0] sm:$0xf] %vm1854_vm15, %v3176_v29 }
 0x58c   : > { %v3174_v62 = vpop.permute.xlu1 %3173  ;;  %v3182_v31 = vpop.permute.xlu0 %3181 }
 0x58d   : > { %3255 = vst.msk [vmem:[#allocation4 + $0x1bc] sm:$0xf] %vm1854_vm15, %v3174_v62  ;;  %v3184_v9 = vpop.permute.xlu2 %3183 }
 0x58e   : > { %3260 = vst.msk [vmem:[#allocation4 + $0x1d0] sm:$0xf] %vm1854_vm15, %v3184_v9 }
 0x58f   : > { %3259 = vst.msk [vmem:[#allocation4 + $0x1cc] sm:$0xf] %vm1854_vm15, %v3182_v31 }
 0x594   : > { %v3180_v41 = vpop.permute.xlu1 %3179  ;;  %v3188_v63 = vpop.permute.xlu0 %3187 }
 0x595   : > { %3258 = vst.msk [vmem:[#allocation4 + $0x1c8] sm:$0xf] %vm1854_vm15, %v3180_v41  ;;  %v3190_v54 = vpop.permute.xlu2 %3189 }
 0x596   : > { %3263 = vst.msk [vmem:[#allocation4 + $0x1dc] sm:$0xf] %vm1854_vm15, %v3190_v54 }
 0x597   : > { %3262 = vst.msk [vmem:[#allocation4 + $0x1d8] sm:$0xf] %vm1854_vm15, %v3188_v63 }
 0x59c   : > { %v3186_v25 = vpop.permute.xlu1 %3185  ;;  %v3194_v35 = vpop.permute.xlu0 %3193 }
 0x59d   : > { %3261 = vst.msk [vmem:[#allocation4 + $0x1d4] sm:$0xf] %vm1854_vm15, %v3186_v25  ;;  %v3196_v14 = vpop.permute.xlu2 %3195 }
 0x59e   : > { %3266 = vst.msk [vmem:[#allocation4 + $0x1e8] sm:$0xf] %vm1854_vm15, %v3196_v14 }
 0x59f   : > { %3265 = vst.msk [vmem:[#allocation4 + $0x1e4] sm:$0xf] %vm1854_vm15, %v3194_v35 }
 0x5a4   : > { %v3192_v39 = vpop.permute.xlu1 %3191  ;;  %v3200_v60 = vpop.permute.xlu0 %3199 }
 0x5a5   : > { %3264 = vst.msk [vmem:[#allocation4 + $0x1e0] sm:$0xf] %vm1854_vm15, %v3192_v39  ;;  %v3202_v43 = vpop.permute.xlu2 %3201 }
 0x5a6   : > { %3269 = vst.msk [vmem:[#allocation4 + $0x1f4] sm:$0xf] %vm1854_vm15, %v3202_v43 }
 0x5a7   : > { %3268 = vst.msk [vmem:[#allocation4 + $0x1f0] sm:$0xf] %vm1854_vm15, %v3200_v60 }
 0x5ac   : > { %v3198_v8 = vpop.permute.xlu1 %3197  ;;  %v3206_v21 = vpop.permute.xlu0 %3205 }
 0x5ad   : > { %3267 = vst.msk [vmem:[#allocation4 + $0x1ec] sm:$0xf] %vm1854_vm15, %v3198_v8 }
 0x5ae   : > { %3271 = vst.msk [vmem:[#allocation4 + $0x1fc] sm:$0xf] %vm1854_vm15, %v3206_v21 }
 0x5b4   : > { %v3204_v32 = vpop.permute.xlu1 %3203 }
 0x5b5   : > { %3270 = vst.msk [vmem:[#allocation4 + $0x1f8] sm:$0xf] %vm1854_vm15, %v3204_v32 }
 0x5b6 PF: > { %v10764_v33 = vld [vmem:[#allocation3 + $0x38] sm:$0xff]  ;;  %vm3734_vm3 = vcmask 261120   ;;  %v10763_v28 = vld [vmem:[#allocation3 + $0x30] sm:$0xff]  ;;  %v10762_v59 = vld [vmem:[#allocation3 + $0x28] sm:$0xff]  ;;  %s18175_s26 = sld [smem:[#allocation32_spill]] }
 0x5b7   : > { %v10772_v40 = vld [vmem:[#allocation3 + $0x78] sm:$0xff]  ;;  %v3781_v57 = vsel %vm3734_vm3, %v10764_v33, 0  ;;  %v10771_v23 = vld [vmem:[#allocation3 + $0x70] sm:$0xff]  ;;  %v3778_v51 = vsel %vm3734_vm3, %v10763_v28, 0  ;;  %v10770_v11 = vld [vmem:[#allocation3 + $0x68] sm:$0xff]  ;;  %v3775_v7 = vsel %vm3734_vm3, %v10762_v59, 0 }
 0x5b8   : > { %v10780_v44 = vld [vmem:[#allocation3 + $0xb8] sm:$0xff]  ;;  %v3805_v46 = vsel %vm3734_vm3, %v10772_v40, 0  ;;  %3807 = vmatpush.bf16.xpose.msra.mxu0 %v3781_v57  ;;  %v10779_v55 = vld [vmem:[#allocation3 + $0xb0] sm:$0xff]  ;;  %v3802_v1 = vsel %vm3734_vm3, %v10771_v23, 0  ;;  %v10778_v12 = vld [vmem:[#allocation3 + $0xa8] sm:$0xff]  ;;  %v3799_v17 = vsel %vm3734_vm3, %v10770_v11, 0 }
 0x5b9   : > { %v10788_v2 = vld [vmem:[#allocation3 + $0xf8] sm:$0xff]  ;;  %v4071_v36 = vsel %vm3734_vm3, %v10780_v44, 0  ;;  %3856 = vmatpush.bf16.xpose.msra.mxu1 %v3805_v46  ;;  %v10787_v15 = vld [vmem:[#allocation3 + $0xf0] sm:$0xff]  ;;  %v4068_v50 = vsel %vm3734_vm3, %v10779_v55, 0  ;;  %v10786_v56 = vld [vmem:[#allocation3 + $0xe8] sm:$0xff]  ;;  %v4065_v34 = vsel %vm3734_vm3, %v10778_v12, 0 }
 0x5ba   : > { %v4095_v22 = vsel %vm3734_vm3, %v10788_v2, 0  ;;  %4097 = vmatpush.bf16.xpose.msra.mxu2 %v4071_v36  ;;  %v4092_v45 = vsel %vm3734_vm3, %v10787_v15, 0  ;;  %v4089_v37 = vsel %vm3734_vm3, %v10786_v56, 0  ;;  %v10761_v5 = vld [vmem:[#allocation3 + $0x20] sm:$0xff]  ;;  %v10760_v3 = vld [vmem:[#allocation3 + $0x18] sm:$0xff]  ;;  %v10759_v30 = vld [vmem:[#allocation3 + $0x10] sm:$0xff] }
 0x5bb   : > { %4146 = vmatpush.bf16.xpose.msra.mxu3 %v4095_v22  ;;  %v10769_v10 = vld [vmem:[#allocation3 + $0x60] sm:$0xff]  ;;  %v3772_v52 = vsel %vm3734_vm3, %v10761_v5, 0  ;;  %v10768_v6 = vld [vmem:[#allocation3 + $0x58] sm:$0xff]  ;;  %v3769_v13 = vsel %vm3734_vm3, %v10760_v3, 0  ;;  %v10767_v20 = vld [vmem:[#allocation3 + $0x50] sm:$0xff]  ;;  %v3766_v42 = vsel %vm3734_vm3, %v10759_v30, 0 }
 0x5bc   : > { %v10777_v4 = vld [vmem:[#allocation3 + $0xa0] sm:$0xff]  ;;  %v3796_v47 = vsel %vm3734_vm3, %v10769_v10, 0  ;;  %v10776_v48 = vld [vmem:[#allocation3 + $0x98] sm:$0xff]  ;;  %v3793_v26 = vsel %vm3734_vm3, %v10768_v6, 0  ;;  %v10775_v61 = vld [vmem:[#allocation3 + $0x90] sm:$0xff]  ;;  %v3790_v19 = vsel %vm3734_vm3, %v10767_v20, 0 }
 0x5bd   : > { %v10785_v58 = vld [vmem:[#allocation3 + $0xe0] sm:$0xff]  ;;  %v4062_v0 = vsel %vm3734_vm3, %v10777_v4, 0  ;;  %v10784_v53 = vld [vmem:[#allocation3 + $0xd8] sm:$0xff]  ;;  %v4059_v18 = vsel %vm3734_vm3, %v10776_v48, 0  ;;  %v10783_v38 = vld [vmem:[#allocation3 + $0xd0] sm:$0xff]  ;;  %v4056_v49 = vsel %vm3734_vm3, %v10775_v61, 0 }
 0x5be   : > { %v4086_v16 = vsel %vm3734_vm3, %v10785_v58, 0  ;;  %v4083_v24 = vsel %vm3734_vm3, %v10784_v53, 0  ;;  %v4080_v29 = vsel %vm3734_vm3, %v10783_v38, 0  ;;  %v10758_v27 = vld [vmem:[#allocation3 + $0x8] sm:$0xff]  ;;  %s9668_s24 = sshll.u32 %s18175_s26, 7  ;;  %v10757_v35 = vld [vmem:[#allocation3] sm:$0xff] }
 0x5bf   : > { %v10766_v62 = vld [vmem:[#allocation3 + $0x48] sm:$0xff]  ;;  %v3763_v41 = vsel %vm3734_vm3, %v10758_v27, 0  ;;  %v10765_v14 = vld [vmem:[#allocation3 + $0x40] sm:$0xff]  ;;  %s3290_s28 = sshra.s32 %s9668_s24, 3  ;;  %v10812_v43 = vld [vmem:[#allocation3 + $0x1b8] sm:$0xff]  ;;  %v3760_v33 = vsel %vm3734_vm3, %v10757_v35, 0  ;;  %s16464_s25 = scalar_lea.vmem %s12530_s2, %s9668_s24 [#allocation5] }
 0x5c0   : > { %3808 = vmatpush.bf16.xpose.msra.mxu0 %v3778_v51  ;;  %v10774_v31 = vld [vmem:[#allocation3 + $0x88] sm:$0xff]  ;;  %v3787_v63 = vsel %vm3734_vm3, %v10766_v62, 0  ;;  %v10773_v39 = vld [vmem:[#allocation3 + $0x80] sm:$0xff]  ;;  %v10820_v8 = vld [vmem:[#allocation3 + $0x1f8] sm:$0xff]  ;;  %v3784_v40 = vsel %vm3734_vm3, %v10765_v14, 0  ;;  %s9669_s0 = sshll.u32 %s3290_s28, 2 }
 0x5c1   : > { %3857 = vmatpush.bf16.xpose.msra.mxu1 %v3802_v1  ;;  %v10782_v9 = vld [vmem:[#allocation3 + $0xc8] sm:$0xff]  ;;  %v4053_v54 = vsel %vm3734_vm3, %v10774_v31, 0  ;;  %v10781_v60 = vld [vmem:[#allocation3 + $0xc0] sm:$0xff]  ;;  %v10796_v21 = vld [vmem:[#allocation3 + $0x138] sm:$0xff]  ;;  %v4050_v44 = vsel %vm3734_vm3, %v10773_v39, 0  ;;  %v4651_v57 = vsel %vm3734_vm3, %v10812_v43, 0 }
 0x5c2   : > { %4098 = vmatpush.bf16.xpose.msra.mxu2 %v4068_v50  ;;  %v4077_v25 = vsel %vm3734_vm3, %v10782_v9, 0  ;;  %v10804_v32 = vld [vmem:[#allocation3 + $0x178] sm:$0xff]  ;;  %v4074_v2 = vsel %vm3734_vm3, %v10781_v60, 0  ;;  %v4675_v46 = vsel %vm3734_vm3, %v10820_v8, 0  ;;  %v4361_v36 = vsel %vm3734_vm3, %v10796_v21, 0  ;;  %s15102_s1 = scalar_lea.vmem [#allocation2], %s9669_s0 }
 0x5c3   : > { %4147 = vmatpush.bf16.xpose.msra.mxu3 %v4092_v45  ;;  %v4385_v22 = vsel %vm3734_vm3, %v10804_v32, 0  ;;  %v10725_v28 = vld [vmem:[%s15102_s1] sm:$0xff]  ;;  %v10811_v23 = vld [vmem:[#allocation3 + $0x1b0] sm:$0xff]  ;;  %v10810_v12 = vld [vmem:[#allocation3 + $0x1a8] sm:$0xff]  ;;  %s18462_s5 = sld [smem:[#allocation163_spill]]  ;;  %s10695_s4 = sshll.u32 %s18175_s26, 4 }
 0x5c4   : > { %v10819_v55 = vld [vmem:[#allocation3 + $0x1f0] sm:$0xff]  ;;  %v10733_v15 = vld [vmem:[%s15102_s1 + $0x80] sm:$0xff]  ;;  %v4648_v50 = vsel %vm3734_vm3, %v10811_v23, 0  ;;  %v10818_v56 = vld [vmem:[#allocation3 + $0x1e8] sm:$0xff]  ;;  %s18472_s11 = sld [smem:[#allocation165_spill]]  ;;  %s9349_s2 = scalar_lea.sflag [#allocation7], %s611_s6 }
 0x5c5   : > { %v10795_v51 = vld [vmem:[#allocation3 + $0x130] sm:$0xff]  ;;  %v4672_v45 = vsel %vm3734_vm3, %v10819_v55, 0  ;;  %v10726_v4 = vld [vmem:[%s15102_s1 + $0x8] sm:$0xff]  ;;  %v10792_v30 = vld [vmem:[#allocation3 + $0x118] sm:$0xff]  ;;  %s18485_s20 = sld [smem:[#allocation33_spill]] }
 0x5c6   : > { %v10803_v1 = vld [vmem:[#allocation3 + $0x170] sm:$0xff]  ;;  %v4358_v59 = vsel %vm3734_vm3, %v10795_v51, 0  ;;  %v10734_v58 = vld [vmem:[%s15102_s1 + $0x88] sm:$0xff]  ;;  %v10800_v20 = vld [vmem:[#allocation3 + $0x158] sm:$0xff]  ;;  %s18490_s0 = sld [smem:[#allocation166_spill]] }
 0x5c7   : > { %v4382_v11 = vsel %vm3734_vm3, %v10803_v1, 0  ;;  %v10807_v27 = vld [vmem:[#allocation3 + $0x190] sm:$0xff]  ;;  %v10729_v35 = vld [vmem:[%s15102_s1 + $0x20] sm:$0xff]  ;;  %v10806_v39 = vld [vmem:[#allocation3 + $0x188] sm:$0xff] }
 0x5c8   : > { %3809 = vmatpush.bf16.xpose.msra.mxu0 %v3775_v7  ;;  %v10794_v7 = vld [vmem:[#allocation3 + $0x128] sm:$0xff]  ;;  %v10815_v62 = vld [vmem:[#allocation3 + $0x1d0] sm:$0xff]  ;;  %v10737_v14 = vld [vmem:[%s15102_s1 + $0xa0] sm:$0xff]  ;;  %v4633_v21 = vsel %vm3734_vm3, %v10806_v39, 0 }
 0x5c9   : > { %3858 = vmatpush.bf16.xpose.msra.mxu1 %v3799_v17  ;;  %v10802_v17 = vld [vmem:[#allocation3 + $0x168] sm:$0xff]  ;;  %v4355_v5 = vsel %vm3734_vm3, %v10794_v7, 0  ;;  %v10791_v31 = vld [vmem:[#allocation3 + $0x110] sm:$0xff]  ;;  %v10789_v55 = vld [vmem:[#allocation3 + $0x100] sm:$0xff] }
 0x5ca   : > { %4099 = vmatpush.bf16.xpose.msra.mxu2 %v4065_v34  ;;  %v4645_v34 = vsel %vm3734_vm3, %v10810_v12, 0  ;;  %v4379_v10 = vsel %vm3734_vm3, %v10802_v17, 0  ;;  %v10799_v9 = vld [vmem:[#allocation3 + $0x150] sm:$0xff]  ;;  %v10814_v60 = vld [vmem:[#allocation3 + $0x1c8] sm:$0xff]  ;;  %v4340_v51 = vsel %vm3734_vm3, %v10789_v55, 0 }
 0x5cb   : > { %4148 = vmatpush.bf16.xpose.msra.mxu3 %v4089_v37  ;;  %v4669_v37 = vsel %vm3734_vm3, %v10818_v56, 0  ;;  %v10790_v43 = vld [vmem:[#allocation3 + $0x108] sm:$0xff]  ;;  %v4657_v32 = vsel %vm3734_vm3, %v10814_v60, 0  ;;  %v10739_v23 = vld [vmem:[%s15102_s1 + $0xb0] sm:$0xff]  ;;  %v10749_v56 = vld [vmem:[%s15102_s1 + $0x180] sm:$0xff]  ;;  %s10696_s12 = sshll.u32 %s18485_s20, 5 }
 0x5cc   : > { %v10798_v8 = vld [vmem:[#allocation3 + $0x148] sm:$0xff]  ;;  %s9360_s23 = sadd.s32 %s10696_s12, %s10695_s4  ;;  %s12131_s20 = scalar_lea.hbm %s18490_s0, 512 }
 0x5cd   : > { %s10697_s14 = sshll.u32 %s9360_s23, 3 }
 0x5d0   : > { %3810 = vmatpush.bf16.xpose.msra.mxu0 %v3772_v52  ;;  %v10809_v52 = vld [vmem:[#allocation3 + $0x1a0] sm:$0xff] }
 0x5d1   : > { %3859 = vmatpush.bf16.xpose.msra.mxu1 %v3796_v47  ;;  %v10817_v47 = vld [vmem:[#allocation3 + $0x1e0] sm:$0xff]  ;;  %v4642_v3 = vsel %vm3734_vm3, %v10809_v52, 0 }
 0x5d2   : > { %4100 = vmatpush.bf16.xpose.msra.mxu2 %v4062_v0  ;;  %v10793_v0 = vld [vmem:[#allocation3 + $0x120] sm:$0xff]  ;;  %v4666_v6 = vsel %vm3734_vm3, %v10817_v47, 0 }
 0x5d3   : > { %4149 = vmatpush.bf16.xpose.msra.mxu3 %v4086_v16  ;;  %v10801_v16 = vld [vmem:[#allocation3 + $0x160] sm:$0xff]  ;;  %v4352_v48 = vsel %vm3734_vm3, %v10793_v0, 0 }
 0x5d4   : > { %v4376_v53 = vsel %vm3734_vm3, %v10801_v16, 0 }
 0x5d8   : > { %3811 = vmatpush.bf16.xpose.msra.mxu0 %v3769_v13  ;;  %v10727_v13 = vld [vmem:[%s15102_s1 + $0x10] sm:$0xff] }
 0x5d9   : > { %3860 = vmatpush.bf16.xpose.msra.mxu1 %v3793_v26  ;;  %v10735_v26 = vld [vmem:[%s15102_s1 + $0x90] sm:$0xff] }
 0x5da   : > { %4101 = vmatpush.bf16.xpose.msra.mxu2 %v4059_v18  ;;  %v10808_v18 = vld [vmem:[#allocation3 + $0x198] sm:$0xff] }
 0x5db   : > { %4150 = vmatpush.bf16.xpose.msra.mxu3 %v4083_v24  ;;  %v10816_v24 = vld [vmem:[#allocation3 + $0x1d8] sm:$0xff]  ;;  %v4639_v61 = vsel %vm3734_vm3, %v10808_v18, 0 }
 0x5dc   : > { %v4663_v38 = vsel %vm3734_vm3, %v10816_v24, 0 }
 0x5e0   : > { %3812 = vmatpush.bf16.xpose.msra.mxu0 %v3766_v42  ;;  %v4349_v42 = vsel %vm3734_vm3, %v10792_v30, 0  ;;  %v10750_v30 = vld [vmem:[%s15102_s1 + $0x188] sm:$0xff] }
 0x5e1   : > { %3861 = vmatpush.bf16.xpose.msra.mxu1 %v3790_v19  ;;  %v4373_v19 = vsel %vm3734_vm3, %v10800_v20, 0 }
 0x5e2   : > { %4102 = vmatpush.bf16.xpose.msra.mxu2 %v4056_v49  ;;  %v10728_v49 = vld [vmem:[%s15102_s1 + $0x18] sm:$0xff] }
 0x5e3   : > { %4151 = vmatpush.bf16.xpose.msra.mxu3 %v4080_v29  ;;  %v10736_v29 = vld [vmem:[%s15102_s1 + $0x98] sm:$0xff] }
 0x5e8   : > { %3813 = vmatpush.bf16.xpose.msra.mxu0 %v3763_v41  ;;  %v4636_v41 = vsel %vm3734_vm3, %v10807_v27, 0 }
 0x5e9   : > { %3862 = vmatpush.bf16.xpose.msra.mxu1 %v3787_v63  ;;  %v4660_v63 = vsel %vm3734_vm3, %v10815_v62, 0 }
 0x5ea   : > { %4103 = vmatpush.bf16.xpose.msra.mxu2 %v4053_v54  ;;  %v4346_v54 = vsel %vm3734_vm3, %v10791_v31, 0 }
 0x5eb   : > { %4152 = vmatpush.bf16.xpose.msra.mxu3 %v4077_v25  ;;  %v4370_v25 = vsel %vm3734_vm3, %v10799_v9, 0 }
 0x5f0   : > { %3814 = vmatpush.bf16.xpose.msra.mxu0 %v3760_v33  ;;  %v4343_v33 = vsel %vm3734_vm3, %v10790_v43, 0 }
 0x5f1   : > { %3863 = vmatpush.bf16.xpose.msra.mxu1 %v3784_v40  ;;  %v4367_v40 = vsel %vm3734_vm3, %v10798_v8, 0 }
 0x5f2   : > { %4104 = vmatpush.bf16.xpose.msra.mxu2 %v4050_v44  ;;  %v10730_v44 = vld [vmem:[%s15102_s1 + $0x28] sm:$0xff] }
 0x5f3   : > { %4153 = vmatpush.bf16.xpose.msra.mxu3 %v4074_v2  ;;  %v10738_v2 = vld [vmem:[%s15102_s1 + $0xa8] sm:$0xff] }
 0x5f7   : > { %9766 = vmatmul.msk.bf16.vlgmr.msra.gmra.mxu0 %vm3734_vm3, %v10725_v28 }
 0x5f8   : > { %4387 = vmatpush.bf16.xpose.msrb.mxu0 %v4361_v36  ;;  %9774 = vmatmul.msk.bf16.vlgmr.msra.gmra.mxu1 %vm3734_vm3, %v10725_v28  ;;  %v10731_v28 = vld [vmem:[%s15102_s1 + $0x30] sm:$0xff] }
 0x5f9   : > { %4436 = vmatpush.bf16.xpose.msrb.mxu1 %v4385_v22  ;;  %9878 = vmatmul.msk.bf16.vlgmr.msra.gmra.mxu2 %vm3734_vm3, %v10733_v15 }
 0x5fa   : > { %4677 = vmatpush.bf16.xpose.msrb.mxu2 %v4651_v57  ;;  %9886 = vmatmul.msk.bf16.vlgmr.msra.gmra.mxu3 %vm3734_vm3, %v10733_v15  ;;  %v10805_v57 = vld [vmem:[#allocation3 + $0x180] sm:$0xff] }
 0x5fb   : > { %4726 = vmatpush.bf16.xpose.msrb.mxu3 %v4675_v46  ;;  %v10813_v46 = vld [vmem:[#allocation3 + $0x1c0] sm:$0xff]  ;;  %v4630_v36 = vsel %vm3734_vm3, %v10805_v57, 0 }
 0x5fc   : > { %v4654_v22 = vsel %vm3734_vm3, %v10813_v46, 0  ;;  %v10797_v15 = vld [vmem:[#allocation3 + $0x140] sm:$0xff] }
 0x5fd   : > { %v4364_v1 = vsel %vm3734_vm3, %v10797_v15, 0 }
 0x600   : > { %4388 = vmatpush.bf16.xpose.msrb.mxu0 %v4358_v59  ;;  %v10741_v59 = vld [vmem:[%s15102_s1 + $0x100] sm:$0xff] }
 0x601   : > { %4437 = vmatpush.bf16.xpose.msrb.mxu1 %v4382_v11 }
 0x602   : > { %4678 = vmatpush.bf16.xpose.msrb.mxu2 %v4648_v50  ;;  %v10732_v50 = vld [vmem:[%s15102_s1 + $0x38] sm:$0xff] }
 0x603   : > { %4727 = vmatpush.bf16.xpose.msrb.mxu3 %v4672_v45  ;;  %v10740_v45 = vld [vmem:[%s15102_s1 + $0xb8] sm:$0xff] }
 0x607   : > { %9767 = vmatmul.msk.bf16.gmra.mxu0 %vm3734_vm3, %v10726_v4 }
 0x608   : > { %4389 = vmatpush.bf16.xpose.msrb.mxu0 %v4355_v5  ;;  %9775 = vmatmul.msk.bf16.gmra.mxu1 %vm3734_vm3, %v10726_v4 }
 0x609   : > { %4438 = vmatpush.bf16.xpose.msrb.mxu1 %v4379_v10  ;;  %9879 = vmatmul.msk.bf16.gmra.mxu2 %vm3734_vm3, %v10734_v58 }
 0x60a   : > { %4679 = vmatpush.bf16.xpose.msrb.mxu2 %v4645_v34  ;;  %9887 = vmatmul.msk.bf16.gmra.mxu3 %vm3734_vm3, %v10734_v58 }
 0x60b   : > { %4728 = vmatpush.bf16.xpose.msrb.mxu3 %v4669_v37 }
 0x610   : > { %4390 = vmatpush.bf16.xpose.msrb.mxu0 %v4352_v48 }
 0x611   : > { %4439 = vmatpush.bf16.xpose.msrb.mxu1 %v4376_v53  ;;  %v10742_v53 = vld [vmem:[%s15102_s1 + $0x108] sm:$0xff] }
 0x612   : > { %4680 = vmatpush.bf16.xpose.msrb.mxu2 %v4642_v3 }
 0x613   : > { %4729 = vmatpush.bf16.xpose.msrb.mxu3 %v4666_v6 }
 0x617   : > { %9768 = vmatmul.msk.bf16.gmra.mxu0 %vm3734_vm3, %v10727_v13 }
 0x618   : > { %9776 = vmatmul.msk.bf16.gmra.mxu1 %vm3734_vm3, %v10727_v13  ;;  %4391 = vmatpush.bf16.xpose.msrb.mxu0 %v4349_v42 }
 0x619   : > { %9880 = vmatmul.msk.bf16.gmra.mxu2 %vm3734_vm3, %v10735_v26  ;;  %4440 = vmatpush.bf16.xpose.msrb.mxu1 %v4373_v19 }
 0x61a   : > { %9888 = vmatmul.msk.bf16.gmra.mxu3 %vm3734_vm3, %v10735_v26  ;;  %4681 = vmatpush.bf16.xpose.msrb.mxu2 %v4639_v61 }
 0x61b   : > { %4730 = vmatpush.bf16.xpose.msrb.mxu3 %v4663_v38 }
 0x620   : > { %4392 = vmatpush.bf16.xpose.msrb.mxu0 %v4346_v54 }
 0x621   : > { %4441 = vmatpush.bf16.xpose.msrb.mxu1 %v4370_v25 }
 0x622   : > { %4682 = vmatpush.bf16.xpose.msrb.mxu2 %v4636_v41 }
 0x623   : > { %4731 = vmatpush.bf16.xpose.msrb.mxu3 %v4660_v63 }
 0x627   : > { %9769 = vmatmul.msk.bf16.gmra.mxu0 %vm3734_vm3, %v10728_v49 }
 0x628   : > { %9777 = vmatmul.msk.bf16.gmra.mxu1 %vm3734_vm3, %v10728_v49  ;;  %4393 = vmatpush.bf16.xpose.msrb.mxu0 %v4343_v33 }
 0x629   : > { %9881 = vmatmul.msk.bf16.gmra.mxu2 %vm3734_vm3, %v10736_v29  ;;  %4442 = vmatpush.bf16.xpose.msrb.mxu1 %v4367_v40 }
 0x62a   : > { %9889 = vmatmul.msk.bf16.gmra.mxu3 %vm3734_vm3, %v10736_v29  ;;  %4683 = vmatpush.bf16.xpose.msrb.mxu2 %v4633_v21  ;;  %v10751_v21 = vld [vmem:[%s15102_s1 + $0x190] sm:$0xff] }
 0x62b   : > { %4732 = vmatpush.bf16.xpose.msrb.mxu3 %v4657_v32 }
 0x630   : > { %4394 = vmatpush.bf16.xpose.msrb.mxu0 %v4340_v51 }
 0x631   : > { %4443 = vmatpush.bf16.xpose.msrb.mxu1 %v4364_v1 }
 0x632   : > { %4684 = vmatpush.bf16.xpose.msrb.mxu2 %v4630_v36 }
 0x633   : > { %4733 = vmatpush.bf16.xpose.msrb.mxu3 %v4654_v22 }
 0x637   : > { %9770 = vmatmul.msk.bf16.gmra.mxu0 %vm3734_vm3, %v10729_v35 }
 0x638   : > { %9778 = vmatmul.msk.bf16.gmra.mxu1 %vm3734_vm3, %v10729_v35 }
 0x639   : > { %9882 = vmatmul.msk.bf16.gmra.mxu2 %vm3734_vm3, %v10737_v14 }
 0x63a   : > { %9890 = vmatmul.msk.bf16.gmra.mxu3 %vm3734_vm3, %v10737_v14  ;;  %v10743_v14 = vld [vmem:[%s15102_s1 + $0x110] sm:$0xff] }
 0x647   : > { %9771 = vmatmul.msk.bf16.gmra.mxu0 %vm3734_vm3, %v10730_v44 }
 0x648   : > { %9779 = vmatmul.msk.bf16.gmra.mxu1 %vm3734_vm3, %v10730_v44 }
 0x649   : > { %9883 = vmatmul.msk.bf16.gmra.mxu2 %vm3734_vm3, %v10738_v2 }
 0x64a   : > { %9891 = vmatmul.msk.bf16.gmra.mxu3 %vm3734_vm3, %v10738_v2 }
 0x657   : > { %9772 = vmatmul.msk.bf16.gmra.mxu0 %vm3734_vm3, %v10731_v28 }
 0x658   : > { %9780 = vmatmul.msk.bf16.gmra.mxu1 %vm3734_vm3, %v10731_v28 }
 0x659   : > { %9884 = vmatmul.msk.bf16.gmra.mxu2 %vm3734_vm3, %v10739_v23 }
 0x65a   : > { %9892 = vmatmul.msk.bf16.gmra.mxu3 %vm3734_vm3, %v10739_v23 }
 0x667   : > { %9773 = vmatmul.msk.bf16.gmra.mxu0 %vm3734_vm3, %v10732_v50 }
 0x668   : > { %9781 = vmatmul.msk.bf16.gmra.mxu1 %vm3734_vm3, %v10732_v50 }
 0x669   : > { %9885 = vmatmul.msk.bf16.gmra.mxu2 %vm3734_vm3, %v10740_v45 }
 0x66a   : > { %9893 = vmatmul.msk.bf16.gmra.mxu3 %vm3734_vm3, %v10740_v45 }
 0x674   : > { %v3816_v11 = vpop.f32.mrf.mxu0 }
 0x675   : > { %v3865_v12 = vpop.f32.mrf.mxu1  ;;  %v15182_v7 = vmul.f32 0.17677669, %v3816_v11 }
 0x676   : > { %v15184_v17 = vmul.f32 0.17677669, %v3865_v12 }
 0x677   : > { %9990 = vmatmul.msk.bf16.vlgmr.msrb.gmra.mxu0 %vm3734_vm3, %v10741_v59 }
 0x678   : > { %v4903_v34 = vmax.f32 %v15182_v7, %v15184_v17  ;;  %9998 = vmatmul.msk.bf16.vlgmr.msrb.gmra.mxu1 %vm3734_vm3, %v10741_v59 }
 0x679   : > { %10102 = vmatmul.msk.bf16.vlgmr.msrb.gmra.mxu2 %vm3734_vm3, %v10749_v56 }
 0x67a   : > { %10110 = vmatmul.msk.bf16.vlgmr.msrb.gmra.mxu3 %vm3734_vm3, %v10749_v56  ;;  %4904 = vmax.xlane.f32.xlu1 %v4903_v34  ;;  %v10744_v56 = vld [vmem:[%s15102_s1 + $0x118] sm:$0xff] }
 0x67b   : > { %v10752_v34 = vld [vmem:[%s15102_s1 + $0x198] sm:$0xff] }
 0x67c   : > { %v4106_v37 = vpop.f32.mrf.mxu2  ;;  %v3818_v58 = vpop.f32.mrf.mxu0 }
 0x67d   : > { %v4155_v5 = vpop.f32.mrf.mxu3  ;;  %v15192_v10 = vmul.f32 0.17677669, %v4106_v37  ;;  %v3867_v52 = vpop.f32.mrf.mxu1  ;;  %v15196_v47 = vmul.f32 0.17677669, %v3818_v58 }
 0x67e   : > { %v15194_v4 = vmul.f32 0.17677669, %v4155_v5  ;;  %v15198_v0 = vmul.f32 0.17677669, %v3867_v52 }
 0x680   : > { %v4951_v16 = vmax.f32 %v15192_v10, %v15194_v4  ;;  %v4906_v3 = vmax.f32 %v15196_v47, %v15198_v0 }
 0x682   : > { %4952 = vmax.xlane.f32.xlu0 %v4951_v16  ;;  %4907 = vmax.xlane.f32.xlu1 %v4906_v3 }
 0x684   : > { %v4108_v6 = vpop.f32.mrf.mxu2  ;;  %v3821_v18 = vpop.f32.mrf.mxu0 }
 0x685   : > { %v4157_v48 = vpop.f32.mrf.mxu3  ;;  %v15205_v13 = vmul.f32 0.17677669, %v4108_v6  ;;  %v3870_v24 = vpop.f32.mrf.mxu1  ;;  %v15216_v61 = vmul.f32 0.17677669, %v3821_v18 }
 0x686   : > { %v15207_v26 = vmul.f32 0.17677669, %v4157_v48  ;;  %v15218_v38 = vmul.f32 0.17677669, %v3870_v24 }
 0x687   : > { %9991 = vmatmul.msk.bf16.gmra.mxu0 %vm3734_vm3, %v10742_v53 }
 0x688   : > { %v4954_v20 = vmax.f32 %v15205_v13, %v15207_v26  ;;  %9999 = vmatmul.msk.bf16.gmra.mxu1 %vm3734_vm3, %v10742_v53  ;;  %v4909_v41 = vmax.f32 %v15216_v61, %v15218_v38 }
 0x689   : > { %10103 = vmatmul.msk.bf16.gmra.mxu2 %vm3734_vm3, %v10750_v30 }
 0x68a   : > { %10111 = vmatmul.msk.bf16.gmra.mxu3 %vm3734_vm3, %v10750_v30  ;;  %4955 = vmax.xlane.f32.xlu0 %v4954_v20 }
 0x68c   : > { %v4111_v42 = vpop.f32.mrf.mxu2  ;;  %v3823_v27 = vpop.f32.mrf.mxu0 }
 0x68d   : > { %v4160_v19 = vpop.f32.mrf.mxu3  ;;  %v15220_v49 = vmul.f32 0.17677669, %v4111_v42  ;;  %v3872_v62 = vpop.f32.mrf.mxu1  ;;  %v15224_v31 = vmul.f32 0.17677669, %v3823_v27 }
 0x68e   : > { %v15222_v29 = vmul.f32 0.17677669, %v4160_v19  ;;  %v15226_v9 = vmul.f32 0.17677669, %v3872_v62 }
 0x690   : > { %v4957_v63 = vmax.f32 %v15220_v49, %v15222_v29  ;;  %v4912_v54 = vmax.f32 %v15224_v31, %v15226_v9 }
 0x692   : > { %4958 = vmax.xlane.f32.xlu2 %v4957_v63  ;;  %4910 = vmax.xlane.f32.xlu0 %v4909_v41 }
 0x693   : > { %4913 = vmax.xlane.f32.xlu1 %v4912_v54 }
 0x694   : > { %v4113_v25 = vpop.f32.mrf.mxu2  ;;  %v3826_v43 = vpop.f32.mrf.mxu0 }
 0x695   : > { %v4162_v35 = vpop.f32.mrf.mxu3  ;;  %v15235_v39 = vmul.f32 0.17677669, %v4113_v25  ;;  %v3875_v8 = vpop.f32.mrf.mxu1  ;;  %v15240_v32 = vmul.f32 0.17677669, %v3826_v43 }
 0x696   : > { %v15237_v60 = vmul.f32 0.17677669, %v4162_v35  ;;  %v15242_v33 = vmul.f32 0.17677669, %v3875_v8 }
 0x697   : > { %9992 = vmatmul.msk.bf16.gmra.mxu0 %vm3734_vm3, %v10743_v14 }
 0x698   : > { %v4960_v40 = vmax.f32 %v15235_v39, %v15237_v60  ;;  %v4915_v44 = vmax.f32 %v15240_v32, %v15242_v33  ;;  %10000 = vmatmul.msk.bf16.gmra.mxu1 %vm3734_vm3, %v10743_v14 }
 0x699   : > { %10104 = vmatmul.msk.bf16.gmra.mxu2 %vm3734_vm3, %v10751_v21 }
 0x69a   : > { %4961 = vmax.xlane.f32.xlu2 %v4960_v40  ;;  %10112 = vmatmul.msk.bf16.gmra.mxu3 %vm3734_vm3, %v10751_v21 }
 0x69b   : > { %4916 = vmax.xlane.f32.xlu1 %v4915_v44 }
 0x69c   : > { %v4116_v2 = vpop.f32.mrf.mxu2  ;;  %v3828_v22 = vpop.f32.mrf.mxu0 }
 0x69d   : > { %v4165_v57 = vpop.f32.mrf.mxu3  ;;  %v15252_v46 = vmul.f32 0.17677669, %v4116_v2  ;;  %v3877_v28 = vpop.f32.mrf.mxu1  ;;  %v15258_v55 = vmul.f32 0.17677669, %v3828_v22  ;;  %v10753_v22 = vld [vmem:[%s15102_s1 + $0x1a0] sm:$0xff] }
 0x69e   : > { %v15254_v36 = vmul.f32 0.17677669, %v4165_v57  ;;  %v15260_v15 = vmul.f32 0.17677669, %v3877_v28 }
 0x6a0   : > { %v4963_v23 = vmax.f32 %v15252_v46, %v15254_v36  ;;  %v4918_v59 = vmax.f32 %v15258_v55, %v15260_v15 }
 0x6a2   : > { %4964 = vmax.xlane.f32.xlu2 %v4963_v23 }
 0x6a4   : > { %v4118_v51 = vpop.f32.mrf.mxu2  ;;  %v3831_v11 = vpop.f32.mrf.mxu0 }
 0x6a5   : > { %v4167_v1 = vpop.f32.mrf.mxu3  ;;  %v15262_v50 = vmul.f32 0.17677669, %v4118_v51  ;;  %v3880_v12 = vpop.f32.mrf.mxu1  ;;  %v15274_v5 = vmul.f32 0.17677669, %v3831_v11 }
 0x6a6   : > { %v15264_v45 = vmul.f32 0.17677669, %v4167_v1  ;;  %v15276_v58 = vmul.f32 0.17677669, %v3880_v12 }
 0x6a7   : > { %9993 = vmatmul.msk.bf16.gmra.mxu0 %vm3734_vm3, %v10744_v56 }
 0x6a8   : > { %v4966_v37 = vmax.f32 %v15262_v50, %v15264_v45  ;;  %10001 = vmatmul.msk.bf16.gmra.mxu1 %vm3734_vm3, %v10744_v56  ;;  %v4921_v48 = vmax.f32 %v15274_v5, %v15276_v58 }
 0x6a9   : > { %10105 = vmatmul.msk.bf16.gmra.mxu2 %vm3734_vm3, %v10752_v34 }
 0x6aa   : > { %4967 = vmax.xlane.f32.xlu0 %v4966_v37  ;;  %4919 = vmax.xlane.f32.xlu2 %v4918_v59 }
 0x6ab   : > { %10113 = vmatmul.msk.bf16.gmra.mxu3 %vm3734_vm3, %v10752_v34 }
 0x6ac   : > { %v4121_v52 = vpop.f32.mrf.mxu2  ;;  %v3833_v53 = vpop.f32.mrf.mxu0 }
 0x6ad   : > { %v4170_v16 = vpop.f32.mrf.mxu3  ;;  %v15280_v3 = vmul.f32 0.17677669, %v4121_v52  ;;  %v3882_v18 = vpop.f32.mrf.mxu1  ;;  %v15288_v30 = vmul.f32 0.17677669, %v3833_v53  ;;  %v10745_v52 = vld [vmem:[%s15102_s1 + $0x120] sm:$0xff] }
 0x6ae   : > { %v15282_v6 = vmul.f32 0.17677669, %v4170_v16  ;;  %v15290_v20 = vmul.f32 0.17677669, %v3882_v18 }
 0x6b0   : > { %v4969_v24 = vmax.f32 %v15280_v3, %v15282_v6  ;;  %v4924_v41 = vmax.f32 %v15288_v30, %v15290_v20 }
 0x6b2   : > { %4970 = vmax.xlane.f32.xlu0 %v4969_v24  ;;  %4922 = vmax.xlane.f32.xlu2 %v4921_v48 }
 0x6b4   : > { %v4123_v42 = vpop.f32.mrf.mxu2  ;;  %v3836_v63 = vpop.f32.mrf.mxu0 }
 0x6b5   : > { %v4172_v19 = vpop.f32.mrf.mxu3  ;;  %v15292_v27 = vmul.f32 0.17677669, %v4123_v42  ;;  %v3885_v54 = vpop.f32.mrf.mxu1  ;;  %v15300_v35 = vmul.f32 0.17677669, %v3836_v63 }
 0x6b6   : > { %v15294_v62 = vmul.f32 0.17677669, %v4172_v19  ;;  %v15302_v14 = vmul.f32 0.17677669, %v3885_v54 }
 0x6b7   : > { %9994 = vmatmul.msk.bf16.gmra.mxu0 %vm3734_vm3, %v10745_v52 }
 0x6b8   : > { %v4972_v25 = vmax.f32 %v15292_v27, %v15294_v62  ;;  %v4927_v44 = vmax.f32 %v15300_v35, %v15302_v14  ;;  %10002 = vmatmul.msk.bf16.gmra.mxu1 %vm3734_vm3, %v10745_v52 }
 0x6b9   : > { %10106 = vmatmul.msk.bf16.gmra.mxu2 %vm3734_vm3, %v10753_v22 }
 0x6ba   : > { %4973 = vmax.xlane.f32.xlu1 %v4972_v25  ;;  %4925 = vmax.xlane.f32.xlu0 %v4924_v41 }
 0x6bb   : > { %10114 = vmatmul.msk.bf16.gmra.mxu3 %vm3734_vm3, %v10753_v22 }
 0x6bc   : > { %v4126_v43 = vpop.f32.mrf.mxu2  ;;  %v3838_v2 = vpop.f32.mrf.mxu0 }
 0x6bd   : > { %v4175_v8 = vpop.f32.mrf.mxu3  ;;  %v15304_v21 = vmul.f32 0.17677669, %v4126_v43  ;;  %v3887_v57 = vpop.f32.mrf.mxu1  ;;  %v15315_v23 = vmul.f32 0.17677669, %v3838_v2 }
 0x6be   : > { %v15306_v40 = vmul.f32 0.17677669, %v4175_v8  ;;  %v15317_v51 = vmul.f32 0.17677669, %v3887_v57 }
 0x6c0   : > { %v4975_v28 = vmax.f32 %v15304_v21, %v15306_v40  ;;  %v4930_v56 = vmax.f32 %v15315_v23, %v15317_v51 }
 0x6c2   : > { %4976 = vmax.xlane.f32.xlu2 %v4975_v28  ;;  %4928 = vmax.xlane.f32.xlu1 %v4927_v44 }
 0x6c4   : > { %v4128_v1 = vpop.f32.mrf.mxu2  ;;  %v3841_v34 = vpop.f32.mrf.mxu0 }
 0x6c5   : > { %v4177_v59 = vpop.f32.mrf.mxu3  ;;  %v15319_v11 = vmul.f32 0.17677669, %v4128_v1  ;;  %v3890_v37 = vpop.f32.mrf.mxu1  ;;  %v15330_v48 = vmul.f32 0.17677669, %v3841_v34  ;;  %v10754_v34 = vld [vmem:[%s15102_s1 + $0x1a8] sm:$0xff] }
 0x6c6   : > { %v15321_v12 = vmul.f32 0.17677669, %v4177_v59  ;;  %v15332_v53 = vmul.f32 0.17677669, %v3890_v37 }
 0x6c8   : > { %v4978_v16 = vmax.f32 %v15319_v11, %v15321_v12  ;;  %v4933_v41 = vmax.f32 %v15330_v48, %v15332_v53 }
 0x6c9   : > { %10107 = vmatmul.msk.bf16.gmra.mxu2 %vm3734_vm3, %v10754_v34 }
 0x6ca   : > { %4979 = vmax.xlane.f32.xlu0 %v4978_v16  ;;  %4931 = vmax.xlane.f32.xlu2 %v4930_v56 }
 0x6cb   : > { %10115 = vmatmul.msk.bf16.gmra.mxu3 %vm3734_vm3, %v10754_v34 }
 0x6cc   : > { %v4131_v18 = vpop.f32.mrf.mxu2  ;;  %v3843_v63 = vpop.f32.mrf.mxu0 }
 0x6cd   : > { %v4180_v24 = vpop.f32.mrf.mxu3  ;;  %v15334_v42 = vmul.f32 0.17677669, %v4131_v18  ;;  %v3892_v54 = vpop.f32.mrf.mxu1  ;;  %v15342_v43 = vmul.f32 0.17677669, %v3843_v63 }
 0x6ce   : > { %v15336_v19 = vmul.f32 0.17677669, %v4180_v24  ;;  %v15344_v8 = vmul.f32 0.17677669, %v3892_v54 }
 0x6cf   : > { %18176 = vst [vmem:[#allocation83_spill] sm:$0xff] %v15342_v43 }
 0x6d0   : > { %v4981_v25 = vmax.f32 %v15334_v42, %v15336_v19  ;;  %18177 = vst [vmem:[#allocation84_spill] sm:$0xff] %v15344_v8  ;;  %v4936_v28 = vmax.f32 %v15342_v43, %v15344_v8 }
 0x6d2   : > { %4982 = vmax.xlane.f32.xlu1 %v4981_v25  ;;  %4934 = vmax.xlane.f32.xlu0 %v4933_v41 }
 0x6d4   : > { %v4133_v44 = vpop.f32.mrf.mxu2  ;;  %v3846_v1 = vpop.f32.mrf.mxu0 }
 0x6d5   : > { %v4182_v2 = vpop.f32.mrf.mxu3  ;;  %v15346_v57 = vmul.f32 0.17677669, %v4133_v44  ;;  %v3895_v59 = vpop.f32.mrf.mxu1  ;;  %v15355_v37 = vmul.f32 0.17677669, %v3846_v1 }
 0x6d6   : > { %v15348_v22 = vmul.f32 0.17677669, %v4182_v2  ;;  %v15357_v52 = vmul.f32 0.17677669, %v3895_v59 }
 0x6d7   : > { %18178 = vst [vmem:[#allocation85_spill] sm:$0xff] %v15355_v37 }
 0x6d8   : > { %v4984_v56 = vmax.f32 %v15346_v57, %v15348_v22  ;;  %18179 = vst [vmem:[#allocation86_spill] sm:$0xff] %v15357_v52  ;;  %v4939_v63 = vmax.f32 %v15355_v37, %v15357_v52 }
 0x6da   : > { %4985 = vmax.xlane.f32.xlu2 %v4984_v56  ;;  %4937 = vmax.xlane.f32.xlu1 %v4936_v28 }
 0x6dc   : > { %v4136_v16 = vpop.f32.mrf.mxu2  ;;  %v3848_v54 = vpop.f32.mrf.mxu0 }
 0x6dd   : > { %v4185_v18 = vpop.f32.mrf.mxu3  ;;  %v15361_v24 = vmul.f32 0.17677669, %v4136_v16  ;;  %v3897_v25 = vpop.f32.mrf.mxu1  ;;  %v15369_v2 = vmul.f32 0.17677669, %v3848_v54 }
 0x6de   : > { %v15363_v41 = vmul.f32 0.17677669, %v4185_v18  ;;  %v15371_v28 = vmul.f32 0.17677669, %v3897_v25 }
 0x6df   : > { %18180 = vst [vmem:[#allocation87_spill] sm:$0xff] %v15361_v24 }
 0x6e0   : > { %18181 = vst [vmem:[#allocation88_spill] sm:$0xff] %v15363_v41  ;;  %v4987_v44 = vmax.f32 %v15361_v24, %v15363_v41  ;;  %v4942_v16 = vmax.f32 %v15369_v2, %v15371_v28 }
 0x6e1   : > { %18182 = vst [vmem:[#allocation89_spill] sm:$0xff] %v15369_v2 }
 0x6e2   : > { %4988 = vmax.xlane.f32.xlu0 %v4987_v44  ;;  %4940 = vmax.xlane.f32.xlu2 %v4939_v63  ;;  %18183 = vst [vmem:[#allocation90_spill] sm:$0xff] %v15371_v28 }
 0x6e4   : > { %v4138_v1 = vpop.f32.mrf.mxu2  ;;  %v3851_v18 = vpop.f32.mrf.mxu0 }
 0x6e5   : > { %v4187_v59 = vpop.f32.mrf.mxu3  ;;  %v15373_v56 = vmul.f32 0.17677669, %v4138_v1  ;;  %v3900_v52 = vpop.f32.mrf.mxu1  ;;  %v15381_v63 = vmul.f32 0.17677669, %v3851_v18 }
 0x6e6   : > { %v15375_v34 = vmul.f32 0.17677669, %v4187_v59  ;;  %v15383_v54 = vmul.f32 0.17677669, %v3900_v52 }
 0x6e7   : > { %18184 = vst [vmem:[#allocation91_spill] sm:$0xff] %v15373_v56 }
 0x6e8   : > { %18185 = vst [vmem:[#allocation92_spill] sm:$0xff] %v15375_v34  ;;  %v4990_v37 = vmax.f32 %v15373_v56, %v15375_v34  ;;  %v4945_v28 = vmax.f32 %v15381_v63, %v15383_v54 }
 0x6e9   : > { %18186 = vst [vmem:[#allocation93_spill] sm:$0xff] %v15381_v63 }
 0x6ea   : > { %4991 = vmax.xlane.f32.xlu1 %v4990_v37  ;;  %4943 = vmax.xlane.f32.xlu0 %v4942_v16  ;;  %18187 = vst [vmem:[#allocation94_spill] sm:$0xff] %v15383_v54 }
 0x6ec   : > { %v4141_v25 = vpop.f32.mrf.mxu2  ;;  %v3853_v2 = vpop.f32.mrf.mxu0 }
 0x6ed   : > { %v4190_v44 = vpop.f32.mrf.mxu3  ;;  %v15385_v1 = vmul.f32 0.17677669, %v4141_v25  ;;  %v3902_v41 = vpop.f32.mrf.mxu1  ;;  %v15393_v37 = vmul.f32 0.17677669, %v3853_v2 }
 0x6ee   : > { %v15387_v59 = vmul.f32 0.17677669, %v4190_v44  ;;  %v15395_v52 = vmul.f32 0.17677669, %v3902_v41  ;;  %v4905_v16 = vpop.xlane.xlu1 %4904 }
 0x6ef   : > { %18188 = vst [vmem:[#allocation95_spill] sm:$0xff] %v15385_v1  ;;  %v5095_v44 = vsub.f32 %v15182_v7, %v4905_v16 }
 0x6f0   : > { %18189 = vst [vmem:[#allocation96_spill] sm:$0xff] %v15387_v59  ;;  %v4993_v34 = vmax.f32 %v15385_v1, %v15387_v59  ;;  %v5096_v1 = vsub.f32 %v15184_v17, %v4905_v16 }
 0x6f1   : > { %18190 = vst [vmem:[#allocation97_spill] sm:$0xff] %v15395_v52 }
 0x6f2   : > { %4994 = vmax.xlane.f32.xlu2 %v4993_v34  ;;  %4946 = vmax.xlane.f32.xlu1 %v4945_v28  ;;  %v4948_v34 = vmax.f32 %v15393_v37, %v15395_v52 }
 0x6f4   : > { %v4143_v63 = vpop.f32.mrf.mxu2  ;;  %v4396_v2 = vpop.f32.mrf.mxu0 }
 0x6f5   : > { %v4192_v18 = vpop.f32.mrf.mxu3  ;;  %v4953_v25 = vpop.xlane.xlu0 %4952  ;;  %v15403_v28 = vmul.f32 0.17677669, %v4143_v63  ;;  %v15410_v8 = vmul.f32 0.17677669, %v4396_v2  ;;  %v10755_v63 = vld [vmem:[%s15102_s1 + $0x1b0] sm:$0xff] }
 0x6f6   : > { %v15398_v56 = vmul.f32 0.17677669, %v4192_v18  ;;  %v5127_v54 = vsub.f32 %v15192_v10, %v4953_v25  ;;  %v5128_v41 = vsub.f32 %v15194_v4, %v4953_v25  ;;  %v4445_v59 = vpop.f32.mrf.mxu1  ;;  %v5223_v18 = vmul.f32 1.442695, %v5095_v44  ;;  %v10746_v10 = vld [vmem:[%s15102_s1 + $0x128] sm:$0xff]  ;;  %10108 = vmatmul.msk.bf16.gmra.mxu2 %vm3734_vm3, %v10755_v63  ;;  %10116 = vmatmul.msk.bf16.gmra.mxu3 %vm3734_vm3, %v10755_v63  ;;  %v4908_v2 = vpop.xlane.xlu1 %4907 }
 0x6f7   : > { %18191 = vst [vmem:[#allocation98_spill] sm:$0xff] %v15410_v8  ;;  %v15412_v43 = vmul.f32 0.17677669, %v4445_v59  ;;  %9995 = vmatmul.msk.bf16.gmra.mxu0 %vm3734_vm3, %v10746_v10  ;;  %10003 = vmatmul.msk.bf16.gmra.mxu1 %vm3734_vm3, %v10746_v10  ;;  %v5225_v4 = vmul.f32 1.442695, %v5096_v1 }
 0x6f8   : > { %v4996_v7 = vmax.f32 %v15403_v28, %v15398_v56  ;;  %v5287_v24 = vmul.f32 1.442695, %v5127_v54  ;;  %v5289_v52 = vmul.f32 1.442695, %v5128_v41  ;;  %11263 = vpow2.f32 %v5223_v18 }
 0x6f9   : > { %18192 = vst [vmem:[#allocation99_spill] sm:$0xff] %v15412_v43 }
 0x6fa   : > { %4949 = vmax.xlane.f32.xlu2 %v4948_v34  ;;  %4997 = vmax.xlane.f32.xlu0 %v4996_v7  ;;  %11265 = vpow2.f32 %v5287_v24  ;;  %v4999_v34 = vmax.f32 %v15410_v8, %v15412_v43 }
 0x6fb   : > { %11267 = vpow2.f32 %v5289_v52 }
 0x6fc   : > { %v4686_v25 = vpop.f32.mrf.mxu2  ;;  %11269 = vpow2.f32 %v5225_v4 }
 0x6fd   : > { %v4735_v17 = vpop.f32.mrf.mxu3  ;;  %v4956_v16 = vpop.xlane.xlu0 %4955  ;;  %v15422_v44 = vmul.f32 0.17677669, %v4686_v25 }
 0x6fe   : > { %v15419_v54 = vmul.f32 0.17677669, %v4735_v17  ;;  %v5129_v59 = vsub.f32 %v15205_v13, %v4956_v16  ;;  %v5130_v1 = vsub.f32 %v15207_v26, %v4956_v16  ;;  %v15429_v18 = vpop.eup %11263  ;;  %v4398_v13 = vpop.f32.mrf.mxu0  ;;  %v5097_v26 = vsub.f32 %v15196_v47, %v4908_v2 }
 0x6ff   : > { %18194 = vst [vmem:[#allocation101_spill] sm:$0xff] %v15429_v18 }
 0x700   : > { %18193 = vst [vmem:[#allocation100_spill] sm:$0xff] %v15419_v54  ;;  %v5047_v41 = vmax.f32 %v15422_v44, %v15419_v54  ;;  %v5291_v7 = vmul.f32 1.442695, %v5129_v59  ;;  %v5293_v24 = vmul.f32 1.442695, %v5130_v1  ;;  %v15431_v10 = vpop.eup %11265  ;;  %v5098_v59 = vsub.f32 %v15198_v0, %v4908_v2  ;;  %v10747_v2 = vld [vmem:[%s15102_s1 + $0x130] sm:$0xff] }
 0x701   : > { %18195 = vst [vmem:[#allocation102_spill] sm:$0xff] %v15431_v10  ;;  %v15433_v25 = vpop.eup %11267  ;;  %v5227_v8 = vmul.f32 1.442695, %v5097_v26 }
 0x702   : > { %5048 = vmax.xlane.f32.xlu1 %v5047_v41  ;;  %5000 = vmax.xlane.f32.xlu0 %v4999_v34  ;;  %18196 = vst [vmem:[#allocation103_spill] sm:$0xff] %v15433_v25  ;;  %v15438_v16 = vpop.eup %11269  ;;  %11271 = vpow2.f32 %v5291_v7  ;;  %v4447_v34 = vpop.f32.mrf.mxu1  ;;  %v5527_v47 = vadd.f32 %v15433_v25, %v15431_v10  ;;  %v5229_v0 = vmul.f32 1.442695, %v5098_v59  ;;  %v15456_v25 = vmul.f32 0.17677669, %v4398_v13 }
 0x703   : > { %18197 = vst [vmem:[#allocation104_spill] sm:$0xff] %v15438_v16  ;;  %11273 = vpow2.f32 %v5293_v24  ;;  %v5479_v54 = vadd.f32 %v15438_v16, %v15429_v18 }
 0x704   : > { %v4688_v4 = vpop.f32.mrf.mxu2  ;;  %11275 = vpow2.f32 %v5227_v8 }
 0x705   : > { %v4737_v63 = vpop.f32.mrf.mxu3  ;;  %v4959_v17 = vpop.xlane.xlu2 %4958  ;;  %v15441_v1 = vmul.f32 0.17677669, %v4688_v4  ;;  %11277 = vpow2.f32 %v5229_v0 }
 0x706   : > { %v15436_v52 = vmul.f32 0.17677669, %v4737_v63  ;;  %v5131_v41 = vsub.f32 %v15220_v49, %v4959_v17  ;;  %v5132_v43 = vsub.f32 %v15222_v29, %v4959_v17  ;;  %v4911_v24 = vpop.xlane.xlu0 %4910  ;;  %v4914_v4 = vpop.xlane.xlu1 %4913  ;;  %v15454_v17 = vmul.f32 0.17677669, %v4447_v34 }
 0x707   : > { %v4401_v26 = vpop.f32.mrf.mxu0  ;;  %9996 = vmatmul.msk.bf16.gmra.mxu0 %vm3734_vm3, %v10747_v2  ;;  %10004 = vmatmul.msk.bf16.gmra.mxu1 %vm3734_vm3, %v10747_v2 }
 0x708   : > { %v5050_v63 = vmax.f32 %v15441_v1, %v15436_v52  ;;  %v5295_v7 = vmul.f32 1.442695, %v5131_v41  ;;  %v15452_v49 = vpop.eup %11271  ;;  %v5297_v29 = vmul.f32 1.442695, %v5132_v43 }
 0x709   : > { %v15460_v59 = vpop.eup %11273 }
 0x70a   : > { %5528 = vadd.xlane.f32.xlu1 %v5527_v47  ;;  %5051 = vmax.xlane.f32.xlu2 %v5050_v63  ;;  %18198 = vst [vmem:[#allocation105_spill] sm:$0xff] %v15460_v59  ;;  %v4450_v13 = vpop.f32.mrf.mxu1  ;;  %11279 = vpow2.f32 %v5295_v7  ;;  %v5100_v63 = vsub.f32 %v15218_v38, %v4911_v24  ;;  %v5530_v2 = vadd.f32 %v15460_v59, %v15452_v49  ;;  %v15478_v7 = vpop.eup %11275 }
 0x70b   : > { %5480 = vadd.xlane.f32.xlu0 %v5479_v54  ;;  %v5099_v54 = vsub.f32 %v15216_v61, %v4911_v24  ;;  %11281 = vpow2.f32 %v5297_v29  ;;  %v15474_v61 = vmul.f32 0.17677669, %v4401_v26  ;;  %18202 = vst [vmem:[#allocation109_spill] sm:$0xff] %v15478_v7  ;;  %v15480_v24 = vpop.eup %11277  ;;  %v5101_v29 = vsub.f32 %v15224_v31, %v4914_v4 }
 0x70c   : > { %v4691_v47 = vpop.f32.mrf.mxu2  ;;  %v5233_v38 = vmul.f32 1.442695, %v5100_v63  ;;  %18203 = vst [vmem:[#allocation110_spill] sm:$0xff] %v15480_v24 }
 0x70d   : > { %v4740_v10 = vpop.f32.mrf.mxu3  ;;  %v4962_v43 = vpop.xlane.xlu2 %4961  ;;  %v15465_v34 = vmul.f32 0.17677669, %v4691_v47  ;;  %v5231_v0 = vmul.f32 1.442695, %v5099_v54  ;;  %v15476_v47 = vmul.f32 0.17677669, %v4450_v13 }
 0x70e   : > { %v15462_v41 = vmul.f32 0.17677669, %v4740_v10  ;;  %v5002_v10 = vmax.f32 %v15456_v25, %v15454_v17  ;;  %v5133_v26 = vsub.f32 %v15235_v39, %v4962_v43  ;;  %v4917_v54 = vpop.xlane.xlu1 %4916  ;;  %v5134_v63 = vsub.f32 %v15237_v60, %v4962_v43 }
 0x70f   : > { %18200 = vst [vmem:[#allocation107_spill] sm:$0xff] %v15465_v34  ;;  %11283 = vpow2.f32 %v5231_v0  ;;  %v5005_v13 = vmax.f32 %v15474_v61, %v15476_v47  ;;  %v5235_v31 = vmul.f32 1.442695, %v5101_v29 }
 0x710   : > { %18199 = vst [vmem:[#allocation106_spill] sm:$0xff] %v15462_v41  ;;  %v5053_v8 = vmax.f32 %v15465_v34, %v15462_v41  ;;  %v15483_v16 = vpop.eup %11279  ;;  %v5102_v41 = vsub.f32 %v15226_v9, %v4914_v4  ;;  %11285 = vpow2.f32 %v5233_v38  ;;  %v5482_v9 = vadd.f32 %v15480_v24, %v15478_v7 }
 0x711   : > { %18201 = vst [vmem:[#allocation108_spill] sm:$0xff] %v15476_v47  ;;  %v15486_v34 = vpop.eup %11281  ;;  %v5299_v0 = vmul.f32 1.442695, %v5133_v26  ;;  %v5301_v47 = vmul.f32 1.442695, %v5134_v63  ;;  %v5103_v38 = vsub.f32 %v15240_v32, %v4917_v54  ;;  %11287 = vpow2.f32 %v5235_v31 }
 0x712   : > { %5531 = vadd.xlane.f32.xlu2 %v5530_v2  ;;  %5003 = vmax.xlane.f32.xlu1 %v5002_v10  ;;  %v4403_v2 = vpop.f32.mrf.mxu0  ;;  %v4452_v4 = vpop.f32.mrf.mxu1  ;;  %v5237_v59 = vmul.f32 1.442695, %v5102_v41  ;;  %v5533_v39 = vadd.f32 %v15486_v34, %v15483_v16  ;;  %v5104_v24 = vsub.f32 %v15242_v33, %v4917_v54 }
 0x713   : > { %5054 = vmax.xlane.f32.xlu0 %v5053_v8  ;;  %v15497_v60 = vmul.f32 0.17677669, %v4452_v4  ;;  %v15499_v43 = vmul.f32 0.17677669, %v4403_v2  ;;  %v5239_v2 = vmul.f32 1.442695, %v5103_v38 }
 0x714   : > { %v4693_v10 = vpop.f32.mrf.mxu2  ;;  %11289 = vpow2.f32 %v5237_v59 }
 0x715   : > { %v4742_v8 = vpop.f32.mrf.mxu3  ;;  %v4965_v18 = vpop.xlane.xlu2 %4964  ;;  %v15506_v7 = vmul.f32 0.17677669, %v4693_v10  ;;  %11291 = vpow2.f32 %v5299_v0  ;;  %v5008_v33 = vmax.f32 %v15499_v43, %v15497_v60  ;;  %v5241_v10 = vmul.f32 1.442695, %v5104_v24  ;;  %v10756_v0 = vld [vmem:[%s15102_s1 + $0x1b8] sm:$0xff] }
 0x716   : > { %v15501_v29 = vpop.eup %11283  ;;  %v15504_v41 = vmul.f32 0.17677669, %v4742_v8  ;;  %v5135_v32 = vsub.f32 %v15252_v46, %v4965_v18  ;;  %11293 = vpow2.f32 %v5301_v47  ;;  %10109 = vmatmul.msk.bf16.gmra.mxu2 %vm3734_vm3, %v10756_v0  ;;  %10117 = vmatmul.msk.bf16.gmra.mxu3 %vm3734_vm3, %v10756_v0 }
 0x717   : > { %11295 = vpow2.f32 %v5239_v2 }
 0x718   : > { %v5056_v59 = vmax.f32 %v15506_v7, %v15504_v41  ;;  %11297 = vpow2.f32 %v5241_v10 }
 0x71a   : > { %5483 = vadd.xlane.f32.xlu1 %v5482_v9  ;;  %5006 = vmax.xlane.f32.xlu2 %v5005_v13  ;;  %v15508_v9 = vpop.eup %11285  ;;  %v5136_v13 = vsub.f32 %v15254_v36, %v4965_v18  ;;  %v5303_v36 = vmul.f32 1.442695, %v5135_v32 }
 0x71b   : > { %5534 = vadd.xlane.f32.xlu0 %v5533_v39  ;;  %v5485_v46 = vadd.f32 %v15508_v9, %v15501_v29  ;;  %v15520_v18 = vpop.eup %11287 }
 0x71c   : > { %v4696_v54 = vpop.f32.mrf.mxu2  ;;  %18204 = vst [vmem:[#allocation111_spill] sm:$0xff] %v15520_v18  ;;  %v5305_v47 = vmul.f32 1.442695, %v5136_v13  ;;  %v15526_v24 = vpop.eup %11289  ;;  %11299 = vpow2.f32 %v5303_v36 }
 0x71d   : > { %v4968_v26 = vpop.xlane.xlu0 %4967  ;;  %v4745_v8 = vpop.f32.mrf.mxu3  ;;  %v15522_v4 = vmul.f32 0.17677669, %v4696_v54  ;;  %18205 = vst [vmem:[#allocation112_spill] sm:$0xff] %v15526_v24 }
 0x71e   : > { %v5137_v63 = vsub.f32 %v15262_v50, %v4968_v26  ;;  %v5138_v31 = vsub.f32 %v15264_v45, %v4968_v26  ;;  %v4920_v50 = vpop.xlane.xlu2 %4919  ;;  %v15524_v39 = vmul.f32 0.17677669, %v4745_v8  ;;  %v15529_v38 = vpop.eup %11291  ;;  %11301 = vpow2.f32 %v5305_v47 }
 0x71f   : > { %v15531_v32 = vpop.eup %11293  ;;  %v5105_v13 = vsub.f32 %v15258_v55, %v4920_v50  ;;  %v5106_v2 = vsub.f32 %v15260_v15, %v4920_v50  ;;  %v5488_v8 = vadd.f32 %v15526_v24, %v15520_v18  ;;  %v4455_v47 = vpop.f32.mrf.mxu1 }
 0x720   : > { %v5307_v45 = vmul.f32 1.442695, %v5137_v63  ;;  %v5309_v26 = vmul.f32 1.442695, %v5138_v31  ;;  %18206 = vst [vmem:[#allocation113_spill] sm:$0xff] %v15531_v32  ;;  %v5059_v54 = vmax.f32 %v15522_v4, %v15524_v39  ;;  %v5536_v63 = vadd.f32 %v15531_v32, %v15529_v38  ;;  %v4406_v50 = vpop.f32.mrf.mxu0 }
 0x721   : > { %v5243_v55 = vmul.f32 1.442695, %v5105_v13  ;;  %v15563_v18 = vmul.f32 0.17677669, %v4455_v47 }
 0x722   : > { %5057 = vmax.xlane.f32.xlu1 %v5056_v59  ;;  %5486 = vadd.xlane.f32.xlu2 %v5485_v46  ;;  %11303 = vpow2.f32 %v5307_v45  ;;  %v5245_v59 = vmul.f32 1.442695, %v5106_v2 }
 0x723   : > { %5009 = vmax.xlane.f32.xlu0 %v5008_v33  ;;  %11305 = vpow2.f32 %v5309_v26  ;;  %v15541_v33 = vpop.eup %11295  ;;  %18212 = vst [vmem:[#allocation119_spill] sm:$0xff] %v15563_v18 }
 0x724   : > { %v15545_v10 = vpop.eup %11297  ;;  %11307 = vpow2.f32 %v5243_v55  ;;  %v4698_v26 = vpop.f32.mrf.mxu2  ;;  %v15565_v55 = vmul.f32 0.17677669, %v4406_v50 }
 0x725   : > { %18207 = vst [vmem:[#allocation114_spill] sm:$0xff] %v15545_v10  ;;  %v15547_v31 = vpop.eup %11299  ;;  %11309 = vpow2.f32 %v5245_v59  ;;  %v4747_v13 = vpop.f32.mrf.mxu3  ;;  %v5491_v2 = vadd.f32 %v15545_v10, %v15541_v33 }
 0x726   : > { %18208 = vst [vmem:[#allocation115_spill] sm:$0xff] %v15547_v31  ;;  %v15549_v46 = vpop.eup %11301  ;;  %v4923_v15 = vpop.xlane.xlu2 %4922  ;;  %v15575_v47 = vmul.f32 0.17677669, %v4747_v13 }
 0x727   : > { %18209 = vst [vmem:[#allocation116_spill] sm:$0xff] %v15549_v46  ;;  %v5107_v0 = vsub.f32 %v15274_v5, %v4923_v15 }
 0x728   : > { %v15551_v36 = vpop.eup %11303 }
 0x729   : > { %18210 = vst [vmem:[#allocation117_spill] sm:$0xff] %v15551_v36  ;;  %v15553_v45 = vpop.eup %11305  ;;  %v5247_v5 = vmul.f32 1.442695, %v5107_v0  ;;  %v5011_v0 = vmax.f32 %v15565_v55, %v15563_v18 }
 0x72a   : > { %5537 = vadd.xlane.f32.xlu1 %v5536_v63  ;;  %5060 = vmax.xlane.f32.xlu2 %v5059_v54  ;;  %18211 = vst [vmem:[#allocation118_spill] sm:$0xff] %v15553_v45  ;;  %v4971_v54 = vpop.xlane.xlu0 %4970  ;;  %v5108_v63 = vsub.f32 %v15276_v58, %v4923_v15  ;;  %v5542_v24 = vadd.f32 %v15553_v45, %v15551_v36  ;;  %v15567_v32 = vpop.eup %11307  ;;  %v15573_v45 = vmul.f32 0.17677669, %v4698_v26 }
 0x72b   : > { %5489 = vadd.xlane.f32.xlu0 %v5488_v8  ;;  %v5539_v8 = vadd.f32 %v15549_v46, %v15547_v31  ;;  %v5139_v58 = vsub.f32 %v15280_v3, %v4971_v54  ;;  %v15570_v10 = vpop.eup %11309  ;;  %v5140_v46 = vsub.f32 %v15282_v6, %v4971_v54  ;;  %11311 = vpow2.f32 %v5247_v5  ;;  %v4408_v3 = vpop.f32.mrf.mxu0 }
 0x72c   : > { %v5249_v15 = vmul.f32 1.442695, %v5108_v63  ;;  %v5494_v6 = vadd.f32 %v15570_v10, %v15567_v32  ;;  %v4701_v26 = vpop.f32.mrf.mxu2  ;;  %v5062_v13 = vmax.f32 %v15573_v45, %v15575_v47 }
 0x72d   : > { %v4974_v59 = vpop.xlane.xlu1 %4973  ;;  %v5311_v63 = vmul.f32 1.442695, %v5139_v58  ;;  %v5313_v54 = vmul.f32 1.442695, %v5140_v46  ;;  %v15586_v18 = vmul.f32 0.17677669, %v4701_v26 }
 0x72e   : > { %v5141_v50 = vsub.f32 %v15292_v27, %v4974_v59  ;;  %11313 = vpow2.f32 %v5249_v15  ;;  %v10748_v27 = vld [vmem:[%s15102_s1 + $0x138] sm:$0xff]  ;;  %v15593_v58 = vmul.f32 0.17677669, %v4408_v3  ;;  %s9362_s1 = scalar_lea.hbm %s18490_s0, %s10697_s14 }
 0x72f   : > { %9997 = vmatmul.msk.bf16.gmra.mxu0 %vm3734_vm3, %v10748_v27  ;;  %11315 = vpow2.f32 %v5311_v63  ;;  %10005 = vmatmul.msk.bf16.gmra.mxu1 %vm3734_vm3, %v10748_v27  ;;  %s9365_s13 = sshll.u32 %s9362_s1, 4  ;;  %s9366_s13 = int_to_ptr.hbm [resolvable:$true] %s9365_s13 }
 0x730   : > { %v5315_v36 = vmul.f32 1.442695, %v5141_v50  ;;  %11317 = vpow2.f32 %v5313_v54 }
 0x731   : > { %v15596_v15 = vpop.eup %11311 }
 0x732   : > { %5492 = vadd.xlane.f32.xlu1 %v5491_v2  ;;  %5540 = vadd.xlane.f32.xlu2 %v5539_v8  ;;  %v4457_v2 = vpop.f32.mrf.mxu1  ;;  %v4750_v8 = vpop.f32.mrf.mxu3  ;;  %18214 = vst [vmem:[#allocation121_spill] sm:$0xff] %v15596_v15  ;;  %11319 = vpow2.f32 %v5315_v36 }
 0x733   : > { %5543 = vadd.xlane.f32.xlu0 %v5542_v24  ;;  %v5142_v24 = vsub.f32 %v15294_v62, %v4974_v59  ;;  %v4926_v31 = vpop.xlane.xlu0 %4925  ;;  %v15588_v5 = vmul.f32 0.17677669, %v4750_v8  ;;  %v15591_v46 = vmul.f32 0.17677669, %v4457_v2  ;;  %v4411_v63 = vpop.f32.mrf.mxu0 }
 0x734   : > { %v5109_v50 = vsub.f32 %v15288_v30, %v4926_v31  ;;  %v15599_v26 = vpop.eup %11313 }
 0x735   : > { %v4977_v62 = vpop.xlane.xlu2 %4976  ;;  %v5317_v59 = vmul.f32 1.442695, %v5142_v24  ;;  %18213 = vst [vmem:[#allocation120_spill] sm:$0xff] %v15591_v46  ;;  %v5065_v24 = vmax.f32 %v15586_v18, %v15588_v5  ;;  %v4929_v8 = vpop.xlane.xlu1 %4928  ;;  %v5014_v54 = vmax.f32 %v15593_v58, %v15591_v46  ;;  %v5497_v36 = vadd.f32 %v15599_v26, %v15596_v15 }
 0x736   : > { %18215 = vst [vmem:[#allocation122_spill] sm:$0xff] %v15599_v26  ;;  %v5143_v2 = vsub.f32 %v15304_v21, %v4977_v62  ;;  %v5251_v30 = vmul.f32 1.442695, %v5109_v50  ;;  %v15614_v21 = vmul.f32 0.17677669, %v4411_v63  ;;  %v5112_v26 = vsub.f32 %v15302_v14, %v4929_v8 }
 0x737   : > { %11321 = vpow2.f32 %v5317_v59 }
 0x738   : > { %11323 = vpow2.f32 %v5251_v30  ;;  %v5257_v14 = vmul.f32 1.442695, %v5112_v26 }
 0x73a   : > { %5495 = vadd.xlane.f32.xlu2 %v5494_v6  ;;  %5012 = vmax.xlane.f32.xlu1 %v5011_v0  ;;  %v5110_v0 = vsub.f32 %v15290_v20, %v4926_v31  ;;  %v4460_v3 = vpop.f32.mrf.mxu1  ;;  %v5144_v6 = vsub.f32 %v15306_v40, %v4977_v62  ;;  %v5319_v40 = vmul.f32 1.442695, %v5143_v2  ;;  %v5111_v62 = vsub.f32 %v15300_v35, %v4929_v8  ;;  %v4703_v8 = vpop.f32.mrf.mxu2 }
 0x73b   : > { %5063 = vmax.xlane.f32.xlu0 %v5062_v13  ;;  %v15610_v13 = vpop.eup %11315  ;;  %v15612_v27 = vmul.f32 0.17677669, %v4460_v3  ;;  %v4752_v30 = vpop.f32.mrf.mxu3 }
 0x73c   : > { %18216 = vst [vmem:[#allocation123_spill] sm:$0xff] %v15610_v13  ;;  %v5253_v20 = vmul.f32 1.442695, %v5110_v0  ;;  %v15616_v59 = vpop.eup %11317  ;;  %v5321_v46 = vmul.f32 1.442695, %v5144_v6 }
 0x73d   : > { %v4980_v31 = vpop.xlane.xlu0 %4979  ;;  %18217 = vst [vmem:[#allocation124_spill] sm:$0xff] %v15612_v27  ;;  %v15619_v50 = vpop.eup %11319  ;;  %v5017_v2 = vmax.f32 %v15614_v21, %v15612_v27  ;;  %v5255_v35 = vmul.f32 1.442695, %v5111_v62  ;;  %v5545_v6 = vadd.f32 %v15616_v59, %v15610_v13  ;;  %v10844_v62 = vld [vmem:[#allocation4 + $0xb8] sm:$0xff] }
 0x73e   : > { %18218 = vst [vmem:[#allocation125_spill] sm:$0xff] %v15616_v59  ;;  %v4932_v15 = vpop.xlane.xlu2 %4931  ;;  %v15622_v0 = vpop.eup %11321  ;;  %11325 = vpow2.f32 %v5253_v20  ;;  %v5146_v3 = vsub.f32 %v15321_v12, %v4980_v31  ;;  %6377 = vmatpush.bf16.msra.mxu2 %v10844_v62  ;;  %v10828_v62 = vld [vmem:[#allocation4 + $0x38] sm:$0xff] }
 0x73f   : > { %18219 = vst [vmem:[#allocation126_spill] sm:$0xff] %v15619_v50  ;;  %11327 = vpow2.f32 %v5319_v40  ;;  %v5113_v63 = vsub.f32 %v15315_v23, %v4932_v15  ;;  %v15636_v23 = vmul.f32 0.17677669, %v4703_v8  ;;  %6103 = vmatpush.bf16.msra.mxu0 %v10828_v62 }
 0x740   : > { %18220 = vst [vmem:[#allocation127_spill] sm:$0xff] %v15622_v0  ;;  %11329 = vpow2.f32 %v5321_v46  ;;  %v5325_v20 = vmul.f32 1.442695, %v5146_v3 }
 0x741   : > { %11331 = vpow2.f32 %v5255_v35  ;;  %18222 = vst [vmem:[#allocation129_spill] sm:$0xff] %v15636_v23  ;;  %v5259_v40 = vmul.f32 1.442695, %v5113_v63 }
 0x742   : > { %5066 = vmax.xlane.f32.xlu1 %v5065_v24  ;;  %5015 = vmax.xlane.f32.xlu2 %v5014_v54  ;;  %v5145_v24 = vsub.f32 %v15319_v11, %v4980_v31  ;;  %v5114_v54 = vsub.f32 %v15317_v51, %v4932_v15  ;;  %v5548_v11 = vadd.f32 %v15622_v0, %v15619_v50  ;;  %v15634_v31 = vpop.eup %11323  ;;  %11333 = vpow2.f32 %v5257_v14 }
 0x743   : > { %5498 = vadd.xlane.f32.xlu0 %v5497_v36  ;;  %18221 = vst [vmem:[#allocation128_spill] sm:$0xff] %v15634_v31  ;;  %v15640_v51 = vmul.f32 0.17677669, %v4752_v30 }
 0x744   : > { %v5323_v12 = vmul.f32 1.442695, %v5145_v24  ;;  %v15638_v46 = vpop.eup %11325  ;;  %v5261_v15 = vmul.f32 1.442695, %v5114_v54  ;;  %v10852_v24 = vld [vmem:[#allocation4 + $0xf8] sm:$0xff] }
 0x745   : > { %v4983_v36 = vpop.xlane.xlu1 %4982  ;;  %18223 = vst [vmem:[#allocation130_spill] sm:$0xff] %v15638_v46  ;;  %v15642_v0 = vpop.eup %11327  ;;  %6426 = vmatpush.bf16.msra.mxu3 %v10852_v24  ;;  %v5500_v14 = vadd.f32 %v15638_v46, %v15634_v31  ;;  %v5068_v8 = vmax.f32 %v15636_v23, %v15640_v51  ;;  %v10836_v24 = vld [vmem:[#allocation4 + $0x78] sm:$0xff] }
 0x746   : > { %18224 = vst [vmem:[#allocation131_spill] sm:$0xff] %v15640_v51  ;;  %11335 = vpow2.f32 %v5323_v12  ;;  %v5147_v3 = vsub.f32 %v15334_v42, %v4983_v36  ;;  %v5148_v35 = vsub.f32 %v15336_v19, %v4983_v36  ;;  %6152 = vmatpush.bf16.msra.mxu1 %v10836_v24  ;;  %v18249_v23 = vld [vmem:[#allocation92_spill] sm:$0xff] }
 0x747   : > { %18225 = vst [vmem:[#allocation132_spill] sm:$0xff] %v15642_v0  ;;  %11337 = vpow2.f32 %v5325_v20 }
 0x748   : > { %11339 = vpow2.f32 %v5259_v40  ;;  %v5327_v54 = vmul.f32 1.442695, %v5147_v3  ;;  %v5329_v12 = vmul.f32 1.442695, %v5148_v35 }
 0x749   : > { %11341 = vpow2.f32 %v5261_v15 }
 0x74a   : > { %5546 = vadd.xlane.f32.xlu1 %v5545_v6  ;;  %5549 = vadd.xlane.f32.xlu2 %v5548_v11  ;;  %v15645_v6 = vpop.eup %11329  ;;  %v4935_v11 = vpop.xlane.xlu0 %4934  ;;  %11343 = vpow2.f32 %v5327_v54 }
 0x74b   : > { %5018 = vmax.xlane.f32.xlu0 %v5017_v2  ;;  %18226 = vst [vmem:[#allocation133_spill] sm:$0xff] %v15645_v6  ;;  %v15654_v42 = vpop.eup %11331  ;;  %v5551_v19 = vadd.f32 %v15645_v6, %v15642_v0  ;;  %v5115_v40 = vsub.f32 %v15330_v48, %v4935_v11  ;;  %v5116_v35 = vsub.f32 %v15332_v53, %v4935_v11  ;;  %11345 = vpow2.f32 %v5329_v12  ;;  %v4413_v6 = vpop.f32.mrf.mxu0 }
 0x74c   : > { %18227 = vst [vmem:[#allocation134_spill] sm:$0xff] %v15654_v42  ;;  %v15658_v30 = vpop.eup %11333 }
 0x74d   : > { %v4986_v26 = vpop.xlane.xlu2 %4985  ;;  %18228 = vst [vmem:[#allocation135_spill] sm:$0xff] %v15658_v30  ;;  %v4938_v36 = vpop.xlane.xlu1 %4937  ;;  %v5503_v54 = vadd.f32 %v15658_v30, %v15654_v42  ;;  %v5265_v53 = vmul.f32 1.442695, %v5116_v35 }
 0x74e   : > { %v5149_v2 = vsub.f32 %v15346_v57, %v4986_v26  ;;  %v5150_v63 = vsub.f32 %v15348_v22, %v4986_v26  ;;  %v15660_v57 = vpop.eup %11335  ;;  %v4462_v26 = vpop.f32.mrf.mxu1 }
 0x74f   : > { %18229 = vst [vmem:[#allocation136_spill] sm:$0xff] %v15660_v57  ;;  %v15662_v20 = vpop.eup %11337  ;;  %v4706_v30 = vpop.f32.mrf.mxu2 }
 0x750   : > { %v5331_v22 = vmul.f32 1.442695, %v5149_v2  ;;  %18230 = vst [vmem:[#allocation137_spill] sm:$0xff] %v15662_v20  ;;  %v5333_v15 = vmul.f32 1.442695, %v5150_v63  ;;  %v15665_v3 = vpop.eup %11339  ;;  %v5554_v0 = vadd.f32 %v15662_v20, %v15660_v57 }
 0x751   : > { %18231 = vst [vmem:[#allocation138_spill] sm:$0xff] %v15665_v3  ;;  %v5263_v63 = vmul.f32 1.442695, %v5115_v40  ;;  %v10851_v40 = vld [vmem:[#allocation4 + $0xf0] sm:$0xff] }
 0x752   : > { %5501 = vadd.xlane.f32.xlu1 %v5500_v14  ;;  %5069 = vmax.xlane.f32.xlu2 %v5068_v8  ;;  %v15668_v14 = vpop.eup %11341  ;;  %v18233_v8 = vld [vmem:[#allocation83_spill] sm:$0xff]  ;;  %11347 = vpow2.f32 %v5331_v22 }
 0x753   : > { %5552 = vadd.xlane.f32.xlu0 %v5551_v19  ;;  %18232 = vst [vmem:[#allocation139_spill] sm:$0xff] %v15668_v14  ;;  %v5117_v2 = vsub.f32 %v18233_v8, %v4938_v36  ;;  %v18234_v19 = vld [vmem:[#allocation84_spill] sm:$0xff]  ;;  %11349 = vpow2.f32 %v5333_v15  ;;  %v5506_v11 = vadd.f32 %v15668_v14, %v15665_v3  ;;  %v15678_v62 = vpop.eup %11343  ;;  %v15682_v8 = vmul.f32 0.17677669, %v4462_v26  ;;  %6427 = vmatpush.bf16.msra.mxu3 %v10851_v40  ;;  %v18243_v40 = vld [vmem:[#allocation87_spill] sm:$0xff] }
 0x754   : > { %v5118_v48 = vsub.f32 %v18234_v19, %v4938_v36  ;;  %18235 = vst [vmem:[#allocation83_spill] sm:$0xff] %v15678_v62  ;;  %v10843_v36 = vld [vmem:[#allocation4 + $0xb0] sm:$0xff]  ;;  %v15680_v15 = vpop.eup %11345  ;;  %11351 = vpow2.f32 %v5263_v63  ;;  %v15684_v19 = vmul.f32 0.17677669, %v4413_v6  ;;  %v10842_v63 = vld [vmem:[#allocation4 + $0xa8] sm:$0xff] }
 0x755   : > { %v5267_v12 = vmul.f32 1.442695, %v5117_v2  ;;  %v4989_v24 = vpop.xlane.xlu0 %4988  ;;  %18236 = vst [vmem:[#allocation84_spill] sm:$0xff] %v15680_v15  ;;  %11353 = vpow2.f32 %v5265_v53  ;;  %6378 = vmatpush.bf16.msra.mxu2 %v10843_v36  ;;  %v5557_v26 = vadd.f32 %v15680_v15, %v15678_v62  ;;  %v10827_v62 = vld [vmem:[#allocation4 + $0x30] sm:$0xff] }
 0x756   : > { %v5269_v22 = vmul.f32 1.442695, %v5118_v48  ;;  %18237 = vst [vmem:[#allocation140_spill] sm:$0xff] %v15682_v8  ;;  %v4465_v35 = vpop.f32.mrf.mxu1  ;;  %v4416_v48 = vpop.f32.mrf.mxu0  ;;  %v5020_v6 = vmax.f32 %v15684_v19, %v15682_v8  ;;  %v5151_v3 = vsub.f32 %v18243_v40, %v4989_v24  ;;  %v10835_v8 = vld [vmem:[#allocation4 + $0x70] sm:$0xff]  ;;  %6104 = vmatpush.bf16.msra.mxu0 %v10827_v62 }
 0x757   : > { %18238 = vst [vmem:[#allocation141_spill] sm:$0xff] %v15684_v19  ;;  %11355 = vpow2.f32 %v5267_v12  ;;  %v15700_v12 = vmul.f32 0.17677669, %v4706_v30  ;;  %v10841_v19 = vld [vmem:[#allocation4 + $0xa0] sm:$0xff]  ;;  %v4708_v31 = vpop.f32.mrf.mxu2  ;;  %6153 = vmatpush.bf16.msra.mxu1 %v10835_v8  ;;  %v10834_v8 = vld [vmem:[#allocation4 + $0x68] sm:$0xff] }
 0x758   : > { %v15686_v14 = vpop.eup %11347  ;;  %11357 = vpow2.f32 %v5269_v22  ;;  %v5335_v51 = vmul.f32 1.442695, %v5151_v3 }
 0x759   : > { %18239 = vst [vmem:[#allocation142_spill] sm:$0xff] %v15686_v14  ;;  %v15688_v2 = vpop.eup %11349  ;;  %6379 = vmatpush.bf16.msra.mxu2 %v10842_v63  ;;  %v15717_v63 = vmul.f32 0.17677669, %v4465_v35 }
 0x75a   : > { %5555 = vadd.xlane.f32.xlu1 %v5554_v0  ;;  %5504 = vadd.xlane.f32.xlu2 %v5503_v54  ;;  %v4755_v0 = vpop.f32.mrf.mxu3  ;;  %18240 = vst [vmem:[#allocation143_spill] sm:$0xff] %v15688_v2  ;;  %v15690_v54 = vpop.xlane.xlu2 %4940  ;;  %v5560_v53 = vadd.f32 %v15688_v2, %v15686_v14  ;;  %v18245_v2 = vld [vmem:[#allocation88_spill] sm:$0xff]  ;;  %11359 = vpow2.f32 %v5335_v51 }
 0x75b   : > { %5507 = vadd.xlane.f32.xlu0 %v5506_v11  ;;  %v10850_v11 = vld [vmem:[#allocation4 + $0xe8] sm:$0xff]  ;;  %v15698_v36 = vpop.eup %11351  ;;  %v15705_v15 = vmul.f32 0.17677669, %v4755_v0  ;;  %v5152_v14 = vsub.f32 %v18245_v2, %v4989_v24  ;;  %18248 = vst [vmem:[#allocation88_spill] sm:$0xff] %v15717_v63  ;;  %6154 = vmatpush.bf16.msra.mxu1 %v10834_v8  ;;  %v10847_v51 = vld [vmem:[#allocation4 + $0xd0] sm:$0xff] }
 0x75c   : > { %18241 = vst [vmem:[#allocation144_spill] sm:$0xff] %v15698_v36  ;;  %v15702_v22 = vpop.eup %11353  ;;  %6428 = vmatpush.bf16.msra.mxu3 %v10850_v11  ;;  %v18247_v0 = vld [vmem:[#allocation91_spill] sm:$0xff]  ;;  %v15722_v11 = vmul.f32 0.17677669, %v4416_v48  ;;  %v10840_v48 = vld [vmem:[#allocation4 + $0x98] sm:$0xff] }
 0x75d   : > { %18242 = vst [vmem:[#allocation145_spill] sm:$0xff] %v15702_v22  ;;  %v4992_v42 = vpop.xlane.xlu1 %4991  ;;  %v15707_v20 = vpop.eup %11355  ;;  %6380 = vmatpush.bf16.msra.mxu2 %v10841_v19  ;;  %v5337_v62 = vmul.f32 1.442695, %v5152_v14  ;;  %v5509_v3 = vadd.f32 %v15702_v22, %v15698_v36  ;;  %v15734_v14 = vmul.f32 0.17677669, %v4708_v31 }
 0x75e   : > { %18244 = vst [vmem:[#allocation87_spill] sm:$0xff] %v15705_v15  ;;  %v15710_v30 = vpop.eup %11357  ;;  %v15714_v40 = vpop.xlane.xlu0 %4943  ;;  %v5154_v24 = vsub.f32 %v18249_v23, %v4992_v42 }
 0x75f   : > { %v4467_v46 = vpop.f32.mrf.mxu1  ;;  %v5512_v59 = vadd.f32 %v15710_v30, %v15707_v20  ;;  %v4418_v23 = vpop.f32.mrf.mxu0  ;;  %11361 = vpow2.f32 %v5337_v62 }
 0x760   : > { %v15732_v27 = vmul.f32 0.17677669, %v4467_v46  ;;  %v15738_v22 = vmul.f32 0.17677669, %v4418_v23  ;;  %v10833_v46 = vld [vmem:[#allocation4 + $0x60] sm:$0xff] }
 0x761   : > { %6381 = vmatpush.bf16.msra.mxu2 %v10840_v48  ;;  %6155 = vmatpush.bf16.msra.mxu1 %v10833_v46  ;;  %v10838_v48 = vld [vmem:[#allocation4 + $0x88] sm:$0xff] }
 0x762   : > { %5558 = vadd.xlane.f32.xlu2 %v5557_v26  ;;  %5021 = vmax.xlane.f32.xlu1 %v5020_v6  ;;  %v10849_v26 = vld [vmem:[#allocation4 + $0xe0] sm:$0xff]  ;;  %v4757_v50 = vpop.f32.mrf.mxu3  ;;  %18252 = vst [vmem:[#allocation91_spill] sm:$0xff] %v15732_v27  ;;  %v5026_v23 = vmax.f32 %v15738_v22, %v15732_v27 }
 0x763   : > { %5561 = vadd.xlane.f32.xlu0 %v5560_v53  ;;  %v18246_v6 = vld [vmem:[#allocation85_spill] sm:$0xff]  ;;  %v5153_v53 = vsub.f32 %v18247_v0, %v4992_v42  ;;  %v18251_v0 = vld [vmem:[#allocation86_spill] sm:$0xff]  ;;  %6429 = vmatpush.bf16.msra.mxu3 %v10849_v26 }
 0x764   : > { %v5119_v57 = vsub.f32 %v18246_v6, %v15690_v54  ;;  %18250 = vst [vmem:[#allocation85_spill] sm:$0xff] %v15722_v11  ;;  %v5071_v6 = vmax.f32 %v15700_v12, %v15705_v15  ;;  %v5120_v35 = vsub.f32 %v18251_v0, %v15690_v54  ;;  %v10826_v42 = vld [vmem:[#allocation4 + $0x28] sm:$0xff]  ;;  %v10848_v15 = vld [vmem:[#allocation4 + $0xd8] sm:$0xff]  ;;  %v15736_v54 = vmul.f32 0.17677669, %v4757_v50  ;;  %v10825_v26 = vld [vmem:[#allocation4 + $0x20] sm:$0xff] }
 0x765   : > { %v15720_v2 = vpop.xlane.xlu2 %4994  ;;  %v5339_v19 = vmul.f32 1.442695, %v5153_v53  ;;  %v5341_v0 = vmul.f32 1.442695, %v5154_v24  ;;  %18254 = vst [vmem:[#allocation86_spill] sm:$0xff] %v15738_v22  ;;  %6105 = vmatpush.bf16.msra.mxu0 %v10826_v42  ;;  %v4947_v53 = vpop.xlane.xlu1 %4946  ;;  %v18256_v24 = vld [vmem:[#allocation90_spill] sm:$0xff] }
 0x766   : > { %v5271_v13 = vmul.f32 1.442695, %v5119_v57  ;;  %18253 = vst [vmem:[#allocation92_spill] sm:$0xff] %v15736_v54  ;;  %v5273_v36 = vmul.f32 1.442695, %v5120_v35  ;;  %v10839_v57 = vld [vmem:[#allocation4 + $0x90] sm:$0xff]  ;;  %v5074_v62 = vmax.f32 %v15734_v14, %v15736_v54  ;;  %v5023_v35 = vmax.f32 %v15722_v11, %v15717_v63 }
 0x767   : > { %6430 = vmatpush.bf16.msra.mxu3 %v10848_v15  ;;  %v10824_v15 = vld [vmem:[#allocation4 + $0x18] sm:$0xff]  ;;  %6382 = vmatpush.bf16.msra.mxu2 %v10839_v57  ;;  %v18261_v46 = vld [vmem:[#allocation94_spill] sm:$0xff] }
 0x768   : > { %11363 = vpow2.f32 %v5271_v13  ;;  %v18257_v13 = vld [vmem:[#allocation95_spill] sm:$0xff]  ;;  %v18258_v42 = vld [vmem:[#allocation96_spill] sm:$0xff]  ;;  %v5124_v57 = vsub.f32 %v18261_v46, %v4947_v53 }
 0x769   : > { %11365 = vpow2.f32 %v5339_v19  ;;  %6106 = vmatpush.bf16.msra.mxu0 %v10825_v26  ;;  %v5156_v8 = vsub.f32 %v18258_v42, %v15720_v2  ;;  %v15756_v19 = vpop.eup %11359  ;;  %v18259_v26 = vld [vmem:[#allocation93_spill] sm:$0xff]  ;;  %v10823_v42 = vld [vmem:[#allocation4 + $0x10] sm:$0xff] }
 0x76a   : > { %5513 = vadd.xlane.f32.xlu2 %v5512_v59  ;;  %5510 = vadd.xlane.f32.xlu1 %v5509_v3  ;;  %v18255_v59 = vld [vmem:[#allocation89_spill] sm:$0xff]  ;;  %11367 = vpow2.f32 %v5341_v0  ;;  %v5155_v3 = vsub.f32 %v18257_v13, %v15720_v2  ;;  %v15760_v13 = vpop.eup %11361  ;;  %v5123_v22 = vsub.f32 %v18259_v26, %v4947_v53  ;;  %v4760_v46 = vpop.f32.mrf.mxu3 }
 0x76b   : > { %5072 = vmax.xlane.f32.xlu0 %v5071_v6  ;;  %v5121_v31 = vsub.f32 %v18255_v59, %v15714_v40  ;;  %v5122_v6 = vsub.f32 %v18256_v24, %v15714_v40  ;;  %11369 = vpow2.f32 %v5273_v36  ;;  %v10832_v40 = vld [vmem:[#allocation4 + $0x58] sm:$0xff]  ;;  %6431 = vmatpush.bf16.msra.mxu3 %v10847_v51  ;;  %v10846_v24 = vld [vmem:[#allocation4 + $0xc8] sm:$0xff]  ;;  %v5345_v63 = vmul.f32 1.442695, %v5156_v8  ;;  %v10837_v26 = vld [vmem:[#allocation4 + $0x80] sm:$0xff] }
 0x76c   : > { %v5343_v2 = vmul.f32 1.442695, %v5155_v3  ;;  %6156 = vmatpush.bf16.msra.mxu1 %v10832_v40  ;;  %6383 = vmatpush.bf16.msra.mxu2 %v10838_v48  ;;  %v5279_v8 = vmul.f32 1.442695, %v5123_v22  ;;  %v4711_v40 = vpop.f32.mrf.mxu2  ;;  %v5281_v48 = vmul.f32 1.442695, %v5124_v57 }
 0x76d   : > { %v15742_v50 = vpop.xlane.xlu0 %4997  ;;  %v5275_v59 = vmul.f32 1.442695, %v5121_v31  ;;  %v15758_v0 = vpop.xlane.xlu2 %4949  ;;  %v5277_v27 = vmul.f32 1.442695, %v5122_v6  ;;  %6107 = vmatpush.bf16.msra.mxu0 %v10824_v15  ;;  %v10831_v6 = vld [vmem:[#allocation4 + $0x50] sm:$0xff] }
 0x76e   : > { %v15763_v36 = vpop.eup %11363  ;;  %v5125_v51 = vsub.f32 %v15393_v37, %v15758_v0  ;;  %v5158_v37 = vsub.f32 %v15398_v56, %v15742_v50  ;;  %v10830_v56 = vld [vmem:[#allocation4 + $0x48] sm:$0xff]  ;;  %v15787_v57 = vmul.f32 0.17677669, %v4711_v40 }
 0x76f   : > { %18260 = vst [vmem:[#allocation89_spill] sm:$0xff] %v15763_v36  ;;  %v15766_v31 = vpop.eup %11365  ;;  %11371 = vpow2.f32 %v5275_v59  ;;  %6432 = vmatpush.bf16.msra.mxu3 %v10846_v24  ;;  %v5563_v59 = vadd.f32 %v15760_v13, %v15756_v19  ;;  %v18264_v24 = vld [vmem:[#allocation97_spill] sm:$0xff] }
 0x770   : > { %11373 = vpow2.f32 %v5277_v27  ;;  %v5126_v11 = vsub.f32 %v18264_v24, %v15758_v0  ;;  %v5283_v54 = vmul.f32 1.442695, %v5125_v51  ;;  %6157 = vmatpush.bf16.msra.mxu1 %v10831_v6  ;;  %6384 = vmatpush.bf16.msra.mxu2 %v10837_v26  ;;  %v15790_v51 = vmul.f32 0.17677669, %v4760_v46  ;;  %v18267_v26 = vld [vmem:[#allocation98_spill] sm:$0xff] }
 0x771   : > { %11375 = vpow2.f32 %v5343_v2  ;;  %6108 = vmatpush.bf16.msra.mxu0 %v10823_v42  ;;  %v18265_v42 = vld [vmem:[#allocation100_spill] sm:$0xff] }
 0x772   : > { %5075 = vmax.xlane.f32.xlu1 %v5074_v62  ;;  %5024 = vmax.xlane.f32.xlu2 %v5023_v35  ;;  %v15770_v62 = vpop.eup %11367  ;;  %v5157_v35 = vsub.f32 %v15403_v28, %v15742_v50  ;;  %v10822_v28 = vld [vmem:[#allocation4 + $0x8] sm:$0xff]  ;;  %11377 = vpow2.f32 %v5345_v63  ;;  %v5349_v63 = vmul.f32 1.442695, %v5158_v37 }
 0x773   : > { %5027 = vmax.xlane.f32.xlu0 %v5026_v23  ;;  %18262 = vst [vmem:[#allocation90_spill] sm:$0xff] %v15770_v62  ;;  %v10845_v23 = vld [vmem:[#allocation4 + $0xc0] sm:$0xff]  ;;  %v15774_v15 = vpop.eup %11369  ;;  %v5566_v27 = vadd.f32 %v15770_v62, %v15766_v31  ;;  %11379 = vpow2.f32 %v5279_v8  ;;  %v18269_v8 = vld [vmem:[#allocation99_spill] sm:$0xff] }
 0x774   : > { %18263 = vst [vmem:[#allocation95_spill] sm:$0xff] %v15774_v15  ;;  %v5347_v22 = vmul.f32 1.442695, %v5157_v35  ;;  %v5515_v2 = vadd.f32 %v15774_v15, %v15763_v36  ;;  %6433 = vmatpush.bf16.msra.mxu3 %v10845_v23  ;;  %11381 = vpow2.f32 %v5281_v48  ;;  %v5285_v23 = vmul.f32 1.442695, %v5126_v11  ;;  %6158 = vmatpush.bf16.msra.mxu1 %v10830_v56 }
 0x775   : > { %v5049_v53 = vpop.xlane.xlu1 %5048  ;;  %v5001_v3 = vpop.xlane.xlu0 %5000  ;;  %6109 = vmatpush.bf16.msra.mxu0 %v10822_v28  ;;  %11383 = vpow2.f32 %v5283_v54 }
 0x776   : > { %v5191_v50 = vsub.f32 %v15422_v44, %v5049_v53  ;;  %v5192_v0 = vsub.f32 %v18265_v42, %v5049_v53  ;;  %v15792_v6 = vpop.eup %11371  ;;  %v5159_v35 = vsub.f32 %v18267_v26, %v5001_v3  ;;  %v10821_v44 = vld [vmem:[#allocation4] sm:$0xff]  ;;  %v5160_v37 = vsub.f32 %v18269_v8, %v5001_v3 }
 0x777   : > { %18266 = vst [vmem:[#allocation96_spill] sm:$0xff] %v15792_v6  ;;  %v15795_v24 = vpop.eup %11373  ;;  %v10829_v53 = vld [vmem:[#allocation4 + $0x40] sm:$0xff]  ;;  %11385 = vpow2.f32 %v5347_v22  ;;  %v5077_v42 = vmax.f32 %v15787_v57, %v15790_v51 }
 0x778   : > { %18268 = vst [vmem:[#allocation93_spill] sm:$0xff] %v15795_v24  ;;  %v15798_v40 = vpop.eup %11375  ;;  %11387 = vpow2.f32 %v5349_v63  ;;  %v5351_v54 = vmul.f32 1.442695, %v5159_v35  ;;  %v5353_v56 = vmul.f32 1.442695, %v5160_v37  ;;  %6159 = vmatpush.bf16.msra.mxu1 %v10829_v53 }
 0x779   : > { %18270 = vst [vmem:[#allocation94_spill] sm:$0xff] %v15798_v40  ;;  %v15800_v48 = vpop.eup %11377  ;;  %6110 = vmatpush.bf16.msra.mxu0 %v10821_v44 }
 0x77a   : > { %5564 = vadd.xlane.f32.xlu1 %v5563_v59  ;;  %5567 = vadd.xlane.f32.xlu2 %v5566_v27  ;;  %v5415_v59 = vmul.f32 1.442695, %v5191_v50  ;;  %18271 = vst [vmem:[#allocation97_spill] sm:$0xff] %v15800_v48  ;;  %v15805_v3 = vpop.eup %11379  ;;  %v5518_v50 = vadd.f32 %v15795_v24, %v15792_v6 }
 0x77b   : > { %5516 = vadd.xlane.f32.xlu0 %v5515_v2  ;;  %v5417_v2 = vmul.f32 1.442695, %v5192_v0  ;;  %18272 = vst [vmem:[#allocation100_spill] sm:$0xff] %v15805_v3  ;;  %v15810_v63 = vpop.eup %11381  ;;  %v5569_v0 = vadd.f32 %v15800_v48, %v15798_v40  ;;  %v4421_v48 = vpop.f32.mrf.mxu0  ;;  %v18286_v40 = vld [vmem:[#allocation105_spill] sm:$0xff] }
 0x77c   : > { %18273 = vst [vmem:[#allocation98_spill] sm:$0xff] %v15810_v63  ;;  %v15814_v26 = vpop.eup %11383 }
 0x77d   : > { %v5529_v46 = vpop.xlane.xlu1 %5528  ;;  %v5052_v27 = vpop.xlane.xlu2 %5051  ;;  %18274 = vst [vmem:[#allocation99_spill] sm:$0xff] %v15814_v26 }
 0x77e   : > { %v5481_v28 = vpop.xlane.xlu0 %5480  ;;  %11389 = vrcp.f32 %v5529_v46  ;;  %v5193_v11 = vsub.f32 %v15441_v1, %v5052_v27  ;;  %v5194_v22 = vsub.f32 %v15436_v52, %v5052_v27  ;;  %v15816_v1 = vpop.eup %11385 }
 0x77f   : > { %11391 = vpow2.f32 %v5285_v23  ;;  %18275 = vst [vmem:[#allocation146_spill] sm:$0xff] %v15816_v1  ;;  %v15818_v52 = vpop.eup %11387 }
 0x780   : > { %11393 = vpow2.f32 %v5415_v59  ;;  %v5419_v35 = vmul.f32 1.442695, %v5193_v11  ;;  %18276 = vst [vmem:[#allocation147_spill] sm:$0xff] %v15818_v52  ;;  %v5421_v44 = vmul.f32 1.442695, %v5194_v22  ;;  %v4713_v11 = vpop.f32.mrf.mxu2 }
 0x781   : > { %11395 = vpow2.f32 %v5417_v2 }
 0x782   : > { %5519 = vadd.xlane.f32.xlu1 %v5518_v50  ;;  %5078 = vmax.xlane.f32.xlu2 %v5077_v42  ;;  %11397 = vpow2.f32 %v5351_v54  ;;  %v5521_v42 = vadd.f32 %v15810_v63, %v15805_v3  ;;  %v4470_v54 = vpop.f32.mrf.mxu1  ;;  %v18281_v50 = vld [vmem:[#allocation103_spill] sm:$0xff] }
 0x783   : > { %5570 = vadd.xlane.f32.xlu0 %v5569_v0  ;;  %11399 = vpow2.f32 %v5353_v56  ;;  %v18280_v56 = vld [vmem:[#allocation102_spill] sm:$0xff] }
 0x784   : > { %v11390_v23 = vpop.eup %11389  ;;  %11401 = vrcp.f32 %v5481_v28 }
 0x785   : > { %v5532_v8 = vpop.xlane.xlu2 %5531  ;;  %v5004_v37 = vpop.xlane.xlu1 %5003  ;;  %v5767_v22 = vmul.f32 %v11390_v23, %v18280_v56  ;;  %v5768_v0 = vmul.f32 %v11390_v23, %v18281_v50  ;;  %v15842_v50 = vmul.f32 0.17677669, %v4470_v54  ;;  %v15855_v54 = vmul.f32 0.17677669, %v4421_v48 }
 0x786   : > { %v15820_v53 = vpop.eup %11391  ;;  %11403 = vrcp.f32 %v5532_v8  ;;  %v15822_v59 = vpop.xlane.xlu0 %5054  ;;  %v5161_v46 = vsub.f32 %v15456_v25, %v5004_v37  ;;  %v5162_v2 = vsub.f32 %v15454_v17, %v5004_v37  ;;  %v5572_v25 = vadd.f32 %v15818_v52, %v15816_v1 }
 0x787   : > { %18277 = vst [vmem:[#allocation148_spill] sm:$0xff] %v15820_v53  ;;  %v15825_v27 = vpop.eup %11393  ;;  %11405 = vpow2.f32 %v5419_v35  ;;  %v4762_v8 = vpop.f32.mrf.mxu3  ;;  %v5524_v37 = vadd.f32 %v15820_v53, %v15814_v26  ;;  %v15848_v26 = vmul.f32 0.17677669, %v4713_v11 }
 0x788   : > { %18278 = vst [vmem:[#allocation149_spill] sm:$0xff] %v15825_v27  ;;  %v15830_v28 = vpop.eup %11395  ;;  %11407 = vpow2.f32 %v5421_v44  ;;  %v5355_v17 = vmul.f32 1.442695, %v5161_v46  ;;  %v5357_v56 = vmul.f32 1.442695, %v5162_v2  ;;  %v5879_v44 = vpack.c.bf16 %v5768_v0, %v5767_v22  ;;  %v18289_v0 = vld [vmem:[#allocation104_spill] sm:$0xff] }
 0x789   : > { %18279 = vst [vmem:[#allocation150_spill] sm:$0xff] %v15830_v28  ;;  %v15836_v35 = vpop.eup %11397  ;;  %v15853_v22 = vmul.f32 0.17677669, %v4762_v8 }
 0x78a   : > { %18282 = vst [vmem:[#allocation102_spill] sm:$0xff] %v15836_v35  ;;  %v15840_v63 = vpop.eup %11399  ;;  %5573 = vadd.xlane.f32.xlu1 %v5572_v25  ;;  %5522 = vadd.xlane.f32.xlu2 %v5521_v42  ;;  %11409 = vpow2.f32 %v5355_v17  ;;  %v18288_v42 = vld [vmem:[#allocation101_spill] sm:$0xff]  ;;  %v6217_v17 = vunpack.c.l.b16 %v5879_v44 }
 0x78b   : > { %18283 = vst [vmem:[#allocation103_spill] sm:$0xff] %v15840_v63  ;;  %v11402_v3 = vpop.eup %11401  ;;  %5525 = vadd.xlane.f32.xlu0 %v5524_v37  ;;  %v5575_v15 = vadd.f32 %v15840_v63, %v15836_v35 }
 0x78c   : > { %v11404_v23 = vpop.eup %11403  ;;  %18284 = vst [vmem:[#allocation151_spill] sm:$0xff] %v15842_v50  ;;  %v5735_v2 = vmul.f32 %v11402_v3, %v18288_v42  ;;  %v5736_v6 = vmul.f32 %v11402_v3, %v18289_v0  ;;  %v5623_v42 = vadd.f32 %v15830_v28, %v15825_v27  ;;  %v4472_v3 = vpop.f32.mrf.mxu1  ;;  %v5080_v27 = vmax.f32 %v15848_v26, %v15853_v22 }
 0x78d   : > { %v15844_v52 = vpop.eup %11405  ;;  %v5769_v1 = vmul.f32 %v11404_v23, %v15452_v49  ;;  %v5770_v46 = vmul.f32 %v11404_v23, %v18286_v40  ;;  %v5484_v24 = vpop.xlane.xlu1 %5483  ;;  %v18290_v23 = vld [vmem:[#allocation108_spill] sm:$0xff] }
 0x78e   : > { %18285 = vst [vmem:[#allocation152_spill] sm:$0xff] %v15844_v52  ;;  %v5007_v53 = vpop.xlane.xlu2 %5006  ;;  %v15850_v25 = vpop.eup %11407  ;;  %11411 = vrcp.f32 %v5484_v24  ;;  %v6218_v24 = vunpack.c.h.b16 %v5879_v44  ;;  %v5863_v44 = vpack.c.bf16 %v5736_v6, %v5735_v2 }
 0x78f   : > { %18287 = vst [vmem:[#allocation105_spill] sm:$0xff] %v15850_v25  ;;  %v5535_v37 = vpop.xlane.xlu0 %5534  ;;  %v5880_v49 = vpack.c.bf16 %v5770_v46, %v5769_v1  ;;  %11413 = vpow2.f32 %v5357_v56  ;;  %v5163_v40 = vsub.f32 %v15474_v61, %v5007_v53  ;;  %v5164_v11 = vsub.f32 %v18290_v23, %v5007_v53  ;;  %v4716_v1 = vpop.f32.mrf.mxu2  ;;  %v18291_v56 = vld [vmem:[#allocation107_spill] sm:$0xff]  ;;  %v18292_v46 = vld [vmem:[#allocation106_spill] sm:$0xff] }
 0x790   : > { %v5626_v48 = vadd.f32 %v15850_v25, %v15844_v52  ;;  %v5195_v61 = vsub.f32 %v18291_v56, %v15822_v59  ;;  %v5196_v53 = vsub.f32 %v18292_v46, %v15822_v59  ;;  %v4765_v0 = vpop.f32.mrf.mxu3  ;;  %v4423_v23 = vpop.f32.mrf.mxu0  ;;  %v5029_v56 = vmax.f32 %v15855_v54, %v15842_v50  ;;  %v18294_v46 = vld [vmem:[#allocation110_spill] sm:$0xff] }
 0x791   : > { %v6219_v8 = vunpack.c.l.b16 %v5880_v49  ;;  %v6220_v36 = vunpack.c.h.b16 %v5880_v49  ;;  %v15870_v63 = vpop.eup %11409  ;;  %v5359_v35 = vmul.f32 1.442695, %v5163_v40  ;;  %v5361_v52 = vmul.f32 1.442695, %v5164_v11 }
 0x792   : > { %5576 = vadd.xlane.f32.xlu1 %v5575_v15  ;;  %5624 = vadd.xlane.f32.xlu2 %v5623_v42  ;;  %v18293_v15 = vld [vmem:[#allocation109_spill] sm:$0xff]  ;;  %v15880_v40 = vmul.f32 0.17677669, %v4716_v1  ;;  %11415 = vrcp.f32 %v5535_v37  ;;  %v5425_v50 = vmul.f32 1.442695, %v5196_v53 }
 0x793   : > { %5627 = vadd.xlane.f32.xlu0 %v5626_v48  ;;  %v6249_v49 = vpack.c.b16 %v6219_v8, %v6217_v17  ;;  %v6250_v28 = vpack.c.b16 %v6220_v36, %v6218_v24  ;;  %v15882_v36 = vmul.f32 0.17677669, %v4765_v0  ;;  %v5423_v17 = vmul.f32 1.442695, %v5195_v61 }
 0x794   : > { %v11412_v25 = vpop.eup %11411  ;;  %v5943_v48 = vunpack.c.l.b16 %v5863_v44  ;;  %11417 = vpow2.f32 %v5359_v35  ;;  %v15891_v37 = vmul.f32 0.17677669, %v4423_v23  ;;  %v4475_v53 = vpop.f32.mrf.mxu1 }
 0x795   : > { %v15876_v59 = vpop.eup %11413  ;;  %v5737_v42 = vmul.f32 %v11412_v25, %v18293_v15  ;;  %v5738_v62 = vmul.f32 %v11412_v25, %v18294_v46  ;;  %6385 = vmatmul.bf16.vlgmr.msra.gmra.mxu2 %v6249_v49  ;;  %6434 = vmatmul.bf16.vlgmr.msra.gmra.mxu3 %v6250_v28  ;;  %v5058_v6 = vpop.xlane.xlu1 %5057  ;;  %v5944_v25 = vunpack.c.h.b16 %v5863_v44  ;;  %11419 = vpow2.f32 %v5361_v52 }
 0x796   : > { %v5487_v2 = vpop.xlane.xlu2 %5486  ;;  %v5197_v11 = vsub.f32 %v15506_v7, %v5058_v6  ;;  %v5198_v24 = vsub.f32 %v15504_v41, %v5058_v6  ;;  %v5578_v1 = vadd.f32 %v15876_v59, %v15870_v63  ;;  %v15889_v41 = vmul.f32 0.17677669, %v4472_v3 }
 0x797   : > { %v5010_v8 = vpop.xlane.xlu0 %5009  ;;  %v5864_v15 = vpack.c.bf16 %v5738_v62, %v5737_v42  ;;  %11421 = vrcp.f32 %v5487_v2  ;;  %v5083_v23 = vmax.f32 %v15880_v40, %v15882_v36 }
 0x798   : > { %v5427_v28 = vmul.f32 1.442695, %v5197_v11  ;;  %v5429_v46 = vmul.f32 1.442695, %v5198_v24  ;;  %11423 = vpow2.f32 %v5423_v17  ;;  %v5165_v7 = vsub.f32 %v15499_v43, %v5010_v8  ;;  %v11416_v61 = vpop.eup %11415  ;;  %v4426_v44 = vpop.f32.mrf.mxu0 }
 0x799   : > { %v5945_v49 = vunpack.c.l.b16 %v5864_v15  ;;  %v5946_v0 = vunpack.c.h.b16 %v5864_v15  ;;  %11425 = vpow2.f32 %v5425_v50  ;;  %v5166_v62 = vsub.f32 %v15497_v60, %v5010_v8 }
 0x79a   : > { %5579 = vadd.xlane.f32.xlu2 %v5578_v1  ;;  %5030 = vmax.xlane.f32.xlu1 %v5029_v56  ;;  %11427 = vpow2.f32 %v5427_v28  ;;  %v15894_v42 = vpop.eup %11417  ;;  %v5363_v60 = vmul.f32 1.442695, %v5165_v7  ;;  %v5032_v6 = vmax.f32 %v15891_v37, %v15889_v41  ;;  %v15908_v15 = vmul.f32 0.17677669, %v4426_v44 }
 0x79b   : > { %5081 = vmax.xlane.f32.xlu0 %v5080_v27  ;;  %v5975_v52 = vpack.c.b16 %v5945_v49, %v5943_v48  ;;  %v5976_v35 = vpack.c.b16 %v5946_v0, %v5944_v25  ;;  %11429 = vpow2.f32 %v5429_v46  ;;  %v15898_v50 = vpop.eup %11419  ;;  %v5365_v17 = vmul.f32 1.442695, %v5166_v62  ;;  %v4718_v62 = vpop.f32.mrf.mxu2 }
 0x79c   : > { %18295 = vst [vmem:[#allocation101_spill] sm:$0xff] %v15898_v50  ;;  %v15906_v48 = vmul.f32 0.17677669, %v4475_v53  ;;  %v5772_v28 = vmul.f32 %v11416_v61, %v15486_v34  ;;  %v5581_v49 = vadd.f32 %v15898_v50, %v15894_v42  ;;  %v18300_v50 = vld [vmem:[#allocation115_spill] sm:$0xff] }
 0x79d   : > { %6111 = vmatmul.bf16.vlgmr.msra.gmra.mxu0 %v5975_v52  ;;  %6160 = vmatmul.bf16.vlgmr.msra.gmra.mxu1 %v5976_v35  ;;  %v5538_v43 = vpop.xlane.xlu1 %5537  ;;  %v11422_v2 = vpop.eup %11421 }
 0x79e   : > { %v5061_v3 = vpop.xlane.xlu2 %5060  ;;  %11431 = vrcp.f32 %v5538_v43  ;;  %v15904_v24 = vpop.eup %11423  ;;  %v5740_v46 = vmul.f32 %v11422_v2, %v15508_v9  ;;  %v5035_v34 = vmax.f32 %v15908_v15, %v15906_v48 }
 0x79f   : > { %v5199_v27 = vsub.f32 %v15522_v4, %v5061_v3  ;;  %v5490_v56 = vpop.xlane.xlu0 %5489  ;;  %v5200_v11 = vsub.f32 %v15524_v39, %v5061_v3  ;;  %v15910_v25 = vpop.eup %11425  ;;  %v5771_v4 = vmul.f32 %v11416_v61, %v15483_v16  ;;  %v5739_v39 = vmul.f32 %v11422_v2, %v15501_v29  ;;  %v18296_v29 = vld [vmem:[#allocation113_spill] sm:$0xff]  ;;  %v18297_v3 = vld [vmem:[#allocation111_spill] sm:$0xff] }
 0x7a0   : > { %11433 = vrcp.f32 %v5490_v56  ;;  %v15916_v0 = vpop.eup %11427  ;;  %v4767_v52 = vpop.f32.mrf.mxu3  ;;  %v15928_v2 = vmul.f32 0.17677669, %v4718_v62 }
 0x7a1   : > { %v5431_v8 = vmul.f32 1.442695, %v5199_v27  ;;  %v5433_v1 = vmul.f32 1.442695, %v5200_v11  ;;  %11435 = vpow2.f32 %v5363_v60  ;;  %v15920_v7 = vpop.eup %11429  ;;  %v5881_v43 = vpack.c.bf16 %v5772_v28, %v5771_v4  ;;  %v18298_v60 = vld [vmem:[#allocation112_spill] sm:$0xff] }
 0x7a2   : > { %5084 = vmax.xlane.f32.xlu1 %v5083_v23  ;;  %5033 = vmax.xlane.f32.xlu2 %v5032_v6  ;;  %11437 = vpow2.f32 %v5365_v17  ;;  %v5865_v6 = vpack.c.bf16 %v5740_v46, %v5739_v39  ;;  %v15930_v17 = vmul.f32 0.17677669, %v4767_v52  ;;  %v5632_v4 = vadd.f32 %v15920_v7, %v15916_v0 }
 0x7a3   : > { %5582 = vadd.xlane.f32.xlu0 %v5581_v49  ;;  %11439 = vpow2.f32 %v5431_v8  ;;  %v5629_v8 = vadd.f32 %v15910_v25, %v15904_v24  ;;  %v6221_v49 = vunpack.c.l.b16 %v5881_v43  ;;  %v6222_v46 = vunpack.c.h.b16 %v5881_v43 }
 0x7a4   : > { %v11432_v16 = vpop.eup %11431  ;;  %11441 = vpow2.f32 %v5433_v1  ;;  %v5947_v52 = vunpack.c.l.b16 %v5865_v6 }
 0x7a5   : > { %v5773_v61 = vmul.f32 %v11432_v16, %v15529_v38  ;;  %v5774_v53 = vmul.f32 %v11432_v16, %v18296_v29  ;;  %v5493_v9 = vpop.xlane.xlu1 %5492 }
 0x7a6   : > { %v11434_v35 = vpop.eup %11433  ;;  %v5541_v44 = vpop.xlane.xlu2 %5540  ;;  %11443 = vrcp.f32 %v5493_v9 }
 0x7a7   : > { %v5741_v23 = vmul.f32 %v11434_v35, %v18297_v3  ;;  %v5742_v27 = vmul.f32 %v11434_v35, %v18298_v60  ;;  %v5544_v56 = vpop.xlane.xlu0 %5543  ;;  %11445 = vrcp.f32 %v5541_v44  ;;  %v5882_v11 = vpack.c.bf16 %v5774_v53, %v5773_v61  ;;  %v15932_v38 = vpop.eup %11435 }
 0x7a8   : > { %11447 = vrcp.f32 %v5544_v56  ;;  %v15938_v1 = vpop.eup %11437  ;;  %v5948_v61 = vunpack.c.h.b16 %v5865_v6  ;;  %v18299_v56 = vld [vmem:[#allocation114_spill] sm:$0xff]  ;;  %v5086_v6 = vmax.f32 %v15928_v2, %v15930_v17 }
 0x7a9   : > { %v5866_v28 = vpack.c.bf16 %v5742_v27, %v5741_v23  ;;  %v6223_v39 = vunpack.c.l.b16 %v5882_v11  ;;  %v6224_v16 = vunpack.c.h.b16 %v5882_v11  ;;  %v15940_v62 = vpop.eup %11439 }
 0x7aa   : > { %5630 = vadd.xlane.f32.xlu1 %v5629_v8  ;;  %5633 = vadd.xlane.f32.xlu2 %v5632_v4  ;;  %v15942_v53 = vpop.eup %11441 }
 0x7ab   : > { %v5949_v35 = vunpack.c.l.b16 %v5866_v28  ;;  %v5950_v29 = vunpack.c.h.b16 %v5866_v28  ;;  %5036 = vmax.xlane.f32.xlu0 %v5035_v34  ;;  %v6251_v9 = vpack.c.b16 %v6223_v39, %v6221_v49  ;;  %v6252_v44 = vpack.c.b16 %v6224_v16, %v6222_v46  ;;  %v18301_v49 = vld [vmem:[#allocation116_spill] sm:$0xff]  ;;  %v18302_v16 = vld [vmem:[#allocation117_spill] sm:$0xff] }
 0x7ac   : > { %v11444_v3 = vpop.eup %11443 }
 0x7ad   : > { %v5977_v23 = vpack.c.b16 %v5949_v35, %v5947_v52  ;;  %v5978_v60 = vpack.c.b16 %v5950_v29, %v5948_v61  ;;  %v11446_v27 = vpop.eup %11445  ;;  %v5743_v43 = vmul.f32 %v11444_v3, %v15541_v33  ;;  %v5744_v11 = vmul.f32 %v11444_v3, %v18299_v56  ;;  %6390 = vmatmul.bf16.gmra.mxu2 %v6251_v9  ;;  %v5013_v4 = vpop.xlane.xlu1 %5012  ;;  %v18303_v35 = vld [vmem:[#allocation118_spill] sm:$0xff] }
 0x7ae   : > { %6439 = vmatmul.bf16.gmra.mxu3 %v6252_v44  ;;  %v5496_v8 = vpop.xlane.xlu2 %5495  ;;  %v11448_v28 = vpop.eup %11447  ;;  %v5775_v34 = vmul.f32 %v11446_v27, %v18300_v50  ;;  %v5776_v39 = vmul.f32 %v11446_v27, %v18301_v49  ;;  %v5167_v33 = vsub.f32 %v15565_v55, %v5013_v4  ;;  %v18304_v44 = vld [vmem:[#allocation119_spill] sm:$0xff]  ;;  %v5584_v50 = vadd.f32 %v15938_v1, %v15932_v38 }
 0x7af   : > { %11449 = vrcp.f32 %v5496_v8  ;;  %6116 = vmatmul.bf16.gmra.mxu0 %v5977_v23  ;;  %6165 = vmatmul.bf16.gmra.mxu1 %v5978_v60  ;;  %v5064_v46 = vpop.xlane.xlu0 %5063  ;;  %v5777_v52 = vmul.f32 %v11448_v28, %v18302_v16  ;;  %v5778_v61 = vmul.f32 %v11448_v28, %v18303_v35  ;;  %v5168_v3 = vsub.f32 %v18304_v44, %v5013_v4 }
 0x7b0   : > { %v5201_v29 = vsub.f32 %v15573_v45, %v5064_v46  ;;  %v5202_v9 = vsub.f32 %v15575_v47, %v5064_v46  ;;  %v5367_v56 = vmul.f32 1.442695, %v5167_v33  ;;  %v5883_v27 = vpack.c.bf16 %v5776_v39, %v5775_v34 }
 0x7b1   : > { %v5635_v55 = vadd.f32 %v15942_v53, %v15940_v62  ;;  %v5884_v8 = vpack.c.bf16 %v5778_v61, %v5777_v52  ;;  %v5369_v49 = vmul.f32 1.442695, %v5168_v3  ;;  %v5867_v45 = vpack.c.bf16 %v5744_v11, %v5743_v43  ;;  %v18305_v61 = vld [vmem:[#allocation120_spill] sm:$0xff] }
 0x7b2   : > { %v5435_v23 = vmul.f32 1.442695, %v5201_v29  ;;  %v5437_v60 = vmul.f32 1.442695, %v5202_v9  ;;  %11451 = vpow2.f32 %v5367_v56  ;;  %5585 = vadd.xlane.f32.xlu1 %v5584_v50  ;;  %5087 = vmax.xlane.f32.xlu2 %v5086_v6  ;;  %v6225_v4 = vunpack.c.l.b16 %v5883_v27 }
 0x7b3   : > { %5636 = vadd.xlane.f32.xlu0 %v5635_v55  ;;  %v6227_v33 = vunpack.c.l.b16 %v5884_v8  ;;  %v5951_v29 = vunpack.c.l.b16 %v5867_v45  ;;  %v5952_v9 = vunpack.c.h.b16 %v5867_v45  ;;  %v6226_v44 = vunpack.c.h.b16 %v5883_v27 }
 0x7b4   : > { %11453 = vpow2.f32 %v5435_v23  ;;  %v6228_v50 = vunpack.c.h.b16 %v5884_v8 }
 0x7b5   : > { %v11450_v47 = vpop.eup %11449  ;;  %11455 = vpow2.f32 %v5437_v60  ;;  %v5067_v39 = vpop.xlane.xlu1 %5066 }
 0x7b6   : > { %v5745_v28 = vmul.f32 %v11450_v47, %v15567_v32  ;;  %v5746_v34 = vmul.f32 %v11450_v47, %v15570_v10  ;;  %11457 = vpow2.f32 %v5369_v49  ;;  %v5016_v46 = vpop.xlane.xlu2 %5015  ;;  %v5203_v52 = vsub.f32 %v15586_v18, %v5067_v39  ;;  %v4428_v49 = vpop.f32.mrf.mxu0 }
 0x7b7   : > { %v5499_v16 = vpop.xlane.xlu0 %5498  ;;  %v5204_v35 = vsub.f32 %v15588_v5, %v5067_v39  ;;  %v5169_v6 = vsub.f32 %v15593_v58, %v5016_v46  ;;  %v5170_v43 = vsub.f32 %v18305_v61, %v5016_v46  ;;  %v6253_v58 = vpack.c.b16 %v6227_v33, %v6225_v4  ;;  %v4477_v47 = vpop.f32.mrf.mxu1 }
 0x7b8   : > { %v5868_v11 = vpack.c.bf16 %v5746_v34, %v5745_v28  ;;  %v15966_v32 = vpop.eup %11451  ;;  %v5439_v10 = vmul.f32 1.442695, %v5203_v52  ;;  %11459 = vrcp.f32 %v5499_v16  ;;  %v6254_v39 = vpack.c.b16 %v6228_v50, %v6226_v44 }
 0x7b9   : > { %18306 = vst [vmem:[#allocation104_spill] sm:$0xff] %v15966_v32  ;;  %v5441_v3 = vmul.f32 1.442695, %v5204_v35  ;;  %v5371_v56 = vmul.f32 1.442695, %v5169_v6  ;;  %v15982_v35 = vpop.f32.mrf.mxu2 }
 0x7ba   : > { %v15968_v23 = vpop.eup %11453  ;;  %v5373_v18 = vmul.f32 1.442695, %v5170_v43  ;;  %v5953_v60 = vunpack.c.l.b16 %v5868_v11  ;;  %v5954_v5 = vunpack.c.h.b16 %v5868_v11  ;;  %11461 = vpow2.f32 %v5439_v10  ;;  %v18311_v43 = vld [vmem:[#allocation124_spill] sm:$0xff] }
 0x7bb   : > { %v15970_v55 = vpop.eup %11455  ;;  %11463 = vpow2.f32 %v5441_v3  ;;  %v15978_v33 = vmul.f32 0.17677669, %v4428_v49  ;;  %v15980_v16 = vmul.f32 0.17677669, %v4477_v47  ;;  %v18316_v49 = vld [vmem:[#allocation123_spill] sm:$0xff] }
 0x7bc   : > { %18307 = vst [vmem:[#allocation108_spill] sm:$0xff] %v15970_v55  ;;  %v15972_v45 = vpop.eup %11457  ;;  %v5638_v27 = vadd.f32 %v15970_v55, %v15968_v23  ;;  %v5979_v28 = vpack.c.b16 %v5953_v60, %v5951_v29  ;;  %v5980_v8 = vpack.c.b16 %v5954_v5, %v5952_v9  ;;  %11465 = vpow2.f32 %v5371_v56  ;;  %v4770_v29 = vpop.f32.mrf.mxu3 }
 0x7bd   : > { %18308 = vst [vmem:[#allocation107_spill] sm:$0xff] %v15972_v45  ;;  %v5587_v34 = vadd.f32 %v15972_v45, %v15966_v32  ;;  %11467 = vpow2.f32 %v5373_v18  ;;  %6395 = vmatmul.bf16.gmra.mxu2 %v6253_v58  ;;  %v5547_v46 = vpop.xlane.xlu1 %5546  ;;  %v5038_v56 = vmax.f32 %v15978_v33, %v15980_v16 }
 0x7be   : > { %5639 = vadd.xlane.f32.xlu1 %v5638_v27  ;;  %v5550_v4 = vpop.xlane.xlu2 %5549  ;;  %18309 = vst [vmem:[#allocation106_spill] sm:$0xff] %v15978_v33  ;;  %11469 = vrcp.f32 %v5547_v46  ;;  %v11460_v6 = vpop.eup %11459  ;;  %6444 = vmatmul.bf16.gmra.mxu3 %v6254_v39  ;;  %v18317_v27 = vld [vmem:[#allocation125_spill] sm:$0xff]  ;;  %v18318_v39 = vld [vmem:[#allocation126_spill] sm:$0xff] }
 0x7bf   : > { %18310 = vst [vmem:[#allocation109_spill] sm:$0xff] %v15980_v16  ;;  %5588 = vadd.xlane.f32.xlu2 %v5587_v34  ;;  %6121 = vmatmul.bf16.gmra.mxu0 %v5979_v28  ;;  %v5019_v52 = vpop.xlane.xlu0 %5018  ;;  %11471 = vrcp.f32 %v5550_v4  ;;  %v18319_v4 = vld [vmem:[#allocation127_spill] sm:$0xff]  ;;  %v16012_v45 = vpop.f32.mrf.mxu0  ;;  %v10868_v33 = vld [vmem:[#allocation4 + $0x178] sm:$0xff] }
 0x7c0   : > { %6170 = vmatmul.bf16.gmra.mxu1 %v5980_v8  ;;  %v5171_v61 = vsub.f32 %v15614_v21, %v5019_v52  ;;  %v5172_v11 = vsub.f32 %v18311_v43, %v5019_v52  ;;  %v15986_v9 = vpop.eup %11461 }
 0x7c1   : > { %18312 = vst [vmem:[#allocation110_spill] sm:$0xff] %v15986_v9  ;;  %v15988_v44 = vpop.eup %11463  ;;  %6700 = vmatpush.bf16.msrb.mxu1 %v10868_v33 }
 0x7c2   : > { %18313 = vst [vmem:[#allocation113_spill] sm:$0xff] %v15988_v44  ;;  %v5375_v10 = vmul.f32 1.442695, %v5171_v61  ;;  %v5377_v3 = vmul.f32 1.442695, %v5172_v11  ;;  %v15992_v50 = vpop.eup %11465  ;;  %v5641_v18 = vadd.f32 %v15988_v44, %v15986_v9  ;;  %v18320_v61 = vld [vmem:[#allocation129_spill] sm:$0xff] }
 0x7c3   : > { %18314 = vst [vmem:[#allocation111_spill] sm:$0xff] %v15992_v50  ;;  %v15996_v60 = vpop.eup %11467  ;;  %v18322_v44 = vld [vmem:[#allocation131_spill] sm:$0xff] }
 0x7c4   : > { %18315 = vst [vmem:[#allocation112_spill] sm:$0xff] %v15996_v60  ;;  %11473 = vpow2.f32 %v5375_v10  ;;  %v11470_v21 = vpop.eup %11469  ;;  %v5590_v5 = vadd.f32 %v15996_v60, %v15992_v50  ;;  %v18321_v10 = vld [vmem:[#allocation121_spill] sm:$0xff]  ;;  %v18323_v60 = vld [vmem:[#allocation122_spill] sm:$0xff]  ;;  %v4723_v50 = vpop.f32.mrf.mxu2 }
 0x7c5   : > { %11475 = vpow2.f32 %v5377_v3  ;;  %v11472_v58 = vpop.eup %11471  ;;  %v5779_v47 = vmul.f32 %v11470_v21, %v18316_v49  ;;  %v5780_v28 = vmul.f32 %v11470_v21, %v18317_v27  ;;  %v5502_v8 = vpop.xlane.xlu1 %5501  ;;  %v5747_v3 = vmul.f32 %v11460_v6, %v18321_v10 }
 0x7c6   : > { %5039 = vmax.xlane.f32.xlu1 %v5038_v56  ;;  %v5070_v34 = vpop.xlane.xlu2 %5069  ;;  %v5781_v46 = vmul.f32 %v11472_v58, %v18318_v39  ;;  %v5782_v52 = vmul.f32 %v11472_v58, %v18319_v4  ;;  %5591 = vadd.xlane.f32.xlu0 %v5590_v5  ;;  %11477 = vrcp.f32 %v5502_v8  ;;  %v5748_v21 = vmul.f32 %v11460_v6, %v18323_v60  ;;  %v4772_v8 = vpop.f32.mrf.mxu3 }
 0x7c7   : > { %5642 = vadd.xlane.f32.xlu2 %v5641_v18  ;;  %v5205_v43 = vsub.f32 %v18320_v61, %v5070_v34  ;;  %v5553_v11 = vpop.xlane.xlu0 %5552  ;;  %v5206_v9 = vsub.f32 %v18322_v44, %v5070_v34  ;;  %v5885_v49 = vpack.c.bf16 %v5780_v28, %v5779_v47  ;;  %v16014_v44 = vpop.f32.mrf.mxu1  ;;  %v16018_v60 = vmul.f32 0.17677669, %v4723_v50 }
 0x7c8   : > { %11479 = vrcp.f32 %v5553_v11  ;;  %v5886_v27 = vpack.c.bf16 %v5782_v52, %v5781_v46  ;;  %v16020_v34 = vmul.f32 0.17677669, %v4772_v8  ;;  %v5869_v46 = vpack.c.bf16 %v5748_v21, %v5747_v3  ;;  %v18328_v52 = vld [vmem:[#allocation128_spill] sm:$0xff]  ;;  %v18329_v11 = vld [vmem:[#allocation130_spill] sm:$0xff] }
 0x7c9   : > { %v5443_v56 = vmul.f32 1.442695, %v5205_v43  ;;  %v5445_v58 = vmul.f32 1.442695, %v5206_v9  ;;  %v6229_v18 = vunpack.c.l.b16 %v5885_v49  ;;  %v6230_v5 = vunpack.c.h.b16 %v5885_v49  ;;  %18326 = vst [vmem:[#allocation116_spill] sm:$0xff] %v16018_v60  ;;  %v10876_v3 = vld [vmem:[#allocation4 + $0x1b8] sm:$0xff] }
 0x7ca   : > { %v16008_v39 = vpop.eup %11473  ;;  %v6231_v61 = vunpack.c.l.b16 %v5886_v27  ;;  %v6232_v10 = vunpack.c.h.b16 %v5886_v27  ;;  %18327 = vst [vmem:[#allocation117_spill] sm:$0xff] %v16020_v34  ;;  %v16025_v50 = vmul.f32 0.17677669, %v15982_v35  ;;  %v10884_v21 = vld [vmem:[#allocation4 + $0x1f8] sm:$0xff]  ;;  %v5092_v8 = vmax.f32 %v16018_v60, %v16020_v34  ;;  %6925 = vmatpush.bf16.msrb.mxu2 %v10876_v3 }
 0x7cb   : > { %18324 = vst [vmem:[#allocation114_spill] sm:$0xff] %v16008_v39  ;;  %v16010_v4 = vpop.eup %11475  ;;  %11481 = vpow2.f32 %v5443_v56  ;;  %6974 = vmatpush.bf16.msrb.mxu3 %v10884_v21 }
 0x7cc   : > { %18325 = vst [vmem:[#allocation115_spill] sm:$0xff] %v16010_v4  ;;  %11483 = vpow2.f32 %v5445_v58  ;;  %v5593_v6 = vadd.f32 %v16010_v4, %v16008_v39  ;;  %v11478_v47 = vpop.eup %11477  ;;  %v6255_v9 = vpack.c.b16 %v6231_v61, %v6229_v18  ;;  %v6256_v28 = vpack.c.b16 %v6232_v10, %v6230_v5 }
 0x7cd   : > { %v5749_v43 = vmul.f32 %v11478_v47, %v18328_v52  ;;  %v5750_v49 = vmul.f32 %v11478_v47, %v18329_v11  ;;  %v5556_v56 = vpop.xlane.xlu1 %5555  ;;  %18330 = vst [vmem:[#allocation118_spill] sm:$0xff] %v16025_v50  ;;  %v16027_v4 = vmul.f32 0.17677669, %v4770_v29  ;;  %v5955_v61 = vunpack.c.l.b16 %v5869_v46  ;;  %v18334_v47 = vld [vmem:[#allocation132_spill] sm:$0xff] }
 0x7ce   : > { %5594 = vadd.xlane.f32.xlu1 %v5593_v6  ;;  %v5505_v27 = vpop.xlane.xlu2 %5504  ;;  %v11480_v32 = vpop.eup %11479  ;;  %11485 = vrcp.f32 %v5556_v56  ;;  %6400 = vmatmul.bf16.gmra.mxu2 %v6255_v9  ;;  %v5956_v10 = vunpack.c.h.b16 %v5869_v46  ;;  %v18335_v9 = vld [vmem:[#allocation133_spill] sm:$0xff] }
 0x7cf   : > { %v5508_v58 = vpop.xlane.xlu0 %5507  ;;  %18331 = vst [vmem:[#allocation119_spill] sm:$0xff] %v16027_v4  ;;  %6449 = vmatmul.bf16.gmra.mxu3 %v6256_v28  ;;  %11487 = vrcp.f32 %v5505_v27  ;;  %v5870_v18 = vpack.c.bf16 %v5750_v49, %v5749_v43  ;;  %v5783_v35 = vmul.f32 %v11480_v32, %v18334_v47  ;;  %v5784_v29 = vmul.f32 %v11480_v32, %v18335_v9  ;;  %v4433_v27 = vpop.f32.mrf.mxu0  ;;  %v18336_v47 = vld [vmem:[#allocation136_spill] sm:$0xff]  ;;  %v18337_v32 = vld [vmem:[#allocation137_spill] sm:$0xff] }
 0x7d0   : > { %11489 = vrcp.f32 %v5508_v58  ;;  %v5089_v46 = vmax.f32 %v16025_v50, %v16027_v4  ;;  %v4482_v58 = vpop.f32.mrf.mxu1  ;;  %v18340_v4 = vld [vmem:[#allocation141_spill] sm:$0xff] }
 0x7d1   : > { %v16029_v5 = vpop.eup %11481  ;;  %v5957_v52 = vunpack.c.l.b16 %v5870_v18  ;;  %v5958_v28 = vunpack.c.h.b16 %v5870_v18  ;;  %v5887_v21 = vpack.c.bf16 %v5784_v29, %v5783_v35  ;;  %v16049_v35 = vmul.f32 0.17677669, %v4433_v27 }
 0x7d2   : > { %18332 = vst [vmem:[#allocation120_spill] sm:$0xff] %v16029_v5  ;;  %v16033_v6 = vpop.eup %11483  ;;  %v16051_v29 = vmul.f32 0.17677669, %v4482_v58 }
 0x7d3   : > { %18333 = vst [vmem:[#allocation124_spill] sm:$0xff] %v16033_v6  ;;  %v5644_v43 = vadd.f32 %v16033_v6, %v16029_v5  ;;  %v5981_v11 = vpack.c.b16 %v5957_v52, %v5955_v61  ;;  %v5982_v49 = vpack.c.b16 %v5958_v28, %v5956_v10  ;;  %v18338_v61 = vld [vmem:[#allocation134_spill] sm:$0xff]  ;;  %v18339_v52 = vld [vmem:[#allocation135_spill] sm:$0xff] }
 0x7d4   : > { %v11486_v56 = vpop.eup %11485  ;;  %v18341_v5 = vld [vmem:[#allocation138_spill] sm:$0xff] }
 0x7d5   : > { %5645 = vadd.xlane.f32.xlu0 %v5644_v43  ;;  %v11488_v39 = vpop.eup %11487  ;;  %v5785_v34 = vmul.f32 %v11486_v56, %v18336_v47  ;;  %v5786_v9 = vmul.f32 %v11486_v56, %v18337_v32  ;;  %6126 = vmatmul.bf16.gmra.mxu0 %v5981_v11  ;;  %v5022_v3 = vpop.xlane.xlu1 %5021  ;;  %v18342_v47 = vld [vmem:[#allocation139_spill] sm:$0xff] }
 0x7d6   : > { %5093 = vmax.xlane.f32.xlu1 %v5092_v8  ;;  %v5559_v18 = vpop.xlane.xlu2 %5558  ;;  %v11490_v6 = vpop.eup %11489  ;;  %v5751_v10 = vmul.f32 %v11488_v39, %v18338_v61  ;;  %v5752_v28 = vmul.f32 %v11488_v39, %v18339_v52  ;;  %6175 = vmatmul.bf16.gmra.mxu1 %v5982_v49  ;;  %v5173_v50 = vsub.f32 %v18340_v4, %v5022_v3  ;;  %v18343_v8 = vld [vmem:[#allocation140_spill] sm:$0xff]  ;;  %v6233_v39 = vunpack.c.l.b16 %v5887_v21 }
 0x7d7   : > { %11491 = vrcp.f32 %v5559_v18  ;;  %v5562_v43 = vpop.xlane.xlu0 %5561  ;;  %v5753_v60 = vmul.f32 %v11490_v6, %v18341_v5  ;;  %v5754_v16 = vmul.f32 %v11490_v6, %v18342_v47  ;;  %v5174_v11 = vsub.f32 %v18343_v8, %v5022_v3  ;;  %v10860_v52 = vld [vmem:[#allocation4 + $0x138] sm:$0xff]  ;;  %v18344_v47 = vld [vmem:[#allocation83_spill] sm:$0xff] }
 0x7d8   : > { %11493 = vrcp.f32 %v5562_v43  ;;  %v5379_v56 = vmul.f32 1.442695, %v5173_v50  ;;  %v5888_v32 = vpack.c.bf16 %v5786_v9, %v5785_v34  ;;  %v6234_v49 = vunpack.c.h.b16 %v5887_v21  ;;  %6651 = vmatpush.bf16.msrb.mxu0 %v10860_v52  ;;  %v18345_v8 = vld [vmem:[#allocation87_spill] sm:$0xff] }
 0x7d9   : > { %v5381_v61 = vmul.f32 1.442695, %v5174_v11  ;;  %v5871_v18 = vpack.c.bf16 %v5752_v28, %v5751_v10  ;;  %v5872_v55 = vpack.c.bf16 %v5754_v16, %v5753_v60  ;;  %v5044_v3 = vmax.f32 %v16049_v35, %v16051_v29  ;;  %v10875_v16 = vld [vmem:[#allocation4 + $0x1b0] sm:$0xff] }
 0x7da   : > { %11495 = vpow2.f32 %v5379_v56  ;;  %v6235_v4 = vunpack.c.l.b16 %v5888_v32  ;;  %v6236_v5 = vunpack.c.h.b16 %v5888_v32  ;;  %v10883_v60 = vld [vmem:[#allocation4 + $0x1f0] sm:$0xff]  ;;  %6926 = vmatpush.bf16.msrb.mxu2 %v10875_v16  ;;  %v16071_v16 = vmul.f32 0.17677669, %v16014_v44 }
 0x7db   : > { %11497 = vpow2.f32 %v5381_v61  ;;  %v5959_v10 = vunpack.c.l.b16 %v5871_v18  ;;  %v5961_v28 = vunpack.c.l.b16 %v5872_v55  ;;  %v5960_v43 = vunpack.c.h.b16 %v5871_v18  ;;  %v18346_v32 = vld [vmem:[#allocation84_spill] sm:$0xff]  ;;  %v18348_v52 = vld [vmem:[#allocation143_spill] sm:$0xff]  ;;  %6975 = vmatpush.bf16.msrb.mxu3 %v10883_v60 }
 0x7dc   : > { %v6257_v34 = vpack.c.b16 %v6235_v4, %v6233_v39  ;;  %v6258_v50 = vpack.c.b16 %v6236_v5, %v6234_v49  ;;  %v18347_v39 = vld [vmem:[#allocation142_spill] sm:$0xff]  ;;  %v5962_v5 = vunpack.c.h.b16 %v5872_v55  ;;  %v16068_v55 = vmul.f32 0.17677669, %v16012_v45 }
 0x7dd   : > { %v11492_v6 = vpop.eup %11491  ;;  %5090 = vmax.xlane.f32.xlu0 %v5089_v46  ;;  %v5511_v9 = vpop.xlane.xlu1 %5510 }
 0x7de   : > { %v11494_v27 = vpop.eup %11493  ;;  %v5514_v58 = vpop.xlane.xlu2 %5513  ;;  %6405 = vmatmul.bf16.gmra.mxu2 %v6257_v34  ;;  %v5787_v33 = vmul.f32 %v11492_v6, %v18344_v47  ;;  %v5788_v61 = vmul.f32 %v11492_v6, %v18346_v32  ;;  %v5984_v6 = vpack.c.b16 %v5962_v5, %v5960_v43  ;;  %v18351_v32 = vld [vmem:[#allocation92_spill] sm:$0xff] }
 0x7df   : > { %11499 = vrcp.f32 %v5514_v58  ;;  %v5073_v21 = vpop.xlane.xlu0 %5072  ;;  %6454 = vmatmul.bf16.gmra.mxu3 %v6258_v50  ;;  %v5789_v49 = vmul.f32 %v11494_v27, %v18347_v39  ;;  %v5790_v4 = vmul.f32 %v11494_v27, %v18348_v52  ;;  %v5983_v58 = vpack.c.b16 %v5961_v28, %v5959_v10  ;;  %v18352_v39 = vld [vmem:[#allocation85_spill] sm:$0xff] }
 0x7e0   : > { %v5207_v46 = vsub.f32 %v15700_v12, %v5073_v21  ;;  %v5208_v11 = vsub.f32 %v18345_v8, %v5073_v21  ;;  %11501 = vrcp.f32 %v5511_v9  ;;  %v16058_v56 = vpop.eup %11495  ;;  %v5889_v21 = vpack.c.bf16 %v5788_v61, %v5787_v33  ;;  %v18349_v8 = vld [vmem:[#allocation144_spill] sm:$0xff] }
 0x7e1   : > { %v16063_v18 = vpop.eup %11497  ;;  %v5890_v47 = vpack.c.bf16 %v5790_v4, %v5789_v49  ;;  %v18353_v49 = vld [vmem:[#allocation88_spill] sm:$0xff] }
 0x7e2   : > { %v5447_v34 = vmul.f32 1.442695, %v5207_v46  ;;  %v5449_v50 = vmul.f32 1.442695, %v5208_v11  ;;  %v5596_v12 = vadd.f32 %v16063_v18, %v16058_v56 }
 0x7e4   : > { %11503 = vpow2.f32 %v5447_v34  ;;  %5597 = vadd.xlane.f32.xlu2 %v5596_v12  ;;  %v10859_v34 = vld [vmem:[#allocation4 + $0x130] sm:$0xff] }
 0x7e5   : > { %v11500_v9 = vpop.eup %11499  ;;  %11505 = vpow2.f32 %v5449_v50  ;;  %5045 = vmax.xlane.f32.xlu0 %v5044_v3  ;;  %6131 = vmatmul.bf16.gmra.mxu0 %v5983_v58  ;;  %v5076_v10 = vpop.xlane.xlu1 %5075  ;;  %v18350_v3 = vld [vmem:[#allocation145_spill] sm:$0xff]  ;;  %v10867_v50 = vld [vmem:[#allocation4 + $0x170] sm:$0xff] }
 0x7e6   : > { %v11502_v27 = vpop.eup %11501  ;;  %v5757_v60 = vmul.f32 %v11500_v9, %v15707_v20  ;;  %v5758_v46 = vmul.f32 %v11500_v9, %v15710_v30  ;;  %v5025_v28 = vpop.xlane.xlu2 %5024  ;;  %6180 = vmatmul.bf16.gmra.mxu1 %v5984_v6  ;;  %v5209_v33 = vsub.f32 %v15734_v14, %v5076_v10  ;;  %v5210_v45 = vsub.f32 %v18351_v32, %v5076_v10  ;;  %v18354_v20 = vld [vmem:[#allocation86_spill] sm:$0xff]  ;;  %v18355_v30 = vld [vmem:[#allocation91_spill] sm:$0xff] }
 0x7e7   : > { %v5755_v11 = vmul.f32 %v11502_v27, %v18349_v8  ;;  %v5756_v43 = vmul.f32 %v11502_v27, %v18350_v3  ;;  %v5028_v61 = vpop.xlane.xlu0 %5027  ;;  %v5175_v44 = vsub.f32 %v18352_v39, %v5025_v28  ;;  %v5176_v52 = vsub.f32 %v18353_v49, %v5025_v28  ;;  %6652 = vmatpush.bf16.msrb.mxu0 %v10859_v34 }
 0x7e8   : > { %v5177_v4 = vsub.f32 %v18354_v20, %v5028_v61  ;;  %v5178_v5 = vsub.f32 %v18355_v30, %v5028_v61  ;;  %v5451_v12 = vmul.f32 1.442695, %v5209_v33  ;;  %v5453_v58 = vmul.f32 1.442695, %v5210_v45  ;;  %6701 = vmatpush.bf16.msrb.mxu1 %v10867_v50  ;;  %v10874_v33 = vld [vmem:[#allocation4 + $0x1a8] sm:$0xff]  ;;  %v10873_v30 = vld [vmem:[#allocation4 + $0x1a0] sm:$0xff] }
 0x7e9   : > { %v6237_v9 = vunpack.c.l.b16 %v5889_v21  ;;  %v6239_v27 = vunpack.c.l.b16 %v5890_v47  ;;  %v5383_v14 = vmul.f32 1.442695, %v5175_v44  ;;  %v5385_v8 = vmul.f32 1.442695, %v5176_v52  ;;  %v10882_v45 = vld [vmem:[#allocation4 + $0x1e8] sm:$0xff]  ;;  %6927 = vmatpush.bf16.msrb.mxu2 %v10874_v33 }
 0x7ea   : > { %v16083_v6 = vpop.eup %11503  ;;  %v6238_v10 = vunpack.c.h.b16 %v5889_v21  ;;  %v6240_v3 = vunpack.c.h.b16 %v5890_v47  ;;  %11507 = vpow2.f32 %v5451_v12  ;;  %v5387_v28 = vmul.f32 1.442695, %v5177_v4  ;;  %6976 = vmatpush.bf16.msrb.mxu3 %v10882_v45 }
 0x7eb   : > { %v16085_v32 = vpop.eup %11505  ;;  %v5041_v61 = vmax.f32 %v16068_v55, %v16071_v16  ;;  %v5873_v39 = vpack.c.bf16 %v5756_v43, %v5755_v11  ;;  %11509 = vpow2.f32 %v5453_v58  ;;  %v5389_v49 = vmul.f32 1.442695, %v5178_v5  ;;  %v10881_v11 = vld [vmem:[#allocation4 + $0x1e0] sm:$0xff]  ;;  %v10858_v58 = vld [vmem:[#allocation4 + $0x128] sm:$0xff] }
 0x7ec   : > { %v5647_v44 = vadd.f32 %v16085_v32, %v16083_v6  ;;  %v5874_v52 = vpack.c.bf16 %v5758_v46, %v5757_v60  ;;  %11511 = vpow2.f32 %v5383_v14  ;;  %v6259_v21 = vpack.c.b16 %v6239_v27, %v6237_v9  ;;  %v10866_v9 = vld [vmem:[#allocation4 + $0x168] sm:$0xff]  ;;  %v10872_v27 = vld [vmem:[#allocation4 + $0x198] sm:$0xff]  ;;  %6653 = vmatpush.bf16.msrb.mxu0 %v10858_v58 }
 0x7ed   : > { %5042 = vmax.xlane.f32.xlu2 %v5041_v61  ;;  %11513 = vpow2.f32 %v5385_v8  ;;  %v6260_v47 = vpack.c.b16 %v6240_v3, %v6238_v10  ;;  %v5565_v20 = vpop.xlane.xlu1 %5564  ;;  %v5963_v5 = vunpack.c.l.b16 %v5873_v39  ;;  %v5964_v46 = vunpack.c.h.b16 %v5873_v39  ;;  %6928 = vmatpush.bf16.msrb.mxu2 %v10873_v30  ;;  %v10880_v10 = vld [vmem:[#allocation4 + $0x1d8] sm:$0xff] }
 0x7ee   : > { %5648 = vadd.xlane.f32.xlu1 %v5647_v44  ;;  %v5568_v4 = vpop.xlane.xlu2 %5567  ;;  %11515 = vpow2.f32 %v5387_v28  ;;  %6410 = vmatmul.bf16.gmra.mxu2 %v6259_v21  ;;  %v5965_v34 = vunpack.c.l.b16 %v5874_v52  ;;  %v5966_v50 = vunpack.c.h.b16 %v5874_v52  ;;  %v10857_v52 = vld [vmem:[#allocation4 + $0x120] sm:$0xff] }
 0x7ef   : > { %v5517_v43 = vpop.xlane.xlu0 %5516  ;;  %11517 = vpow2.f32 %v5389_v49  ;;  %6459 = vmatmul.bf16.gmra.mxu3 %v6260_v47  ;;  %6702 = vmatpush.bf16.msrb.mxu1 %v10866_v9  ;;  %v10865_v21 = vld [vmem:[#allocation4 + $0x160] sm:$0xff]  ;;  %v10871_v47 = vld [vmem:[#allocation4 + $0x190] sm:$0xff] }
 0x7f0   : > { %v16091_v60 = vpop.eup %11507  ;;  %11519 = vrcp.f32 %v5565_v20  ;;  %6977 = vmatpush.bf16.msrb.mxu3 %v10881_v11  ;;  %v5985_v28 = vpack.c.b16 %v5965_v34, %v5963_v5  ;;  %v5986_v33 = vpack.c.b16 %v5966_v50, %v5964_v46  ;;  %v10879_v5 = vld [vmem:[#allocation4 + $0x1d0] sm:$0xff]  ;;  %6654 = vmatpush.bf16.msrb.mxu0 %v10857_v52 }
 0x7f1   : > { %v16093_v12 = vpop.eup %11509  ;;  %11521 = vrcp.f32 %v5568_v4  ;;  %6929 = vmatpush.bf16.msrb.mxu2 %v10872_v27  ;;  %v18357_v27 = vld [vmem:[#allocation90_spill] sm:$0xff] }
 0x7f2   : > { %v16095_v14 = vpop.eup %11511  ;;  %11523 = vrcp.f32 %v5517_v43  ;;  %v5650_v8 = vadd.f32 %v16093_v12, %v16091_v60 }
 0x7f3   : > { %v16099_v3 = vpop.eup %11513  ;;  %6703 = vmatpush.bf16.msrb.mxu1 %v10865_v21  ;;  %v10878_v21 = vld [vmem:[#allocation4 + $0x1c8] sm:$0xff] }
 0x7f4   : > { %v16101_v61 = vpop.eup %11515  ;;  %v5599_v39 = vadd.f32 %v16099_v3, %v16095_v14  ;;  %6978 = vmatpush.bf16.msrb.mxu3 %v10880_v10 }
 0x7f5   : > { %5651 = vadd.xlane.f32.xlu2 %v5650_v8  ;;  %v16105_v45 = vpop.eup %11517  ;;  %6136 = vmatmul.bf16.gmra.mxu0 %v5985_v28  ;;  %v5520_v49 = vpop.xlane.xlu1 %5519 }
 0x7f6   : > { %18356 = vst [vmem:[#allocation123_spill] sm:$0xff] %v16105_v45  ;;  %v5079_v44 = vpop.xlane.xlu2 %5078  ;;  %v11520_v20 = vpop.eup %11519  ;;  %v5602_v4 = vadd.f32 %v16105_v45, %v16101_v61  ;;  %5600 = vadd.xlane.f32.xlu0 %v5599_v39  ;;  %6185 = vmatmul.bf16.gmra.mxu1 %v5986_v33  ;;  %11525 = vrcp.f32 %v5520_v49  ;;  %v18359_v39 = vld [vmem:[#allocation95_spill] sm:$0xff] }
 0x7f7   : > { %v5211_v30 = vsub.f32 %v15787_v57, %v5079_v44  ;;  %v5212_v11 = vsub.f32 %v15790_v51, %v5079_v44  ;;  %v5571_v43 = vpop.xlane.xlu0 %5570  ;;  %v11522_v34 = vpop.eup %11521  ;;  %v5791_v46 = vmul.f32 %v11520_v20, %v15756_v19  ;;  %v5792_v50 = vmul.f32 %v11520_v20, %v15760_v13  ;;  %6930 = vmatpush.bf16.msrb.mxu2 %v10871_v47  ;;  %v18358_v57 = vld [vmem:[#allocation89_spill] sm:$0xff]  ;;  %v10870_v44 = vld [vmem:[#allocation4 + $0x188] sm:$0xff] }
 0x7f8   : > { %v11524_v58 = vpop.eup %11523  ;;  %v5793_v9 = vmul.f32 %v11522_v34, %v15766_v31  ;;  %v5794_v8 = vmul.f32 %v11522_v34, %v18357_v27  ;;  %5603 = vadd.xlane.f32.xlu1 %v5602_v4  ;;  %11527 = vrcp.f32 %v5571_v43  ;;  %6979 = vmatpush.bf16.msrb.mxu3 %v10879_v5  ;;  %v10856_v19 = vld [vmem:[#allocation4 + $0x118] sm:$0xff]  ;;  %v10855_v27 = vld [vmem:[#allocation4 + $0x110] sm:$0xff] }
 0x7f9   : > { %v5455_v10 = vmul.f32 1.442695, %v5211_v30  ;;  %v5457_v28 = vmul.f32 1.442695, %v5212_v11  ;;  %v5759_v51 = vmul.f32 %v11524_v58, %v18358_v57  ;;  %v5760_v33 = vmul.f32 %v11524_v58, %v18359_v39  ;;  %v10864_v13 = vld [vmem:[#allocation4 + $0x158] sm:$0xff]  ;;  %6655 = vmatpush.bf16.msrb.mxu0 %v10856_v19  ;;  %v10877_v57 = vld [vmem:[#allocation4 + $0x1c0] sm:$0xff] }
 0x7fa   : > { %v5891_v49 = vpack.c.bf16 %v5792_v50, %v5791_v46  ;;  %v5892_v52 = vpack.c.bf16 %v5794_v8, %v5793_v9  ;;  %6704 = vmatpush.bf16.msrb.mxu1 %v10864_v13  ;;  %v18360_v11 = vld [vmem:[#allocation96_spill] sm:$0xff]  ;;  %v18361_v43 = vld [vmem:[#allocation93_spill] sm:$0xff] }
 0x7fb   : > { %11529 = vpow2.f32 %v5455_v10  ;;  %6931 = vmatpush.bf16.msrb.mxu2 %v10870_v44  ;;  %v5875_v58 = vpack.c.bf16 %v5760_v33, %v5759_v51  ;;  %v10863_v9 = vld [vmem:[#allocation4 + $0x150] sm:$0xff]  ;;  %v10869_v8 = vld [vmem:[#allocation4 + $0x180] sm:$0xff] }
 0x7fc   : > { %11531 = vpow2.f32 %v5457_v28  ;;  %v6241_v31 = vunpack.c.l.b16 %v5891_v49  ;;  %v6242_v20 = vunpack.c.h.b16 %v5891_v49  ;;  %v11526_v4 = vpop.eup %11525  ;;  %v6243_v47 = vunpack.c.l.b16 %v5892_v52  ;;  %6980 = vmatpush.bf16.msrb.mxu3 %v10878_v21 }
 0x7fd   : > { %v6244_v30 = vunpack.c.h.b16 %v5892_v52  ;;  %v5761_v34 = vmul.f32 %v11526_v4, %v18360_v11  ;;  %v5762_v46 = vmul.f32 %v11526_v4, %v18361_v43  ;;  %v5574_v5 = vpop.xlane.xlu1 %5573  ;;  %6656 = vmatpush.bf16.msrb.mxu0 %v10855_v27  ;;  %v5967_v51 = vunpack.c.l.b16 %v5875_v58  ;;  %v10862_v4 = vld [vmem:[#allocation4 + $0x148] sm:$0xff] }
 0x7fe   : > { %v5523_v50 = vpop.xlane.xlu2 %5522  ;;  %11533 = vrcp.f32 %v5574_v5  ;;  %v6261_v10 = vpack.c.b16 %v6243_v47, %v6241_v31  ;;  %v11528_v39 = vpop.eup %11527  ;;  %6705 = vmatpush.bf16.msrb.mxu1 %v10863_v9  ;;  %v5968_v52 = vunpack.c.h.b16 %v5875_v58  ;;  %v10854_v31 = vld [vmem:[#allocation4 + $0x108] sm:$0xff] }
 0x7ff   : > { %v5526_v28 = vpop.xlane.xlu0 %5525  ;;  %v6262_v49 = vpack.c.b16 %v6244_v30, %v6242_v20  ;;  %11535 = vrcp.f32 %v5523_v50  ;;  %v5876_v19 = vpack.c.bf16 %v5762_v46, %v5761_v34  ;;  %6932 = vmatpush.bf16.msrb.mxu2 %v10869_v8  ;;  %v18364_v47 = vld [vmem:[#allocation94_spill] sm:$0xff]  ;;  %v18365_v30 = vld [vmem:[#allocation97_spill] sm:$0xff]  ;;  %v18367_v9 = vld [vmem:[#allocation147_spill] sm:$0xff] }
 0x800   : > { %6415 = vmatmul.bf16.gmra.mxu2 %v6261_v10  ;;  %11537 = vrcp.f32 %v5526_v28  ;;  %v5795_v20 = vmul.f32 %v11528_v39, %v18364_v47  ;;  %v5796_v11 = vmul.f32 %v11528_v39, %v18365_v30  ;;  %6981 = vmatpush.bf16.msrb.mxu3 %v10877_v57  ;;  %v18366_v58 = vld [vmem:[#allocation146_spill] sm:$0xff]  ;;  %v18368_v47 = vld [vmem:[#allocation100_spill] sm:$0xff] }
 0x801   : > { %v16119_v13 = vpop.eup %11529  ;;  %6464 = vmatmul.bf16.gmra.mxu3 %v6262_v49  ;;  %v5969_v33 = vunpack.c.l.b16 %v5876_v19  ;;  %v5970_v21 = vunpack.c.h.b16 %v5876_v19  ;;  %6657 = vmatpush.bf16.msrb.mxu0 %v10854_v31  ;;  %v10853_v49 = vld [vmem:[#allocation4 + $0x100] sm:$0xff] }
 0x802   : > { %18362 = vst [vmem:[#allocation125_spill] sm:$0xff] %v16119_v13  ;;  %v16121_v44 = vpop.eup %11531  ;;  %6706 = vmatpush.bf16.msrb.mxu1 %v10862_v4  ;;  %v10861_v39 = vld [vmem:[#allocation4 + $0x140] sm:$0xff]  ;;  %v18371_v4 = vld [vmem:[#allocation148_spill] sm:$0xff] }
 0x803   : > { %18363 = vst [vmem:[#allocation126_spill] sm:$0xff] %v16121_v44  ;;  %v5653_v34 = vadd.f32 %v16121_v44, %v16119_v13  ;;  %v5987_v43 = vpack.c.b16 %v5969_v33, %v5967_v51  ;;  %v5988_v46 = vpack.c.b16 %v5970_v21, %v5968_v52  ;;  %v18369_v57 = vld [vmem:[#allocation98_spill] sm:$0xff]  ;;  %v5893_v52 = vpack.c.bf16 %v5796_v11, %v5795_v20  ;;  %v18370_v21 = vld [vmem:[#allocation99_spill] sm:$0xff] }
 0x804   : > { %v11534_v5 = vpop.eup %11533 }
 0x805   : > { %5654 = vadd.xlane.f32.xlu2 %v5653_v34  ;;  %v11536_v50 = vpop.eup %11535  ;;  %v5797_v27 = vmul.f32 %v11534_v5, %v18366_v58  ;;  %v5798_v8 = vmul.f32 %v11534_v5, %v18367_v9  ;;  %v5577_v10 = vpop.xlane.xlu1 %5576  ;;  %6141 = vmatmul.bf16.gmra.mxu0 %v5987_v43  ;;  %v6245_v9 = vunpack.c.l.b16 %v5893_v52  ;;  %v6246_v13 = vunpack.c.h.b16 %v5893_v52 }
 0x806   : > { %v5625_v28 = vpop.xlane.xlu2 %5624  ;;  %v11538_v19 = vpop.eup %11537  ;;  %v5763_v30 = vmul.f32 %v11536_v50, %v18368_v47  ;;  %v5764_v51 = vmul.f32 %v11536_v50, %v18369_v57  ;;  %6190 = vmatmul.bf16.gmra.mxu1 %v5988_v46  ;;  %6658 = vmatpush.bf16.msrb.mxu0 %v10853_v49 }
 0x807   : > { %v5628_v33 = vpop.xlane.xlu0 %5627  ;;  %v5765_v31 = vmul.f32 %v11538_v19, %v18370_v21  ;;  %v5766_v34 = vmul.f32 %v11538_v19, %v18371_v4  ;;  %11539 = vrcp.f32 %v5625_v28  ;;  %v5894_v58 = vpack.c.bf16 %v5798_v8, %v5797_v27  ;;  %6707 = vmatpush.bf16.msrb.mxu1 %v10861_v39 }
 0x808   : > { %11541 = vrcp.f32 %v5628_v33  ;;  %v5877_v44 = vpack.c.bf16 %v5764_v51, %v5763_v30  ;;  %v18372_v30 = vld [vmem:[#allocation149_spill] sm:$0xff] }
 0x809   : > { %v6247_v43 = vunpack.c.l.b16 %v5894_v58  ;;  %v6248_v5 = vunpack.c.h.b16 %v5894_v58  ;;  %v5878_v47 = vpack.c.bf16 %v5766_v34, %v5765_v31  ;;  %11543 = vrcp.f32 %v5577_v10  ;;  %v18373_v10 = vld [vmem:[#allocation151_spill] sm:$0xff]  ;;  %v18374_v31 = vld [vmem:[#allocation150_spill] sm:$0xff]  ;;  %v18375_v34 = vld [vmem:[#allocation152_spill] sm:$0xff] }
 0x80a   : > { %v5971_v8 = vunpack.c.l.b16 %v5877_v44  ;;  %v5972_v39 = vunpack.c.h.b16 %v5877_v44 }
 0x80b   : > { %v6263_v45 = vpack.c.b16 %v6247_v43, %v6245_v9  ;;  %v6264_v20 = vpack.c.b16 %v6248_v5, %v6246_v13  ;;  %v5973_v49 = vunpack.c.l.b16 %v5878_v47  ;;  %v5974_v33 = vunpack.c.h.b16 %v5878_v47  ;;  %v18376_v43 = vld [vmem:[#allocation105_spill] sm:$0xff] }
 0x80d   : > { %v11540_v50 = vpop.eup %11539  ;;  %v5031_v11 = vpop.xlane.xlu1 %5030  ;;  %v5989_v47 = vpack.c.b16 %v5973_v49, %v5971_v8  ;;  %v18377_v8 = vld [vmem:[#allocation102_spill] sm:$0xff] }
 0x80e   : > { %v5580_v46 = vpop.xlane.xlu2 %5579  ;;  %v11542_v57 = vpop.eup %11541  ;;  %v5179_v27 = vsub.f32 %v15855_v54, %v5031_v11  ;;  %v5831_v51 = vmul.f32 %v11540_v50, %v18372_v30  ;;  %v5180_v21 = vsub.f32 %v18373_v10, %v5031_v11  ;;  %v5832_v4 = vmul.f32 %v11540_v50, %v18374_v31 }
 0x80f   : > { %11545 = vrcp.f32 %v5580_v46  ;;  %v5082_v19 = vpop.xlane.xlu0 %5081  ;;  %v5833_v58 = vmul.f32 %v11542_v57, %v18375_v34  ;;  %v5834_v54 = vmul.f32 %v11542_v57, %v18376_v43  ;;  %v11544_v44 = vpop.eup %11543 }
 0x810   : > { %v5213_v28 = vsub.f32 %v15848_v26, %v5082_v19  ;;  %6420 = vmatmul.bf16.gmra.mxu2 %v6263_v45  ;;  %v5214_v52 = vsub.f32 %v15853_v22, %v5082_v19  ;;  %v5391_v13 = vmul.f32 1.442695, %v5179_v27  ;;  %v5393_v9 = vmul.f32 1.442695, %v5180_v21 }
 0x811   : > { %6469 = vmatmul.bf16.gmra.mxu3 %v6264_v20  ;;  %v5990_v22 = vpack.c.b16 %v5974_v33, %v5972_v39  ;;  %v5911_v46 = vpack.c.bf16 %v5832_v4, %v5831_v51  ;;  %v5912_v11 = vpack.c.bf16 %v5834_v54, %v5833_v58  ;;  %v5799_v49 = vmul.f32 %v11544_v44, %v18377_v8 }
 0x812   : > { %v5459_v5 = vmul.f32 1.442695, %v5213_v28  ;;  %v5461_v26 = vmul.f32 1.442695, %v5214_v52  ;;  %11547 = vpow2.f32 %v5391_v13  ;;  %v18378_v52 = vld [vmem:[#allocation103_spill] sm:$0xff] }
 0x813   : > { %v5800_v10 = vmul.f32 %v11544_v44, %v18378_v52  ;;  %v6768_v43 = vunpack.c.h.b16 %v5912_v11 }
 0x814   : > { %11549 = vpow2.f32 %v5459_v5 }
 0x815   : > { %v11546_v45 = vpop.eup %11545  ;;  %11551 = vpow2.f32 %v5461_v26  ;;  %6146 = vmatmul.bf16.gmra.mxu0 %v5989_v47  ;;  %v5085_v50 = vpop.xlane.xlu1 %5084 }
 0x816   : > { %11553 = vpow2.f32 %v5393_v9  ;;  %v5034_v19 = vpop.xlane.xlu2 %5033  ;;  %6195 = vmatmul.bf16.gmra.mxu1 %v5990_v22  ;;  %v5215_v20 = vsub.f32 %v15880_v40, %v5085_v50  ;;  %v5216_v57 = vsub.f32 %v15882_v36, %v5085_v50  ;;  %v5801_v39 = vmul.f32 %v11546_v45, %v15870_v63 }
 0x817   : > { %v5583_v27 = vpop.xlane.xlu0 %5582  ;;  %v5181_v28 = vsub.f32 %v15891_v37, %v5034_v19  ;;  %v5182_v30 = vsub.f32 %v15889_v41, %v5034_v19  ;;  %v5802_v33 = vmul.f32 %v11546_v45, %v15876_v59  ;;  %v6765_v37 = vunpack.c.l.b16 %v5911_v46 }
 0x818   : > { %v16148_v51 = vpop.eup %11547  ;;  %v5463_v21 = vmul.f32 1.442695, %v5215_v20  ;;  %v5465_v13 = vmul.f32 1.442695, %v5216_v57  ;;  %v6386_v40 = vpop.f32.mrf.mxu2  ;;  %11555 = vrcp.f32 %v5583_v27  ;;  %v6766_v63 = vunpack.c.h.b16 %v5911_v46 }
 0x819   : > { %v5395_v31 = vmul.f32 1.442695, %v5181_v28  ;;  %v6435_v4 = vpop.f32.mrf.mxu3  ;;  %v5397_v41 = vmul.f32 1.442695, %v5182_v30  ;;  %v6767_v59 = vunpack.c.l.b16 %v5912_v11  ;;  %v5896_v44 = vpack.c.bf16 %v5802_v33, %v5801_v39 }
 0x81a   : > { %v16151_v36 = vpop.eup %11549  ;;  %v16153_v34 = vadd.f32 %v6435_v4, %v6386_v40  ;;  %11557 = vpow2.f32 %v5463_v21  ;;  %v6112_v54 = vpop.f32.mrf.mxu0  ;;  %v5895_v22 = vpack.c.bf16 %v5800_v10, %v5799_v49  ;;  %v6798_v19 = vpack.c.b16 %v6768_v43, %v6766_v63 }
 0x81b   : > { %v16155_v58 = vpop.eup %11551  ;;  %v6161_v5 = vpop.f32.mrf.mxu1  ;;  %11559 = vpow2.f32 %v5465_v13  ;;  %v6797_v50 = vpack.c.b16 %v6767_v59, %v6765_v37  ;;  %v6493_v57 = vunpack.c.l.b16 %v5896_v44  ;;  %v6494_v39 = vunpack.c.h.b16 %v5896_v44 }
 0x81c   : > { %v16157_v26 = vpop.eup %11553  ;;  %v16159_v9 = vadd.f32 %v6161_v5, %v6112_v54  ;;  %v5656_v47 = vadd.f32 %v16155_v58, %v16151_v36  ;;  %11561 = vpow2.f32 %v5395_v31  ;;  %v6491_v33 = vunpack.c.l.b16 %v5895_v22 }
 0x81d   : > { %v5605_v45 = vadd.f32 %v16157_v26, %v16148_v51  ;;  %11563 = vpow2.f32 %v5397_v41  ;;  %v5631_v46 = vpop.xlane.xlu1 %5630  ;;  %v6492_v13 = vunpack.c.h.b16 %v5895_v22 }
 0x81e   : > { %5657 = vadd.xlane.f32.xlu0 %v5656_v47  ;;  %v5634_v11 = vpop.xlane.xlu2 %5633  ;;  %11565 = vrcp.f32 %v5631_v46  ;;  %v11556_v20 = vpop.eup %11555  ;;  %v6523_v4 = vpack.c.b16 %v6493_v57, %v6491_v33 }
 0x81f   : > { %5606 = vadd.xlane.f32.xlu1 %v5605_v45  ;;  %v5037_v27 = vpop.xlane.xlu0 %5036  ;;  %11567 = vrcp.f32 %v5634_v11  ;;  %v6524_v63 = vpack.c.b16 %v6494_v39, %v6492_v13 }
 0x820   : > { %v5183_v28 = vsub.f32 %v15908_v15, %v5037_v27  ;;  %v5184_v30 = vsub.f32 %v15906_v48, %v5037_v27  ;;  %v16167_v8 = vpop.eup %11557  ;;  %6933 = vmatmul.bf16.vlgmr.msrb.gmra.mxu2 %v6797_v50  ;;  %v16191_v27 = vpop.f32.mrf.mxu2 }
 0x821   : > { %v16169_v49 = vpop.eup %11559  ;;  %6982 = vmatmul.bf16.vlgmr.msrb.gmra.mxu3 %v6798_v19 }
 0x822   : > { %v5399_v52 = vmul.f32 1.442695, %v5183_v28  ;;  %v5401_v10 = vmul.f32 1.442695, %v5184_v30  ;;  %v16171_v21 = vpop.eup %11561  ;;  %v16173_v31 = vpop.f32.mrf.mxu0  ;;  %v5659_v48 = vadd.f32 %v16169_v49, %v16167_v8 }
 0x823   : > { %v16175_v40 = vpop.f32.mrf.mxu1  ;;  %v16179_v15 = vpop.eup %11563 }
 0x824   : > { %11569 = vpow2.f32 %v5399_v52  ;;  %v11566_v37 = vpop.eup %11565  ;;  %v5608_v41 = vadd.f32 %v16179_v15, %v16171_v21 }
 0x825   : > { %11571 = vpow2.f32 %v5401_v10  ;;  %v11568_v59 = vpop.eup %11567  ;;  %v5835_v43 = vmul.f32 %v11566_v37, %v15904_v24  ;;  %v5836_v54 = vmul.f32 %v11566_v37, %v15910_v25  ;;  %6659 = vmatmul.bf16.vlgmr.msrb.gmra.mxu0 %v6523_v4  ;;  %v5586_v5 = vpop.xlane.xlu1 %5585  ;;  %v5803_v24 = vmul.f32 %v11556_v20, %v15894_v42  ;;  %v18379_v25 = vld [vmem:[#allocation101_spill] sm:$0xff] }
 0x826   : > { %5660 = vadd.xlane.f32.xlu0 %v5659_v48  ;;  %v5088_v44 = vpop.xlane.xlu2 %5087  ;;  %v5837_v47 = vmul.f32 %v11568_v59, %v15916_v0  ;;  %v5838_v45 = vmul.f32 %v11568_v59, %v15920_v7  ;;  %5609 = vadd.xlane.f32.xlu2 %v5608_v41  ;;  %11573 = vrcp.f32 %v5586_v5  ;;  %v5804_v19 = vmul.f32 %v11556_v20, %v18379_v25  ;;  %v16195_v7 = vpop.f32.mrf.mxu3 }
 0x827   : > { %6708 = vmatmul.bf16.vlgmr.msrb.gmra.mxu1 %v6524_v63  ;;  %v5217_v22 = vsub.f32 %v15928_v2, %v5088_v44  ;;  %v5637_v46 = vpop.xlane.xlu0 %5636  ;;  %v5218_v11 = vsub.f32 %v15930_v17, %v5088_v44  ;;  %v5913_v50 = vpack.c.bf16 %v5836_v54, %v5835_v43 }
 0x828   : > { %v5914_v28 = vpack.c.bf16 %v5838_v45, %v5837_v47  ;;  %11575 = vrcp.f32 %v5637_v46  ;;  %v5897_v37 = vpack.c.bf16 %v5804_v19, %v5803_v24 }
 0x829   : > { %v5467_v57 = vmul.f32 1.442695, %v5217_v22  ;;  %v5469_v30 = vmul.f32 1.442695, %v5218_v11  ;;  %v6769_v39 = vunpack.c.l.b16 %v5913_v50  ;;  %v6770_v2 = vunpack.c.h.b16 %v5913_v50 }
 0x82a   : > { %v16193_v0 = vpop.eup %11569  ;;  %v6771_v17 = vunpack.c.l.b16 %v5914_v28  ;;  %v6772_v52 = vunpack.c.h.b16 %v5914_v28  ;;  %v6495_v45 = vunpack.c.l.b16 %v5897_v37 }
 0x82b   : > { %v16197_v33 = vpop.eup %11571  ;;  %11577 = vpow2.f32 %v5467_v57 }
 0x82c   : > { %11579 = vpow2.f32 %v5469_v30  ;;  %v6117_v42 = vpop.f32.mrf.mxu0  ;;  %v6166_v20 = vpop.f32.mrf.mxu1  ;;  %v5611_v10 = vadd.f32 %v16197_v33, %v16193_v0  ;;  %v6799_v4 = vpack.c.b16 %v6771_v17, %v6769_v39  ;;  %v6800_v59 = vpack.c.b16 %v6772_v52, %v6770_v2 }
 0x82d   : > { %v11574_v13 = vpop.eup %11573  ;;  %v16201_v48 = vadd.f32 %v6166_v20, %v6117_v42  ;;  %v18380_v42 = vld [vmem:[#allocation108_spill] sm:$0xff] }
 0x82e   : > { %v5805_v41 = vmul.f32 %v11574_v13, %v15932_v38  ;;  %v5806_v63 = vmul.f32 %v11574_v13, %v15938_v1  ;;  %5612 = vadd.xlane.f32.xlu2 %v5611_v10  ;;  %v11576_v43 = vpop.eup %11575  ;;  %v6496_v38 = vunpack.c.h.b16 %v5897_v37 }
 0x82f   : > { %v5839_v39 = vmul.f32 %v11576_v43, %v15940_v62  ;;  %v5840_v2 = vmul.f32 %v11576_v43, %v15942_v53 }
 0x830   : > { %v5898_v54 = vpack.c.bf16 %v5806_v63, %v5805_v41  ;;  %6938 = vmatmul.bf16.gmra.mxu2 %v6799_v4  ;;  %v6391_v47 = vpop.f32.mrf.mxu2  ;;  %v18381_v41 = vld [vmem:[#allocation106_spill] sm:$0xff] }
 0x831   : > { %v16205_v5 = vpop.eup %11577  ;;  %v5640_v44 = vpop.xlane.xlu1 %5639  ;;  %6987 = vmatmul.bf16.gmra.mxu3 %v6800_v59  ;;  %v5915_v4 = vpack.c.bf16 %v5840_v2, %v5839_v39  ;;  %v18382_v59 = vld [vmem:[#allocation109_spill] sm:$0xff] }
 0x832   : > { %v16207_v22 = vpop.eup %11579  ;;  %11581 = vrcp.f32 %v5640_v44  ;;  %v5589_v46 = vpop.xlane.xlu2 %5588  ;;  %v6497_v50 = vunpack.c.l.b16 %v5898_v54  ;;  %v6498_v24 = vunpack.c.h.b16 %v5898_v54 }
 0x833   : > { %v6440_v11 = vpop.f32.mrf.mxu3  ;;  %v5662_v25 = vadd.f32 %v16207_v22, %v16205_v5  ;;  %11583 = vrcp.f32 %v5589_v46  ;;  %v6773_v46 = vunpack.c.l.b16 %v5915_v4 }
 0x834   : > { %v16209_v1 = vadd.f32 %v6440_v11, %v6391_v47  ;;  %v16213_v19 = vpop.f32.mrf.mxu0  ;;  %v16215_v57 = vpop.f32.mrf.mxu1  ;;  %v6525_v28 = vpack.c.b16 %v6497_v50, %v6495_v45  ;;  %v6526_v30 = vpack.c.b16 %v6498_v24, %v6496_v38  ;;  %v6774_v50 = vunpack.c.h.b16 %v5915_v4  ;;  %v18383_v24 = vld [vmem:[#allocation104_spill] sm:$0xff] }
 0x835   : > { %5663 = vadd.xlane.f32.xlu1 %v5662_v25 }
 0x836   : > { %6664 = vmatmul.bf16.gmra.mxu0 %v6525_v28 }
 0x837   : > { %6713 = vmatmul.bf16.gmra.mxu1 %v6526_v30  ;;  %v18385_v30 = vld [vmem:[#allocation107_spill] sm:$0xff] }
 0x838   : > { %v11582_v17 = vpop.eup %11581  ;;  %v16221_v13 = vpop.f32.mrf.mxu2 }
 0x839   : > { %v5841_v52 = vmul.f32 %v11582_v17, %v15968_v23  ;;  %v5842_v20 = vmul.f32 %v11582_v17, %v18380_v42  ;;  %v5040_v10 = vpop.xlane.xlu1 %5039  ;;  %v5592_v37 = vpop.xlane.xlu0 %5591 }
 0x83a   : > { %v5185_v63 = vsub.f32 %v18381_v41, %v5040_v10  ;;  %v5186_v62 = vsub.f32 %v18382_v59, %v5040_v10  ;;  %v11584_v54 = vpop.eup %11583  ;;  %11585 = vrcp.f32 %v5592_v37  ;;  %v5643_v2 = vpop.xlane.xlu2 %5642  ;;  %v18386_v37 = vld [vmem:[#allocation111_spill] sm:$0xff]  ;;  %v18387_v41 = vld [vmem:[#allocation112_spill] sm:$0xff] }
 0x83b   : > { %v16225_v53 = vpop.f32.mrf.mxu3  ;;  %v5916_v43 = vpack.c.bf16 %v5842_v20, %v5841_v52  ;;  %v5807_v25 = vmul.f32 %v11584_v54, %v18383_v24  ;;  %v5808_v39 = vmul.f32 %v11584_v54, %v18385_v30 }
 0x83c   : > { %v5403_v44 = vmul.f32 1.442695, %v5185_v63  ;;  %v5405_v47 = vmul.f32 1.442695, %v5186_v62  ;;  %v6122_v45 = vpop.f32.mrf.mxu0 }
 0x83d   : > { %v6171_v23 = vpop.f32.mrf.mxu1  ;;  %v6775_v11 = vunpack.c.l.b16 %v5916_v43  ;;  %v6776_v38 = vunpack.c.h.b16 %v5916_v43  ;;  %v5899_v62 = vpack.c.bf16 %v5808_v39, %v5807_v25 }
 0x83e   : > { %11587 = vpow2.f32 %v5403_v44  ;;  %v16228_v28 = vadd.f32 %v6171_v23, %v6122_v45 }
 0x83f   : > { %11589 = vpow2.f32 %v5405_v47  ;;  %v6801_v17 = vpack.c.b16 %v6775_v11, %v6773_v46  ;;  %v6802_v52 = vpack.c.b16 %v6776_v38, %v6774_v50  ;;  %v6500_v23 = vunpack.c.h.b16 %v5899_v62 }
 0x840   : > { %18384 = vst [vmem:[#allocation127_spill] sm:$0xff] %v16228_v28  ;;  %v6396_v20 = vpop.f32.mrf.mxu2  ;;  %v11586_v10 = vpop.eup %11585  ;;  %11591 = vrcp.f32 %v5643_v2  ;;  %v6499_v24 = vunpack.c.l.b16 %v5899_v62 }
 0x841   : > { %6943 = vmatmul.bf16.gmra.mxu2 %v6801_v17  ;;  %v5595_v42 = vpop.xlane.xlu1 %5594  ;;  %6992 = vmatmul.bf16.gmra.mxu3 %v6802_v52  ;;  %v5809_v4 = vmul.f32 %v11586_v10, %v18386_v37  ;;  %v5810_v63 = vmul.f32 %v11586_v10, %v18387_v41  ;;  %v18390_v17 = vld [vmem:[#allocation116_spill] sm:$0xff]  ;;  %v18392_v37 = vld [vmem:[#allocation110_spill] sm:$0xff]  ;;  %v18393_v41 = vld [vmem:[#allocation113_spill] sm:$0xff] }
 0x843   : > { %v6445_v59 = vpop.f32.mrf.mxu3  ;;  %v5900_v47 = vpack.c.bf16 %v5810_v63, %v5809_v4 }
 0x844   : > { %v16233_v43 = vpop.eup %11587  ;;  %v16235_v44 = vadd.f32 %v6445_v59, %v6396_v20  ;;  %v18391_v20 = vld [vmem:[#allocation117_spill] sm:$0xff]  ;;  %v16247_v59 = vpop.f32.mrf.mxu0 }
 0x845   : > { %v16237_v54 = vpop.eup %11589  ;;  %v6502_v46 = vunpack.c.h.b16 %v5900_v47  ;;  %v6501_v11 = vunpack.c.l.b16 %v5900_v47  ;;  %v16251_v62 = vpop.f32.mrf.mxu1 }
 0x846   : > { %18388 = vst [vmem:[#allocation129_spill] sm:$0xff] %v16235_v44  ;;  %v5614_v45 = vadd.f32 %v16237_v54, %v16233_v43  ;;  %v11592_v50 = vpop.eup %11591 }
 0x847   : > { %v6528_v30 = vpack.c.b16 %v6502_v46, %v6500_v23  ;;  %v6527_v2 = vpack.c.b16 %v6501_v11, %v6499_v24  ;;  %v5843_v4 = vmul.f32 %v11592_v50, %v18392_v37  ;;  %v5844_v63 = vmul.f32 %v11592_v50, %v18393_v41  ;;  %v18397_v50 = vld [vmem:[#allocation118_spill] sm:$0xff]  ;;  %v18398_v41 = vld [vmem:[#allocation119_spill] sm:$0xff] }
 0x848   : > { %5615 = vadd.xlane.f32.xlu0 %v5614_v45  ;;  %v5646_v38 = vpop.xlane.xlu0 %5645  ;;  %v16241_v39 = vpop.f32.mrf.mxu2 }
 0x849   : > { %11593 = vrcp.f32 %v5646_v38  ;;  %v5094_v25 = vpop.xlane.xlu1 %5093  ;;  %18389 = vst [vmem:[#allocation121_spill] sm:$0xff] %v16241_v39  ;;  %6718 = vmatmul.bf16.gmra.mxu1 %v6528_v30  ;;  %6669 = vmatmul.bf16.gmra.mxu0 %v6527_v2  ;;  %v5917_v11 = vpack.c.bf16 %v5844_v63, %v5843_v4  ;;  %v18395_v38 = vld [vmem:[#allocation120_spill] sm:$0xff] }
 0x84a   : > { %v5221_v52 = vsub.f32 %v18390_v17, %v5094_v25  ;;  %v5222_v10 = vsub.f32 %v18391_v20, %v5094_v25  ;;  %v18396_v25 = vld [vmem:[#allocation124_spill] sm:$0xff] }
 0x84b   : > { %v16249_v47 = vpop.f32.mrf.mxu3 }
 0x84c   : > { %18394 = vst [vmem:[#allocation131_spill] sm:$0xff] %v16249_v47  ;;  %v5475_v45 = vmul.f32 1.442695, %v5221_v52  ;;  %v5477_v23 = vmul.f32 1.442695, %v5222_v10 }
 0x84e   : > { %11595 = vpow2.f32 %v5475_v45  ;;  %v6777_v45 = vunpack.c.l.b16 %v5917_v11 }
 0x84f   : > { %v11594_v46 = vpop.eup %11593  ;;  %11597 = vpow2.f32 %v5477_v23 }
 0x850   : > { %v5845_v24 = vmul.f32 %v11594_v46, %v18395_v38  ;;  %v5846_v17 = vmul.f32 %v11594_v46, %v18396_v25  ;;  %v5091_v20 = vpop.xlane.xlu0 %5090  ;;  %11599 = vrcp.f32 %v5595_v42  ;;  %v6778_v46 = vunpack.c.h.b16 %v5917_v11 }
 0x851   : > { %v5219_v37 = vsub.f32 %v18397_v50, %v5091_v20  ;;  %v5220_v30 = vsub.f32 %v18398_v41, %v5091_v20  ;;  %v6401_v44 = vpop.f32.mrf.mxu2 }
 0x852   : > { %v5918_v28 = vpack.c.bf16 %v5846_v17, %v5845_v24  ;;  %v6127_v10 = vpop.f32.mrf.mxu0 }
 0x853   : > { %v5471_v47 = vmul.f32 1.442695, %v5219_v37  ;;  %v5473_v2 = vmul.f32 1.442695, %v5220_v30  ;;  %v6450_v52 = vpop.f32.mrf.mxu3  ;;  %v6176_v63 = vpop.f32.mrf.mxu1  ;;  %v18401_v30 = vld [vmem:[#allocation114_spill] sm:$0xff] }
 0x854   : > { %v16257_v39 = vpop.eup %11595  ;;  %v16259_v4 = vadd.f32 %v6450_v52, %v6401_v44  ;;  %v6779_v23 = vunpack.c.l.b16 %v5918_v28  ;;  %v6780_v38 = vunpack.c.h.b16 %v5918_v28  ;;  %v16263_v20 = vadd.f32 %v6176_v63, %v6127_v10  ;;  %v18402_v52 = vld [vmem:[#allocation115_spill] sm:$0xff] }
 0x855   : > { %v16261_v25 = vpop.eup %11597  ;;  %11601 = vpow2.f32 %v5471_v47 }
 0x856   : > { %18399 = vst [vmem:[#allocation122_spill] sm:$0xff] %v16259_v4  ;;  %11603 = vpow2.f32 %v5473_v2  ;;  %v5668_v42 = vadd.f32 %v16261_v25, %v16257_v39  ;;  %v6803_v24 = vpack.c.b16 %v6779_v23, %v6777_v45  ;;  %v6804_v17 = vpack.c.b16 %v6780_v38, %v6778_v46  ;;  %v11600_v50 = vpop.eup %11599 }
 0x857   : > { %18400 = vst [vmem:[#allocation128_spill] sm:$0xff] %v16263_v20  ;;  %v5598_v37 = vpop.xlane.xlu2 %5597  ;;  %v5811_v2 = vmul.f32 %v11600_v50, %v18401_v30  ;;  %v5812_v10 = vmul.f32 %v11600_v50, %v18402_v52  ;;  %v10886_v20 = vld [vmem:[#allocation13 + $0x8] sm:$0xff] }
 0x858   : > { %5669 = vadd.xlane.f32.xlu2 %v5668_v42  ;;  %6948 = vmatmul.bf16.gmra.mxu2 %v6803_v24  ;;  %v5046_v44 = vpop.xlane.xlu0 %5045  ;;  %11605 = vrcp.f32 %v5598_v37 }
 0x859   : > { %6997 = vmatmul.bf16.gmra.mxu3 %v6804_v17  ;;  %v5189_v28 = vsub.f32 %v16049_v35, %v5046_v44  ;;  %v5190_v11 = vsub.f32 %v16051_v29, %v5046_v44  ;;  %v16269_v47 = vpop.f32.mrf.mxu2  ;;  %v5901_v24 = vpack.c.bf16 %v5812_v10, %v5811_v2  ;;  %v10890_v44 = vld [vmem:[#allocation13 + $0x28] sm:$0xff]  ;;  %7174 = vmatpush.bf16.msra.mxu1 %v10886_v20 }
 0x85a   : > { %v16277_v46 = vpop.f32.mrf.mxu0  ;;  %7271 = vmatpush.bf16.msra.mxu2 %v10890_v44 }
 0x85b   : > { %v16271_v41 = vpop.eup %11601  ;;  %v5411_v45 = vmul.f32 1.442695, %v5189_v28  ;;  %v5413_v63 = vmul.f32 1.442695, %v5190_v11  ;;  %v16275_v23 = vpop.f32.mrf.mxu3  ;;  %18404 = vst [vmem:[#allocation132_spill] sm:$0xff] %v16277_v46  ;;  %v10892_v28 = vld [vmem:[#allocation13 + $0x38] sm:$0xff] }
 0x85c   : > { %18403 = vst [vmem:[#allocation130_spill] sm:$0xff] %v16275_v23  ;;  %v16279_v38 = vpop.eup %11603  ;;  %v16281_v42 = vpop.f32.mrf.mxu1  ;;  %v10888_v11 = vld [vmem:[#allocation13 + $0x18] sm:$0xff]  ;;  %7384 = vmatpush.bf16.msra.mxu3 %v10892_v28 }
 0x85d   : > { %18405 = vst [vmem:[#allocation133_spill] sm:$0xff] %v16281_v42  ;;  %11607 = vpow2.f32 %v5411_v45  ;;  %v5665_v35 = vadd.f32 %v16279_v38, %v16271_v41  ;;  %7089 = vmatpush.bf16.msra.mxu0 %v10888_v11 }
 0x85e   : > { %11609 = vpow2.f32 %v5413_v63  ;;  %v11606_v29 = vpop.eup %11605 }
 0x85f   : > { %5666 = vadd.xlane.f32.xlu1 %v5665_v35  ;;  %v5813_v17 = vmul.f32 %v11606_v29, %v16058_v56  ;;  %v5814_v50 = vmul.f32 %v11606_v29, %v16063_v18  ;;  %v6504_v29 = vunpack.c.h.b16 %v5901_v24 }
 0x860   : > { %v5043_v37 = vpop.xlane.xlu2 %5042 }
 0x861   : > { %v5649_v30 = vpop.xlane.xlu1 %5648  ;;  %v5187_v52 = vsub.f32 %v16068_v55, %v5043_v37  ;;  %v5188_v45 = vsub.f32 %v16071_v16, %v5043_v37  ;;  %v6406_v4 = vpop.f32.mrf.mxu2  ;;  %v5902_v63 = vpack.c.bf16 %v5814_v50, %v5813_v17 }
 0x862   : > { %11611 = vrcp.f32 %v5649_v30  ;;  %v6132_v35 = vpop.f32.mrf.mxu0  ;;  %v6503_v30 = vunpack.c.l.b16 %v5901_v24 }
 0x863   : > { %v16289_v2 = vpop.eup %11607  ;;  %v5407_v56 = vmul.f32 1.442695, %v5187_v52  ;;  %v5409_v10 = vmul.f32 1.442695, %v5188_v45  ;;  %v6455_v18 = vpop.f32.mrf.mxu3  ;;  %v6506_v37 = vunpack.c.h.b16 %v5902_v63  ;;  %v6505_v46 = vunpack.c.l.b16 %v5902_v63 }
 0x864   : > { %v16291_v42 = vpop.eup %11609  ;;  %v16293_v55 = vadd.f32 %v6455_v18, %v6406_v4  ;;  %v6181_v16 = vpop.f32.mrf.mxu1 }
 0x865   : > { %11613 = vpow2.f32 %v5407_v56  ;;  %v16295_v17 = vadd.f32 %v6181_v16, %v6132_v35  ;;  %v5620_v50 = vadd.f32 %v16291_v42, %v16289_v2  ;;  %v6530_v44 = vpack.c.b16 %v6506_v37, %v6504_v29 }
 0x866   : > { %18406 = vst [vmem:[#allocation136_spill] sm:$0xff] %v16293_v55  ;;  %11615 = vpow2.f32 %v5409_v10  ;;  %v6529_v28 = vpack.c.b16 %v6505_v46, %v6503_v30 }
 0x867   : > { %18407 = vst [vmem:[#allocation137_spill] sm:$0xff] %v16295_v17  ;;  %5621 = vadd.xlane.f32.xlu1 %v5620_v50  ;;  %6723 = vmatmul.bf16.gmra.mxu1 %v6530_v44 }
 0x868   : > { %v11612_v11 = vpop.eup %11611  ;;  %v5652_v20 = vpop.xlane.xlu2 %5651  ;;  %6674 = vmatmul.bf16.gmra.mxu0 %v6529_v28 }
 0x869   : > { %11617 = vrcp.f32 %v5652_v20  ;;  %v5601_v4 = vpop.xlane.xlu0 %5600  ;;  %v16299_v52 = vpop.f32.mrf.mxu2  ;;  %v5847_v45 = vmul.f32 %v11612_v11, %v16083_v6  ;;  %v5848_v63 = vmul.f32 %v11612_v11, %v16085_v32 }
 0x86a   : > { %18408 = vst [vmem:[#allocation134_spill] sm:$0xff] %v16299_v52  ;;  %11619 = vrcp.f32 %v5601_v4  ;;  %v16307_v10 = vpop.f32.mrf.mxu0 }
 0x86b   : > { %v16301_v24 = vpop.eup %11613  ;;  %v16305_v56 = vpop.f32.mrf.mxu3  ;;  %18410 = vst [vmem:[#allocation141_spill] sm:$0xff] %v16307_v10  ;;  %v5919_v37 = vpack.c.bf16 %v5848_v63, %v5847_v45 }
 0x86c   : > { %18409 = vst [vmem:[#allocation135_spill] sm:$0xff] %v16305_v56  ;;  %v16309_v46 = vpop.eup %11615  ;;  %v5604_v18 = vpop.xlane.xlu1 %5603 }
 0x86d   : > { %v16311_v35 = vpop.f32.mrf.mxu1  ;;  %11621 = vrcp.f32 %v5604_v18  ;;  %v5617_v29 = vadd.f32 %v16309_v46, %v16301_v24  ;;  %v6781_v17 = vunpack.c.l.b16 %v5919_v37 }
 0x86e   : > { %18411 = vst [vmem:[#allocation138_spill] sm:$0xff] %v16311_v35  ;;  %v18412_v35 = vld [vmem:[#allocation123_spill] sm:$0xff] }
 0x86f   : > { %v11618_v16 = vpop.eup %11617  ;;  %5618 = vadd.xlane.f32.xlu0 %v5617_v29 }
 0x870   : > { %v5849_v6 = vmul.f32 %v11618_v16, %v16091_v60  ;;  %v5850_v32 = vmul.f32 %v11618_v16, %v16093_v12  ;;  %v11620_v30 = vpop.eup %11619  ;;  %v6782_v16 = vunpack.c.h.b16 %v5919_v37 }
 0x871   : > { %v5815_v50 = vmul.f32 %v11620_v30, %v16095_v14  ;;  %v5816_v44 = vmul.f32 %v11620_v30, %v16099_v3  ;;  %v6411_v28 = vpop.f32.mrf.mxu2 }
 0x872   : > { %v5920_v11 = vpack.c.bf16 %v5850_v32, %v5849_v6  ;;  %v6137_v18 = vpop.f32.mrf.mxu0 }
 0x873   : > { %v11622_v20 = vpop.eup %11621  ;;  %v6460_v4 = vpop.f32.mrf.mxu3  ;;  %v5903_v10 = vpack.c.bf16 %v5816_v44, %v5815_v50 }
 0x874   : > { %v5817_v55 = vmul.f32 %v11622_v20, %v16101_v61  ;;  %v5818_v29 = vmul.f32 %v11622_v20, %v18412_v35  ;;  %v16321_v45 = vadd.f32 %v6460_v4, %v6411_v28  ;;  %v6783_v63 = vunpack.c.l.b16 %v5920_v11 }
 0x875   : > { %v6186_v60 = vpop.f32.mrf.mxu1  ;;  %v6784_v14 = vunpack.c.h.b16 %v5920_v11  ;;  %v6507_v32 = vunpack.c.l.b16 %v5903_v10  ;;  %v6508_v56 = vunpack.c.h.b16 %v5903_v10 }
 0x876   : > { %v16323_v12 = vadd.f32 %v6186_v60, %v6137_v18  ;;  %v6805_v3 = vpack.c.b16 %v6783_v63, %v6781_v17  ;;  %v5904_v30 = vpack.c.bf16 %v5818_v29, %v5817_v55 }
 0x877   : > { %v6806_v6 = vpack.c.b16 %v6784_v14, %v6782_v16 }
 0x878   : > { %6953 = vmatmul.bf16.gmra.mxu2 %v6805_v3  ;;  %v6509_v52 = vunpack.c.l.b16 %v5904_v30  ;;  %v6510_v23 = vunpack.c.h.b16 %v5904_v30 }
 0x879   : > { %7002 = vmatmul.bf16.gmra.mxu3 %v6806_v6  ;;  %v16325_v28 = vpop.f32.mrf.mxu2  ;;  %v18419_v6 = vld [vmem:[#allocation125_spill] sm:$0xff] }
 0x87a   : > { %v6531_v61 = vpack.c.b16 %v6509_v52, %v6507_v32  ;;  %v6532_v35 = vpack.c.b16 %v6510_v23, %v6508_v56  ;;  %v16329_v4 = vpop.f32.mrf.mxu0  ;;  %v5655_v52 = vpop.xlane.xlu2 %5654 }
 0x87b   : > { %v16327_v20 = vpop.f32.mrf.mxu3  ;;  %11623 = vrcp.f32 %v5655_v52 }
 0x87c   : > { %6679 = vmatmul.bf16.gmra.mxu0 %v6531_v61  ;;  %6728 = vmatmul.bf16.gmra.mxu1 %v6532_v35  ;;  %v18420_v61 = vld [vmem:[#allocation126_spill] sm:$0xff] }
 0x87d   : > { %v16331_v37 = vpop.f32.mrf.mxu1 }
 0x881   : > { %v11624_v63 = vpop.eup %11623 }
 0x882   : > { %v6142_v55 = vpop.f32.mrf.mxu0  ;;  %v5851_v32 = vmul.f32 %v11624_v63, %v18419_v6  ;;  %v5852_v35 = vmul.f32 %v11624_v63, %v18420_v61 }
 0x883   : > { %v6416_v17 = vpop.f32.mrf.mxu2 }
 0x884   : > { %v6465_v10 = vpop.f32.mrf.mxu3 }
 0x885   : > { %v6191_v50 = vpop.f32.mrf.mxu1  ;;  %v16335_v11 = vadd.f32 %v6465_v10, %v6416_v17 }
 0x886   : > { %v16333_v44 = vadd.f32 %v6191_v50, %v6142_v55 }
 0x887   : > { %18414 = vst [vmem:[#allocation140_spill] sm:$0xff] %v16335_v11  ;;  %v5921_v11 = vpack.c.bf16 %v5852_v35, %v5851_v32  ;;  %v10891_v35 = vld [vmem:[#allocation13 + $0x30] sm:$0xff] }
 0x888   : > { %18413 = vst [vmem:[#allocation139_spill] sm:$0xff] %v16333_v44  ;;  %7385 = vmatpush.bf16.msra.mxu3 %v10891_v35 }
 0x88a   : > { %v16337_v23 = vpop.f32.mrf.mxu0 }
 0x88b   : > { %18415 = vst [vmem:[#allocation83_spill] sm:$0xff] %v16337_v23  ;;  %v16339_v56 = vpop.f32.mrf.mxu2 }
 0x88c   : > { %18416 = vst [vmem:[#allocation87_spill] sm:$0xff] %v16339_v56  ;;  %v16343_v29 = vpop.f32.mrf.mxu3  ;;  %v6786_v56 = vunpack.c.h.b16 %v5921_v11 }
 0x88d   : > { %v16341_v18 = vpop.f32.mrf.mxu1  ;;  %18418 = vst [vmem:[#allocation142_spill] sm:$0xff] %v16343_v29  ;;  %v6785_v29 = vunpack.c.l.b16 %v5921_v11  ;;  %v10887_v11 = vld [vmem:[#allocation13 + $0x10] sm:$0xff] }
 0x88e   : > { %18417 = vst [vmem:[#allocation84_spill] sm:$0xff] %v16341_v18  ;;  %7090 = vmatpush.bf16.msra.mxu0 %v10887_v11 }
 0x891   : > { %v5658_v60 = vpop.xlane.xlu0 %5657 }
 0x892   : > { %v5607_v16 = vpop.xlane.xlu1 %5606  ;;  %11625 = vrcp.f32 %v5658_v60  ;;  %v6147_v14 = vpop.f32.mrf.mxu0 }
 0x893   : > { %v6421_v3 = vpop.f32.mrf.mxu2  ;;  %11627 = vrcp.f32 %v5607_v16 }
 0x894   : > { %v6470_v55 = vpop.f32.mrf.mxu3 }
 0x895   : > { %v6196_v30 = vpop.f32.mrf.mxu1  ;;  %v16349_v50 = vadd.f32 %v6470_v55, %v6421_v3 }
 0x896   : > { %v16347_v17 = vadd.f32 %v6196_v30, %v6147_v14 }
 0x898   : > { %v11626_v10 = vpop.eup %11625 }
 0x899   : > { %v5853_v52 = vmul.f32 %v11626_v10, %v16151_v36  ;;  %v5854_v44 = vmul.f32 %v11626_v10, %v16155_v58  ;;  %v5610_v60 = vpop.xlane.xlu2 %5609  ;;  %v11628_v18 = vpop.eup %11627  ;;  %v10885_v10 = vld [vmem:[#allocation13] sm:$0xff] }
 0x89a   : > { %11629 = vrcp.f32 %v5610_v60  ;;  %v5819_v16 = vmul.f32 %v11628_v18, %v16148_v51  ;;  %v5820_v14 = vmul.f32 %v11628_v18, %v16157_v26  ;;  %v5661_v61 = vpop.xlane.xlu0 %5660  ;;  %7175 = vmatpush.bf16.msra.mxu1 %v10885_v10 }
 0x89b   : > { %v5922_v23 = vpack.c.bf16 %v5854_v44, %v5853_v52  ;;  %11631 = vrcp.f32 %v5661_v61  ;;  %v10889_v44 = vld [vmem:[#allocation13 + $0x20] sm:$0xff] }
 0x89c   : > { %v5905_v32 = vpack.c.bf16 %v5820_v14, %v5819_v16  ;;  %7272 = vmatpush.bf16.msra.mxu2 %v10889_v44 }
 0x89d   : > { %v6787_v6 = vunpack.c.l.b16 %v5922_v23  ;;  %v6788_v63 = vunpack.c.h.b16 %v5922_v23 }
 0x89e   : > { %v6511_v51 = vunpack.c.l.b16 %v5905_v32 }
 0x89f   : > { %v6807_v3 = vpack.c.b16 %v6787_v6, %v6785_v29  ;;  %v6808_v30 = vpack.c.b16 %v6788_v63, %v6786_v56  ;;  %v6512_v56 = vunpack.c.h.b16 %v5905_v32 }
 0x8a0   : > { %v11630_v55 = vpop.eup %11629 }
 0x8a1   : > { %6958 = vmatmul.bf16.gmra.mxu2 %v6807_v3  ;;  %7007 = vmatmul.bf16.gmra.mxu3 %v6808_v30  ;;  %v5821_v36 = vmul.f32 %v11630_v55, %v16171_v21  ;;  %v5822_v58 = vmul.f32 %v11630_v55, %v16179_v15  ;;  %v11632_v60 = vpop.eup %11631  ;;  %v5613_v61 = vpop.xlane.xlu2 %5612 }
 0x8a2   : > { %v5855_v15 = vmul.f32 %v11632_v60, %v16167_v8  ;;  %v5856_v6 = vmul.f32 %v11632_v60, %v16169_v49 }
 0x8a3   : > { %v5906_v23 = vpack.c.bf16 %v5822_v58, %v5821_v36 }
 0x8a4   : > { %v5923_v3 = vpack.c.bf16 %v5856_v6, %v5855_v15 }
 0x8a5   : > { %v6513_v26 = vunpack.c.l.b16 %v5906_v23  ;;  %v6514_v18 = vunpack.c.h.b16 %v5906_v23 }
 0x8a6   : > { %v6789_v55 = vunpack.c.l.b16 %v5923_v3  ;;  %v6790_v58 = vunpack.c.h.b16 %v5923_v3 }
 0x8a7   : > { %v6533_v52 = vpack.c.b16 %v6513_v26, %v6511_v51  ;;  %v6534_v21 = vpack.c.b16 %v6514_v18, %v6512_v56  ;;  %v16365_v26 = vpop.f32.mrf.mxu0  ;;  %v16367_v56 = vpop.f32.mrf.mxu2 }
 0x8a8   : > { %v5664_v29 = vpop.xlane.xlu1 %5663  ;;  %v16369_v18 = vpop.f32.mrf.mxu3 }
 0x8a9   : > { %11633 = vrcp.f32 %v5664_v29  ;;  %6684 = vmatmul.bf16.gmra.mxu0 %v6533_v52  ;;  %6733 = vmatmul.bf16.gmra.mxu1 %v6534_v21  ;;  %v16371_v52 = vpop.f32.mrf.mxu1 }
 0x8aa   : > { %11635 = vrcp.f32 %v5613_v61 }
 0x8af   : > { %v11634_v63 = vpop.eup %11633 }
 0x8b0   : > { %v5857_v16 = vmul.f32 %v11634_v63, %v16205_v5  ;;  %v5858_v14 = vmul.f32 %v11634_v63, %v16207_v22  ;;  %v11636_v11 = vpop.eup %11635 }
 0x8b1   : > { %v5823_v49 = vmul.f32 %v11636_v11, %v16193_v0  ;;  %v5824_v5 = vmul.f32 %v11636_v11, %v16197_v33 }
 0x8b2   : > { %v5924_v30 = vpack.c.bf16 %v5858_v14, %v5857_v16  ;;  %v6983_v16 = vpop.f32.mrf.mxu3  ;;  %v6709_v14 = vpop.f32.mrf.mxu1 }
 0x8b3   : > { %v5907_v51 = vpack.c.bf16 %v5824_v5, %v5823_v49 }
 0x8b4   : > { %v6791_v36 = vunpack.c.l.b16 %v5924_v30  ;;  %v6792_v32 = vunpack.c.h.b16 %v5924_v30 }
 0x8b5   : > { %v6515_v21 = vunpack.c.l.b16 %v5907_v51  ;;  %v6516_v0 = vunpack.c.h.b16 %v5907_v51 }
 0x8b6   : > { %v6809_v44 = vpack.c.b16 %v6791_v36, %v6789_v55  ;;  %v6810_v35 = vpack.c.b16 %v6792_v32, %v6790_v58 }
 0x8b8   : > { %6963 = vmatmul.bf16.gmra.mxu2 %v6809_v44  ;;  %7012 = vmatmul.bf16.gmra.mxu3 %v6810_v35 }
 0x8ba   : > { %v6985_v44 = vpop.f32.mrf.mxu3  ;;  %v6711_v35 = vpop.f32.mrf.mxu1 }
 0x8bb   : > { %v5616_v8 = vpop.xlane.xlu0 %5615 }
 0x8bc   : > { %11637 = vrcp.f32 %v5616_v8 }
 0x8c2   : > { %v11638_v22 = vpop.eup %11637 }
 0x8c3   : > { %v5825_v23 = vmul.f32 %v11638_v22, %v16233_v43  ;;  %v5826_v10 = vmul.f32 %v11638_v22, %v16237_v54  ;;  %v6660_v43 = vpop.f32.mrf.mxu0  ;;  %v6934_v54 = vpop.f32.mrf.mxu2 }
 0x8c5   : > { %v5908_v29 = vpack.c.bf16 %v5826_v10, %v5825_v23 }
 0x8c7   : > { %v6517_v60 = vunpack.c.l.b16 %v5908_v29  ;;  %v6518_v15 = vunpack.c.h.b16 %v5908_v29 }
 0x8c9   : > { %v6535_v33 = vpack.c.b16 %v6517_v60, %v6515_v21  ;;  %v6536_v6 = vpack.c.b16 %v6518_v15, %v6516_v0  ;;  %v6988_v15 = vpop.f32.mrf.mxu3 }
 0x8cb   : > { %v5670_v63 = vpop.xlane.xlu2 %5669  ;;  %6689 = vmatmul.bf16.gmra.mxu0 %v6535_v33  ;;  %6738 = vmatmul.bf16.gmra.mxu1 %v6536_v6  ;;  %v6662_v36 = vpop.f32.mrf.mxu0 }
 0x8cc   : > { %11639 = vrcp.f32 %v5670_v63  ;;  %v6936_v32 = vpop.f32.mrf.mxu2  ;;  %v6714_v33 = vpop.f32.mrf.mxu1 }
 0x8d2   : > { %v5667_v3 = vpop.xlane.xlu1 %5666  ;;  %v11640_v30 = vpop.eup %11639 }
 0x8d3   : > { %11641 = vrcp.f32 %v5667_v3  ;;  %v5861_v61 = vmul.f32 %v11640_v30, %v16257_v39  ;;  %v5862_v55 = vmul.f32 %v11640_v30, %v16261_v25 }
 0x8d4   : > { %v6939_v0 = vpop.f32.mrf.mxu2 }
 0x8d5   : > { %v5926_v5 = vpack.c.bf16 %v5862_v55, %v5861_v61 }
 0x8d7   : > { %v6795_v10 = vunpack.c.l.b16 %v5926_v5  ;;  %v6796_v29 = vunpack.c.h.b16 %v5926_v5 }
 0x8d9   : > { %v11642_v58 = vpop.eup %11641 }
 0x8da   : > { %v5859_v8 = vmul.f32 %v11642_v58, %v16271_v41  ;;  %v5860_v11 = vmul.f32 %v11642_v58, %v16279_v38  ;;  %v5622_v49 = vpop.xlane.xlu1 %5621  ;;  %v6665_v41 = vpop.f32.mrf.mxu0  ;;  %v6986_v58 = vadd.f32 %v6985_v44, %v6936_v32 }
 0x8db   : > { %11643 = vrcp.f32 %v5622_v49  ;;  %v6990_v49 = vpop.f32.mrf.mxu3 }
 0x8dc   : > { %v5925_v22 = vpack.c.bf16 %v5860_v11, %v5859_v8  ;;  %v6712_v8 = vadd.f32 %v6711_v35, %v6662_v36  ;;  %v6941_v11 = vpop.f32.mrf.mxu2  ;;  %v6438_v35 = vadd.f32 %v16195_v7, %v16191_v27  ;;  %v6443_v7 = vadd.f32 %v16225_v53, %v16221_v13  ;;  %v18422_v53 = vld [vmem:[#allocation131_spill] sm:$0xff] }
 0x8dd   : > { %v6174_v13 = vadd.f32 %v16251_v62, %v16247_v59 }
 0x8de   : > { %v6793_v23 = vunpack.c.l.b16 %v5925_v22  ;;  %v6794_v51 = vunpack.c.h.b16 %v5925_v22  ;;  %v6716_v22 = vpop.f32.mrf.mxu1 }
 0x8e0   : > { %v6811_v39 = vpack.c.b16 %v6795_v10, %v6793_v23  ;;  %v6812_v21 = vpack.c.b16 %v6796_v29, %v6794_v51 }
 0x8e1   : > { %v11644_v60 = vpop.eup %11643 }
 0x8e2   : > { %6968 = vmatmul.bf16.gmra.mxu2 %v6811_v39  ;;  %7017 = vmatmul.bf16.gmra.mxu3 %v6812_v21  ;;  %v5619_v25 = vpop.xlane.xlu0 %5618  ;;  %v5829_v38 = vmul.f32 %v11644_v60, %v16289_v2  ;;  %v5830_v6 = vmul.f32 %v11644_v60, %v16291_v42  ;;  %v6667_v5 = vpop.f32.mrf.mxu0  ;;  %v6984_v2 = vadd.f32 %v6983_v16, %v6934_v54 }
 0x8e3   : > { %11645 = vrcp.f32 %v5619_v25  ;;  %v6710_v39 = vadd.f32 %v6709_v14, %v6660_v43  ;;  %v6993_v36 = vpop.f32.mrf.mxu3  ;;  %v6164_v43 = vadd.f32 %v16175_v40, %v16173_v31  ;;  %v6991_v54 = vadd.f32 %v6990_v49, %v6941_v11 }
 0x8e4   : > { %v5910_v61 = vpack.c.bf16 %v5830_v6, %v5829_v38  ;;  %v7330_v25 = vpack.c.bf16 %v6986_v58, %v6984_v2  ;;  %v6717_v16 = vadd.f32 %v6716_v22, %v6667_v5  ;;  %v6989_v14 = vadd.f32 %v6988_v15, %v6939_v0 }
 0x8e5   : > { %v6715_v60 = vadd.f32 %v6714_v33, %v6665_v41  ;;  %v7035_v38 = vpack.c.bf16 %v6438_v35, %v16153_v34  ;;  %v7023_v6 = vpack.c.bf16 %v6164_v43, %v16159_v9  ;;  %v6169_v9 = vadd.f32 %v16215_v57, %v16213_v19 }
 0x8e6   : > { %v6521_v10 = vunpack.c.l.b16 %v5910_v61  ;;  %v6522_v29 = vunpack.c.h.b16 %v5910_v61  ;;  %v6719_v44 = vpop.f32.mrf.mxu1  ;;  %v7036_v11 = vpack.c.bf16 %v6443_v7, %v16209_v1 }
 0x8e9   : > { %v11646_v63 = vpop.eup %11645 }
 0x8ea   : > { %v5827_v3 = vmul.f32 %v11646_v63, %v16301_v24  ;;  %v5828_v30 = vmul.f32 %v11646_v63, %v16309_v46  ;;  %v7217_v24 = vpack.c.bf16 %v6712_v8, %v6710_v39  ;;  %v6944_v46 = vpop.f32.mrf.mxu2  ;;  %v6670_v32 = vpop.f32.mrf.mxu0  ;;  %v7331_v63 = vpack.c.bf16 %v6991_v54, %v6989_v14 }
 0x8eb   : > { %v6995_v61 = vpop.f32.mrf.mxu3  ;;  %v6994_v41 = vadd.f32 %v6993_v36, %v6944_v46  ;;  %v6720_v33 = vadd.f32 %v6719_v44, %v6670_v32  ;;  %v7024_v8 = vpack.c.bf16 %v6169_v9, %v16201_v48  ;;  %v18421_v48 = vld [vmem:[#allocation121_spill] sm:$0xff] }
 0x8ec   : > { %v5909_v55 = vpack.c.bf16 %v5828_v30, %v5827_v3  ;;  %v7218_v3 = vpack.c.bf16 %v6717_v16, %v6715_v60  ;;  %v6448_v1 = vadd.f32 %v18422_v53, %v18421_v48  ;;  %v18424_v36 = vld [vmem:[#allocation129_spill] sm:$0xff]  ;;  %v18425_v16 = vld [vmem:[#allocation130_spill] sm:$0xff]  ;;  %v18426_v60 = vld [vmem:[#allocation132_spill] sm:$0xff] }
 0x8ed   : > { %v6453_v14 = vadd.f32 %v18425_v16, %v16269_v47 }
 0x8ee   : > { %v6519_v23 = vunpack.c.l.b16 %v5909_v55  ;;  %v6520_v51 = vunpack.c.h.b16 %v5909_v55  ;;  %v6721_v58 = vpop.f32.mrf.mxu1  ;;  %v7037_v32 = vpack.c.bf16 %v6448_v1, %v18424_v36  ;;  %v18434_v1 = vld [vmem:[#allocation136_spill] sm:$0xff] }
 0x8f0   : > { %v6537_v42 = vpack.c.b16 %v6521_v10, %v6519_v23  ;;  %v6538_v21 = vpack.c.b16 %v6522_v29, %v6520_v51 }
 0x8f2   : > { %6694 = vmatmul.bf16.gmra.mxu0 %v6537_v42  ;;  %6743 = vmatmul.bf16.gmra.mxu1 %v6538_v21  ;;  %v6946_v30 = vpop.f32.mrf.mxu2  ;;  %v6672_v55 = vpop.f32.mrf.mxu0 }
 0x8f3   : > { %10414 = vmatmul.msk.bf16.vlgmr.msra.gmra.mxu2 %vm3734_vm3, %v7217_v24  ;;  %10430 = vmatmul.msk.bf16.vlgmr.msra.gmra.mxu3 %vm3734_vm3, %v7330_v25  ;;  %v6998_v40 = vpop.f32.mrf.mxu3  ;;  %v6996_v0 = vadd.f32 %v6995_v61, %v6946_v30  ;;  %v6722_v15 = vadd.f32 %v6721_v58, %v6672_v55  ;;  %v18423_v24 = vld [vmem:[#allocation127_spill] sm:$0xff] }
 0x8f4   : > { %v7025_v46 = vpack.c.bf16 %v6174_v13, %v18423_v24 }
 0x8f5   : > { %v7332_v49 = vpack.c.bf16 %v6996_v0, %v6994_v41  ;;  %v7219_v5 = vpack.c.bf16 %v6722_v15, %v6720_v33 }
 0x8f6   : > { %v6724_v34 = vpop.f32.mrf.mxu1 }
 0x8fa   : > { %v6949_v31 = vpop.f32.mrf.mxu2  ;;  %v6675_v27 = vpop.f32.mrf.mxu0 }
 0x8fb   : > { %v7000_v23 = vpop.f32.mrf.mxu3  ;;  %v6999_v21 = vadd.f32 %v6998_v40, %v6949_v31  ;;  %v6725_v25 = vadd.f32 %v6724_v34, %v6675_v27  ;;  %v18428_v31 = vld [vmem:[#allocation122_spill] sm:$0xff]  ;;  %v18429_v27 = vld [vmem:[#allocation128_spill] sm:$0xff] }
 0x8fc   : > { %v7038_v40 = vpack.c.bf16 %v6453_v14, %v18428_v31  ;;  %v6473_v31 = vadd.f32 %v16369_v18, %v16367_v56 }
 0x8fe   : > { %v6726_v57 = vpop.f32.mrf.mxu1 }
 0x902   : > { %10382 = vmatmul.msk.bf16.vlgmr.msra.gmra.mxu0 %vm3734_vm3, %v7035_v38  ;;  %10398 = vmatmul.msk.bf16.vlgmr.msra.gmra.mxu1 %vm3734_vm3, %v7023_v6  ;;  %v6951_v22 = vpop.f32.mrf.mxu2  ;;  %v6677_v19 = vpop.f32.mrf.mxu0  ;;  %v18427_v38 = vld [vmem:[#allocation133_spill] sm:$0xff] }
 0x903   : > { %10415 = vmatmul.msk.bf16.gmra.mxu2 %vm3734_vm3, %v7218_v3  ;;  %10431 = vmatmul.msk.bf16.gmra.mxu3 %vm3734_vm3, %v7331_v63  ;;  %v7003_v51 = vpop.f32.mrf.mxu3  ;;  %v7001_v29 = vadd.f32 %v7000_v23, %v6951_v22  ;;  %v6727_v2 = vadd.f32 %v6726_v57, %v6677_v19  ;;  %v6179_v6 = vadd.f32 %v18427_v38, %v18426_v60  ;;  %v18432_v22 = vld [vmem:[#allocation141_spill] sm:$0xff]  ;;  %v18433_v23 = vld [vmem:[#allocation138_spill] sm:$0xff] }
 0x904   : > { %v6184_v19 = vadd.f32 %v18433_v23, %v18432_v22 }
 0x905   : > { %v7333_v44 = vpack.c.bf16 %v7001_v29, %v6999_v21  ;;  %v7220_v35 = vpack.c.bf16 %v6727_v2, %v6725_v25  ;;  %v7026_v34 = vpack.c.bf16 %v6179_v6, %v18429_v27 }
 0x906   : > { %v6729_v42 = vpop.f32.mrf.mxu1 }
 0x90a   : > { %v6954_v10 = vpop.f32.mrf.mxu2  ;;  %v6680_v39 = vpop.f32.mrf.mxu0 }
 0x90b   : > { %v7005_v62 = vpop.f32.mrf.mxu3  ;;  %v6730_v55 = vadd.f32 %v6729_v42, %v6680_v39  ;;  %v7004_v58 = vadd.f32 %v7003_v51, %v6954_v10  ;;  %v18435_v51 = vld [vmem:[#allocation137_spill] sm:$0xff] }
 0x90c   : > { %v7027_v29 = vpack.c.bf16 %v6184_v19, %v18435_v51 }
 0x90e   : > { %v6731_v54 = vpop.f32.mrf.mxu1 }
 0x912   : > { %10383 = vmatmul.msk.bf16.gmra.mxu0 %vm3734_vm3, %v7036_v11  ;;  %10399 = vmatmul.msk.bf16.gmra.mxu1 %vm3734_vm3, %v7024_v8  ;;  %v6956_v59 = vpop.f32.mrf.mxu2  ;;  %v6682_v43 = vpop.f32.mrf.mxu0  ;;  %v18430_v11 = vld [vmem:[#allocation134_spill] sm:$0xff] }
 0x913   : > { %10416 = vmatmul.msk.bf16.gmra.mxu2 %vm3734_vm3, %v7219_v5  ;;  %10432 = vmatmul.msk.bf16.gmra.mxu3 %vm3734_vm3, %v7332_v49  ;;  %v6732_v63 = vadd.f32 %v6731_v54, %v6682_v43  ;;  %v7006_v3 = vadd.f32 %v7005_v62, %v6956_v59  ;;  %v18431_v49 = vld [vmem:[#allocation135_spill] sm:$0xff] }
 0x914   : > { %v6458_v5 = vadd.f32 %v18431_v49, %v18430_v11 }
 0x915   : > { %v7221_v0 = vpack.c.bf16 %v6732_v63, %v6730_v55  ;;  %v7334_v15 = vpack.c.bf16 %v7006_v3, %v7004_v58  ;;  %v18440_v63 = vld [vmem:[#allocation140_spill] sm:$0xff] }
 0x916   : > { %v7039_v10 = vpack.c.bf16 %v6458_v5, %v18434_v1 }
 0x922   : > { %10384 = vmatmul.msk.bf16.gmra.mxu0 %vm3734_vm3, %v7037_v32  ;;  %10400 = vmatmul.msk.bf16.gmra.mxu1 %vm3734_vm3, %v7025_v46  ;;  %v6463_v32 = vadd.f32 %v16327_v20, %v16325_v28  ;;  %v18436_v28 = vld [vmem:[#allocation87_spill] sm:$0xff]  ;;  %v18437_v20 = vld [vmem:[#allocation142_spill] sm:$0xff] }
 0x923   : > { %10417 = vmatmul.msk.bf16.gmra.mxu2 %vm3734_vm3, %v7220_v35  ;;  %10433 = vmatmul.msk.bf16.gmra.mxu3 %vm3734_vm3, %v7333_v44  ;;  %v6189_v44 = vadd.f32 %v16331_v37, %v16329_v4  ;;  %v6468_v4 = vadd.f32 %v18437_v20, %v18436_v28  ;;  %v18439_v37 = vld [vmem:[#allocation84_spill] sm:$0xff] }
 0x924   : > { %v6959_v30 = vpop.f32.mrf.mxu2  ;;  %v7008_v61 = vpop.f32.mrf.mxu3  ;;  %v7040_v62 = vpack.c.bf16 %v6463_v32, %v16321_v45  ;;  %v18438_v45 = vld [vmem:[#allocation83_spill] sm:$0xff] }
 0x925   : > { %v7009_v48 = vadd.f32 %v7008_v61, %v6959_v30  ;;  %v7028_v43 = vpack.c.bf16 %v6189_v44, %v16323_v12  ;;  %v6194_v12 = vadd.f32 %v18439_v37, %v18438_v45  ;;  %v7041_v3 = vpack.c.bf16 %v6468_v4, %v18440_v63  ;;  %v18441_v30 = vld [vmem:[#allocation139_spill] sm:$0xff]  ;;  %v3277_v45 = vld [vmem:[%s16464_s25 + $0x18] sm:$0xff] }
 0x926   : > { %v6685_v9 = vpop.f32.mrf.mxu0  ;;  %v6734_v7 = vpop.f32.mrf.mxu1 }
 0x927   : > { %v6735_v53 = vadd.f32 %v6734_v7, %v6685_v9  ;;  %v7029_v61 = vpack.c.bf16 %v6194_v12, %v18441_v30 }
 0x92c   : > { %v6961_v47 = vpop.f32.mrf.mxu2  ;;  %v7010_v41 = vpop.f32.mrf.mxu3 }
 0x92d   : > { %v7011_v57 = vadd.f32 %v7010_v41, %v6961_v47  ;;  %v7042_v47 = vpack.c.bf16 %v6473_v31, %v16349_v50  ;;  %v3278_v31 = vld [vmem:[%s16464_s25 + $0x20] sm:$0xff] }
 0x92e   : > { %v6687_v33 = vpop.f32.mrf.mxu0  ;;  %v6736_v8 = vpop.f32.mrf.mxu1 }
 0x92f   : > { %v6737_v13 = vadd.f32 %v6736_v8, %v6687_v33  ;;  %v7335_v42 = vpack.c.bf16 %v7011_v57, %v7009_v48  ;;  %v16466_v57 = vld [vmem:[#allocation14] ss:$0 sm:$0xff] }
 0x930   : > { %v3274_v48 = vld [vmem:[%s16464_s25] sm:$0xff] }
 0x931   : > { %v7222_v21 = vpack.c.bf16 %v6737_v13, %v6735_v53 }
 0x932   : > { %10385 = vmatmul.msk.bf16.gmra.mxu0 %vm3734_vm3, %v7038_v40  ;;  %10401 = vmatmul.msk.bf16.gmra.mxu1 %vm3734_vm3, %v7026_v34  ;;  %v6199_v40 = vadd.f32 %v16371_v52, %v16365_v26 }
 0x933   : > { %10418 = vmatmul.msk.bf16.gmra.mxu2 %vm3734_vm3, %v7221_v0  ;;  %10434 = vmatmul.msk.bf16.gmra.mxu3 %vm3734_vm3, %v7334_v15 }
 0x934   : > { %v7030_v41 = vpack.c.bf16 %v6199_v40, %v16347_v17 }
 0x93b   : > { %v6964_v2 = vpop.f32.mrf.mxu2  ;;  %v7013_v39 = vpop.f32.mrf.mxu3 }
 0x93c   : > { %v7014_v59 = vadd.f32 %v7013_v39, %v6964_v2 }
 0x942   : > { %10386 = vmatmul.msk.bf16.gmra.mxu0 %vm3734_vm3, %v7039_v10  ;;  %10402 = vmatmul.msk.bf16.gmra.mxu1 %vm3734_vm3, %v7027_v29 }
 0x943   : > { %10419 = vmatmul.msk.bf16.gmra.mxu2 %vm3734_vm3, %v7222_v21  ;;  %10435 = vmatmul.msk.bf16.gmra.mxu3 %vm3734_vm3, %v7335_v42  ;;  %v6966_v46 = vpop.f32.mrf.mxu2  ;;  %v7015_v36 = vpop.f32.mrf.mxu3 }
 0x944   : > { %v7016_v35 = vadd.f32 %v7015_v36, %v6966_v46 }
 0x946   : > { %v7336_v14 = vpack.c.bf16 %v7016_v35, %v7014_v59 }
 0x948   : > { %v6690_v25 = vpop.f32.mrf.mxu0  ;;  %v6739_v24 = vpop.f32.mrf.mxu1 }
 0x949   : > { %v6740_v60 = vadd.f32 %v6739_v24, %v6690_v25  ;;  %v3275_v25 = vld [vmem:[%s16464_s25 + $0x8] sm:$0xff] }
 0x950   : > { %v6692_v54 = vpop.f32.mrf.mxu0  ;;  %v6741_v16 = vpop.f32.mrf.mxu1 }
 0x951   : > { %v6742_v38 = vadd.f32 %v6741_v16, %v6692_v54  ;;  %v3276_v54 = vld [vmem:[%s16464_s25 + $0x10] sm:$0xff] }
 0x952   : > { %10387 = vmatmul.msk.bf16.gmra.mxu0 %vm3734_vm3, %v7040_v62  ;;  %10403 = vmatmul.msk.bf16.gmra.mxu1 %vm3734_vm3, %v7028_v43 }
 0x953   : > { %v7223_v6 = vpack.c.bf16 %v6742_v38, %v6740_v60  ;;  %10436 = vmatmul.msk.bf16.gmra.mxu3 %vm3734_vm3, %v7336_v14 }
 0x955   : > { %10420 = vmatmul.msk.bf16.gmra.mxu2 %vm3734_vm3, %v7223_v6 }
 0x962   : > { %10388 = vmatmul.msk.bf16.gmra.mxu0 %vm3734_vm3, %v7041_v3  ;;  %10404 = vmatmul.msk.bf16.gmra.mxu1 %vm3734_vm3, %v7029_v61 }
 0x965   : > { %v6969_v55 = vpop.f32.mrf.mxu2  ;;  %v7018_v58 = vpop.f32.mrf.mxu3 }
 0x966   : > { %v7019_v9 = vadd.f32 %v7018_v58, %v6969_v55 }
 0x96d   : > { %v6971_v27 = vpop.f32.mrf.mxu2  ;;  %v7020_v34 = vpop.f32.mrf.mxu3 }
 0x96e   : > { %v7021_v7 = vadd.f32 %v7020_v34, %v6971_v27 }
 0x96f   : > { %v6695_v0 = vpop.f32.mrf.mxu0  ;;  %v6744_v15 = vpop.f32.mrf.mxu1 }
 0x970   : > { %v7337_v33 = vpack.c.bf16 %v7021_v7, %v7019_v9  ;;  %v6745_v8 = vadd.f32 %v6744_v15, %v6695_v0 }
 0x972   : > { %10389 = vmatmul.msk.bf16.gmra.mxu0 %vm3734_vm3, %v7042_v47  ;;  %10405 = vmatmul.msk.bf16.gmra.mxu1 %vm3734_vm3, %v7030_v41 }
 0x973   : > { %10437 = vmatmul.msk.bf16.gmra.mxu3 %vm3734_vm3, %v7337_v33  ;;  %v3279_v33 = vld [vmem:[%s16464_s25 + $0x28] sm:$0xff] }
 0x976   : > { %v7274_v26 = vpop.f32.mrf.mxu2  ;;  %v7387_v56 = vpop.f32.mrf.mxu3 }
 0x977   : > { %v6697_v18 = vpop.f32.mrf.mxu0  ;;  %v6746_v52 = vpop.f32.mrf.mxu1 }
 0x978   : > { %v6747_v11 = vadd.f32 %v6746_v52, %v6697_v18 }
 0x97a   : > { %v7224_v49 = vpack.c.bf16 %v6747_v11, %v6745_v8 }
 0x97c   : > { %10421 = vmatmul.msk.bf16.gmra.mxu2 %vm3734_vm3, %v7224_v49 }
 0x97e   : > { %v7276_v50 = vpop.f32.mrf.mxu2  ;;  %v7389_v22 = vpop.f32.mrf.mxu3 }
 0x97f   : > { %v7092_v17 = vpop.f32.mrf.mxu0  ;;  %v7177_v5 = vpop.f32.mrf.mxu1 }
 0x980   : > { %v7178_v23 = vadd.f32 %v7177_v5, %v7092_v17  ;;  %v3280_v5 = vld [vmem:[%s16464_s25 + $0x30] sm:$0xff] }
 0x982   : > { %v7314_v19 = vadd.f32 %v7274_v26, %v7178_v23 }
 0x984   : > { %v7427_v13 = vadd.f32 %v7387_v56, %v7314_v19  ;;  %v12276_v19 = vmov 128.0  }
 0x985   : > { %11647 = vrcp.f32 %v12276_v19 }
 0x986   : > { %v7447_v53 = vadd.f32 %v16466_v57, %v7427_v13  ;;  %v7279_v51 = vpop.f32.mrf.mxu2  ;;  %v7392_v39 = vpop.f32.mrf.mxu3 }
 0x987   : > { %v7094_v1 = vpop.f32.mrf.mxu0  ;;  %v7179_v10 = vpop.f32.mrf.mxu1 }
 0x988   : > { %v7180_v29 = vadd.f32 %v7179_v10, %v7094_v1  ;;  %v16470_v2 = vadd.f32 %v7447_v53, %v3274_v48 }
 0x98a   : > { %18442 = vst [vmem:[#allocation143_spill] sm:$0xff] %v16470_v2  ;;  %v7315_v42 = vadd.f32 %v7276_v50, %v7180_v29  ;;  %7481 = vadd.xlane.f32.xlu2 %v16470_v2 }
 0x98b   : > { %v11648_v13 = vpop.eup %11647 }
 0x98c   : > { %v7428_v21 = vadd.f32 %v7389_v22, %v7315_v42  ;;  %v7514_v1 = vmul.f32 128.0, %v11648_v13  ;;  %vm7518_vm15 = vweird.f32 %v11648_v13 }
 0x98e   : > { %v7448_v24 = vadd.f32 %v16466_v57, %v7428_v21  ;;  %v7281_v35 = vpop.f32.mrf.mxu2  ;;  %v7394_v62 = vpop.f32.mrf.mxu3  ;;  %v7515_v10 = vsub.f32 1.0, %v7514_v1 }
 0x98f   : > { %v7097_v46 = vpop.f32.mrf.mxu0  ;;  %v7182_v36 = vpop.f32.mrf.mxu1 }
 0x990   : > { %v7183_v32 = vadd.f32 %v7182_v36, %v7097_v46  ;;  %v16475_v44 = vadd.f32 %v7448_v24, %v3275_v25  ;;  %v7516_v29 = vmul.f32 %v11648_v13, %v7515_v10 }
 0x992   : > { %18443 = vst [vmem:[#allocation144_spill] sm:$0xff] %v16475_v44  ;;  %v7316_v59 = vadd.f32 %v7279_v51, %v7183_v32  ;;  %7483 = vadd.xlane.f32.xlu0 %v16475_v44  ;;  %v7517_v25 = vadd.f32 %v11648_v13, %v7516_v29 }
 0x994   : > { %v7429_v43 = vadd.f32 %v7392_v39, %v7316_v59  ;;  %v16503_v36 = vsel %vm7518_vm15, %v11648_v13, %v7517_v25  ;;  %v3283_v13 = vld [vmem:[%s16464_s25 + $0x48] sm:$0xff] }
 0x996   : > { %v7449_v16 = vadd.f32 %v16466_v57, %v7429_v43  ;;  %v7284_v20 = vpop.f32.mrf.mxu2  ;;  %v7397_v37 = vpop.f32.mrf.mxu3 }
 0x997   : > { %v7099_v14 = vpop.f32.mrf.mxu0  ;;  %v7184_v60 = vpop.f32.mrf.mxu1 }
 0x998   : > { %v7185_v38 = vadd.f32 %v7184_v60, %v7099_v14  ;;  %v16480_v6 = vadd.f32 %v7449_v16, %v3276_v54 }
 0x99a   : > { %18444 = vst [vmem:[#allocation145_spill] sm:$0xff] %v16480_v6  ;;  %v7317_v28 = vadd.f32 %v7281_v35, %v7185_v38  ;;  %7485 = vadd.xlane.f32.xlu1 %v16480_v6 }
 0x99c   : > { %v7430_v4 = vadd.f32 %v7394_v62, %v7317_v28 }
 0x99e   : > { %v7450_v12 = vadd.f32 %v16466_v57, %v7430_v4  ;;  %v7286_v40 = vpop.f32.mrf.mxu2  ;;  %v7399_v15 = vpop.f32.mrf.mxu3 }
 0x99f   : > { %v7102_v63 = vpop.f32.mrf.mxu0  ;;  %v7187_v3 = vpop.f32.mrf.mxu1 }
 0x9a0   : > { %v7188_v30 = vadd.f32 %v7187_v3, %v7102_v63  ;;  %v16485_v61 = vadd.f32 %v7450_v12, %v3277_v45  ;;  %v3281_v12 = vld [vmem:[%s16464_s25 + $0x38] sm:$0xff] }
 0x9a2   : > { %18445 = vst [vmem:[#allocation92_spill] sm:$0xff] %v16485_v61  ;;  %v7318_v55 = vadd.f32 %v7284_v20, %v7188_v30  ;;  %7487 = vadd.xlane.f32.xlu2 %v16485_v61 }
 0x9a4   : > { %v7431_v58 = vadd.f32 %v7397_v37, %v7318_v55 }
 0x9a6   : > { %v7451_v27 = vadd.f32 %v16466_v57, %v7431_v58  ;;  %v7289_v11 = vpop.f32.mrf.mxu2  ;;  %v7402_v50 = vpop.f32.mrf.mxu3 }
 0x9a7   : > { %v7104_v34 = vpop.f32.mrf.mxu0  ;;  %v7189_v9 = vpop.f32.mrf.mxu1 }
 0x9a8   : > { %v7190_v7 = vadd.f32 %v7189_v9, %v7104_v34  ;;  %v16490_v0 = vadd.f32 %v7451_v27, %v3278_v31 }
 0x9aa   : > { %18446 = vst [vmem:[#allocation85_spill] sm:$0xff] %v16490_v0  ;;  %v7319_v47 = vadd.f32 %v7286_v40, %v7190_v7  ;;  %7489 = vadd.xlane.f32.xlu0 %v16490_v0 }
 0x9ac   : > { %v7432_v41 = vadd.f32 %v7399_v15, %v7319_v47 }
 0x9ae   : > { %v7452_v26 = vadd.f32 %v16466_v57, %v7432_v41  ;;  %v7291_v51 = vpop.f32.mrf.mxu2  ;;  %v7404_v39 = vpop.f32.mrf.mxu3  ;;  %v3282_v41 = vld [vmem:[%s16464_s25 + $0x40] sm:$0xff] }
 0x9af   : > { %v7107_v56 = vpop.f32.mrf.mxu0  ;;  %v7192_v18 = vpop.f32.mrf.mxu1 }
 0x9b0   : > { %v7193_v52 = vadd.f32 %v7192_v18, %v7107_v56  ;;  %v16495_v8 = vadd.f32 %v7452_v26, %v3279_v33 }
 0x9b2   : > { %18447 = vst [vmem:[#allocation88_spill] sm:$0xff] %v16495_v8  ;;  %v7320_v49 = vadd.f32 %v7289_v11, %v7193_v52  ;;  %7491 = vadd.xlane.f32.xlu1 %v16495_v8 }
 0x9b4   : > { %v7433_v17 = vadd.f32 %v7402_v50, %v7320_v49 }
 0x9b6   : > { %v7453_v22 = vadd.f32 %v16466_v57, %v7433_v17  ;;  %v7294_v46 = vpop.f32.mrf.mxu2  ;;  %v7407_v35 = vpop.f32.mrf.mxu3 }
 0x9b7   : > { %v7109_v48 = vpop.f32.mrf.mxu0  ;;  %v7194_v53 = vpop.f32.mrf.mxu1 }
 0x9b8   : > { %v16500_v23 = vadd.f32 %v7453_v22, %v3280_v5  ;;  %v7195_v24 = vadd.f32 %v7194_v53, %v7109_v48 }
 0x9ba   : > { %18448 = vst [vmem:[#allocation86_spill] sm:$0xff] %v16500_v23  ;;  %7493 = vadd.xlane.f32.xlu1 %v16500_v23  ;;  %v7321_v59 = vadd.f32 %v7291_v51, %v7195_v24 }
 0x9bc   : > { %v7434_v14 = vadd.f32 %v7404_v39, %v7321_v59 }
 0x9be   : > { %v7296_v28 = vpop.f32.mrf.mxu2  ;;  %v7454_v37 = vadd.f32 %v16466_v57, %v7434_v14  ;;  %v7409_v63 = vpop.f32.mrf.mxu3 }
 0x9bf   : > { %v7112_v42 = vpop.f32.mrf.mxu0  ;;  %v7197_v21 = vpop.f32.mrf.mxu1 }
 0x9c0   : > { %v7198_v60 = vadd.f32 %v7197_v21, %v7112_v42  ;;  %v16519_v27 = vadd.f32 %v7454_v37, %v3281_v12 }
 0x9c2   : > { %v7322_v4 = vadd.f32 %v7294_v46, %v7198_v60  ;;  %18449 = vst [vmem:[#allocation91_spill] sm:$0xff] %v16519_v27 }
 0x9c4   : > { %v7435_v58 = vadd.f32 %v7407_v35, %v7322_v4  ;;  %v3284_v35 = vld [vmem:[%s16464_s25 + $0x50] sm:$0xff] }
 0x9c6   : > { %v7455_v15 = vadd.f32 %v16466_v57, %v7435_v58  ;;  %v7299_v47 = vpop.f32.mrf.mxu2  ;;  %v7412_v26 = vpop.f32.mrf.mxu3 }
 0x9c7   : > { %v7114_v62 = vpop.f32.mrf.mxu0  ;;  %v7199_v54 = vpop.f32.mrf.mxu1 }
 0x9c8   : > { %v7200_v31 = vadd.f32 %v7199_v54, %v7114_v62  ;;  %v16530_v49 = vadd.f32 %v7455_v15, %v3282_v41  ;;  %v3286_v41 = vld [vmem:[%s16464_s25 + $0x60] sm:$0xff] }
 0x9ca   : > { %v7323_v9 = vadd.f32 %v7296_v28, %v7200_v31  ;;  %18450 = vst [vmem:[#allocation90_spill] sm:$0xff] %v16530_v49 }
 0x9cc   : > { %v7436_v56 = vadd.f32 %v7409_v63, %v7323_v9  ;;  %v3285_v63 = vld [vmem:[%s16464_s25 + $0x58] sm:$0xff] }
 0x9ce   : > { %v7456_v19 = vadd.f32 %v16466_v57, %v7436_v56  ;;  %v7301_v53 = vpop.f32.mrf.mxu2  ;;  %v7414_v39 = vpop.f32.mrf.mxu3 }
 0x9cf   : > { %v7117_v3 = vpop.f32.mrf.mxu0  ;;  %v7202_v55 = vpop.f32.mrf.mxu1 }
 0x9d0   : > { %v7203_v18 = vadd.f32 %v7202_v55, %v7117_v3  ;;  %v16539_v51 = vadd.f32 %v7456_v19, %v3283_v13 }
 0x9d2   : > { %v7324_v5 = vadd.f32 %v7299_v47, %v7203_v18  ;;  %18451 = vst [vmem:[#allocation89_spill] sm:$0xff] %v16539_v51 }
 0x9d4   : > { %v7437_v1 = vadd.f32 %v7412_v26, %v7324_v5 }
 0x9d6   : > { %v7417_v28 = vpop.f32.mrf.mxu3 }
 0x9d7   : > { %v7119_v52 = vpop.f32.mrf.mxu0  ;;  %v7204_v50 = vpop.f32.mrf.mxu1 }
 0x9d8   : > { %v7205_v10 = vadd.f32 %v7204_v50, %v7119_v52  ;;  %v7304_v62 = vpop.f32.mrf.mxu2 }
 0x9da   : > { %v7325_v24 = vadd.f32 %v7301_v53, %v7205_v10  ;;  %v3287_v53 = vld [vmem:[%s16464_s25 + $0x68] sm:$0xff] }
 0x9de   : > { %v7419_v26 = vpop.f32.mrf.mxu3 }
 0x9df   : > { %v7122_v42 = vpop.f32.mrf.mxu0  ;;  %v7207_v21 = vpop.f32.mrf.mxu1 }
 0x9e0   : > { %v7208_v54 = vadd.f32 %v7207_v21, %v7122_v42  ;;  %v3288_v42 = vld [vmem:[%s16464_s25 + $0x70] sm:$0xff] }
 0x9e7   : > { %v7124_v37 = vpop.f32.mrf.mxu0  ;;  %v7209_v12 = vpop.f32.mrf.mxu1 }
 0x9e8   : > { %v7210_v58 = vadd.f32 %v7209_v12, %v7124_v37  ;;  %v10917_v37 = vld [vmem:[#allocation19 + $0xc4] sm:$0xf] }
 0x9ef   : > { %v7127_v18 = vpop.f32.mrf.mxu0  ;;  %v7212_v52 = vpop.f32.mrf.mxu1 }
 0x9fd   : > { %v7482_v32 = vpop.xlane.xlu2 %7481 }
 0x9fe   : > { %v7520_v43 = vmul.f32 %v16503_v36, %v7482_v32  ;;  %v7457_v32 = vadd.f32 %v16466_v57, %v7437_v1  ;;  %v7422_v1 = vpop.f32.mrf.mxu3 }
 0xa00   : > { %v16507_v16 = vsub.f32 %v16470_v2, %v7520_v43  ;;  %v7438_v43 = vadd.f32 %v7414_v39, %v7325_v24  ;;  %v16550_v14 = vadd.f32 %v7457_v32, %v3284_v35  ;;  %v10923_v24 = vld [vmem:[#allocation19 + $0xec] sm:$0xf0]  ;;  %v10554_v35 = vld [vmem:[#allocation19 + $0xf0] sm:$0xf0] }
 0xa02   : > { %v7552_v38 = vmul.f32 %v16507_v16, %v16507_v16  ;;  %18452 = vst [vmem:[#allocation95_spill] sm:$0xff] %v16550_v14 }
 0xa04   : > { %7568 = vadd.xlane.f32.xlu2 %v7552_v38 }
 0xa05   : > { %v7484_v20 = vpop.xlane.xlu0 %7483 }
 0xa06   : > { %v7521_v45 = vmul.f32 %v16503_v36, %v7484_v20  ;;  %v7326_v20 = vadd.f32 %v7304_v62, %v7208_v54  ;;  %v10560_v62 = vld [vmem:[#allocation19 + $0xe8] sm:$0xf] }
 0xa08   : > { %v16515_v30 = vsub.f32 %v16475_v44, %v7521_v45  ;;  %v7458_v45 = vadd.f32 %v16466_v57, %v7438_v43  ;;  %v7439_v55 = vadd.f32 %v7417_v28, %v7326_v20  ;;  %v10924_v43 = vld [vmem:[#allocation19 + $0xf4] sm:$0xf0]  ;;  %v10562_v28 = vld [vmem:[#allocation19 + $0xf8] sm:$0xf0] }
 0xa0a   : > { %v7553_v40 = vmul.f32 %v16515_v30, %v16515_v30  ;;  %v7459_v47 = vadd.f32 %v16466_v57, %v7439_v55  ;;  %v10544_v55 = vld [vmem:[#allocation19 + $0xc8] sm:$0xf] }
 0xa0c   : > { %7570 = vadd.xlane.f32.xlu0 %v7553_v40  ;;  %7495 = vadd.xlane.f32.xlu2 %v16519_v27  ;;  %v16563_v40 = vadd.f32 %v7458_v45, %v3285_v63  ;;  %v10919_v45 = vld [vmem:[#allocation19 + $0xcc] sm:$0xf0]  ;;  %v10538_v63 = vld [vmem:[#allocation19 + $0xd0] sm:$0xf0] }
 0xa0d   : > { %v7486_v34 = vpop.xlane.xlu1 %7485 }
 0xa0e   : > { %v7522_v7 = vmul.f32 %v16503_v36, %v7486_v34  ;;  %18453 = vst [vmem:[#allocation96_spill] sm:$0xff] %v16563_v40  ;;  %v7306_v34 = vpop.f32.mrf.mxu2 }
 0xa10   : > { %v16526_v33 = vsub.f32 %v16480_v6, %v7522_v7  ;;  %v7327_v7 = vadd.f32 %v7306_v34, %v7210_v58  ;;  %v10920_v58 = vld [vmem:[#allocation19 + $0xd4] sm:$0xf0] }
 0xa11   : > { %v10545_v34 = vor.u32 %v10920_v58, %v10544_v55  ;;  %v10906_v55 = vld [vmem:[#allocation19 + $0x6c] sm:$0xf]  ;;  %v10498_v58 = vld [vmem:[#allocation19 + $0x78] sm:$0xf0] }
 0xa12   : > { %v7554_v11 = vmul.f32 %v16526_v33, %v16526_v33 }
 0xa14   : > { %7572 = vadd.xlane.f32.xlu0 %v7554_v11  ;;  %7497 = vadd.xlane.f32.xlu2 %v16530_v49  ;;  %v7440_v11 = vadd.f32 %v7419_v26, %v7327_v7  ;;  %v10546_v7 = vld [vmem:[#allocation19 + $0xd8] sm:$0xf0]  ;;  %v10913_v26 = vld [vmem:[#allocation19 + $0xa4] sm:$0xf] }
 0xa15   : > { %v7488_v17 = vpop.xlane.xlu2 %7487 }
 0xa16   : > { %v7523_v22 = vmul.f32 %v16503_v36, %v7488_v17  ;;  %v16574_v17 = vadd.f32 %v7459_v47, %v3286_v41  ;;  %v7309_v5 = vpop.f32.mrf.mxu2  ;;  %v7460_v13 = vadd.f32 %v16466_v57, %v7440_v11  ;;  %v10520_v47 = vld [vmem:[#allocation19 + $0xa0] sm:$0xf]  ;;  %v10915_v41 = vld [vmem:[#allocation19 + $0xac] sm:$0xf0]  ;;  %v10528_v11 = vld [vmem:[#allocation19 + $0xa8] sm:$0xf] }
 0xa18   : > { %v16537_v48 = vsub.f32 %v16485_v61, %v7523_v22  ;;  %18454 = vst [vmem:[#allocation93_spill] sm:$0xff] %v16574_v17  ;;  %v7213_v22 = vadd.f32 %v7212_v52, %v7127_v18  ;;  %v10521_v18 = vor.u32 %v10915_v41, %v10520_v47  ;;  %v10522_v52 = vld [vmem:[#allocation19 + $0xb0] sm:$0xf0]  ;;  %v10480_v41 = vld [vmem:[#allocation19 + $0x48] sm:$0xf] }
 0xa19   : > { %v10474_v47 = vld [vmem:[#allocation19 + $0x50] sm:$0xf0] }
 0xa1a   : > { %v7555_v29 = vmul.f32 %v16537_v48, %v16537_v48  ;;  %v7328_v19 = vadd.f32 %v7309_v5, %v7213_v22  ;;  %v10525_v5 = vor.u32 %v10913_v26, %v10522_v52  ;;  %v10904_v26 = vld [vmem:[#allocation19 + $0x54] sm:$0xf0] }
 0xa1b   : > { %v10481_v52 = vor.u32 %v10904_v26, %v10480_v41  ;;  %v7129_v26 = vpop.f32.mrf.mxu0 }
 0xa1c   : > { %7499 = vadd.xlane.f32.xlu0 %v16539_v51  ;;  %7574 = vadd.xlane.f32.xlu1 %v7555_v29  ;;  %v7441_v10 = vadd.f32 %v7422_v1, %v7328_v19  ;;  %v16579_v29 = vadd.f32 %v7460_v13, %v3287_v53  ;;  %v10914_v19 = vld [vmem:[#allocation19 + $0xac] sm:$0xf]  ;;  %v10530_v13 = vld [vmem:[#allocation19 + $0xb8] sm:$0xf0]  ;;  %v10504_v1 = vld [vmem:[#allocation19 + $0x80] sm:$0xf] }
 0xa1d   : > { %v7490_v25 = vpop.xlane.xlu0 %7489  ;;  %v10533_v53 = vor.u32 %v10914_v19, %v10530_v13  ;;  %v10456_v19 = vld [vmem:[#allocation19 + $0x20] sm:$0xf]  ;;  %v10899_v13 = vld [vmem:[#allocation19 + $0x2c] sm:$0xf0] }
 0xa1e   : > { %v7524_v46 = vmul.f32 %v16503_v36, %v7490_v25  ;;  %18455 = vst [vmem:[#allocation94_spill] sm:$0xff] %v16579_v29  ;;  %v7461_v39 = vadd.f32 %v16466_v57, %v7441_v10  ;;  %v10552_v25 = vld [vmem:[#allocation19 + $0xe0] sm:$0xf]  ;;  %v10911_v10 = vld [vmem:[#allocation19 + $0x8c] sm:$0xf0] }
 0xa1f   : > { %v10553_v32 = vor.u32 %v10923_v24, %v10552_v25  ;;  %v10506_v25 = vld [vmem:[#allocation19 + $0x90] sm:$0xf0]  ;;  %v10512_v24 = vld [vmem:[#allocation19 + $0x88] sm:$0xf] }
 0xa20   : > { %v16548_v59 = vsub.f32 %v16490_v0, %v7524_v46  ;;  %v16584_v21 = vadd.f32 %v7461_v39, %v3288_v42  ;;  %v10921_v46 = vld [vmem:[#allocation19 + $0xe4] sm:$0xf]  ;;  %v10505_v42 = vor.u32 %v10911_v10, %v10504_v1  ;;  %v10457_v10 = vor.u32 %v10899_v13, %v10456_v19 }
 0xa21   : > { %v10557_v54 = vor.u32 %v10921_v46, %v10554_v35  ;;  %8056 = vmatpush.bf16.msrb.mxu0 %v10553_v32  ;;  %v10909_v39 = vld [vmem:[#allocation19 + $0x84] sm:$0xf]  ;;  %v10912_v46 = vld [vmem:[#allocation19 + $0x94] sm:$0xf0] }
 0xa22   : > { %v7556_v60 = vmul.f32 %v16548_v59, %v16548_v59  ;;  %18456 = vst [vmem:[#allocation97_spill] sm:$0xff] %v16584_v21  ;;  %v10509_v32 = vor.u32 %v10909_v39, %v10506_v25  ;;  %v10513_v35 = vor.u32 %v10912_v46, %v10512_v24  ;;  %v10458_v39 = vld [vmem:[#allocation19 + $0x30] sm:$0xf0]  ;;  %v10900_v25 = vld [vmem:[#allocation19 + $0x34] sm:$0xf0] }
 0xa23   : > { %8105 = vmatpush.bf16.msrb.mxu1 %v10557_v54 }
 0xa24   : > { %7501 = vadd.xlane.f32.xlu0 %v16550_v14  ;;  %7576 = vadd.xlane.f32.xlu1 %v7556_v60  ;;  %v10561_v60 = vor.u32 %v10924_v43, %v10560_v62  ;;  %v10910_v62 = vld [vmem:[#allocation19 + $0x8c] sm:$0xf]  ;;  %v10514_v43 = vld [vmem:[#allocation19 + $0x98] sm:$0xf0] }
 0xa25   : > { %v7492_v38 = vpop.xlane.xlu1 %7491  ;;  %v10517_v54 = vor.u32 %v10910_v62, %v10514_v43 }
 0xa26   : > { %v7525_v4 = vmul.f32 %v16503_v36, %v7492_v38  ;;  %v10922_v38 = vld [vmem:[#allocation19 + $0xec] sm:$0xf]  ;;  %8154 = vmatpush.bf16.msrb.mxu2 %v10561_v60  ;;  %v10488_v60 = vld [vmem:[#allocation19 + $0x60] sm:$0xf] }
 0xa27   : > { %v10565_v20 = vor.u32 %v10922_v38, %v10562_v28  ;;  %v10907_v38 = vld [vmem:[#allocation19 + $0x6c] sm:$0xf0]  ;;  %v10905_v28 = vld [vmem:[#allocation19 + $0x64] sm:$0xf] }
 0xa28   : > { %v16559_v3 = vsub.f32 %v16495_v8, %v7525_v4  ;;  %v10536_v4 = vld [vmem:[#allocation19 + $0xc0] sm:$0xf] }
 0xa29   : > { %8203 = vmatpush.bf16.msrb.mxu3 %v10565_v20  ;;  %v10537_v12 = vor.u32 %v10919_v45, %v10536_v4  ;;  %v10489_v20 = vor.u32 %v10907_v38, %v10488_v60  ;;  %v10490_v4 = vld [vmem:[#allocation19 + $0x70] sm:$0xf0]  ;;  %v10496_v45 = vld [vmem:[#allocation19 + $0x68] sm:$0xf]  ;;  %v10895_v60 = vld [vmem:[#allocation19 + $0xc] sm:$0xf0] }
 0xa2a   : > { %v7557_v31 = vmul.f32 %v16559_v3, %v16559_v3  ;;  %8155 = vmatpush.bf16.msrb.mxu2 %v10545_v34  ;;  %v10472_v34 = vld [vmem:[#allocation19 + $0x40] sm:$0xf]  ;;  %v10893_v38 = vld [vmem:[#allocation19 + $0x4] sm:$0xf] }
 0xa2b   : > { %8057 = vmatpush.bf16.msrb.mxu0 %v10537_v12  ;;  %v10493_v12 = vor.u32 %v10905_v28, %v10490_v4  ;;  %v10448_v4 = vld [vmem:[#allocation19 + $0x8] sm:$0xf] }
 0xa2c   : > { %7578 = vadd.xlane.f32.xlu2 %v7557_v31  ;;  %7503 = vadd.xlane.f32.xlu1 %v16563_v40  ;;  %v10541_v31 = vor.u32 %v10917_v37, %v10538_v63  ;;  %v10908_v37 = vld [vmem:[#allocation19 + $0x74] sm:$0xf0] }
 0xa2d   : > { %v7494_v9 = vpop.xlane.xlu1 %7493  ;;  %v10497_v63 = vor.u32 %v10908_v37, %v10496_v45  ;;  %v10896_v45 = vld [vmem:[#allocation19 + $0x14] sm:$0xf0] }
 0xa2e   : > { %v7526_v15 = vmul.f32 %v16503_v36, %v7494_v9  ;;  %v10918_v9 = vld [vmem:[#allocation19 + $0xcc] sm:$0xf]  ;;  %8106 = vmatpush.bf16.msrb.mxu1 %v10541_v31  ;;  %v10501_v31 = vor.u32 %v10906_v55, %v10498_v58  ;;  %v10450_v55 = vld [vmem:[#allocation19 + $0x18] sm:$0xf0] }
 0xa2f   : > { %8058 = vmatpush.bf16.msrb.mxu0 %v10521_v18 }
 0xa30   : > { %v16570_v56 = vsub.f32 %v16500_v23, %v7526_v15  ;;  %v10549_v15 = vor.u32 %v10918_v9, %v10546_v7  ;;  %v10903_v9 = vld [vmem:[#allocation19 + $0x4c] sm:$0xf0]  ;;  %v10901_v7 = vld [vmem:[#allocation19 + $0x44] sm:$0xf] }
 0xa31   : > { %v10477_v18 = vor.u32 %v10901_v7, %v10474_v47 }
 0xa32   : > { %v7558_v50 = vmul.f32 %v16570_v56, %v16570_v56  ;;  %8204 = vmatpush.bf16.msrb.mxu3 %v10549_v15  ;;  %8107 = vmatpush.bf16.msrb.mxu1 %v10525_v5  ;;  %v10473_v15 = vor.u32 %v10903_v9, %v10472_v34 }
 0xa33   : > { %8059 = vmatpush.bf16.msrb.mxu0 %v10505_v42  ;;  %v10464_v42 = vld [vmem:[#allocation19 + $0x28] sm:$0xf] }
 0xa34   : > { %7580 = vadd.xlane.f32.xlu2 %v7558_v50  ;;  %7505 = vadd.xlane.f32.xlu1 %v16574_v17  ;;  %v10916_v50 = vld [vmem:[#allocation19 + $0xb4] sm:$0xf0]  ;;  %v10465_v46 = vor.u32 %v10900_v25, %v10464_v42 }
 0xa35   : > { %v10529_v22 = vor.u32 %v10916_v50, %v10528_v11  ;;  %v10902_v11 = vld [vmem:[#allocation19 + $0x4c] sm:$0xf]  ;;  %v10482_v50 = vld [vmem:[#allocation19 + $0x58] sm:$0xf0] }
 0xa36   : > { %8205 = vmatpush.bf16.msrb.mxu3 %v10533_v53  ;;  %8108 = vmatpush.bf16.msrb.mxu1 %v10509_v32  ;;  %v10485_v5 = vor.u32 %v10902_v11, %v10482_v50  ;;  %v10897_v53 = vld [vmem:[#allocation19 + $0x24] sm:$0xf]  ;;  %v10898_v32 = vld [vmem:[#allocation19 + $0x2c] sm:$0xf]  ;;  %v7311_v50 = vpop.f32.mrf.mxu2 }
 0xa37   : > { %8156 = vmatpush.bf16.msrb.mxu2 %v10529_v22  ;;  %8060 = vmatpush.bf16.msrb.mxu0 %v10489_v20  ;;  %v10461_v24 = vor.u32 %v10897_v53, %v10458_v39  ;;  %v10442_v20 = vld [vmem:[#allocation19 + $0x10] sm:$0xf0] }
 0xa38   : > { %v10445_v37 = vor.u32 %v10893_v38, %v10442_v20 }
 0xa3a   : > { %8206 = vmatpush.bf16.msrb.mxu3 %v10517_v54  ;;  %8109 = vmatpush.bf16.msrb.mxu1 %v10493_v12  ;;  %v10440_v54 = vld [vmem:[#allocation19] sm:$0xf]  ;;  %v10449_v12 = vor.u32 %v10896_v45, %v10448_v4 }
 0xa3b   : > { %8157 = vmatpush.bf16.msrb.mxu2 %v10513_v35  ;;  %8061 = vmatpush.bf16.msrb.mxu0 %v10473_v15  ;;  %v10466_v35 = vld [vmem:[#allocation19 + $0x38] sm:$0xf0]  ;;  %v10441_v28 = vor.u32 %v10895_v60, %v10440_v54 }
 0xa3c   : > { %7507 = vadd.xlane.f32.xlu2 %v16579_v29  ;;  %v10469_v43 = vor.u32 %v10898_v32, %v10466_v35  ;;  %v7424_v32 = vpop.f32.mrf.mxu3 }
 0xa3e   : > { %8207 = vmatpush.bf16.msrb.mxu3 %v10501_v31  ;;  %8110 = vmatpush.bf16.msrb.mxu1 %v10477_v18  ;;  %v7214_v18 = vpop.f32.mrf.mxu1 }
 0xa3f   : > { %8158 = vmatpush.bf16.msrb.mxu2 %v10497_v63  ;;  %8062 = vmatpush.bf16.msrb.mxu0 %v10457_v10  ;;  %v10894_v63 = vld [vmem:[#allocation19 + $0xc] sm:$0xf] }
 0xa40   : > { %v10453_v58 = vor.u32 %v10894_v63, %v10450_v55 }
 0xa42   : > { %8208 = vmatpush.bf16.msrb.mxu3 %v10485_v5  ;;  %8111 = vmatpush.bf16.msrb.mxu1 %v10461_v24 }
 0xa43   : > { %8159 = vmatpush.bf16.msrb.mxu2 %v10481_v52  ;;  %8063 = vmatpush.bf16.msrb.mxu0 %v10441_v28 }
 0xa44   : > { %7509 = vadd.xlane.f32.xlu2 %v16584_v21 }
 0xa46   : > { %8209 = vmatpush.bf16.msrb.mxu3 %v10469_v43  ;;  %8112 = vmatpush.bf16.msrb.mxu1 %v10445_v37 }
 0xa47   : > { %8160 = vmatpush.bf16.msrb.mxu2 %v10465_v46 }
 0xa4a   : > { %8210 = vmatpush.bf16.msrb.mxu3 %v10453_v58  ;;  %v3289_v58 = vld [vmem:[%s16464_s25 + $0x78] sm:$0xff]  ;;  %s9363_s25 = sshll.u32 %s12559_s8, 4  ;;  %s9364_s25 = int_to_ptr.vmem [resolvable:$true] %s9363_s25 }
 0xa4b   : > { %8161 = vmatpush.bf16.msrb.mxu2 %v10449_v12 }
 0xa77   : > { %v7569_v22 = vpop.xlane.xlu2 %7568 }
 0xa78   : > { %v7600_v1 = vmul.f32 %v7569_v22, %v16503_v36  ;;  %v7215_v22 = vadd.f32 %v7214_v18, %v7129_v26 }
 0xa7a   : > { %v7616_v62 = vadd.f32 1e-12, %v7600_v1  ;;  %v7329_v1 = vadd.f32 %v7311_v50, %v7215_v22  ;;  %v16616_v50 = vld [vmem:[#allocation17] ss:$0 sm:$0xff] }
 0xa7c   : > { %11649 = vrsqrt.f32 %v7616_v62  ;;  %v7442_v54 = vadd.f32 %v7424_v32, %v7329_v1  ;;  %vm7638_vm5 = vweird.f32 %v7616_v62 }
 0xa7e   : > { %v7462_v37 = vadd.f32 %v16466_v57, %v7442_v54 }
 0xa7f   : > { %v7571_v31 = vpop.xlane.xlu0 %7570  ;;  %v7496_v34 = vpop.xlane.xlu2 %7495 }
 0xa80   : > { %v7601_v9 = vmul.f32 %v7571_v31, %v16503_v36  ;;  %v7527_v7 = vmul.f32 %v16503_v36, %v7496_v34  ;;  %v16606_v34 = vld [vmem:[#allocation16] ss:$0 sm:$0xff]  ;;  %v16614_v18 = vadd.f32 %v7462_v37, %v3289_v58 }
 0xa82   : > { %v11650_v15 = vpop.eup %11649  ;;  %v7617_v47 = vadd.f32 1e-12, %v7601_v9  ;;  %v16591_v41 = vsub.f32 %v16519_v27, %v7527_v7  ;;  %18457 = vst [vmem:[#allocation146_spill] sm:$0xff] %v16614_v18 }
 0xa83   : > { %v7633_v52 = vmul.f32 %v11650_v15, %v7616_v62  ;;  %vm7639_vm4 = vweird.f32 %v11650_v15 }
 0xa84   : > { %11651 = vrsqrt.f32 %v7617_v47  ;;  %v7559_v11 = vmul.f32 %v16591_v41, %v16591_v41  ;;  %vm7640_vm6 = vmor %vm7638_vm5, %vm7639_vm4  ;;  %vm7648_vm8 = vweird.f32 %v7617_v47 }
 0xa85   : > { %v7634_v5 = vmul.f32 %v11650_v15, %v7633_v52 }
 0xa86   : > { %7582 = vadd.xlane.f32.xlu0 %v7559_v11 }
 0xa87   : > { %v7635_v19 = vmul.f32 0.5, %v7634_v5  ;;  %v7573_v13 = vpop.xlane.xlu0 %7572  ;;  %v7498_v53 = vpop.xlane.xlu2 %7497 }
 0xa88   : > { %v7602_v10 = vmul.f32 %v7573_v13, %v16503_v36  ;;  %v7528_v39 = vmul.f32 %v16503_v36, %v7498_v53 }
 0xa89   : > { %v7636_v42 = vsub.f32 1.5, %v7635_v19 }
 0xa8a   : > { %v11652_v25 = vpop.eup %11651  ;;  %v7618_v24 = vadd.f32 1e-12, %v7602_v10  ;;  %v16598_v46 = vsub.f32 %v16530_v49, %v7528_v39 }
 0xa8b   : > { %v7637_v35 = vmul.f32 %v11650_v15, %v7636_v42  ;;  %v7643_v43 = vmul.f32 %v11652_v25, %v7617_v47  ;;  %vm7649_vm7 = vweird.f32 %v11652_v25 }
 0xa8c   : > { %11653 = vrsqrt.f32 %v7618_v24  ;;  %v7560_v60 = vmul.f32 %v16598_v46, %v16598_v46  ;;  %vm7650_vm9 = vmor %vm7648_vm8, %vm7649_vm7  ;;  %vm7658_vm11 = vweird.f32 %v7618_v24 }
 0xa8d   : > { %v7644_v38 = vmul.f32 %v11652_v25, %v7643_v43  ;;  %v7641_v28 = vsel %vm7640_vm6, %v11650_v15, %v7637_v35 }
 0xa8e   : > { %7584 = vadd.xlane.f32.xlu0 %v7560_v60  ;;  %v7792_v62 = vmul.f32 %v7641_v28, %v16507_v16 }
 0xa8f   : > { %v7645_v20 = vmul.f32 0.5, %v7644_v38  ;;  %v7500_v4 = vpop.xlane.xlu0 %7499  ;;  %v7575_v45 = vpop.xlane.xlu1 %7574 }
 0xa90   : > { %v7529_v12 = vmul.f32 %v16503_v36, %v7500_v4  ;;  %v7603_v63 = vmul.f32 %v7575_v45, %v16503_v36  ;;  %v7811_v16 = vmul.f32 %v16606_v34, %v7792_v62 }
 0xa91   : > { %v7646_v55 = vsub.f32 1.5, %v7645_v20 }
 0xa92   : > { %v11654_v31 = vpop.eup %11653  ;;  %v16610_v9 = vsub.f32 %v16539_v51, %v7529_v12  ;;  %v7619_v7 = vadd.f32 1e-12, %v7603_v63  ;;  %v7830_v42 = vadd.f32 %v16616_v50, %v7811_v16 }
 0xa93   : > { %v7647_v15 = vmul.f32 %v11652_v25, %v7646_v55  ;;  %v7653_v26 = vmul.f32 %v11654_v31, %v7618_v24  ;;  %vm7659_vm10 = vweird.f32 %v11654_v31 }
 0xa94   : > { %11655 = vrsqrt.f32 %v7619_v7  ;;  %v7561_v57 = vmul.f32 %v16610_v9, %v16610_v9  ;;  %vm7660_vm12 = vmor %vm7658_vm11, %vm7659_vm10  ;;  %vm7668_vm14 = vweird.f32 %v7619_v7 }
 0xa95   : > { %v7651_v52 = vsel %vm7650_vm9, %v11652_v25, %v7647_v15  ;;  %v7654_v11 = vmul.f32 %v11654_v31, %v7653_v26 }
 0xa96   : > { %v7793_v5 = vmul.f32 %v7651_v52, %v16515_v30  ;;  %7586 = vadd.xlane.f32.xlu1 %v7561_v57  ;;  %7511 = vadd.xlane.f32.xlu0 %v16614_v18 }
 0xa97   : > { %v7655_v47 = vmul.f32 0.5, %v7654_v11  ;;  %v7502_v22 = vpop.xlane.xlu0 %7501  ;;  %v7577_v19 = vpop.xlane.xlu1 %7576 }
 0xa98   : > { %v7812_v13 = vmul.f32 %v16606_v34, %v7793_v5  ;;  %v7530_v53 = vmul.f32 %v16503_v36, %v7502_v22  ;;  %v7604_v1 = vmul.f32 %v7577_v19, %v16503_v36 }
 0xa99   : > { %v7656_v10 = vsub.f32 1.5, %v7655_v47 }
 0xa9a   : > { %v11656_v39 = vpop.eup %11655  ;;  %v7831_v25 = vadd.f32 %v16616_v50, %v7812_v13  ;;  %v16627_v30 = vsub.f32 %v16550_v14, %v7530_v53  ;;  %v7620_v32 = vadd.f32 1e-12, %v7604_v1 }
 0xa9b   : > { %v7657_v35 = vmul.f32 %v11654_v31, %v7656_v10  ;;  %v7663_v43 = vmul.f32 %v11656_v39, %v7619_v7  ;;  %vm7669_vm13 = vweird.f32 %v11656_v39 }
 0xa9c   : > { %11657 = vrsqrt.f32 %v7620_v32  ;;  %v7562_v54 = vmul.f32 %v16627_v30, %v16627_v30  ;;  %v7846_v60 = vpack.c.bf16 %v7831_v25, %v7830_v42  ;;  %vm7670_vm0 = vmor %vm7668_vm14, %vm7669_vm13  ;;  %vm7678_vm2 = vweird.f32 %v7620_v32 }
 0xa9d   : > { %v7664_v38 = vmul.f32 %v11656_v39, %v7663_v43  ;;  %v7661_v28 = vsel %vm7660_vm12, %v11654_v31, %v7657_v35 }
 0xa9e   : > { %7588 = vadd.xlane.f32.xlu1 %v7562_v54  ;;  %8064 = vmatmul.bf16.vlgmr.msrb.gmra.mxu0 %v7846_v60  ;;  %v7794_v24 = vmul.f32 %v7661_v28, %v16526_v33 }
 0xa9f   : > { %v7665_v20 = vmul.f32 0.5, %v7664_v38  ;;  %8113 = vmatmul.bf16.vlgmr.msrb.gmra.mxu1 %v7846_v60  ;;  %8162 = vmatmul.bf16.vlgmr.msrb.gmra.mxu2 %v7846_v60  ;;  %v7504_v4 = vpop.xlane.xlu1 %7503  ;;  %v7579_v45 = vpop.xlane.xlu2 %7578 }
 0xaa0   : > { %8211 = vmatmul.bf16.vlgmr.msrb.gmra.mxu3 %v7846_v60  ;;  %v7531_v37 = vmul.f32 %v16503_v36, %v7504_v4  ;;  %v7605_v12 = vmul.f32 %v7579_v45, %v16503_v36  ;;  %v7813_v16 = vmul.f32 %v16606_v34, %v7794_v24 }
 0xaa1   : > { %v7666_v63 = vsub.f32 1.5, %v7665_v20 }
 0xaa2   : > { %v11658_v55 = vpop.eup %11657  ;;  %v16635_v58 = vsub.f32 %v16563_v40, %v7531_v37  ;;  %v7621_v62 = vadd.f32 1e-12, %v7605_v12  ;;  %v7832_v1 = vadd.f32 %v16616_v50, %v7813_v16 }
 0xaa3   : > { %v7667_v31 = vmul.f32 %v11656_v39, %v7666_v63  ;;  %v7673_v15 = vmul.f32 %v11658_v55, %v7620_v32  ;;  %vm7679_vm1 = vweird.f32 %v11658_v55 }
 0xaa4   : > { %11659 = vrsqrt.f32 %v7621_v62  ;;  %v7563_v26 = vmul.f32 %v16635_v58, %v16635_v58  ;;  %vm7680_vm3 = vmor %vm7678_vm2, %vm7679_vm1  ;;  %vm7688_vm4 = vweird.f32 %v7621_v62 }
 0xaa5   : > { %v7671_v57 = vsel %vm7670_vm0, %v11656_v39, %v7667_v31  ;;  %v7674_v52 = vmul.f32 %v11658_v55, %v7673_v15 }
 0xaa6   : > { %v7795_v11 = vmul.f32 %v7671_v57, %v16537_v48  ;;  %7590 = vadd.xlane.f32.xlu2 %v7563_v26 }
 0xaa7   : > { %v7675_v33 = vmul.f32 0.5, %v7674_v52  ;;  %v7506_v5 = vpop.xlane.xlu1 %7505  ;;  %v7581_v47 = vpop.xlane.xlu2 %7580 }
 0xaa8   : > { %v7532_v22 = vmul.f32 %v16503_v36, %v7506_v5  ;;  %v7814_v7 = vmul.f32 %v16606_v34, %v7795_v11 }
 0xaa9   : > { %v7676_v19 = vsub.f32 1.5, %v7675_v33 }
 0xaaa   : > { %v11660_v13 = vpop.eup %11659  ;;  %v16644_v53 = vsub.f32 %v16574_v17, %v7532_v22  ;;  %v7833_v10 = vadd.f32 %v16616_v50, %v7814_v7 }
 0xaab   : > { %v7677_v48 = vmul.f32 %v11658_v55, %v7676_v19  ;;  %v7683_v39 = vmul.f32 %v11660_v13, %v7621_v62  ;;  %vm7689_vm15 = vweird.f32 %v11660_v13 }
 0xaac   : > { %v7847_v42 = vpack.c.bf16 %v7833_v10, %v7832_v1  ;;  %v7564_v25 = vmul.f32 %v16644_v53, %v16644_v53  ;;  %vm7690_vm5 = vmor %vm7688_vm4, %vm7689_vm15 }
 0xaad   : > { %v7684_v35 = vmul.f32 %v11660_v13, %v7683_v39  ;;  %v7681_v43 = vsel %vm7680_vm3, %v11658_v55, %v7677_v48 }
 0xaae   : > { %8069 = vmatmul.bf16.gmra.mxu0 %v7847_v42  ;;  %7592 = vadd.xlane.f32.xlu0 %v7564_v25  ;;  %v7796_v20 = vmul.f32 %v7681_v43, %v16548_v59 }
 0xaaf   : > { %v7685_v54 = vmul.f32 0.5, %v7684_v35  ;;  %8118 = vmatmul.bf16.gmra.mxu1 %v7847_v42  ;;  %8167 = vmatmul.bf16.gmra.mxu2 %v7847_v42  ;;  %v7508_v60 = vpop.xlane.xlu2 %7507 }
 0xab0   : > { %8216 = vmatmul.bf16.gmra.mxu3 %v7847_v42  ;;  %v7533_v38 = vmul.f32 %v16503_v36, %v7508_v60  ;;  %v7815_v63 = vmul.f32 %v16606_v34, %v7796_v20 }
 0xab1   : > { %v7686_v28 = vsub.f32 1.5, %v7685_v54 }
 0xab2   : > { %v16653_v4 = vsub.f32 %v16579_v29, %v7533_v38  ;;  %v7834_v62 = vadd.f32 %v16616_v50, %v7815_v63 }
 0xab3   : > { %v7687_v32 = vmul.f32 %v11660_v13, %v7686_v28 }
 0xab4   : > { %v7565_v45 = vmul.f32 %v16653_v4, %v16653_v4 }
 0xab5   : > { %v7691_v37 = vsel %vm7690_vm5, %v11660_v13, %v7687_v32 }
 0xab6   : > { %v7797_v12 = vmul.f32 %v7691_v37, %v16559_v3  ;;  %7594 = vadd.xlane.f32.xlu1 %v7565_v45  ;;  %v7606_v3 = vmul.f32 %v7581_v47, %v16503_v36 }
 0xab7   : > { %v7510_v55 = vpop.xlane.xlu2 %7509 }
 0xab8   : > { %v7534_v24 = vmul.f32 %v16503_v36, %v7510_v55  ;;  %v7816_v59 = vmul.f32 %v16606_v34, %v7797_v12  ;;  %v7622_v52 = vadd.f32 1e-12, %v7606_v3 }
 0xaba   : > { %v16662_v31 = vsub.f32 %v16584_v21, %v7534_v24  ;;  %v7835_v15 = vadd.f32 %v16616_v50, %v7816_v59  ;;  %11661 = vrsqrt.f32 %v7622_v52  ;;  %vm7698_vm7 = vweird.f32 %v7622_v52 }
 0xabc   : > { %v7848_v26 = vpack.c.bf16 %v7835_v15, %v7834_v62  ;;  %v7566_v57 = vmul.f32 %v16662_v31, %v16662_v31 }
 0xabe   : > { %8074 = vmatmul.bf16.gmra.mxu0 %v7848_v26  ;;  %7596 = vadd.xlane.f32.xlu2 %v7566_v57 }
 0xabf   : > { %8123 = vmatmul.bf16.gmra.mxu1 %v7848_v26  ;;  %8172 = vmatmul.bf16.gmra.mxu2 %v7848_v26 }
 0xac0   : > { %8221 = vmatmul.bf16.gmra.mxu3 %v7848_v26  ;;  %v11662_v11 = vpop.eup %11661 }
 0xac1   : > { %v7693_v16 = vmul.f32 %v11662_v11, %v7622_v52  ;;  %vm7699_vm6 = vweird.f32 %v11662_v11 }
 0xac2   : > { %vm7700_vm8 = vmor %vm7698_vm7, %vm7699_vm6 }
 0xac3   : > { %v7694_v33 = vmul.f32 %v11662_v11, %v7693_v16 }
 0xac5   : > { %v7695_v19 = vmul.f32 0.5, %v7694_v33 }
 0xac7   : > { %v7696_v13 = vsub.f32 1.5, %v7695_v19 }
 0xac9   : > { %v7697_v42 = vmul.f32 %v11662_v11, %v7696_v13 }
 0xacb   : > { %v7701_v35 = vsel %vm7700_vm8, %v11662_v11, %v7697_v42 }
 0xacc   : > { %v7798_v45 = vmul.f32 %v7701_v35, %v16570_v56 }
 0xace   : > { %v7817_v26 = vmul.f32 %v16606_v34, %v7798_v45 }
 0xad0   : > { %v7836_v16 = vadd.f32 %v16616_v50, %v7817_v26 }
 0xaf9   : > { %v7583_v5 = vpop.xlane.xlu0 %7582 }
 0xafa   : > { %v7607_v22 = vmul.f32 %v7583_v5, %v16503_v36 }
 0xafc   : > { %v7623_v7 = vadd.f32 1e-12, %v7607_v22 }
 0xafe   : > { %11663 = vrsqrt.f32 %v7623_v7  ;;  %vm7708_vm10 = vweird.f32 %v7623_v7 }
 0xb01   : > { %v7585_v1 = vpop.xlane.xlu0 %7584 }
 0xb02   : > { %v7608_v10 = vmul.f32 %v7585_v1, %v16503_v36 }
 0xb04   : > { %v11664_v48 = vpop.eup %11663  ;;  %v7624_v39 = vadd.f32 1e-12, %v7608_v10 }
 0xb05   : > { %v7703_v47 = vmul.f32 %v11664_v48, %v7623_v7  ;;  %vm7709_vm9 = vweird.f32 %v11664_v48 }
 0xb06   : > { %11665 = vrsqrt.f32 %v7624_v39  ;;  %vm7710_vm11 = vmor %vm7708_vm10, %vm7709_vm9  ;;  %vm7718_vm14 = vweird.f32 %v7624_v39 }
 0xb07   : > { %v7704_v25 = vmul.f32 %v11664_v48, %v7703_v47 }
 0xb09   : > { %v7705_v43 = vmul.f32 0.5, %v7704_v25  ;;  %v7587_v54 = vpop.xlane.xlu1 %7586  ;;  %v7512_v60 = vpop.xlane.xlu0 %7511 }
 0xb0a   : > { %v7609_v38 = vmul.f32 %v7587_v54, %v16503_v36  ;;  %v7535_v28 = vmul.f32 %v16503_v36, %v7512_v60 }
 0xb0b   : > { %v7706_v20 = vsub.f32 1.5, %v7705_v43 }
 0xb0c   : > { %v11666_v32 = vpop.eup %11665  ;;  %v7625_v37 = vadd.f32 1e-12, %v7609_v38  ;;  %v16675_v12 = vsub.f32 %v16614_v18, %v7535_v28 }
 0xb0d   : > { %v7707_v63 = vmul.f32 %v11664_v48, %v7706_v20  ;;  %v7713_v55 = vmul.f32 %v11666_v32, %v7624_v39  ;;  %vm7719_vm12 = vweird.f32 %v11666_v32 }
 0xb0e   : > { %11667 = vrsqrt.f32 %v7625_v37  ;;  %v7567_v24 = vmul.f32 %v16675_v12, %v16675_v12  ;;  %vm7720_vm0 = vmor %vm7718_vm14, %vm7719_vm12  ;;  %vm7728_vm1 = vweird.f32 %v7625_v37 }
 0xb0f   : > { %v7711_v59 = vsel %vm7710_vm11, %v11664_v48, %v7707_v63  ;;  %v7714_v15 = vmul.f32 %v11666_v32, %v7713_v55 }
 0xb10   : > { %v7799_v62 = vmul.f32 %v7711_v59, %v16591_v41  ;;  %7598 = vadd.xlane.f32.xlu0 %v7567_v24 }
 0xb11   : > { %v7589_v56 = vpop.xlane.xlu1 %7588  ;;  %v7715_v11 = vmul.f32 0.5, %v7714_v15 }
 0xb12   : > { %v7610_v57 = vmul.f32 %v7589_v56, %v16503_v36  ;;  %v7818_v3 = vmul.f32 %v16606_v34, %v7799_v62 }
 0xb13   : > { %v7716_v41 = vsub.f32 1.5, %v7715_v11 }
 0xb14   : > { %v11668_v52 = vpop.eup %11667  ;;  %v7837_v33 = vadd.f32 %v16616_v50, %v7818_v3  ;;  %v7626_v22 = vadd.f32 1e-12, %v7610_v57 }
 0xb15   : > { %v7723_v5 = vmul.f32 %v11668_v52, %v7625_v37  ;;  %v7717_v42 = vmul.f32 %v11666_v32, %v7716_v41  ;;  %vm7729_vm13 = vweird.f32 %v11668_v52 }
 0xb16   : > { %v7849_v7 = vpack.c.bf16 %v7837_v33, %v7836_v16  ;;  %11669 = vrsqrt.f32 %v7626_v22  ;;  %vm7730_vm2 = vmor %vm7728_vm1, %vm7729_vm13  ;;  %vm7738_vm4 = vweird.f32 %v7626_v22 }
 0xb17   : > { %v7724_v19 = vmul.f32 %v11668_v52, %v7723_v5  ;;  %v7721_v43 = vsel %vm7720_vm0, %v11666_v32, %v7717_v42  ;;  %v10956_v42 = vld [vmem:[#allocation20 + $0xf8] sm:$0xff] }
 0xb18   : > { %8079 = vmatmul.bf16.gmra.mxu0 %v7849_v7  ;;  %8128 = vmatmul.bf16.gmra.mxu1 %v7849_v7  ;;  %v7800_v20 = vmul.f32 %v7721_v43, %v16598_v46  ;;  %v10940_v43 = vld [vmem:[#allocation20 + $0x78] sm:$0xff] }
 0xb19   : > { %v7725_v13 = vmul.f32 0.5, %v7724_v19  ;;  %8177 = vmatmul.bf16.gmra.mxu2 %v7849_v7  ;;  %8226 = vmatmul.bf16.gmra.mxu3 %v7849_v7  ;;  %v7591_v1 = vpop.xlane.xlu2 %7590 }
 0xb1a   : > { %v7611_v10 = vmul.f32 %v7591_v1, %v16503_v36  ;;  %v7819_v37 = vmul.f32 %v16606_v34, %v7800_v20  ;;  %v10948_v1 = vld [vmem:[#allocation20 + $0xb8] sm:$0xff]  ;;  %9267 = vmatpush.bf16.msra.mxu3 %v10956_v42  ;;  %9169 = vmatpush.bf16.msra.mxu1 %v10940_v43 }
 0xb1b   : > { %v7726_v48 = vsub.f32 1.5, %v7725_v13  ;;  %9218 = vmatpush.bf16.msra.mxu2 %v10948_v1  ;;  %v8065_v19 = vpop.f32.mrf.mxu0 }
 0xb1c   : > { %v7627_v47 = vadd.f32 1e-12, %v7611_v10  ;;  %v11670_v35 = vpop.eup %11669  ;;  %v7838_v26 = vadd.f32 %v16616_v50, %v7819_v37  ;;  %v10938_v37 = vld [vmem:[#allocation20 + $0x68] sm:$0xff]  ;;  %v8114_v1 = vpop.f32.mrf.mxu1 }
 0xb1d   : > { %v7727_v25 = vmul.f32 %v11668_v52, %v7726_v48  ;;  %v7733_v38 = vmul.f32 %v11670_v35, %v7626_v22  ;;  %vm7739_vm3 = vweird.f32 %v11670_v35  ;;  %v10932_v48 = vld [vmem:[#allocation20 + $0x38] sm:$0xff] }
 0xb1e   : > { %11671 = vrsqrt.f32 %v7627_v47  ;;  %vm16702_vm5 = vmor %vm7738_vm4, %vm7739_vm3  ;;  %vm7748_vm6 = vweird.f32 %v7627_v47  ;;  %9120 = vmatpush.bf16.msra.mxu0 %v10932_v48 }
 0xb1f   : > { %v7731_v54 = vsel %vm7730_vm2, %v11668_v52, %v7727_v25  ;;  %v7734_v24 = vmul.f32 %v11670_v35, %v7733_v38 }
 0xb20   : > { %v7801_v45 = vmul.f32 %v7731_v54, %v16610_v9  ;;  %v10947_v54 = vld [vmem:[#allocation20 + $0xb0] sm:$0xff] }
 0xb21   : > { %v7593_v60 = vpop.xlane.xlu0 %7592  ;;  %v7735_v32 = vmul.f32 0.5, %v7734_v24  ;;  %9219 = vmatpush.bf16.msra.mxu2 %v10947_v54 }
 0xb22   : > { %v7612_v28 = vmul.f32 %v7593_v60, %v16503_v36  ;;  %v7820_v62 = vmul.f32 %v16606_v34, %v7801_v45  ;;  %v10955_v60 = vld [vmem:[#allocation20 + $0xf0] sm:$0xff]  ;;  %v10946_v45 = vld [vmem:[#allocation20 + $0xa8] sm:$0xff] }
 0xb23   : > { %v7736_v9 = vsub.f32 1.5, %v7735_v32  ;;  %9268 = vmatpush.bf16.msra.mxu3 %v10955_v60 }
 0xb24   : > { %v11672_v63 = vpop.eup %11671  ;;  %v16689_v39 = vadd.f32 1e-12, %v7612_v28  ;;  %v7839_v46 = vadd.f32 %v16616_v50, %v7820_v62 }
 0xb25   : > { %v7743_v55 = vmul.f32 %v11672_v63, %v7627_v47  ;;  %v7737_v16 = vmul.f32 %v11670_v35, %v7736_v9  ;;  %vm7749_vm15 = vweird.f32 %v11672_v63  ;;  %v10931_v47 = vld [vmem:[#allocation20 + $0x30] sm:$0xff]  ;;  %9220 = vmatpush.bf16.msra.mxu2 %v10946_v45 }
 0xb26   : > { %11673 = vrsqrt.f32 %v16689_v39  ;;  %v7850_v56 = vpack.c.bf16 %v7839_v46, %v7838_v26  ;;  %vm16706_vm7 = vmor %vm7748_vm6, %vm7749_vm15  ;;  %9121 = vmatpush.bf16.msra.mxu0 %v10931_v47  ;;  %vm7758_vm9 = vweird.f32 %v16689_v39 }
 0xb27   : > { %v7744_v59 = vmul.f32 %v11672_v63, %v7743_v55  ;;  %v7741_v10 = vsel %vm16702_vm5, %v11670_v35, %v7737_v16  ;;  %v10939_v35 = vld [vmem:[#allocation20 + $0x70] sm:$0xff]  ;;  %v10954_v55 = vld [vmem:[#allocation20 + $0xe8] sm:$0xff] }
 0xb28   : > { %8084 = vmatmul.bf16.gmra.mxu0 %v7850_v56  ;;  %8133 = vmatmul.bf16.gmra.mxu1 %v7850_v56  ;;  %v7802_v38 = vmul.f32 %v7741_v10, %v16627_v30 }
 0xb29   : > { %v7745_v15 = vmul.f32 0.5, %v7744_v59  ;;  %8182 = vmatmul.bf16.gmra.mxu2 %v7850_v56  ;;  %8231 = vmatmul.bf16.gmra.mxu3 %v7850_v56  ;;  %v7595_v52 = vpop.xlane.xlu1 %7594 }
 0xb2a   : > { %v7613_v7 = vmul.f32 %v7595_v52, %v16503_v36  ;;  %v7821_v24 = vmul.f32 %v16606_v34, %v7802_v38  ;;  %9170 = vmatpush.bf16.msra.mxu1 %v10939_v35  ;;  %9269 = vmatpush.bf16.msra.mxu3 %v10954_v55 }
 0xb2b   : > { %v7746_v57 = vsub.f32 1.5, %v7745_v15 }
 0xb2c   : > { %v16696_v3 = vpop.eup %11673  ;;  %v7629_v13 = vadd.f32 1e-12, %v7613_v7  ;;  %v7840_v32 = vadd.f32 %v16616_v50, %v7821_v24 }
 0xb2d   : > { %v7753_v11 = vmul.f32 %v16696_v3, %v16689_v39  ;;  %v7747_v33 = vmul.f32 %v11672_v63, %v7746_v57  ;;  %vm7759_vm8 = vweird.f32 %v16696_v3 }
 0xb2e   : > { %11675 = vrsqrt.f32 %v7629_v13  ;;  %9171 = vmatpush.bf16.msra.mxu1 %v10938_v37  ;;  %vm7760_vm10 = vmor %vm7758_vm9, %vm7759_vm8  ;;  %vm7768_vm12 = vweird.f32 %v7629_v13 }
 0xb2f   : > { %v7754_v5 = vmul.f32 %v16696_v3, %v7753_v11  ;;  %v7751_v22 = vsel %vm16706_vm7, %v11672_v63, %v7747_v33  ;;  %v10930_v63 = vld [vmem:[#allocation20 + $0x28] sm:$0xff] }
 0xb30   : > { %v7803_v28 = vmul.f32 %v7751_v22, %v16635_v58  ;;  %9122 = vmatpush.bf16.msra.mxu0 %v10930_v63  ;;  %v8067_v22 = vpop.f32.mrf.mxu0 }
 0xb31   : > { %v7755_v25 = vmul.f32 0.5, %v7754_v5 }
 0xb32   : > { %v7822_v59 = vmul.f32 %v16606_v34, %v7803_v28 }
 0xb33   : > { %v7756_v20 = vsub.f32 1.5, %v7755_v25 }
 0xb34   : > { %v11676_v62 = vpop.eup %11675  ;;  %v7841_v15 = vadd.f32 %v16616_v50, %v7822_v59 }
 0xb35   : > { %v7757_v30 = vmul.f32 %v16696_v3, %v7756_v20  ;;  %v7763_v58 = vmul.f32 %v11676_v62, %v7629_v13  ;;  %vm7769_vm11 = vweird.f32 %v11676_v62 }
 0xb36   : > { %v7851_v46 = vpack.c.bf16 %v7841_v15, %v7840_v32  ;;  %vm7770_vm13 = vmor %vm7768_vm12, %vm7769_vm11 }
 0xb37   : > { %v7764_v26 = vmul.f32 %v11676_v62, %v7763_v58  ;;  %v7761_v56 = vsel %vm7760_vm10, %v16696_v3, %v7757_v30 }
 0xb38   : > { %8089 = vmatmul.bf16.gmra.mxu0 %v7851_v46  ;;  %8138 = vmatmul.bf16.gmra.mxu1 %v7851_v46  ;;  %v7804_v52 = vmul.f32 %v7761_v56, %v16644_v53  ;;  %v7886_v53 = vld [vmem:[%s18462_s5] sm:$0xf]  ;;  %v8070_v55 = vpop.f32.mrf.mxu0  ;;  %s12125_s5 = sshra.s32 %s9366_s13, 4  ;;  %s12126_s5 = int_to_ptr.hbm [resolvable:$true] %s12125_s5 }
 0xb39   : > { %v7765_v9 = vmul.f32 0.5, %v7764_v26  ;;  %8187 = vmatmul.bf16.gmra.mxu2 %v7851_v46  ;;  %8236 = vmatmul.bf16.gmra.mxu3 %v7851_v46  ;;  %v16733_v13 = vperm.slane %v7886_v53, 0  ;;  %v16735_v10 = vperm.slane %v7886_v53, 1  ;;  %v16737_v48 = vperm.slane %v7886_v53, 2  ;;  %s12127_s7 = scalar_lea.hbm %s12126_s5, 128  ;;  %p12132_p13 = scmp.lt.s32.totalorder %s12126_s5, %s18490_s0 }
 0xb3a   : > { %v7823_v33 = vmul.f32 %v16606_v34, %v7804_v52  ;;  %v16742_v25 = vperm.slane %v7886_v53, 3  ;;  %v7597_v52 = vpop.xlane.xlu2 %7596  ;;  %p12128_p1 = scmp.ne.s32.totalorder %s12126_s5, %s12127_s7  ;;  %p12133_p0 = scmp.lt.s32.totalorder %s12131_s20, %s12127_s7 }
 0xb3b   : > { %v7766_v57 = vsub.f32 1.5, %v7765_v9  ;;  %v16740_v42 = vadd.f32 %v8065_v19, %v16733_v13  ;;  %v16745_v43 = vadd.f32 %v8114_v1, %v16735_v10  ;;  %v16760_v37 = vadd.f32 %v8067_v22, %v16733_v13 }
 0xb3c   : > { %v7842_v3 = vadd.f32 %v16616_v50, %v7823_v33  ;;  %v7614_v19 = vmul.f32 %v7597_v52, %v16503_v36  ;;  %v16806_v52 = vadd.f32 %v8070_v55, %v16733_v13  ;;  %p12129_p9 = pnand %p12128_p1, %p12505_p6  ;;  %p12134_p2 = por %p12133_p0, %p12132_p13 }
 0xb3d   : > { %v7767_v11 = vmul.f32 %v11676_v62, %v7766_v57  ;;  %v8316_v47 = vmul.f32 0.044715, %v16740_v42  ;;  %v8317_v38 = vmul.f32 0.044715, %v16745_v43  ;;  %v8320_v26 = vmul.f32 0.044715, %v16760_v37 }
 0xb3e   : > { %p12130_p12 = pneg %p12129_p9 }
 0xb3f   : > { %v7771_v16 = vsel %vm7770_vm13, %v11676_v62, %v7767_v11  ;;  %v8380_v45 = vmul.f32 %v8316_v47, %v16740_v42  ;;  %v8381_v24 = vmul.f32 %v8317_v38, %v16745_v43 }
 0xb40   : > { %v7805_v39 = vmul.f32 %v7771_v16, %v16653_v4  ;;  %v8163_v4 = vpop.f32.mrf.mxu2  ;;  %p12135_p4 = pnand %p12134_p2, %p12130_p12 }
 0xb41   : > { %v16748_v54 = vadd.f32 %v8163_v4, %v16737_v48  ;;  %v8444_v58 = vmul.f32 %v8380_v45, %v16740_v42  ;;  %v8445_v15 = vmul.f32 %v8381_v24, %v16745_v43 }
 0xb42   : > { %v7824_v5 = vmul.f32 %v16606_v34, %v7805_v39  ;;  %v8212_v34 = vpop.f32.mrf.mxu3 }
 0xb43   : > { %v16752_v60 = vadd.f32 %v8212_v34, %v16742_v25  ;;  %v8318_v35 = vmul.f32 0.044715, %v16748_v54  ;;  %v8508_v11 = vadd.f32 %v8444_v58, %v16740_v42  ;;  %v8509_v33 = vadd.f32 %v8445_v15, %v16745_v43 }
 0xb44   : > { %v7843_v7 = vadd.f32 %v16616_v50, %v7824_v5  ;;  %v8116_v50 = vpop.f32.mrf.mxu1 }
 0xb45   : > { %v8319_v63 = vmul.f32 0.044715, %v16752_v60  ;;  %v8382_v62 = vmul.f32 %v8318_v35, %v16748_v54  ;;  %v16764_v30 = vadd.f32 %v8116_v50, %v16735_v10  ;;  %v8572_v34 = vmul.f32 0.7978846, %v8508_v11 }
 0xb46   : > { %v7852_v41 = vpack.c.bf16 %v7843_v7, %v7842_v3  ;;  %v8384_v3 = vmul.f32 %v8320_v26, %v16760_v37  ;;  %v8573_v47 = vmul.f32 0.7978846, %v8509_v33  ;;  %v16796_v35 = vadd.f32 1e-12, %v7614_v19  ;;  %v10945_v19 = vld [vmem:[#allocation20 + $0xa0] sm:$0xff] }
 0xb47   : > { %v8383_v32 = vmul.f32 %v8319_v63, %v16752_v60  ;;  %v8446_v56 = vmul.f32 %v8382_v62, %v16748_v54  ;;  %v8321_v9 = vmul.f32 0.044715, %v16764_v30  ;;  %11677 = vtanh.f32 %v8572_v34  ;;  %9221 = vmatpush.bf16.msra.mxu2 %v10945_v19 }
 0xb48   : > { %8094 = vmatmul.bf16.gmra.mxu0 %v7852_v41  ;;  %8143 = vmatmul.bf16.gmra.mxu1 %v7852_v41  ;;  %v8165_v28 = vpop.f32.mrf.mxu2  ;;  %v8448_v38 = vmul.f32 %v8384_v3, %v16760_v37  ;;  %11679 = vtanh.f32 %v8573_v47  ;;  %vm7778_vm14 = vweird.f32 %v16796_v35 }
 0xb49   : > { %8192 = vmatmul.bf16.gmra.mxu2 %v7852_v41  ;;  %8241 = vmatmul.bf16.gmra.mxu3 %v7852_v41  ;;  %v16771_v46 = vadd.f32 %v8165_v28, %v16737_v48  ;;  %v8447_v16 = vmul.f32 %v8383_v32, %v16752_v60  ;;  %v16786_v41 = vpop.f32.mrf.mxu0  ;;  %v8510_v1 = vadd.f32 %v8446_v56, %v16748_v54  ;;  %11681 = vrsqrt.f32 %v16796_v35 }
 0xb4a   : > { %v8214_v20 = vpop.f32.mrf.mxu3  ;;  %v8385_v53 = vmul.f32 %v8321_v9, %v16764_v30  ;;  %v8512_v58 = vadd.f32 %v8448_v38, %v16760_v37  ;;  %v10937_v38 = vld [vmem:[#allocation20 + $0x60] sm:$0xff] }
 0xb4b   : > { %v16778_v39 = vadd.f32 %v8214_v20, %v16742_v25  ;;  %v8322_v7 = vmul.f32 0.044715, %v16771_v46  ;;  %v8511_v22 = vadd.f32 %v8447_v16, %v16752_v60  ;;  %v8574_v20 = vmul.f32 0.7978846, %v8510_v1  ;;  %v10929_v1 = vld [vmem:[#allocation20 + $0x20] sm:$0xff]  ;;  %9172 = vmatpush.bf16.msra.mxu1 %v10937_v38 }
 0xb4c   : > { %v8119_v59 = vpop.f32.mrf.mxu1  ;;  %v8449_v45 = vmul.f32 %v8385_v53, %v16764_v30  ;;  %v8576_v33 = vmul.f32 0.7978846, %v8512_v58  ;;  %v10953_v53 = vld [vmem:[#allocation20 + $0xe0] sm:$0xff]  ;;  %9123 = vmatpush.bf16.msra.mxu0 %v10929_v1  ;;  %v16836_v58 = vmul.f32 0.5, %v16764_v30 }
 0xb4d   : > { %v8323_v50 = vmul.f32 0.044715, %v16778_v39  ;;  %v8386_v28 = vmul.f32 %v8322_v7, %v16771_v46  ;;  %v8575_v63 = vmul.f32 0.7978846, %v8511_v22  ;;  %11683 = vtanh.f32 %v8574_v20  ;;  %v11678_v16 = vpop.eup %11677  ;;  %9270 = vmatpush.bf16.msra.mxu3 %v10953_v53 }
 0xb4e   : > { %v8513_v15 = vadd.f32 %v8449_v45, %v16764_v30  ;;  %v16810_v7 = vadd.f32 %v8119_v59, %v16735_v10  ;;  %v11680_v34 = vpop.eup %11679  ;;  %v16813_v22 = vmul.f32 0.5, %v16740_v42  ;;  %v16824_v59 = vmul.f32 0.5, %v16748_v54 }
 0xb4f   : > { %v8387_v24 = vmul.f32 %v8323_v50, %v16778_v39  ;;  %v8450_v32 = vmul.f32 %v8386_v28, %v16771_v46  ;;  %11685 = vtanh.f32 %v8575_v63  ;;  %v16816_v50 = vmul.f32 0.5, %v16745_v43  ;;  %v16821_v28 = vpop.eup %11681  ;;  %v10944_v43 = vld [vmem:[#allocation20 + $0x98] sm:$0xff] }
 0xb50   : > { %v8168_v57 = vpop.f32.mrf.mxu2  ;;  %v8577_v55 = vmul.f32 0.7978846, %v8513_v15  ;;  %v16827_v20 = vmul.f32 0.5, %v16752_v60  ;;  %v16830_v45 = vmul.f32 0.5, %v16760_v37  ;;  %v10928_v63 = vld [vmem:[#allocation20 + $0x18] sm:$0xff]  ;;  %v16839_v54 = vmul.f32 0.5, %v16771_v46  ;;  %9222 = vmatpush.bf16.msra.mxu2 %v10944_v43 }
 0xb51   : > { %v8451_v56 = vmul.f32 %v8387_v24, %v16778_v39  ;;  %v8075_v9 = vpop.f32.mrf.mxu0  ;;  %v8514_v3 = vadd.f32 %v8450_v32, %v16771_v46  ;;  %v16819_v47 = vadd.f32 %v8168_v57, %v16737_v48  ;;  %v16833_v24 = vadd.f32 1.0, %v11678_v16  ;;  %v10952_v37 = vld [vmem:[#allocation20 + $0xd8] sm:$0xff]  ;;  %9124 = vmatpush.bf16.msra.mxu0 %v10928_v63 }
 0xb52   : > { %v16781_v5 = vpop.f32.mrf.mxu3  ;;  %v8324_v60 = vmul.f32 0.044715, %v16806_v52  ;;  %v16842_v15 = vadd.f32 1.0, %v11680_v34  ;;  %11687 = vtanh.f32 %v8576_v33  ;;  %v8325_v19 = vmul.f32 0.044715, %v16810_v7  ;;  %9271 = vmatpush.bf16.msra.mxu3 %v10952_v37 }
 0xb53   : > { %v8515_v42 = vadd.f32 %v8451_v56, %v16778_v39  ;;  %v11684_v57 = vpop.eup %11683  ;;  %v8578_v56 = vmul.f32 0.7978846, %v8514_v3  ;;  %11689 = vtanh.f32 %v8577_v55  ;;  %v16846_v16 = vmul.f32 0.5, %v16778_v39 }
 0xb54   : > { %v16790_v4 = vpop.f32.mrf.mxu1  ;;  %v8326_v30 = vmul.f32 0.044715, %v16819_v47  ;;  %v7773_v46 = vmul.f32 %v16821_v28, %v16796_v35  ;;  %v16851_v53 = vadd.f32 1.0, %v11684_v57  ;;  %v16855_v34 = vadd.f32 %v16781_v5, %v16742_v25  ;;  %v10936_v5 = vld [vmem:[#allocation20 + $0x58] sm:$0xff] }
 0xb55   : > { %v11686_v32 = vpop.eup %11685  ;;  %v8579_v38 = vmul.f32 0.7978846, %v8515_v42  ;;  %v16859_v33 = vadd.f32 %v16786_v41, %v16733_v13  ;;  %v8388_v3 = vmul.f32 %v8324_v60, %v16806_v52  ;;  %v16866_v55 = vadd.f32 %v16790_v4, %v16735_v10  ;;  %9173 = vmatpush.bf16.msra.mxu1 %v10936_v5 }
 0xb56   : > { %v16861_v39 = vadd.f32 1.0, %v11686_v32  ;;  %11691 = vtanh.f32 %v8578_v56  ;;  %v8389_v41 = vmul.f32 %v8325_v19, %v16810_v7  ;;  %v16876_v63 = vadd.f32 %v8075_v9, %v16733_v13 }
 0xb57   : > { %v16879_v32 = vmul.f32 %v8326_v30, %v16819_v47  ;;  %v7774_v4 = vmul.f32 %v16821_v28, %v7773_v46  ;;  %11693 = vtanh.f32 %v8579_v38  ;;  %v8327_v9 = vmul.f32 0.044715, %v16855_v34 }
 0xb58   : > { %v8170_v62 = vpop.f32.mrf.mxu2  ;;  %v8328_v18 = vmul.f32 0.044715, %v16859_v33  ;;  %v8329_v46 = vmul.f32 0.044715, %v16866_v55  ;;  %v8332_v38 = vmul.f32 0.044715, %v16876_v63  ;;  %vm7779_vm0 = vweird.f32 %v16821_v28 }
 0xb59   : > { %v16869_v42 = vadd.f32 %v8170_v62, %v16737_v48  ;;  %v8077_v60 = vpop.f32.mrf.mxu0  ;;  %v16909_v49 = vmul.f32 %v8327_v9, %v16855_v34  ;;  %v8452_v2 = vmul.f32 %v8388_v3, %v16806_v52  ;;  %v16961_v3 = vmul.f32 %v16842_v15, %v16816_v50  ;;  %vm16987_vm1 = vmor %vm7778_vm14, %vm7779_vm0 }
 0xb5a   : > { %v8219_v26 = vpop.f32.mrf.mxu3 }
 0xb5b   : > { %v16873_v43 = vadd.f32 %v8219_v26, %v16742_v25  ;;  %v11688_v26 = vpop.eup %11687  ;;  %v8516_v15 = vadd.f32 %v8452_v2, %v16806_v52 }
 0xb5c   : > { %v8124_v11 = vpop.f32.mrf.mxu1  ;;  %v11690_v21 = vpop.eup %11689  ;;  %v8704_v51 = vadd.f32 1.0, %v11688_v26 }
 0xb5d   : > { %v16883_v62 = vadd.f32 %v8124_v11, %v16735_v10  ;;  %v8330_v11 = vmul.f32 0.044715, %v16869_v42  ;;  %v8331_v5 = vmul.f32 0.044715, %v16873_v43  ;;  %v8705_v27 = vadd.f32 1.0, %v11690_v21 }
 0xb5e   : > { %v16931_v6 = vmul.f32 %v8704_v51, %v16830_v45 }
 0xb5f   : > { %v8395_v9 = vmul.f32 %v8331_v5, %v16873_v43  ;;  %v16937_v5 = vmul.f32 %v8705_v27, %v16836_v58 }
 0xb60   : > { %v8173_v1 = vpop.f32.mrf.mxu2 }
 0xb61   : > { %v16886_v37 = vadd.f32 %v8173_v1, %v16737_v48  ;;  %v16897_v1 = vadd.f32 %v8077_v60, %v16733_v13  ;;  %v8392_v60 = vmul.f32 %v8328_v18, %v16859_v33  ;;  %v16921_v18 = vmul.f32 %v8332_v38, %v16876_v63 }
 0xb62   : > { %v8222_v57 = vpop.f32.mrf.mxu3 }
 0xb63   : > { %v16894_v29 = vadd.f32 %v8222_v57, %v16742_v25  ;;  %v8334_v14 = vmul.f32 0.044715, %v16886_v37  ;;  %v11692_v57 = vpop.eup %11691  ;;  %v8336_v23 = vmul.f32 0.044715, %v16897_v1  ;;  %v8456_v51 = vmul.f32 %v8392_v60, %v16859_v33 }
 0xb64   : > { %v8126_v56 = vpop.f32.mrf.mxu1  ;;  %v11694_v8 = vpop.eup %11693  ;;  %v8706_v38 = vadd.f32 1.0, %v11692_v57 }
 0xb65   : > { %v16902_v17 = vadd.f32 %v8126_v56, %v16735_v10  ;;  %v8393_v56 = vmul.f32 %v8329_v46, %v16866_v55 }
 0xb66   : > { %v16974_v50 = vmul.f32 %v8706_v38, %v16839_v54  ;;  %v10951_v38 = vld [vmem:[#allocation20 + $0xd0] sm:$0xff]  ;;  %v10942_v54 = vld [vmem:[#allocation20 + $0x88] sm:$0xff] }
 0xb67   : > { %v8337_v21 = vmul.f32 0.044715, %v16902_v17  ;;  %v8457_v60 = vmul.f32 %v8393_v56, %v16866_v55  ;;  %v8707_v56 = vadd.f32 1.0, %v11694_v8  ;;  %9272 = vmatpush.bf16.msra.mxu3 %v10951_v38 }
 0xb68   : > { %v8175_v26 = vpop.f32.mrf.mxu2 }
 0xb69   : > { %v16934_v44 = vadd.f32 %v8175_v26, %v16737_v48  ;;  %v16954_v27 = vmul.f32 %v8337_v21, %v16902_v17  ;;  %v10935_v26 = vld [vmem:[#allocation20 + $0x50] sm:$0xff] }
 0xb6a   : > { %v8224_v61 = vpop.f32.mrf.mxu3  ;;  %v10943_v21 = vld [vmem:[#allocation20 + $0x90] sm:$0xff]  ;;  %9174 = vmatpush.bf16.msra.mxu1 %v10935_v26 }
 0xb6b   : > { %v16957_v58 = vadd.f32 %v8224_v61, %v16742_v25  ;;  %v8454_v61 = vmul.f32 %v16879_v32, %v16819_v47  ;;  %9223 = vmatpush.bf16.msra.mxu2 %v10943_v21  ;;  %v10934_v21 = vld [vmem:[#allocation20 + $0x48] sm:$0xff] }
 0xb6d   : > { %v8339_v2 = vmul.f32 0.044715, %v16957_v58 }
 0xb6e   : > { %9175 = vmatpush.bf16.msra.mxu1 %v10934_v21  ;;  %v11810_v21 = vld [vmem:[#allocation17] ss:$0 sm:$0xff] }
 0xb6f   : > { %9224 = vmatpush.bf16.msra.mxu2 %v10942_v54 }
 0xb83   : > { %v7599_v19 = vpop.xlane.xlu0 %7598 }
 0xb84   : > { %v7615_v30 = vmul.f32 %v7599_v19, %v16503_v36  ;;  %v7775_v36 = vmul.f32 0.5, %v7774_v4  ;;  %v8333_v19 = vmul.f32 0.044715, %v16883_v62  ;;  %v8394_v4 = vmul.f32 %v8330_v11, %v16869_v42 }
 0xb85   : > { %v16928_v11 = vmul.f32 %v8334_v14, %v16886_v37  ;;  %v16948_v14 = vmul.f32 %v16833_v24, %v16813_v22  ;;  %v16980_v24 = vmul.f32 %v16851_v53, %v16824_v59  ;;  %v16997_v59 = vmul.f32 0.5, %v16806_v52 }
 0xb86   : > { %v16904_v40 = vadd.f32 1e-12, %v7615_v30  ;;  %v8335_v30 = vmul.f32 0.044715, %v16894_v29  ;;  %v7776_v0 = vsub.f32 1.5, %v7775_v36  ;;  %v16925_v46 = vmul.f32 %v8333_v19, %v16883_v62 }
 0xb87   : > { %v16944_v19 = vmul.f32 %v8336_v23, %v16897_v1  ;;  %18463 = vst [vmem:[#allocation147_spill] sm:$0xff] %v16948_v14  ;;  %v8453_v23 = vmul.f32 %v8389_v41, %v16810_v7  ;;  %v10927_v41 = vld [vmem:[#allocation20 + $0x10] sm:$0xff]  ;;  %v8520_v14 = vadd.f32 %v8456_v51, %v16859_v33  ;;  %v8521_v51 = vadd.f32 %v8457_v60, %v16866_v55 }
 0xb88   : > { %11695 = vrsqrt.f32 %v16904_v40  ;;  %v16941_v36 = vmul.f32 %v8335_v30, %v16894_v29  ;;  %v7777_v57 = vmul.f32 %v16821_v28, %v7776_v0  ;;  %v8338_v30 = vmul.f32 0.044715, %v16934_v44  ;;  %9125 = vmatpush.bf16.msra.mxu0 %v10927_v41 }
 0xb89   : > { %v8517_v8 = vadd.f32 %v8453_v23, %v16810_v7  ;;  %v8830_v52 = vpack.c.bf16 %v16974_v50, %v16980_v24  ;;  %v8458_v23 = vmul.f32 %v8394_v4, %v16869_v42  ;;  %v8455_v60 = vmul.f32 %v16909_v49, %v16855_v34 }
 0xb8a   : > { %v7781_v35 = vsel %vm16987_vm1, %v16821_v28, %v7777_v57  ;;  %v8584_v57 = vmul.f32 0.7978846, %v8520_v14  ;;  %v8459_v41 = vmul.f32 %v8395_v9, %v16873_v43  ;;  %vm7788_vm3 = vweird.f32 %v16904_v40 }
 0xb8b   : > { %v7806_v32 = vmul.f32 %v7781_v35, %v16662_v31  ;;  %v8585_v4 = vmul.f32 0.7978846, %v8521_v51  ;;  %v17024_v14 = vmul.f32 %v8339_v2, %v16957_v58  ;;  %v8522_v9 = vadd.f32 %v8458_v23, %v16869_v42  ;;  %v11809_v35 = vld [vmem:[#allocation16] ss:$0 sm:$0xff]  ;;  %v10933_v51 = vld [vmem:[#allocation20 + $0x40] sm:$0xff] }
 0xb8c   : > { %v8519_v2 = vadd.f32 %v8455_v60, %v16855_v34  ;;  %v8464_v38 = vmul.f32 %v16944_v19, %v16897_v1  ;;  %v10949_v23 = vld [vmem:[#allocation20 + $0xc0] sm:$0xff]  ;;  %v17045_v60 = vmul.f32 0.5, %v16810_v7  ;;  %9176 = vmatpush.bf16.msra.mxu1 %v10933_v51  ;;  %v8462_v51 = vmul.f32 %v16928_v11, %v16886_v37 }
 0xb8d   : > { %v17083_v11 = vmul.f32 0.5, %v16897_v1 }
 0xb8e   : > { %v16951_v45 = vpop.eup %11695 }
 0xb8f   : > { %v7783_v22 = vmul.f32 %v16951_v45, %v16904_v40  ;;  %vm7789_vm2 = vweird.f32 %v16951_v45 }
 0xb90   : > { %vm7790_vm15 = vmor %vm7788_vm3, %vm7789_vm2 }
 0xb91   : > { %v7784_v0 = vmul.f32 %v16951_v45, %v7783_v22  ;;  %v16994_v22 = vmul.f32 %v16861_v39, %v16827_v20  ;;  %v17007_v20 = vmul.f32 %v8338_v30, %v16934_v44  ;;  %v8580_v39 = vmul.f32 0.7978846, %v8516_v15 }
 0xb92   : > { %v17017_v30 = vmul.f32 %v8707_v56, %v16846_v16  ;;  %v8518_v15 = vadd.f32 %v8454_v61, %v16819_v47  ;;  %v10926_v16 = vld [vmem:[#allocation20 + $0x8] sm:$0xff]  ;;  %v17031_v56 = vmul.f32 0.5, %v16859_v33  ;;  %v10925_v33 = vld [vmem:[#allocation20] sm:$0xff] }
 0xb93   : > { %v7785_v53 = vmul.f32 0.5, %v7784_v0  ;;  %v8581_v0 = vmul.f32 0.7978846, %v8517_v8  ;;  %11697 = vtanh.f32 %v8580_v39  ;;  %v10950_v61 = vld [vmem:[#allocation20 + $0xc8] sm:$0xff]  ;;  %9126 = vmatpush.bf16.msra.mxu0 %v10926_v16  ;;  %v8523_v39 = vadd.f32 %v8459_v41, %v16873_v43 }
 0xb94   : > { %11699 = vtanh.f32 %v8584_v57  ;;  %9273 = vmatpush.bf16.msra.mxu3 %v10950_v61  ;;  %v8582_v19 = vmul.f32 0.7978846, %v8518_v15  ;;  %v17050_v41 = vmul.f32 0.5, %v16866_v55  ;;  %v8583_v16 = vmul.f32 0.7978846, %v8519_v2 }
 0xb95   : > { %v7786_v28 = vsub.f32 1.5, %v7785_v53  ;;  %v17026_v49 = vpop.f32.mrf.mxu0  ;;  %v17028_v31 = vpop.f32.mrf.mxu1  ;;  %v7825_v53 = vmul.f32 %v11809_v35, %v7806_v32  ;;  %11701 = vtanh.f32 %v8581_v0  ;;  %v8586_v32 = vmul.f32 0.7978846, %v8522_v9 }
 0xb96   : > { %11703 = vtanh.f32 %v8585_v4  ;;  %v8465_v0 = vmul.f32 %v16954_v27, %v16902_v17  ;;  %v8528_v4 = vadd.f32 %v8464_v38, %v16897_v1  ;;  %v8587_v7 = vmul.f32 0.7978846, %v8523_v39 }
 0xb97   : > { %v7787_v26 = vmul.f32 %v16951_v45, %v7786_v28  ;;  %v8831_v28 = vpack.c.bf16 %v17017_v30, %v16994_v22  ;;  %9127 = vmatpush.bf16.msra.mxu0 %v10925_v33  ;;  %v8461_v9 = vmul.f32 %v16925_v46, %v16883_v62  ;;  %11705 = vtanh.f32 %v8582_v19 }
 0xb98   : > { %9274 = vmatpush.bf16.msra.mxu3 %v10949_v23  ;;  %v8466_v61 = vmul.f32 %v17007_v20, %v16934_v44  ;;  %11707 = vtanh.f32 %v8586_v32  ;;  %v17069_v46 = vmul.f32 0.5, %v16855_v34  ;;  %v8592_v33 = vmul.f32 0.7978846, %v8528_v4 }
 0xb99   : > { %v7791_v40 = vsel %vm7790_vm15, %v16951_v45, %v7787_v26  ;;  %v10941_v45 = vld [vmem:[#allocation20 + $0x80] sm:$0xff]  ;;  %v17053_v26 = vmul.f32 0.5, %v16819_v47  ;;  %v11698_v15 = vpop.eup %11697  ;;  %v17061_v47 = vmul.f32 0.5, %v16869_v42  ;;  %v17073_v42 = vmul.f32 0.5, %v16873_v43 }
 0xb9a   : > { %v7807_v8 = vmul.f32 %v7791_v40, %v16675_v12  ;;  %v8460_v12 = vmul.f32 %v16921_v18, %v16876_v63  ;;  %v7844_v18 = vadd.f32 %v11810_v21, %v7825_v53  ;;  %v11700_v27 = vpop.eup %11699  ;;  %9225 = vmatpush.bf16.msra.mxu2 %v10941_v45  ;;  %11709 = vtanh.f32 %v8583_v16 }
 0xb9b   : > { %v11702_v2 = vpop.eup %11701  ;;  %v8708_v45 = vadd.f32 1.0, %v11698_v15  ;;  %11711 = vtanh.f32 %v8587_v7  ;;  %v17078_v34 = vmul.f32 0.5, %v16876_v63  ;;  %v8525_v23 = vadd.f32 %v8461_v9, %v16883_v62 }
 0xb9c   : > { %v7826_v57 = vmul.f32 %v11809_v35, %v7807_v8  ;;  %v17058_v54 = vpop.f32.mrf.mxu2  ;;  %v8524_v55 = vadd.f32 %v8460_v12, %v16876_v63  ;;  %v17066_v38 = vpop.f32.mrf.mxu3  ;;  %v8529_v35 = vadd.f32 %v8465_v0, %v16902_v17  ;;  %v8712_v43 = vadd.f32 1.0, %v11700_v27 }
 0xb9d   : > { %v11704_v53 = vpop.eup %11703  ;;  %v8082_v20 = vpop.f32.mrf.mxu0  ;;  %v8709_v19 = vadd.f32 1.0, %v11702_v2  ;;  %v17086_v0 = vmul.f32 0.5, %v16883_v62  ;;  %11713 = vtanh.f32 %v8592_v33  ;;  %v17089_v63 = vmul.f32 0.5, %v16902_v17 }
 0xb9e   : > { %v7845_v40 = vadd.f32 %v11810_v21, %v7826_v57  ;;  %v8131_v39 = vpop.f32.mrf.mxu1  ;;  %v8588_v12 = vmul.f32 0.7978846, %v8524_v55  ;;  %v8530_v57 = vadd.f32 %v8466_v61, %v16934_v44  ;;  %v8713_v32 = vadd.f32 1.0, %v11704_v53  ;;  %v11706_v4 = vpop.eup %11705 }
 0xb9f   : > { %v8593_v16 = vmul.f32 0.7978846, %v8529_v35  ;;  %v17092_v15 = vmul.f32 0.5, %v16886_v37  ;;  %v8526_v21 = vadd.f32 %v8462_v51, %v16886_v37  ;;  %v8589_v1 = vmul.f32 0.7978846, %v8525_v23 }
 0xba0   : > { %v7853_v8 = vpack.c.bf16 %v7845_v40, %v7844_v18  ;;  %v11708_v18 = vpop.eup %11707  ;;  %v17096_v40 = vmul.f32 %v8708_v45, %v16997_v59  ;;  %v17099_v7 = vmul.f32 0.5, %v16934_v44  ;;  %v8467_v62 = vmul.f32 %v17024_v14, %v16957_v58 }
 0xba1   : > { %v11710_v9 = vpop.eup %11709  ;;  %v17104_v17 = vmul.f32 %v8712_v43, %v17031_v56  ;;  %v17107_v27 = vmul.f32 %v8709_v19, %v17045_v60  ;;  %11715 = vtanh.f32 %v8588_v12  ;;  %v8594_v37 = vmul.f32 0.7978846, %v8530_v57 }
 0xba2   : > { %8099 = vmatmul.bf16.gmra.mxu0 %v7853_v8  ;;  %8148 = vmatmul.bf16.gmra.mxu1 %v7853_v8  ;;  %v11712_v55 = vpop.eup %11711  ;;  %v17111_v59 = vadd.f32 %v17026_v49, %v16733_v13  ;;  %v17114_v44 = vmul.f32 %v8713_v32, %v17050_v41  ;;  %v8710_v61 = vadd.f32 1.0, %v11706_v4  ;;  %11717 = vtanh.f32 %v8593_v16 }
 0xba3   : > { %8197 = vmatmul.bf16.gmra.mxu2 %v7853_v8  ;;  %8246 = vmatmul.bf16.gmra.mxu3 %v7853_v8  ;;  %v17118_v14 = vadd.f32 %v17028_v31, %v16735_v10  ;;  %v8714_v2 = vadd.f32 1.0, %v11708_v18  ;;  %v8590_v60 = vmul.f32 0.7978846, %v8526_v21  ;;  %v8463_v8 = vmul.f32 %v16941_v36, %v16894_v29  ;;  %v11714_v33 = vpop.eup %11713 }
 0xba4   : > { %v8180_v56 = vpop.f32.mrf.mxu2  ;;  %v17123_v35 = vadd.f32 %v8082_v20, %v16733_v13  ;;  %v17125_v49 = vpop.f32.mrf.mxu3  ;;  %v8711_v53 = vadd.f32 1.0, %v11710_v9  ;;  %11719 = vtanh.f32 %v8589_v1  ;;  %v8531_v41 = vadd.f32 %v8467_v62, %v16957_v58 }
 0xba5   : > { %v17129_v51 = vadd.f32 %v8131_v39, %v16735_v10  ;;  %v8832_v31 = vpack.c.bf16 %v17104_v17, %v17096_v40  ;;  %v8715_v45 = vadd.f32 1.0, %v11712_v55  ;;  %11721 = vtanh.f32 %v8594_v37  ;;  %v8085_v23 = vpop.f32.mrf.mxu0 }
 0xba6   : > { %v8340_v36 = vmul.f32 0.044715, %v17111_v59  ;;  %v17136_v20 = vadd.f32 %v17058_v54, %v16737_v48  ;;  %v17138_v43 = vpop.f32.mrf.mxu1  ;;  %v8833_v19 = vpack.c.bf16 %v17114_v44, %v17107_v27  ;;  %v17143_v39 = vmul.f32 %v8710_v61, %v17053_v26 }
 0xba7   : > { %v11716_v12 = vpop.eup %11715  ;;  %v8341_v57 = vmul.f32 0.044715, %v17118_v14  ;;  %v17147_v32 = vmul.f32 %v8714_v2, %v17061_v47  ;;  %11723 = vtanh.f32 %v8590_v60  ;;  %v8527_v16 = vadd.f32 %v8463_v8, %v16894_v29 }
 0xba8   : > { %v11718_v54 = vpop.eup %11717  ;;  %v8344_v4 = vmul.f32 0.044715, %v17123_v35  ;;  %v17152_v21 = vmul.f32 %v8711_v53, %v17069_v46  ;;  %v8720_v18 = vadd.f32 1.0, %v11714_v33  ;;  %v8595_v1 = vmul.f32 0.7978846, %v8531_v41  ;;  %v18466_v41 = vld [vmem:[#allocation147_spill] sm:$0xff] }
 0xba9   : > { %v17156_v26 = vadd.f32 %v17066_v38, %v16742_v25  ;;  %v8345_v62 = vmul.f32 0.044715, %v17129_v51  ;;  %v17160_v47 = vmul.f32 %v8715_v45, %v17073_v42  ;;  %v17163_v9 = vmul.f32 0.5, %v16894_v29 }
 0xbaa   : > { %v11720_v37 = vpop.eup %11719  ;;  %v8404_v55 = vmul.f32 %v8340_v36, %v17111_v59  ;;  %v8342_v46 = vmul.f32 0.044715, %v17136_v20  ;;  %v8716_v61 = vadd.f32 1.0, %v11716_v12  ;;  %v17168_v2 = vmul.f32 0.5, %v16957_v58 }
 0xbab   : > { %v11722_v60 = vpop.eup %11721  ;;  %v8405_v38 = vmul.f32 %v8341_v57, %v17118_v14  ;;  %v17172_v8 = vadd.f32 %v8180_v56, %v16737_v48  ;;  %v8721_v42 = vadd.f32 1.0, %v11718_v54  ;;  %v8591_v53 = vmul.f32 0.7978846, %v8527_v16 }
 0xbac   : > { %v8408_v29 = vmul.f32 %v8344_v4, %v17123_v35  ;;  %v18467_v33 = vpack.c.bf16 %v16931_v6, %v18466_v41  ;;  %v18468_v45 = vpack.c.bf16 %v16937_v5, %v16961_v3  ;;  %v8834_v58 = vpack.c.bf16 %v17147_v32, %v17143_v39  ;;  %v8183_v16 = vpop.f32.mrf.mxu2 }
 0xbad   : > { %v17184_v36 = vmul.f32 %v8720_v18, %v17083_v11  ;;  %11725 = vtanh.f32 %v8595_v1  ;;  %v11724_v56 = vpop.eup %11723  ;;  %v8343_v12 = vmul.f32 0.044715, %v17156_v26  ;;  %v8409_v57 = vmul.f32 %v8345_v62, %v17129_v51  ;;  %v17197_v11 = vpop.f32.mrf.mxu3 }
 0xbae   : > { %v8835_v6 = vpack.c.bf16 %v17160_v47, %v17152_v21  ;;  %v8717_v5 = vadd.f32 1.0, %v11720_v37  ;;  %v8406_v3 = vmul.f32 %v8342_v46, %v17136_v20  ;;  %v8087_v54 = vpop.f32.mrf.mxu0  ;;  %v17200_v4 = vmul.f32 %v8716_v61, %v17078_v34 }
 0xbaf   : > { %v8722_v18 = vadd.f32 1.0, %v11722_v60  ;;  %v8468_v24 = vmul.f32 %v8404_v55, %v17111_v59  ;;  %v8346_v50 = vmul.f32 0.044715, %v17172_v8  ;;  %v17205_v22 = vmul.f32 %v8721_v42, %v17089_v63 }
 0xbb0   : > { %11727 = vtanh.f32 %v8591_v53  ;;  %v17210_v30 = vadd.f32 %v17125_v49, %v16742_v25  ;;  %v8718_v1 = vadd.f32 1.0, %v11724_v56  ;;  %v8472_v62 = vmul.f32 %v8408_v29, %v17123_v35 }
 0xbb1   : > { %v8407_v37 = vmul.f32 %v8343_v12, %v17156_v26  ;;  %v17217_v55 = vadd.f32 %v8087_v54, %v16733_v13  ;;  %v17220_v63 = vmul.f32 %v8717_v5, %v17086_v0  ;;  %v8473_v46 = vmul.f32 %v8409_v57, %v17129_v51 }
 0xbb2   : > { %9128 = vmatmul.bf16.vlgmr.msra.gmra.mxu0 %v18467_v33  ;;  %9177 = vmatmul.bf16.vlgmr.msra.gmra.mxu1 %v18468_v45  ;;  %v17224_v49 = vadd.f32 %v8085_v23, %v16733_v13  ;;  %v17227_v60 = vmul.f32 %v8722_v18, %v17099_v7  ;;  %v8470_v42 = vmul.f32 %v8406_v3, %v17136_v20  ;;  %v8347_v23 = vmul.f32 0.044715, %v17210_v30 }
 0xbb3   : > { %9226 = vmatmul.bf16.vlgmr.msra.gmra.mxu2 %v8830_v52  ;;  %9275 = vmatmul.bf16.vlgmr.msra.gmra.mxu3 %v8831_v28  ;;  %v8469_v52 = vmul.f32 %v8405_v38, %v17118_v14  ;;  %v8136_v28 = vpop.f32.mrf.mxu1  ;;  %v11726_v61 = vpop.eup %11725  ;;  %v8532_v38 = vadd.f32 %v8468_v24, %v17111_v59  ;;  %v8410_v53 = vmul.f32 %v8346_v50, %v17172_v8  ;;  %v8352_v12 = vmul.f32 0.044715, %v17217_v55 }
 0xbb4   : > { %v17233_v29 = vadd.f32 %v8136_v28, %v16735_v10  ;;  %v17241_v7 = vadd.f32 %v17138_v43, %v16735_v10  ;;  %v17244_v33 = vmul.f32 %v8718_v1, %v17092_v15  ;;  %v8536_v45 = vadd.f32 %v8472_v62, %v17123_v35 }
 0xbb5   : > { %v8533_v41 = vadd.f32 %v8469_v52, %v17118_v14  ;;  %v8723_v57 = vadd.f32 1.0, %v11726_v61  ;;  %v8537_v5 = vadd.f32 %v8473_v46, %v17129_v51  ;;  %v8471_v3 = vmul.f32 %v8407_v37, %v17156_v26  ;;  %v8185_v52 = vpop.f32.mrf.mxu2  ;;  %v8234_v46 = vpop.f32.mrf.mxu3 }
 0xbb6   : > { %v11728_v56 = vpop.eup %11727  ;;  %v8348_v54 = vmul.f32 0.044715, %v17224_v49  ;;  %v8596_v43 = vmul.f32 0.7978846, %v8532_v38  ;;  %v8534_v24 = vadd.f32 %v8470_v42, %v17136_v20  ;;  %v17255_v15 = vadd.f32 %v8183_v16, %v16737_v48 }
 0xbb7   : > { %v8353_v50 = vmul.f32 0.044715, %v17233_v29  ;;  %v8597_v28 = vmul.f32 0.7978846, %v8533_v41  ;;  %v8474_v1 = vmul.f32 %v8410_v53, %v17172_v8  ;;  %v8411_v62 = vmul.f32 %v8347_v23, %v17210_v30 }
 0xbb8   : > { %v8349_v37 = vmul.f32 0.044715, %v17241_v7  ;;  %v8719_v61 = vadd.f32 1.0, %v11728_v56  ;;  %v8600_v0 = vmul.f32 0.7978846, %v8536_v45  ;;  %v8416_v38 = vmul.f32 %v8352_v12, %v17217_v55 }
 0xbb9   : > { %v17263_v42 = vmul.f32 %v8723_v57, %v17168_v2  ;;  %v8601_v16 = vmul.f32 0.7978846, %v8537_v5  ;;  %v8535_v18 = vadd.f32 %v8471_v3, %v17156_v26  ;;  %v8412_v34 = vmul.f32 %v8348_v54, %v17224_v49  ;;  %v17287_v3 = vpop.f32.mrf.mxu0 }
 0xbba   : > { %v17268_v41 = vadd.f32 %v8185_v52, %v16737_v48  ;;  %11729 = vtanh.f32 %v8596_v43  ;;  %v8598_v53 = vmul.f32 0.7978846, %v8534_v24  ;;  %v8350_v23 = vmul.f32 0.044715, %v17255_v15 }
 0xbbb   : > { %v8417_v56 = vmul.f32 %v8353_v50, %v17233_v29  ;;  %11731 = vtanh.f32 %v8597_v28  ;;  %v8538_v45 = vadd.f32 %v8474_v1, %v17172_v8  ;;  %v8413_v2 = vmul.f32 %v8349_v37, %v17241_v7  ;;  %v17305_v32 = vpop.f32.mrf.mxu1 }
 0xbbc   : > { %v17281_v12 = vmul.f32 %v8719_v61, %v17163_v9  ;;  %11733 = vtanh.f32 %v8600_v0  ;;  %v8475_v57 = vmul.f32 %v8411_v62, %v17210_v30  ;;  %v17285_v5 = vadd.f32 %v8234_v46, %v16742_v25 }
 0xbbd   : > { %11735 = vtanh.f32 %v8601_v16  ;;  %v8599_v40 = vmul.f32 0.7978846, %v8535_v18  ;;  %v8480_v17 = vmul.f32 %v8416_v38, %v17217_v55  ;;  %v8354_v27 = vmul.f32 0.044715, %v17268_v41  ;;  %v17316_v52 = vpop.f32.mrf.mxu2 }
 0xbbe   : > { %v8839_v44 = vpack.c.bf16 %v17263_v42, %v17281_v12  ;;  %11737 = vtanh.f32 %v8598_v53  ;;  %v17303_v39 = vadd.f32 %v17197_v11, %v16742_v25  ;;  %v8602_v21 = vmul.f32 0.7978846, %v8538_v45 }
 0xbbf   : > { %v8481_v47 = vmul.f32 %v8417_v56, %v17233_v29  ;;  %v8539_v0 = vadd.f32 %v8475_v57, %v17210_v30  ;;  %v8355_v18 = vmul.f32 0.044715, %v17285_v5  ;;  %v8278_v11 = vmul.f32 0.5, %v17136_v20 }
 0xbc0   : > { %v11730_v9 = vpop.eup %11729  ;;  %11739 = vtanh.f32 %v8599_v40  ;;  %v8544_v43 = vadd.f32 %v8480_v17, %v17217_v55  ;;  %v8418_v50 = vmul.f32 %v8354_v27, %v17268_v41  ;;  %v17322_v28 = vmul.f32 0.5, %v17156_v26 }
 0xbc1   : > { %v11732_v54 = vpop.eup %11731  ;;  %v8351_v20 = vmul.f32 0.044715, %v17303_v39  ;;  %11741 = vtanh.f32 %v8602_v21  ;;  %v8545_v37 = vadd.f32 %v8481_v47, %v17233_v29  ;;  %v8724_v38 = vadd.f32 1.0, %v11730_v9 }
 0xbc2   : > { %9133 = vmatmul.bf16.gmra.mxu0 %v8832_v31  ;;  %9182 = vmatmul.bf16.gmra.mxu1 %v8833_v19  ;;  %v8476_v31 = vmul.f32 %v8412_v34, %v17224_v49  ;;  %v8414_v19 = vmul.f32 %v8350_v23, %v17255_v15  ;;  %v8477_v34 = vmul.f32 %v8413_v2, %v17241_v7  ;;  %v11734_v24 = vpop.eup %11733  ;;  %v8281_v16 = vmul.f32 0.5, %v17129_v51 }
 0xbc3   : > { %9231 = vmatmul.bf16.gmra.mxu2 %v8834_v58  ;;  %9280 = vmatmul.bf16.gmra.mxu3 %v8835_v6  ;;  %v8276_v58 = vmul.f32 0.5, %v17111_v59  ;;  %v8277_v6 = vmul.f32 0.5, %v17118_v14  ;;  %v17318_v59 = vpop.f32.mrf.mxu3  ;;  %v8280_v14 = vmul.f32 0.5, %v17123_v35  ;;  %v11736_v62 = vpop.eup %11735  ;;  %v8603_v53 = vmul.f32 0.7978846, %v8539_v0 }
 0xbc4   : > { %v8540_v1 = vadd.f32 %v8476_v31, %v17224_v49  ;;  %v8478_v46 = vmul.f32 %v8414_v19, %v17255_v15  ;;  %v11738_v61 = vpop.eup %11737  ;;  %v8541_v35 = vadd.f32 %v8477_v34, %v17241_v7  ;;  %v8419_v26 = vmul.f32 %v8355_v18, %v17285_v5  ;;  %v8092_v19 = vpop.f32.mrf.mxu0 }
 0xbc5   : > { %v8728_v23 = vadd.f32 1.0, %v11734_v24  ;;  %v8725_v56 = vadd.f32 1.0, %v11732_v54  ;;  %v8608_v45 = vmul.f32 0.7978846, %v8544_v43  ;;  %v8729_v2 = vadd.f32 1.0, %v11736_v62 }
 0xbc6   : > { %v8282_v57 = vmul.f32 0.5, %v17172_v8  ;;  %v8604_v40 = vmul.f32 0.7978846, %v8540_v1  ;;  %v8482_v17 = vmul.f32 %v8418_v50, %v17268_v41  ;;  %v11740_v27 = vpop.eup %11739  ;;  %v8415_v31 = vmul.f32 %v8351_v20, %v17303_v39  ;;  %v8141_v8 = vpop.f32.mrf.mxu1 }
 0xbc7   : > { %v17335_v51 = vmul.f32 0.5, %v17210_v30  ;;  %v8609_v21 = vmul.f32 0.7978846, %v8545_v37  ;;  %v8542_v47 = vadd.f32 %v8478_v46, %v17255_v15  ;;  %v17338_v9 = vmul.f32 %v8724_v38, %v8276_v58  ;;  %v11742_v54 = vpop.eup %11741  ;;  %v8190_v50 = vpop.f32.mrf.mxu2 }
 0xbc8   : > { %v8726_v0 = vadd.f32 1.0, %v11738_v61  ;;  %11743 = vtanh.f32 %v8603_v53  ;;  %v8605_v34 = vmul.f32 0.7978846, %v8541_v35  ;;  %v17340_v18 = vmul.f32 %v8728_v23, %v8280_v14 }
 0xbc9   : > { %v17342_v43 = vmul.f32 %v8725_v56, %v8277_v6  ;;  %11745 = vtanh.f32 %v8608_v45  ;;  %v8483_v24 = vmul.f32 %v8419_v26, %v17285_v5  ;;  %v17345_v30 = vmul.f32 %v8729_v2, %v8281_v16 }
 0xbca   : > { %v8727_v1 = vadd.f32 1.0, %v11740_v27  ;;  %11747 = vtanh.f32 %v8604_v40  ;;  %v8546_v58 = vadd.f32 %v8482_v17, %v17268_v41  ;;  %v17350_v62 = vadd.f32 %v17287_v3, %v16733_v13 }
 0xbcb   : > { %v8239_v20 = vpop.f32.mrf.mxu3  ;;  %11749 = vtanh.f32 %v8609_v21  ;;  %v8606_v14 = vmul.f32 0.7978846, %v8542_v47  ;;  %v8479_v6 = vmul.f32 %v8415_v31, %v17303_v39  ;;  %v18469_v37 = vpack.c.bf16 %v17184_v36, %v17200_v4 }
 0xbcc   : > { %v18470_v46 = vpack.c.bf16 %v17205_v22, %v17220_v63  ;;  %v8730_v61 = vadd.f32 1.0, %v11742_v54  ;;  %v17359_v38 = vmul.f32 %v8726_v0, %v8278_v11  ;;  %v8284_v16 = vmul.f32 0.5, %v17224_v49 }
 0xbcd   : > { %11751 = vtanh.f32 %v8605_v34  ;;  %v17364_v3 = vadd.f32 %v17305_v32, %v16735_v10  ;;  %v18471_v53 = vpack.c.bf16 %v17227_v60, %v17244_v33  ;;  %v8840_v36 = vpack.c.bf16 %v17340_v18, %v17338_v9 }
 0xbce   : > { %v17375_v4 = vmul.f32 0.5, %v17241_v7  ;;  %v8547_v22 = vadd.f32 %v8483_v24, %v17285_v5  ;;  %v11744_v63 = vpop.eup %11743  ;;  %v17379_v49 = vadd.f32 %v8092_v19, %v16733_v13  ;;  %v8841_v60 = vpack.c.bf16 %v17345_v30, %v17342_v43  ;;  %v8144_v47 = vpop.f32.mrf.mxu1 }
 0xbcf   : > { %v8288_v33 = vmul.f32 0.5, %v17217_v55  ;;  %v8610_v32 = vmul.f32 0.7978846, %v8546_v58  ;;  %v11746_v42 = vpop.eup %11745  ;;  %v8356_v12 = vmul.f32 0.044715, %v17350_v62  ;;  %11753 = vtanh.f32 %v8606_v14  ;;  %v17414_v54 = vpop.f32.mrf.mxu2 }
 0xbd0   : > { %v8543_v7 = vadd.f32 %v8479_v6, %v17303_v39  ;;  %v11748_v11 = vpop.eup %11747  ;;  %v17390_v35 = vadd.f32 %v8141_v8, %v16735_v10  ;;  %v17392_v26 = vmul.f32 %v8730_v61, %v8282_v57  ;;  %v8289_v23 = vmul.f32 0.5, %v17233_v29 }
 0xbd1   : > { %v8286_v55 = vmul.f32 0.5, %v17255_v15  ;;  %v11750_v56 = vpop.eup %11749  ;;  %v8357_v45 = vmul.f32 0.044715, %v17364_v3  ;;  %v17398_v2 = vadd.f32 %v8190_v50, %v16737_v48  ;;  %v8731_v40 = vadd.f32 1.0, %v11744_v63 }
 0xbd2   : > { %9138 = vmatmul.bf16.gmra.mxu0 %v18469_v37  ;;  %9187 = vmatmul.bf16.gmra.mxu1 %v18470_v46  ;;  %v8611_v17 = vmul.f32 0.7978846, %v8547_v22  ;;  %v8360_v31 = vmul.f32 0.044715, %v17379_v49  ;;  %v17402_v19 = vadd.f32 %v8239_v20, %v16742_v25  ;;  %v8736_v57 = vadd.f32 1.0, %v11746_v42 }
 0xbd3   : > { %9236 = vmatmul.bf16.gmra.mxu2 %v18471_v53  ;;  %9285 = vmatmul.bf16.gmra.mxu3 %v8839_v44  ;;  %v17386_v44 = vmul.f32 %v8727_v1, %v17322_v28  ;;  %v8095_v28 = vpop.f32.mrf.mxu0  ;;  %v11752_v27 = vpop.eup %11751  ;;  %11755 = vtanh.f32 %v8610_v32  ;;  %v8420_v29 = vmul.f32 %v8356_v12, %v17350_v62  ;;  %v17407_v15 = vadd.f32 %v17316_v52, %v16737_v48 }
 0xbd4   : > { %v17411_v21 = vadd.f32 %v17318_v59, %v16742_v25  ;;  %v8607_v0 = vmul.f32 0.7978846, %v8543_v7  ;;  %v8361_v34 = vmul.f32 0.044715, %v17390_v35  ;;  %v8732_v8 = vadd.f32 1.0, %v11748_v11  ;;  %v17419_v20 = vpop.f32.mrf.mxu3 }
 0xbd5   : > { %v8737_v24 = vadd.f32 1.0, %v11750_v56  ;;  %v8290_v50 = vmul.f32 0.5, %v17268_v41  ;;  %v11754_v1 = vpop.eup %11753  ;;  %v8421_v58 = vmul.f32 %v8357_v45, %v17364_v3  ;;  %v8362_v52 = vmul.f32 0.044715, %v17398_v2 }
 0xbd6   : > { %v8795_v59 = vmul.f32 %v8731_v40, %v17335_v51  ;;  %v8733_v14 = vadd.f32 1.0, %v11752_v27  ;;  %v8424_v6 = vmul.f32 %v8360_v31, %v17379_v49  ;;  %v8363_v37 = vmul.f32 0.044715, %v17402_v19  ;;  %v8146_v18 = vpop.f32.mrf.mxu1 }
 0xbd7   : > { %v17424_v46 = vmul.f32 %v8736_v57, %v8288_v33  ;;  %11757 = vtanh.f32 %v8611_v17  ;;  %v8358_v61 = vmul.f32 0.044715, %v17407_v15  ;;  %v8359_v41 = vmul.f32 0.044715, %v17411_v21 }
 0xbd8   : > { %11759 = vtanh.f32 %v8607_v0  ;;  %v8484_v53 = vmul.f32 %v8420_v29, %v17350_v62  ;;  %v8425_v63 = vmul.f32 %v8361_v34, %v17390_v35  ;;  %v17430_v32 = vmul.f32 %v8732_v8, %v8284_v16 }
 0xbd9   : > { %v11756_v22 = vpop.eup %11755  ;;  %v17432_v51 = vmul.f32 %v8737_v24, %v8289_v23  ;;  %v8734_v42 = vadd.f32 1.0, %v11754_v1  ;;  %v8426_v12 = vmul.f32 %v8362_v52, %v17398_v2  ;;  %v8842_v33 = vpack.c.bf16 %v17392_v26, %v17359_v38 }
 0xbda   : > { %v8843_v7 = vpack.c.bf16 %v8795_v59, %v17386_v44  ;;  %v8485_v11 = vmul.f32 %v8421_v58, %v17364_v3  ;;  %v8427_v56 = vmul.f32 %v8363_v37, %v17402_v19  ;;  %v8844_v45 = vpack.c.bf16 %v17424_v46, %v17430_v32 }
 0xbdb   : > { %v17443_v16 = vmul.f32 %v8733_v14, %v17375_v4  ;;  %v8488_v23 = vmul.f32 %v8424_v6, %v17379_v49  ;;  %v8422_v40 = vmul.f32 %v8358_v61, %v17407_v15  ;;  %v8423_v17 = vmul.f32 %v8359_v41, %v17411_v21  ;;  %v8097_v27 = vpop.f32.mrf.mxu0 }
 0xbdc   : > { %v8738_v38 = vadd.f32 1.0, %v11756_v22  ;;  %v8548_v44 = vadd.f32 %v8484_v53, %v17350_v62  ;;  %v17457_v31 = vmul.f32 %v8734_v42, %v8286_v55  ;;  %v8287_v57 = vmul.f32 0.5, %v17303_v39  ;;  %v8195_v39 = vpop.f32.mrf.mxu2  ;;  %v8244_v8 = vpop.f32.mrf.mxu3 }
 0xbdd   : > { %v11758_v26 = vpop.eup %11757  ;;  %v8845_v4 = vpack.c.bf16 %v17432_v51, %v17443_v16  ;;  %v8489_v29 = vmul.f32 %v8425_v63, %v17390_v35  ;;  %v17462_v34 = vadd.f32 %v8095_v28, %v16733_v13  ;;  %v17465_v9 = vadd.f32 %v8144_v47, %v16735_v10 }
 0xbde   : > { %v11760_v0 = vpop.eup %11759  ;;  %v8291_v43 = vmul.f32 0.5, %v17285_v5  ;;  %v8490_v30 = vmul.f32 %v8426_v12, %v17398_v2  ;;  %v8549_v55 = vadd.f32 %v8485_v11, %v17364_v3  ;;  %v8491_v28 = vmul.f32 %v8427_v56, %v17402_v19 }
 0xbdf   : > { %v8802_v47 = vmul.f32 %v8738_v38, %v8290_v50  ;;  %v8739_v24 = vadd.f32 1.0, %v11758_v26  ;;  %v8612_v1 = vmul.f32 0.7978846, %v8548_v44  ;;  %v8486_v58 = vmul.f32 %v8422_v40, %v17407_v15 }
 0xbe0   : > { %v17477_v5 = vadd.f32 %v8146_v18, %v16735_v10  ;;  %v8735_v52 = vadd.f32 1.0, %v11760_v0  ;;  %v8553_v59 = vadd.f32 %v8489_v29, %v17390_v35  ;;  %v8487_v14 = vmul.f32 %v8423_v17, %v17411_v21 }
 0xbe1   : > { %v8364_v6 = vmul.f32 0.044715, %v17462_v34  ;;  %v8365_v37 = vmul.f32 0.044715, %v17465_v9  ;;  %v17484_v61 = vadd.f32 %v8195_v39, %v16737_v48  ;;  %v8554_v50 = vadd.f32 %v8490_v30, %v17398_v2 }
 0xbe2   : > { %9143 = vmatmul.bf16.gmra.mxu0 %v8840_v36  ;;  %9192 = vmatmul.bf16.gmra.mxu1 %v8841_v60  ;;  %v17470_v36 = vadd.f32 %v8097_v27, %v16733_v13  ;;  %v8552_v60 = vadd.f32 %v8488_v23, %v17379_v49  ;;  %v17489_v53 = vadd.f32 %v8244_v8, %v16742_v25  ;;  %v8369_v56 = vmul.f32 0.044715, %v17477_v5 }
 0xbe3   : > { %9241 = vmatmul.bf16.gmra.mxu2 %v8842_v33  ;;  %9290 = vmatmul.bf16.gmra.mxu3 %v8843_v7  ;;  %v8555_v63 = vadd.f32 %v8491_v28, %v17402_v19  ;;  %v17494_v42 = vadd.f32 %v17414_v54, %v16737_v48  ;;  %v8803_v12 = vmul.f32 %v8739_v24, %v8291_v43  ;;  %v8613_v33 = vmul.f32 0.7978846, %v8549_v55 }
 0xbe4   : > { %v8368_v41 = vmul.f32 0.044715, %v17470_v36  ;;  %v8616_v22 = vmul.f32 0.7978846, %v8552_v60  ;;  %v8550_v7 = vadd.f32 %v8486_v58, %v17407_v15  ;;  %v17499_v11 = vadd.f32 %v17419_v20, %v16742_v25 }
 0xbe5   : > { %v8617_v23 = vmul.f32 0.7978846, %v8553_v59  ;;  %v8551_v40 = vadd.f32 %v8487_v14, %v17411_v21  ;;  %v8428_v17 = vmul.f32 %v8364_v6, %v17462_v34  ;;  %v8370_v27 = vmul.f32 0.044715, %v17484_v61 }
 0xbe6   : > { %11761 = vtanh.f32 %v8612_v1  ;;  %v8618_v54 = vmul.f32 0.7978846, %v8554_v50  ;;  %v8432_v38 = vmul.f32 %v8368_v41, %v17470_v36  ;;  %v8371_v44 = vmul.f32 0.044715, %v17489_v53 }
 0xbe7   : > { %11763 = vtanh.f32 %v8616_v22  ;;  %v8619_v26 = vmul.f32 0.7978846, %v8555_v63  ;;  %v8429_v20 = vmul.f32 %v8365_v37, %v17465_v9  ;;  %v8366_v29 = vmul.f32 0.044715, %v17494_v42 }
 0xbe8   : > { %11765 = vtanh.f32 %v8613_v33  ;;  %v8614_v0 = vmul.f32 0.7978846, %v8550_v7  ;;  %v8367_v18 = vmul.f32 0.044715, %v17499_v11  ;;  %v8433_v43 = vmul.f32 %v8369_v56, %v17477_v5 }
 0xbe9   : > { %11767 = vtanh.f32 %v8617_v23  ;;  %v8615_v30 = vmul.f32 0.7978846, %v8551_v40  ;;  %v8434_v39 = vmul.f32 %v8370_v27, %v17484_v61  ;;  %v8799_v60 = vmul.f32 %v8735_v52, %v8287_v57 }
 0xbea   : > { %11769 = vtanh.f32 %v8618_v54  ;;  %v8492_v55 = vmul.f32 %v8428_v17, %v17462_v34  ;;  %v8435_v28 = vmul.f32 %v8371_v44, %v17489_v53  ;;  %v8846_v8 = vpack.c.bf16 %v8802_v47, %v17457_v31 }
 0xbeb   : > { %11771 = vtanh.f32 %v8619_v26  ;;  %v8496_v24 = vmul.f32 %v8432_v38, %v17470_v36  ;;  %v8430_v58 = vmul.f32 %v8366_v29, %v17494_v42  ;;  %v8847_v59 = vpack.c.bf16 %v8803_v12, %v8799_v60 }
 0xbec   : > { %v11762_v1 = vpop.eup %11761  ;;  %11773 = vtanh.f32 %v8614_v0  ;;  %v8493_v14 = vmul.f32 %v8429_v20, %v17465_v9  ;;  %v8431_v57 = vmul.f32 %v8367_v18, %v17499_v11  ;;  %v8497_v31 = vmul.f32 %v8433_v43, %v17477_v5 }
 0xbed   : > { %v11764_v6 = vpop.eup %11763  ;;  %11775 = vtanh.f32 %v8615_v30  ;;  %v8556_v52 = vadd.f32 %v8492_v55, %v17462_v34  ;;  %v8498_v37 = vmul.f32 %v8434_v39, %v17484_v61  ;;  %v8292_v41 = vmul.f32 0.5, %v17350_v62 }
 0xbee   : > { %v11766_v47 = vpop.eup %11765  ;;  %v8293_v46 = vmul.f32 0.5, %v17364_v3  ;;  %v8560_v32 = vadd.f32 %v8496_v24, %v17470_v36  ;;  %v8499_v51 = vmul.f32 %v8435_v28, %v17489_v53  ;;  %v8296_v16 = vmul.f32 0.5, %v17379_v49 }
 0xbef   : > { %v11768_v50 = vpop.eup %11767  ;;  %v8557_v22 = vadd.f32 %v8493_v14, %v17465_v9  ;;  %v8494_v63 = vmul.f32 %v8430_v58, %v17494_v42  ;;  %v8294_v33 = vmul.f32 0.5, %v17407_v15  ;;  %v8298_v62 = vmul.f32 0.5, %v17398_v2 }
 0xbf0   : > { %v8561_v3 = vadd.f32 %v8497_v31, %v17477_v5  ;;  %v8495_v7 = vmul.f32 %v8431_v57, %v17499_v11  ;;  %v8295_v23 = vmul.f32 0.5, %v17411_v21  ;;  %v8299_v49 = vmul.f32 0.5, %v17402_v19 }
 0xbf1   : > { %v8620_v40 = vmul.f32 0.7978846, %v8556_v52  ;;  %v8744_v27 = vadd.f32 1.0, %v11764_v6  ;;  %v8745_v54 = vadd.f32 1.0, %v11768_v50  ;;  %v8624_v38 = vmul.f32 0.7978846, %v8560_v32 }
 0xbf2   : > { %9148 = vmatmul.bf16.gmra.mxu0 %v8844_v45  ;;  %9197 = vmatmul.bf16.gmra.mxu1 %v8845_v4  ;;  %v11770_v45 = vpop.eup %11769  ;;  %v8297_v4 = vmul.f32 0.5, %v17390_v35  ;;  %v8562_v35 = vadd.f32 %v8498_v37, %v17484_v61  ;;  %v8563_v15 = vadd.f32 %v8499_v51, %v17489_v53  ;;  %v8621_v26 = vmul.f32 0.7978846, %v8557_v22 }
 0xbf3   : > { %9246 = vmatmul.bf16.gmra.mxu2 %v8846_v8  ;;  %9295 = vmatmul.bf16.gmra.mxu3 %v8847_v59  ;;  %v11772_v12 = vpop.eup %11771  ;;  %v8746_v44 = vadd.f32 1.0, %v11770_v45  ;;  %v8558_v20 = vadd.f32 %v8494_v63, %v17494_v42  ;;  %v8740_v29 = vadd.f32 1.0, %v11762_v1  ;;  %v8741_v0 = vadd.f32 1.0, %v11766_v47 }
 0xbf4   : > { %v11774_v56 = vpop.eup %11773  ;;  %v8747_v2 = vadd.f32 1.0, %v11772_v12  ;;  %v8625_v18 = vmul.f32 0.7978846, %v8561_v3  ;;  %v8559_v21 = vadd.f32 %v8495_v7, %v17499_v11  ;;  %11777 = vtanh.f32 %v8620_v40 }
 0xbf5   : > { %v11776_v17 = vpop.eup %11775  ;;  %v8742_v19 = vadd.f32 1.0, %v11774_v56  ;;  %v8626_v30 = vmul.f32 0.7978846, %v8562_v35  ;;  %v8808_v39 = vmul.f32 %v8744_v27, %v8296_v16  ;;  %v8809_v60 = vmul.f32 %v8745_v54, %v8297_v4 }
 0xbf6   : > { %v8743_v43 = vadd.f32 1.0, %v11776_v17  ;;  %11779 = vtanh.f32 %v8624_v38  ;;  %v8627_v55 = vmul.f32 0.7978846, %v8563_v15  ;;  %v8810_v28 = vmul.f32 %v8746_v44, %v8298_v62 }
 0xbf7   : > { %v8811_v8 = vmul.f32 %v8747_v2, %v8299_v49  ;;  %11781 = vtanh.f32 %v8621_v26  ;;  %v8622_v24 = vmul.f32 0.7978846, %v8558_v20  ;;  %v8804_v58 = vmul.f32 %v8740_v29, %v8292_v41 }
 0xbf8   : > { %v8805_v59 = vmul.f32 %v8741_v0, %v8293_v46  ;;  %11783 = vtanh.f32 %v8625_v18  ;;  %v8623_v1 = vmul.f32 0.7978846, %v8559_v21  ;;  %v8806_v14 = vmul.f32 %v8742_v19, %v8294_v33 }
 0xbf9   : > { %v8807_v6 = vmul.f32 %v8743_v43, %v8295_v23  ;;  %11785 = vtanh.f32 %v8626_v30  ;;  %v8848_v57 = vpack.c.bf16 %v8808_v39, %v8804_v58  ;;  %v8304_v33 = vmul.f32 0.5, %v17470_v36 }
 0xbfa   : > { %v8849_v31 = vpack.c.bf16 %v8809_v60, %v8805_v59  ;;  %11787 = vtanh.f32 %v8627_v55  ;;  %v11778_v47 = vpop.eup %11777  ;;  %v8850_v52 = vpack.c.bf16 %v8810_v28, %v8806_v14  ;;  %v8305_v3 = vmul.f32 0.5, %v17477_v5 }
 0xbfb   : > { %v8851_v37 = vpack.c.bf16 %v8811_v8, %v8807_v6  ;;  %11789 = vtanh.f32 %v8622_v24  ;;  %v8748_v62 = vadd.f32 1.0, %v11778_v47  ;;  %v8306_v56 = vmul.f32 0.5, %v17484_v61 }
 0xbfc   : > { %v11780_v50 = vpop.eup %11779  ;;  %11791 = vtanh.f32 %v8623_v1  ;;  %v8307_v49 = vmul.f32 0.5, %v17489_v53  ;;  %v8300_v35 = vmul.f32 0.5, %v17462_v34  ;;  %v8301_v27 = vmul.f32 0.5, %v17465_v9 }
 0xbfd   : > { %v11782_v32 = vpop.eup %11781  ;;  %v8752_v4 = vadd.f32 1.0, %v11780_v50  ;;  %v8302_v38 = vmul.f32 0.5, %v17494_v42  ;;  %v8303_v36 = vmul.f32 0.5, %v17499_v11 }
 0xbfe   : > { %v11784_v41 = vpop.eup %11783  ;;  %v8749_v7 = vadd.f32 1.0, %v11782_v32  ;;  %v8812_v5 = vmul.f32 %v8748_v62, %v8300_v35 }
 0xbff   : > { %v11786_v46 = vpop.eup %11785  ;;  %v8753_v22 = vadd.f32 1.0, %v11784_v41  ;;  %v8816_v17 = vmul.f32 %v8752_v4, %v8304_v33  ;;  %v17591_v41 = vld [vmem:[%s18472_s11] ss:$0 sm:$0xff] }
 0xc00   : > { %v11788_v51 = vpop.eup %11787  ;;  %v8754_v63 = vadd.f32 1.0, %v11786_v46  ;;  %v8813_v2 = vmul.f32 %v8749_v7, %v8301_v27 }
 0xc01   : > { %v11790_v45 = vpop.eup %11789  ;;  %v8755_v12 = vadd.f32 1.0, %v11788_v51  ;;  %v8817_v54 = vmul.f32 %v8753_v22, %v8305_v3  ;;  %v8852_v20 = vpack.c.bf16 %v8816_v17, %v8812_v5 }
 0xc02   : > { %9153 = vmatmul.bf16.gmra.mxu0 %v8848_v57  ;;  %9202 = vmatmul.bf16.gmra.mxu1 %v8849_v31  ;;  %v11792_v16 = vpop.eup %11791  ;;  %v8750_v23 = vadd.f32 1.0, %v11790_v45  ;;  %v8818_v15 = vmul.f32 %v8754_v63, %v8306_v56 }
 0xc03   : > { %9251 = vmatmul.bf16.gmra.mxu2 %v8850_v52  ;;  %9300 = vmatmul.bf16.gmra.mxu3 %v8851_v37  ;;  %v8751_v40 = vadd.f32 1.0, %v11792_v16  ;;  %v8819_v44 = vmul.f32 %v8755_v12, %v8307_v49  ;;  %v8853_v29 = vpack.c.bf16 %v8817_v54, %v8813_v2 }
 0xc04   : > { %v8814_v26 = vmul.f32 %v8750_v23, %v8302_v38 }
 0xc05   : > { %v8815_v61 = vmul.f32 %v8751_v40, %v8303_v36 }
 0xc06   : > { %v8854_v53 = vpack.c.bf16 %v8818_v15, %v8814_v26 }
 0xc07   : > { %v8855_v0 = vpack.c.bf16 %v8819_v44, %v8815_v61 }
 0xc12   : > { %9158 = vmatmul.bf16.gmra.mxu0 %v8852_v20  ;;  %9207 = vmatmul.bf16.gmra.mxu1 %v8853_v29 }
 0xc13   : > { %9256 = vmatmul.bf16.gmra.mxu2 %v8854_v53  ;;  %9305 = vmatmul.bf16.gmra.mxu3 %v8855_v0 }
 0xc1f   : > { %v8100_v34 = vpop.f32.mrf.mxu0  ;;  %v8149_v9 = vpop.f32.mrf.mxu1 }
 0xc20   : > { %v17555_v42 = vadd.f32 %v8100_v34, %v16733_v13  ;;  %v17558_v11 = vadd.f32 %v8149_v9, %v16735_v10 }
 0xc22   : > { %v8372_v18 = vmul.f32 0.044715, %v17555_v42  ;;  %v8373_v21 = vmul.f32 0.044715, %v17558_v11 }
 0xc24   : > { %v8436_v19 = vmul.f32 %v8372_v18, %v17555_v42  ;;  %v8437_v43 = vmul.f32 %v8373_v21, %v17558_v11 }
 0xc26   : > { %v8198_v30 = vpop.f32.mrf.mxu2  ;;  %v8247_v39 = vpop.f32.mrf.mxu3  ;;  %v8500_v60 = vmul.f32 %v8436_v19, %v17555_v42  ;;  %v8501_v55 = vmul.f32 %v8437_v43, %v17558_v11 }
 0xc27   : > { %v17567_v28 = vadd.f32 %v8198_v30, %v16737_v48  ;;  %v17570_v8 = vadd.f32 %v8247_v39, %v16742_v25  ;;  %v8102_v24 = vpop.f32.mrf.mxu0  ;;  %v8151_v58 = vpop.f32.mrf.mxu1 }
 0xc28   : > { %v17573_v59 = vadd.f32 %v8102_v24, %v16733_v13  ;;  %v17576_v1 = vadd.f32 %v8151_v58, %v16735_v10  ;;  %v8564_v14 = vadd.f32 %v8500_v60, %v17555_v42  ;;  %v8565_v31 = vadd.f32 %v8501_v55, %v17558_v11  ;;  %v18473_v58 = vld [vmem:[#allocation143_spill] sm:$0xff] }
 0xc29   : > { %v8374_v6 = vmul.f32 0.044715, %v17567_v28  ;;  %v8375_v57 = vmul.f32 0.044715, %v17570_v8  ;;  %v8308_v60 = vmul.f32 0.5, %v17555_v42 }
 0xc2a   : > { %v8376_v47 = vmul.f32 0.044715, %v17573_v59  ;;  %v8377_v52 = vmul.f32 0.044715, %v17576_v1  ;;  %v8628_v50 = vmul.f32 0.7978846, %v8564_v14 }
 0xc2b   : > { %v8438_v37 = vmul.f32 %v8374_v6, %v17567_v28  ;;  %v8439_v13 = vmul.f32 %v8375_v57, %v17570_v8  ;;  %v8629_v46 = vmul.f32 0.7978846, %v8565_v31  ;;  %v8312_v6 = vmul.f32 0.5, %v17573_v59 }
 0xc2c   : > { %v8440_v10 = vmul.f32 %v8376_v47, %v17573_v59  ;;  %v8441_v32 = vmul.f32 %v8377_v52, %v17576_v1  ;;  %11793 = vtanh.f32 %v8628_v50  ;;  %v8309_v31 = vmul.f32 0.5, %v17558_v11 }
 0xc2d   : > { %v8502_v51 = vmul.f32 %v8438_v37, %v17567_v28  ;;  %v8503_v45 = vmul.f32 %v8439_v13, %v17570_v8  ;;  %11795 = vtanh.f32 %v8629_v46  ;;  %v8313_v47 = vmul.f32 0.5, %v17576_v1 }
 0xc2e   : > { %v8200_v16 = vpop.f32.mrf.mxu2  ;;  %v8249_v4 = vpop.f32.mrf.mxu3  ;;  %v8504_v22 = vmul.f32 %v8440_v10, %v17573_v59  ;;  %v8505_v63 = vmul.f32 %v8441_v32, %v17576_v1 }
 0xc2f   : > { %v17598_v12 = vadd.f32 %v8200_v16, %v16737_v48  ;;  %v17601_v33 = vadd.f32 %v8249_v4, %v16742_v25  ;;  %v9129_v62 = vpop.f32.mrf.mxu0  ;;  %v9178_v3 = vpop.f32.mrf.mxu1  ;;  %v8566_v7 = vadd.f32 %v8502_v51, %v17567_v28  ;;  %v8567_v49 = vadd.f32 %v8503_v45, %v17570_v8 }
 0xc30   : > { %v8568_v56 = vadd.f32 %v8504_v22, %v17573_v59  ;;  %v8569_v23 = vadd.f32 %v8505_v63, %v17576_v1  ;;  %v9130_v48 = vadd.f32 %v17591_v41, %v9129_v62 }
 0xc31   : > { %v8378_v40 = vmul.f32 0.044715, %v17598_v12  ;;  %v8379_v35 = vmul.f32 0.044715, %v17601_v33  ;;  %v8630_v38 = vmul.f32 0.7978846, %v8566_v7 }
 0xc32   : > { %v8632_v25 = vmul.f32 0.7978846, %v8568_v56  ;;  %v8633_v17 = vmul.f32 0.7978846, %v8569_v23  ;;  %v8631_v15 = vmul.f32 0.7978846, %v8567_v49  ;;  %v11794_v36 = vpop.eup %11793  ;;  %v9179_v44 = vadd.f32 %v9178_v3, %v9130_v48 }
 0xc33   : > { %v8442_v27 = vmul.f32 %v8378_v40, %v17598_v12  ;;  %v8443_v54 = vmul.f32 %v8379_v35, %v17601_v33  ;;  %v11796_v20 = vpop.eup %11795  ;;  %v8756_v18 = vadd.f32 1.0, %v11794_v36  ;;  %v8310_v23 = vmul.f32 0.5, %v17567_v28  ;;  %v18474_v35 = vld [vmem:[#allocation144_spill] sm:$0xff] }
 0xc34   : > { %11797 = vtanh.f32 %v8632_v25  ;;  %v8757_v55 = vadd.f32 1.0, %v11796_v20  ;;  %v8314_v49 = vmul.f32 0.5, %v17598_v12  ;;  %v8311_v25 = vmul.f32 0.5, %v17570_v8 }
 0xc35   : > { %11799 = vtanh.f32 %v8633_v17  ;;  %v8506_v5 = vmul.f32 %v8442_v27, %v17598_v12  ;;  %v8507_v2 = vmul.f32 %v8443_v54, %v17601_v33  ;;  %v8820_v50 = vmul.f32 %v8756_v18, %v8308_v60 }
 0xc36   : > { %v9227_v26 = vpop.f32.mrf.mxu2  ;;  %v9276_v61 = vpop.f32.mrf.mxu3  ;;  %11801 = vtanh.f32 %v8630_v38  ;;  %v8821_v51 = vmul.f32 %v8757_v55, %v8309_v31  ;;  %v8315_v17 = vmul.f32 0.5, %v17601_v33 }
 0xc37   : > { %v9228_v29 = vadd.f32 %v9227_v26, %v9179_v44  ;;  %v9131_v53 = vpop.f32.mrf.mxu0  ;;  %v9180_v0 = vpop.f32.mrf.mxu1  ;;  %v8570_v34 = vadd.f32 %v8506_v5, %v17598_v12  ;;  %v8571_v9 = vadd.f32 %v8507_v2, %v17601_v33  ;;  %11803 = vtanh.f32 %v8631_v15 }
 0xc38   : > { %v9132_v19 = vadd.f32 %v17591_v41, %v9131_v53 }
 0xc39   : > { %v9277_v21 = vadd.f32 %v9276_v61, %v9228_v29  ;;  %v8634_v43 = vmul.f32 0.7978846, %v8570_v34  ;;  %v8635_v30 = vmul.f32 0.7978846, %v8571_v9  ;;  %v18475_v29 = vld [vmem:[#allocation145_spill] sm:$0xff] }
 0xc3a   : > { %v11798_v39 = vpop.eup %11797  ;;  %v9181_v13 = vadd.f32 %v9180_v0, %v9132_v19 }
 0xc3b   : > { %v11800_v24 = vpop.eup %11799  ;;  %v9316_v14 = vadd.f32 %v9277_v21, %v18473_v58  ;;  %v8760_v57 = vadd.f32 1.0, %v11798_v39  ;;  %11805 = vtanh.f32 %v8634_v43  ;;  %v18476_v39 = vld [vmem:[#allocation92_spill] sm:$0xff] }
 0xc3c   : > { %v8761_v52 = vadd.f32 1.0, %v11800_v24  ;;  %11807 = vtanh.f32 %v8635_v30  ;;  %v11802_v37 = vpop.eup %11801 }
 0xc3d   : > { %9332 = vst [vmem:[%s12559_s8] sm:$0xff] %v9316_v14  ;;  %v8824_v10 = vmul.f32 %v8760_v57, %v8312_v6  ;;  %v11804_v42 = vpop.eup %11803  ;;  %v8758_v11 = vadd.f32 1.0, %v11802_v37 }
 0xc3e   : > { %v9229_v32 = vpop.f32.mrf.mxu2  ;;  %v9278_v46 = vpop.f32.mrf.mxu3  ;;  %v8825_v45 = vmul.f32 %v8761_v52, %v8313_v47  ;;  %v8759_v7 = vadd.f32 1.0, %v11804_v42  ;;  %v18477_v52 = vld [vmem:[#allocation85_spill] sm:$0xff] }
 0xc3f   : > { %v9230_v16 = vadd.f32 %v9229_v32, %v9181_v13  ;;  %v9134_v59 = vpop.f32.mrf.mxu0  ;;  %v9183_v4 = vpop.f32.mrf.mxu1  ;;  %v8856_v22 = vpack.c.bf16 %v8824_v10, %v8820_v50  ;;  %v8822_v54 = vmul.f32 %v8758_v11, %v8310_v23 }
 0xc40   : > { %v8857_v63 = vpack.c.bf16 %v8825_v45, %v8821_v51  ;;  %v9135_v3 = vadd.f32 %v17591_v41, %v9134_v59  ;;  %v8823_v36 = vmul.f32 %v8759_v7, %v8311_v25 }
 0xc41   : > { %v11806_v62 = vpop.eup %11805  ;;  %v9279_v1 = vadd.f32 %v9278_v46, %v9230_v16  ;;  %9163 = vmatmul.bf16.gmra.mxu0 %v8856_v22  ;;  %v18478_v16 = vld [vmem:[#allocation88_spill] sm:$0xff] }
 0xc42   : > { %v11808_v56 = vpop.eup %11807  ;;  %9212 = vmatmul.bf16.gmra.mxu1 %v8857_v63  ;;  %v8762_v40 = vadd.f32 1.0, %v11806_v62  ;;  %v9184_v15 = vadd.f32 %v9183_v4, %v9135_v3 }
 0xc43   : > { %v9317_v48 = vadd.f32 %v9279_v1, %v18474_v35  ;;  %v8763_v27 = vadd.f32 1.0, %v11808_v56  ;;  %v18479_v56 = vld [vmem:[#allocation86_spill] sm:$0xff] }
 0xc44   : > { %v8826_v38 = vmul.f32 %v8762_v40, %v8314_v49 }
 0xc45   : > { %9333 = vst [vmem:[%s12559_s8 + $0x8] sm:$0xff] %v9317_v48  ;;  %v8827_v44 = vmul.f32 %v8763_v27, %v8315_v17 }
 0xc46   : > { %v9232_v5 = vpop.f32.mrf.mxu2  ;;  %v9281_v2 = vpop.f32.mrf.mxu3  ;;  %v8858_v28 = vpack.c.bf16 %v8826_v38, %v8822_v54  ;;  %v18480_v38 = vld [vmem:[#allocation91_spill] sm:$0xff] }
 0xc47   : > { %v9233_v26 = vadd.f32 %v9232_v5, %v9184_v15  ;;  %v9136_v12 = vpop.f32.mrf.mxu0  ;;  %v9185_v61 = vpop.f32.mrf.mxu1  ;;  %v8859_v20 = vpack.c.bf16 %v8827_v44, %v8823_v36 }
 0xc48   : > { %9261 = vmatmul.bf16.gmra.mxu2 %v8858_v28  ;;  %v9137_v33 = vadd.f32 %v17591_v41, %v9136_v12 }
 0xc49   : > { %v9282_v8 = vadd.f32 %v9281_v2, %v9233_v26  ;;  %9310 = vmatmul.bf16.gmra.mxu3 %v8859_v20  ;;  %v18481_v20 = vld [vmem:[#allocation90_spill] sm:$0xff] }
 0xc4a   : > { %v9186_v0 = vadd.f32 %v9185_v61, %v9137_v33 }
 0xc4b   : > { %v9318_v53 = vadd.f32 %v9282_v8, %v18475_v29 }
 0xc4d   : > { %9334 = vst [vmem:[%s12559_s8 + $0x10] sm:$0xff] %v9318_v53 }
 0xc4e   : > { %v9234_v34 = vpop.f32.mrf.mxu2  ;;  %v9283_v9 = vpop.f32.mrf.mxu3 }
 0xc4f   : > { %v9235_v18 = vadd.f32 %v9234_v34, %v9186_v0  ;;  %v9139_v21 = vpop.f32.mrf.mxu0  ;;  %v9188_v19 = vpop.f32.mrf.mxu1 }
 0xc50   : > { %v9140_v30 = vadd.f32 %v17591_v41, %v9139_v21 }
 0xc51   : > { %v9284_v43 = vadd.f32 %v9283_v9, %v9235_v18 }
 0xc52   : > { %v9189_v55 = vadd.f32 %v9188_v19, %v9140_v30  ;;  %v18482_v19 = vld [vmem:[#allocation89_spill] sm:$0xff] }
 0xc53   : > { %v9319_v60 = vadd.f32 %v9284_v43, %v18476_v39 }
 0xc55   : > { %9335 = vst [vmem:[%s12559_s8 + $0x18] sm:$0xff] %v9319_v60 }
 0xc56   : > { %v9237_v24 = vpop.f32.mrf.mxu2  ;;  %v9286_v58 = vpop.f32.mrf.mxu3 }
 0xc57   : > { %v9238_v14 = vadd.f32 %v9237_v24, %v9189_v55  ;;  %v9141_v6 = vpop.f32.mrf.mxu0  ;;  %v9190_v57 = vpop.f32.mrf.mxu1 }
 0xc58   : > { %v9142_v47 = vadd.f32 %v17591_v41, %v9141_v6 }
 0xc59   : > { %v9287_v31 = vadd.f32 %v9286_v58, %v9238_v14 }
 0xc5a   : > { %v9191_v13 = vadd.f32 %v9190_v57, %v9142_v47  ;;  %v18483_v57 = vld [vmem:[#allocation95_spill] sm:$0xff] }
 0xc5b   : > { %v9320_v37 = vadd.f32 %v9287_v31, %v18477_v52 }
 0xc5d   : > { %9336 = vst [vmem:[%s12559_s8 + $0x20] sm:$0xff] %v9320_v37 }
 0xc5e   : > { %v9239_v50 = vpop.f32.mrf.mxu2  ;;  %v9288_v10 = vpop.f32.mrf.mxu3 }
 0xc5f   : > { %v9240_v42 = vadd.f32 %v9239_v50, %v9191_v13  ;;  %v9144_v32 = vpop.f32.mrf.mxu0  ;;  %v9193_v46 = vpop.f32.mrf.mxu1 }
 0xc60   : > { %v9145_v45 = vadd.f32 %v17591_v41, %v9144_v32 }
 0xc61   : > { %v9289_v51 = vadd.f32 %v9288_v10, %v9240_v42 }
 0xc62   : > { %v9194_v4 = vadd.f32 %v9193_v46, %v9145_v45  ;;  %v18484_v46 = vld [vmem:[#allocation96_spill] sm:$0xff] }
 0xc63   : > { %v9321_v59 = vadd.f32 %v9289_v51, %v18478_v16 }
 0xc65   : > { %9337 = vst [vmem:[%s12559_s8 + $0x28] sm:$0xff] %v9321_v59 }
 0xc66   : > { %v9242_v22 = vpop.f32.mrf.mxu2  ;;  %v9291_v63 = vpop.f32.mrf.mxu3 }
 0xc67   : > { %v9243_v11 = vadd.f32 %v9242_v22, %v9194_v4  ;;  %v9146_v62 = vpop.f32.mrf.mxu0  ;;  %v9195_v1 = vpop.f32.mrf.mxu1 }
 0xc68   : > { %v9147_v7 = vadd.f32 %v17591_v41, %v9146_v62  ;;  %v18486_v62 = vld [vmem:[#allocation93_spill] sm:$0xff] }
 0xc69   : > { %v9292_v3 = vadd.f32 %v9291_v63, %v9243_v11 }
 0xc6a   : > { %v9196_v49 = vadd.f32 %v9195_v1, %v9147_v7 }
 0xc6b   : > { %v9322_v23 = vadd.f32 %v9292_v3, %v18479_v56 }
 0xc6d   : > { %9338 = vst [vmem:[%s12559_s8 + $0x30] sm:$0xff] %v9322_v23 }
 0xc6e   : > { %v9244_v40 = vpop.f32.mrf.mxu2  ;;  %v9293_v35 = vpop.f32.mrf.mxu3 }
 0xc6f   : > { %v9245_v48 = vadd.f32 %v9244_v40, %v9196_v49  ;;  %v9149_v25 = vpop.f32.mrf.mxu0  ;;  %v9198_v17 = vpop.f32.mrf.mxu1 }
 0xc70   : > { %v9150_v54 = vadd.f32 %v17591_v41, %v9149_v25 }
 0xc71   : > { %v9294_v27 = vadd.f32 %v9293_v35, %v9245_v48  ;;  %v18487_v35 = vld [vmem:[#allocation94_spill] sm:$0xff] }
 0xc72   : > { %v9199_v36 = vadd.f32 %v9198_v17, %v9150_v54 }
 0xc73   : > { %v9323_v15 = vadd.f32 %v9294_v27, %v18480_v38 }
 0xc75   : > { %9339 = vst [vmem:[%s12559_s8 + $0x38] sm:$0xff] %v9323_v15 }
 0xc76   : > { %v9247_v44 = vpop.f32.mrf.mxu2  ;;  %v9296_v5 = vpop.f32.mrf.mxu3 }
 0xc77   : > { %v9248_v2 = vadd.f32 %v9247_v44, %v9199_v36  ;;  %v9151_v28 = vpop.f32.mrf.mxu0  ;;  %v9200_v26 = vpop.f32.mrf.mxu1 }
 0xc78   : > { %v9152_v61 = vadd.f32 %v17591_v41, %v9151_v28  ;;  %v18488_v28 = vld [vmem:[#allocation97_spill] sm:$0xff] }
 0xc79   : > { %v9297_v12 = vadd.f32 %v9296_v5, %v9248_v2 }
 0xc7a   : > { %v9201_v33 = vadd.f32 %v9200_v26, %v9152_v61 }
 0xc7b   : > { %v9324_v8 = vadd.f32 %v9297_v12, %v18481_v20 }
 0xc7d   : > { %9340 = vst [vmem:[%s12559_s8 + $0x40] sm:$0xff] %v9324_v8 }
 0xc7e   : > { %v9249_v29 = vpop.f32.mrf.mxu2  ;;  %v9298_v53 = vpop.f32.mrf.mxu3 }
 0xc7f   : > { %v9250_v0 = vadd.f32 %v9249_v29, %v9201_v33  ;;  %v9154_v34 = vpop.f32.mrf.mxu0  ;;  %v9203_v9 = vpop.f32.mrf.mxu1  ;;  %v18491_v29 = vld [vmem:[#allocation146_spill] sm:$0xff] }
 0xc80   : > { %v9155_v21 = vadd.f32 %v17591_v41, %v9154_v34 }
 0xc81   : > { %v9299_v18 = vadd.f32 %v9298_v53, %v9250_v0 }
 0xc82   : > { %v9204_v30 = vadd.f32 %v9203_v9, %v9155_v21 }
 0xc83   : > { %v9325_v43 = vadd.f32 %v9299_v18, %v18482_v19 }
 0xc85   : > { %9341 = vst [vmem:[%s12559_s8 + $0x48] sm:$0xff] %v9325_v43 }
 0xc86   : > { %v9252_v39 = vpop.f32.mrf.mxu2  ;;  %v9301_v60 = vpop.f32.mrf.mxu3 }
 0xc87   : > { %v9253_v55 = vadd.f32 %v9252_v39, %v9204_v30  ;;  %v9156_v24 = vpop.f32.mrf.mxu0  ;;  %v9205_v58 = vpop.f32.mrf.mxu1 }
 0xc88   : > { %v9157_v6 = vadd.f32 %v17591_v41, %v9156_v24 }
 0xc89   : > { %v9302_v14 = vadd.f32 %v9301_v60, %v9253_v55 }
 0xc8a   : > { %v9206_v47 = vadd.f32 %v9205_v58, %v9157_v6 }
 0xc8b   : > { %v9326_v31 = vadd.f32 %v9302_v14, %v18483_v57 }
 0xc8d   : > { %9342 = vst [vmem:[%s12559_s8 + $0x50] sm:$0xff] %v9326_v31 }
 0xc8e   : > { %v9254_v52 = vpop.f32.mrf.mxu2  ;;  %v9303_v37 = vpop.f32.mrf.mxu3 }
 0xc8f   : > { %v9255_v13 = vadd.f32 %v9254_v52, %v9206_v47  ;;  %v9159_v50 = vpop.f32.mrf.mxu0  ;;  %v9208_v32 = vpop.f32.mrf.mxu1 }
 0xc90   : > { %v9160_v42 = vadd.f32 %v17591_v41, %v9159_v50 }
 0xc91   : > { %v9304_v10 = vadd.f32 %v9303_v37, %v9255_v13 }
 0xc92   : > { %v9209_v45 = vadd.f32 %v9208_v32, %v9160_v42 }
 0xc93   : > { %v9327_v51 = vadd.f32 %v9304_v10, %v18484_v46 }
 0xc95   : > { %9343 = vst [vmem:[%s12559_s8 + $0x58] sm:$0xff] %v9327_v51 }
 0xc96   : > { %v9257_v16 = vpop.f32.mrf.mxu2  ;;  %v9306_v59 = vpop.f32.mrf.mxu3 }
 0xc97   : > { %v9258_v4 = vadd.f32 %v9257_v16, %v9209_v45  ;;  %v9161_v22 = vpop.f32.mrf.mxu0  ;;  %v9210_v3 = vpop.f32.mrf.mxu1 }
 0xc98   : > { %v9162_v11 = vadd.f32 %v17591_v41, %v9161_v22 }
 0xc99   : > { %v9307_v63 = vadd.f32 %v9306_v59, %v9258_v4 }
 0xc9a   : > { %v9211_v7 = vadd.f32 %v9210_v3, %v9162_v11 }
 0xc9b   : > { %v9328_v1 = vadd.f32 %v9307_v63, %v18486_v62 }
 0xc9d   : > { %9344 = vst [vmem:[%s12559_s8 + $0x60] sm:$0xff] %v9328_v1 }
 0xc9e   : > { %v9259_v56 = vpop.f32.mrf.mxu2  ;;  %v9308_v49 = vpop.f32.mrf.mxu3 }
 0xc9f   : > { %v9260_v23 = vadd.f32 %v9259_v56, %v9211_v7 }
 0xca1   : > { %v9309_v40 = vadd.f32 %v9308_v49, %v9260_v23 }
 0xca3   : > { %v9329_v48 = vadd.f32 %v9309_v40, %v18487_v35 }
 0xca5   : > { %9345 = vst [vmem:[%s12559_s8 + $0x68] sm:$0xff] %v9329_v48 }
 0xcbe   : > { %v9164_v25 = vpop.f32.mrf.mxu0 }
 0xcbf   : > { %v9165_v17 = vadd.f32 %v17591_v41, %v9164_v25  ;;  %v9213_v27 = vpop.f32.mrf.mxu1 }
 0xcc1   : > { %v9214_v54 = vadd.f32 %v9213_v27, %v9165_v17 }
 0xcc6   : > { %v9166_v38 = vpop.f32.mrf.mxu0 }
 0xcc7   : > { %v9167_v5 = vadd.f32 %v17591_v41, %v9166_v38  ;;  %v9215_v12 = vpop.f32.mrf.mxu1 }
 0xcc9   : > { %v9216_v61 = vadd.f32 %v9215_v12, %v9167_v5 }
 0xccb   : > { %v9262_v15 = vpop.f32.mrf.mxu2 }
 0xccc   : > { %v9263_v36 = vadd.f32 %v9262_v15, %v9214_v54  ;;  %v9311_v44 = vpop.f32.mrf.mxu3 }
 0xcce   : > { %v9312_v2 = vadd.f32 %v9311_v44, %v9263_v36 }
 0xcd0   : > { %v9330_v26 = vadd.f32 %v9312_v2, %v18488_v28 }
 0xcd2   : > { %9346 = vst [vmem:[%s12559_s8 + $0x70] sm:$0xff] %v9330_v26 }
 0xcd3   : > { %v9264_v20 = vpop.f32.mrf.mxu2 }
 0xcd4   : > { %v9265_v8 = vadd.f32 %v9264_v20, %v9216_v61  ;;  %v9313_v33 = vpop.f32.mrf.mxu3 }
 0xcd6   : > { %v9314_v41 = vadd.f32 %v9313_v33, %v9265_v8 }
 0xcd8   : > { %v9331_v53 = vadd.f32 %v9314_v41, %v18491_v29 }
 0xcda   : > { %9347 = vst [vmem:[%s12559_s8 + $0x78] sm:$0xff] %v9331_v53 }
 0xcdb   : > { %12138 = shalt.err (!%p12135_p4)
}
 0xcdc   : > { %s12277_s6 = smov 128   ;;  %s12278_s8 = smov 8  }
 0xcdd   : > { %11019 = dma.vmem_to_hbm [thread:$0]  (%p12505_p6), %s9364_s25, 2048, %s9366_s13, %s9349_s2, %s12277_s6, %s12277_s6, %s12278_s8  }
 0xcde PF: > { %s18492_s23 = sld [smem:[#allocation30_spill]]  ;;  %p11076_p5 = scmp.ge.s32.totalorder %s12253_s18, 2 }
 0xce0   : > { %p11054_p7 = pnand %p11076_p5, %p12518_p10 }
 0xce2   : > { %p11055_p8 = pneg %p11054_p7 }
 0xce4   : > { %s9380_s14 = sand.u32 1, %s18492_s23  }
 0xce5   : > { %s9381_s24 = scalar_lea.sflag [#allocation7], %s9380_s14 }
 0xce6   : > { %12208 = dma.done.wait (%p11055_p8), %s9381_s24, 2048  }
 0xce7   : > { %12210 = vsyncadd (%p11055_p8), %s9381_s24, 4294965248  ;;  %s34_s18 = sadd.s32 1, %s12253_s18   ;;  %s18493_s25 = sld [smem:[#allocation31_spill]] }
 0xce8   : > { %p31_p11 = scmp.ge.s32.totalorder %s34_s18, 6   ;;  %s18494_s26 = smov %s12221_s27 }
 0xce9   : > { %s18495_s27 = smov %s12513_s15  ;;  %s18496_s28 = smov %s12229_s29 }
 0xcea   : > { %s18497_s29 = smov %s12233_s30  ;;  %s18498_s30 = smov %s12510_s21 }
 0xceb   : > { %s18499_s14 = smov %s12245_s16  ;;  %s18500_s15 = smov %s12249_s17 }
 0xcec   : > { %s18501_s16 = smov %s18504_s22  ;;  %s18502_s17 = smov %s18508_s10 }
 0xced   :  { %33 = sbr.rel (!%p31_p11) target bundleno = 29 (0x1d), region = 168 }
 0xcf2   :  { %9387 = vsyncpa [#allocation6], 1 }
 0xcf3   :  { %9389 = vsyncpa [#allocation6 + $0x1], 1 }
 0xcf4   :  { %9390 = vsyncpa [#allocation9], 1 }
 0xcf5   :  { %9391 = vsyncpa [#allocation12], 1 }
 0xcf6   :  { %9392 = vsyncpa [#allocation15], 1 }
 0xcf7   :  { %9393 = vsyncpa [#allocation18], 1 }
 0xcf8   :  { %9394 = vsyncpa [#allocation21], 1 }
 0xcf9   :  { %9395 = vsyncpa [#allocation7], 1 }
 0xcfa   :  { %9397 = vsyncpa [#allocation7 + $0x1], 1 }

</bundles_post_ra>
